<compile_context>
chip_gen: v7x
topology: tpu7x:2x2x1
jax: 0.10.0
libtpu: 0.0.40
codegen_flags: <defaults>
</compile_context>

<pallas_src>
import functools

import jax
import jax.numpy as jnp
import numpy as np
from jax import lax
from jax.experimental import pallas as pl
from jax.experimental.pallas import tpu as pltpu

N_NODES = 12          # 384 = 12 * 32  (from in_dim=384 in the module)
C_IN = 2
HID = 32
HEADS = 4
FEAT = N_NODES * HID  # 384
NH = HEADS * N_NODES  # 48
NHH = NH * N_NODES    # 576
NHD = NH * HID        # 1536
C1 = 128
C_CLS = 3 + 3 + 2 + 2  # 10
PADT = 8              # halo padding (>= 5 frames needed, 8 keeps DMA aligned)
NEG_SLOPE = 0.01


def _round_up(v, m):
    return ((v + m - 1) // m) * m


def _cdiv(a, b):
    return (a + b - 1) // b


def _selector_constants():
    """0/1 selector matrices for the fused multi-head attention (host consts)."""
    m = np.arange(NH)                       # k*12 + idx
    l = np.arange(NHH)                      # i*48 + k*12 + j
    li, lk, lj = l // NH, (l % NH) // N_NODES, l % N_NODES
    rb = (li[None, :] == (m % N_NODES)[:, None]) & \
         (lk[None, :] == (m // N_NODES)[:, None])          # (48, 576) bcast [k,i]/j
    rc = (lj[None, :] == (m % N_NODES)[:, None]) & \
         (lk[None, :] == (m // N_NODES)[:, None])          # (48, 576) bcast [k,j]/i
    rbc = np.concatenate([rb, rc], axis=0)                  # (96, 576)
    rs = ((l // NH)[:, None] == (m % N_NODES)[None, :]) & \
         (((l % NH) // N_NODES)[:, None] == (m // N_NODES)[None, :])  # (576, 48)
    lane = np.arange(NHD)
    bsel = (m[:, None] == (lane // HID)[None, :])           # (48, 1536) repeat x32
    qsel = ((lane % HID)[:, None] == np.arange(HID)[None, :])  # (1536, 32)
    return (rbc.astype(np.float32), rs.astype(np.float32),
            bsel.astype(np.float32), qsel.astype(np.float32))


# --------------------------------------------------------------------------
# Kernel 1: GCN (2 layers) + fused multi-head graph attention, G graphs/step
#   one graph = 384 lanes [node*32 + channel]; all matmul operands bf16
# --------------------------------------------------------------------------
def _graph_kernel(x_ref, k0_ref, sh_ref, k1_ref, u12_ref, vbig_ref,
                  rbc_ref, rs_ref, bsel_ref, qsel_ref, o_ref):
    bf16 = jnp.bfloat16
    shifts = sh_ref[...]                                         # (2, 384) f32

    # GCN layer 0: relu(BN(adj @ (x W0) + b0))   (adj & BN scale folded into K0)
    h = jnp.dot(x_ref[...], k0_ref[...], preferred_element_type=jnp.float32)
    h = jnp.maximum(h + shifts[0:1, :], 0.0)                     # (G, 384)
    # GCN layer 1: adj @ (h W1) + b1
    g = jnp.dot(h.astype(bf16), k1_ref[...],
                preferred_element_type=jnp.float32) + shifts[1:2, :]
    gb = g.astype(bf16)

    # ---- fused multi-head attention scores (heads stacked along lanes) ----
    fw = jnp.dot(gb, u12_ref[...], preferred_element_type=jnp.float32)   # (G, 96)
    rbc = rbc_ref[...]                                           # (96, 576) bf16
    e = jnp.dot(fw.astype(bf16), rbc, preferred_element_type=jnp.float32)
    e = jnp.where(e >= 0.0, e, NEG_SLOPE * e)                    # (G, 576)

    f1 = fw[:, 0:NH]                                             # (G, 48) [k*12+i]
    f2 = fw[:, NH:2 * NH]                                        # (G, 48) [k*12+j]
    # per-row bound >= per-(head,i) group max (softmax is shift-invariant,
    # leaky_relu is monotone) -> single cheap 48-lane reduction
    gmx = f1 + jnp.max(f2, axis=-1, keepdims=True)
    gmx = jnp.where(gmx >= 0.0, gmx, NEG_SLOPE * gmx)            # (G, 48)

    rb = rbc[0:NH, :]                                            # (48, 576)
    emax = jnp.dot(gmx.astype(bf16), rb, preferred_element_type=jnp.float32)
    p = jnp.exp(e - emax)                                        # (G, 576), <= 1
    denom = jnp.dot(p.astype(bf16), rs_ref[...],
                    preferred_element_type=jnp.float32)          # (G, 48)
    rden = pl.reciprocal(jnp.maximum(denom, 1e-30), approx=True)
    rdb = jnp.dot(rden.astype(bf16), rb, preferred_element_type=jnp.float32)
    attn = (p * rdb).astype(bf16)                                # (G, 576)

    # projected values  yp[g, (k*12+j)*32 + d] = (g_graph @ W_k @ Wmh_k)[j, d]
    yp = jnp.dot(gb, vbig_ref[...], preferred_element_type=jnp.float32)  # (G, 1536)

    bsel = bsel_ref[...]                                         # (48, 1536) bf16
    qsel = qsel_ref[...]                                         # (1536, 32) bf16
    for i in range(N_NODES):
        a_i = attn[:, i * NH:(i + 1) * NH]                       # (G, 48) [k*12+j]
        ab = jnp.dot(a_i, bsel, preferred_element_type=jnp.float32)      # (G, 1536)
        prod = (ab * yp).astype(bf16)
        o_ref[:, i * HID:(i + 1) * HID] = jnp.dot(
            prod, qsel, preferred_element_type=jnp.float32).astype(o_ref.dtype)


# --------------------------------------------------------------------------
# Kernel 2: Conv1d stack (k=1 / k=3 p=1 / k=3 p=2 d=2) + cls head
#   one halo'd (tt + 16, 384) window per grid step, DMA'd in-kernel from HBM
# --------------------------------------------------------------------------
def _conv_kernel(feat_hbm, w1_ref, shc_ref, w2_ref, w3_ref, wc_ref, o_ref,
                 xbuf, sem, *, t, tt, tp):
    bf16 = jnp.bfloat16
    bi = pl.program_id(0)
    ti = pl.program_id(1)
    Lw = tt + 2 * PADT

    # fetch the halo'd feature window for this (batch, tile) straight from HBM
    start = pl.multiple_of(bi * tp + ti * tt, 8)
    cp = pltpu.make_async_copy(feat_hbm.at[pl.ds(start, Lw), :], xbuf, sem)
    cp.start()
    cp.wait()

    # validity mask built in-kernel: frame index of local row l is ti*tt + l - PADT
    rows = lax.broadcasted_iota(jnp.int32, (Lw, 1), 0)
    frame = rows + (ti * tt - PADT)
    valid = jnp.logical_and(frame >= 0, frame < t).astype(jnp.float32)   # (Lw, 1)

    shc = shc_ref[...]                                           # (3, 128) f32

    # conv1 (k=1) + BN + ReLU ; zero outside [0, t) (mimics zero padding)
    h1 = jnp.dot(xbuf[...], w1_ref[...], preferred_element_type=jnp.float32)
    h1 = (jnp.maximum(h1 + shc[0:1, :], 0.0) * valid).astype(bf16)       # (Lw, 128)

    # conv2: k=3, dilation 1, padding 1  -> frames [-4, tt+4)
    L2 = tt + 8
    h2 = (jnp.dot(h1[3:3 + L2], w2_ref[0], preferred_element_type=jnp.float32) +
          jnp.dot(h1[4:4 + L2], w2_ref[1], preferred_element_type=jnp.float32) +
          jnp.dot(h1[5:5 + L2], w2_ref[2], preferred_element_type=jnp.float32) +
          shc[1:2, :])
    h2 = (jnp.maximum(h2, 0.0) * valid[4:4 + L2]).astype(bf16)

    # conv3: k=3, dilation 2, padding 2  -> frames [-2, tt+2)
    L3 = tt + 4
    h3 = (jnp.dot(h2[0:L3], w3_ref[0], preferred_element_type=jnp.float32) +
          jnp.dot(h2[2:2 + L3], w3_ref[1], preferred_element_type=jnp.float32) +
          jnp.dot(h2[4:4 + L3], w3_ref[2], preferred_element_type=jnp.float32) +
          shc[2:3, :])
    h3 = (jnp.maximum(h3, 0.0) * valid[6:6 + L3]).astype(bf16)

    # classification conv: k=3, dilation 2 (output channels zero-padded to 128)
    out = (jnp.dot(h3[0:tt], wc_ref[0], preferred_element_type=jnp.float32) +
           jnp.dot(h3[2:2 + tt], wc_ref[1], preferred_element_type=jnp.float32) +
           jnp.dot(h3[4:4 + tt], wc_ref[2], preferred_element_type=jnp.float32))
    o_ref[0] = out                                               # (tt, 128) lane-dense


# --------------------------------------------------------------------------
# Wrapper
# --------------------------------------------------------------------------
def auwgcn_forward(x, p):
    b, t, n, c = x.shape
    assert n == N_NODES and c == C_IN
    bt = b * t
    f32 = jnp.float32
    bf16 = jnp.bfloat16

    # ---- fold parameters into lane-dense matrices (trace-time, f32 math) ----
    adj = p['adj'].astype(f32)
    eye12 = jnp.eye(N_NODES, dtype=f32)
    scale0 = jnp.tile(p['s0'][0], N_NODES)                          # (384,)
    k0 = (jnp.kron(adj.T, p['w0']) * scale0[None, :]).astype(bf16)  # (24, 384)
    sh0 = jnp.tile((p['b0'] * p['s0'] + p['t0'])[0], N_NODES)       # (384,)
    k1 = jnp.kron(adj.T, p['w1']).astype(bf16)                      # (384, 384)
    sh1 = jnp.tile(p['b1'][0], N_NODES)
    shifts_g = jnp.stack([sh0, sh1], axis=0)                        # (2, 384) f32

    u1 = jnp.einsum('kco,ko->kc', p['w_heads'], p['a1'][:, :, 0])   # W_k @ a1_k
    u2 = jnp.einsum('kco,ko->kc', p['w_heads'], p['a2'][:, 0, :])   # W_k @ a2_k
    u12 = jnp.concatenate(
        [jnp.einsum('kc,nm->nckm', u1, eye12).reshape(FEAT, NH),
         jnp.einsum('kc,nm->nckm', u2, eye12).reshape(FEAT, NH)],
        axis=1).astype(bf16)                                        # (384, 96)
    v = jnp.einsum('kco,kod->kcd', p['w_heads'],
                   p['w_mh'].reshape(HEADS, HID, HID))              # W_k @ Wmh_k
    vbig = jnp.einsum('kcd,jm->jckmd', v, eye12).reshape(FEAT, NHD).astype(bf16)

    rbc_np, rs_np, bsel_np, qsel_np = _selector_constants()
    rbc = jnp.asarray(rbc_np, dtype=bf16)
    rs = jnp.asarray(rs_np, dtype=bf16)
    bsel = jnp.asarray(bsel_np, dtype=bf16)
    qsel = jnp.asarray(qsel_np, dtype=bf16)

    # ---- stage 1: batched GCN + attention -----------------------------------
    G = min(256, _round_up(bt, 8))
    bt_pad = _round_up(bt, G)
    if bt_pad // G < 2 and bt >= 16:      # keep both v7x TensorCores busy
        G = _round_up(_cdiv(bt, 2), 8)
        bt_pad = _round_up(bt, G)

    xg = jnp.pad(x.reshape(bt, N_NODES * C_IN).astype(bf16),
                 ((0, bt_pad - bt), (0, 0)))

    c2 = lambda i: (0, 0)
    graph_out = pl.pallas_call(
        _graph_kernel,
        out_shape=jax.ShapeDtypeStruct((bt_pad, FEAT), bf16),
        grid=(bt_pad // G,),
        in_specs=[
            pl.BlockSpec((G, N_NODES * C_IN), lambda i: (i, 0)),
            pl.BlockSpec((N_NODES * C_IN, FEAT), c2),
            pl.BlockSpec((2, FEAT), c2),
            pl.BlockSpec((FEAT, FEAT), c2),
            pl.BlockSpec((FEAT, 2 * NH), c2),
            pl.BlockSpec((FEAT, NHD), c2),
            pl.BlockSpec((2 * NH, NHH), c2),
            pl.BlockSpec((NHH, NH), c2),
            pl.BlockSpec((NH, NHD), c2),
            pl.BlockSpec((NHD, HID), c2),
        ],
        out_specs=pl.BlockSpec((G, FEAT), lambda i: (i, 0)),
        compiler_params=pltpu.CompilerParams(
            dimension_semantics=("parallel",),
            vmem_limit_bytes=32 * 1024 * 1024),
    )(xg, k0, shifts_g, k1, u12, vbig, rbc, rs, bsel, qsel)

    feat = graph_out[:bt].reshape(b, t, FEAT)

    # ---- stage 2: T-tiled dilated conv stack (in-kernel halo DMA) -----------
    tt = min(1024, _round_up(t, 8))
    if b * _cdiv(t, tt) < 2 and t >= 16:  # keep both v7x TensorCores busy
        tt = _round_up(_cdiv(t, 2), 8)
    t_pad = _round_up(t, tt)
    nt = t_pad // tt
    tp = t_pad + 2 * PADT

    featp = jnp.pad(feat, ((0, 0), (PADT, PADT + t_pad - t), (0, 0)))
    featp = featp.reshape(b * tp, FEAT)                             # bf16, HBM

    w1b = (p['wc1'] * p['s1']).astype(bf16)
    w2b = (p['wc2'] * p['s2']).astype(bf16)
    w3b = (p['wc3'] * p['s3']).astype(bf16)
    wcb = jnp.pad(p['wcls'], ((0, 0), (0, 0), (0, C1 - C_CLS))).astype(bf16)
    shc = jnp.concatenate([p['t1'], p['t2'], p['t3']], axis=0)      # (3, 128) f32

    c2g = lambda bi, ti: (0, 0)
    c3g = lambda bi, ti: (0, 0, 0)
    conv_out = pl.pallas_call(
        functools.partial(_conv_kernel, t=t, tt=tt, tp=tp),
        out_shape=jax.ShapeDtypeStruct((b, t_pad, C1), jnp.float32),
        grid=(b, nt),
        in_specs=[
            pl.BlockSpec(memory_space=pl.ANY),          # features stay in HBM
            pl.BlockSpec((FEAT, C1), c2g),
            pl.BlockSpec((3, C1), c2g),
            pl.BlockSpec((3, C1, C1), c3g),
            pl.BlockSpec((3, C1, C1), c3g),
            pl.BlockSpec((3, C1, C1), c3g),
        ],
        out_specs=pl.BlockSpec((1, tt, C1), lambda bi, ti: (bi, ti, 0)),
        scratch_shapes=[
            pltpu.VMEM((tt + 2 * PADT, FEAT), bf16),
            pltpu.SemaphoreType.DMA,
        ],
        compiler_params=pltpu.CompilerParams(
            dimension_semantics=("parallel", "arbitrary"),
            vmem_limit_bytes=32 * 1024 * 1024),
    )(featp, w1b, shc, w2b, w3b, wcb)

    out = conv_out[:, :t, :C_CLS]
    return out.transpose(0, 2, 1)                     # (B, 10, T) PyTorch layout


# --------------------------------------------------------------------------
# Deterministic parameter construction (synthetic; shapes follow __init__)
# --------------------------------------------------------------------------
def _bn_fold(kg, kb, km, kv, n):
    gamma = 1.0 + 0.1 * jax.random.normal(kg, (n,), jnp.float32)
    beta = 0.05 * jax.random.normal(kb, (n,), jnp.float32)
    mean = 0.02 * jax.random.normal(km, (n,), jnp.float32)
    var = 1.0 + 0.1 * jax.random.uniform(kv, (n,), jnp.float32)
    scale = gamma / jnp.sqrt(var + 1e-5)
    shift = beta - mean * scale
    return scale.reshape(1, n), shift.reshape(1, n)


def init_params(key):
    ks = jax.random.split(key, 32)
    u = lambda k, shape, s: jax.random.uniform(k, shape, jnp.float32, -s, s)
    nrm = lambda k, shape, s: s * jax.random.normal(k, shape, jnp.float32)
    p = {}
    # adjacency (would be loaded from <dataset>.npy) — synthesized
    p['adj'] = jax.random.uniform(ks[0], (N_NODES, N_NODES), jnp.float32, 0.0, 0.3)
    stdv = 1.0 / (HID ** 0.5)
    p['w0'] = u(ks[1], (C_IN, HID), stdv)
    p['b0'] = u(ks[2], (1, HID), stdv)
    p['w1'] = u(ks[3], (HID, HID), stdv)
    p['b1'] = u(ks[4], (1, HID), stdv)
    p['s0'], p['t0'] = _bn_fold(ks[5], ks[6], ks[7], ks[8], HID)
    xs = (6.0 / (HID + HID)) ** 0.5
    p['w_heads'] = u(ks[9], (HEADS, HID, HID), xs)
    p['a1'] = u(ks[10], (HEADS, HID, 1), (6.0 / (2 * HID + 1)) ** 0.5)
    p['a2'] = u(ks[11], (HEADS, 1, HID), (6.0 / (2 * HID + 1)) ** 0.5)
    p['w_mh'] = u(ks[12], (HEADS * HID, HID), (6.0 / (HEADS * HID + HID)) ** 0.5)
    p['wc1'] = nrm(ks[13], (FEAT, C1), (2.0 / FEAT) ** 0.5)
    p['s1'], p['t1'] = _bn_fold(ks[14], ks[15], ks[16], ks[17], C1)
    p['wc2'] = nrm(ks[18], (3, C1, C1), (2.0 / (3 * C1)) ** 0.5)
    p['s2'], p['t2'] = _bn_fold(ks[19], ks[20], ks[21], ks[22], C1)
    p['wc3'] = nrm(ks[23], (3, C1, C1), (2.0 / (3 * C1)) ** 0.5)
    p['s3'], p['t3'] = _bn_fold(ks[24], ks[25], ks[26], ks[27], C1)
    p['wcls'] = nrm(ks[28], (3, C1, C_CLS), (2.0 / (3 * C1)) ** 0.5)
    return p


# --------------------------------------------------------------------------
# Pure-JAX reference (mirrors PyTorch forward in eval mode) for validation
# --------------------------------------------------------------------------
def reference_forward(x, p):
    b, t, n, c = x.shape
    h = x.reshape(b * t, n, c).astype(jnp.float32)
    adj = p['adj']
    sup = jnp.einsum('bnc,co->bno', h, p['w0'])
    h = jnp.einsum('nm,bmo->bno', adj, sup) + p['b0']
    h = jnp.maximum(h * p['s0'] + p['t0'], 0.0)
    sup = jnp.einsum('bnc,co->bno', h, p['w1'])
    g = jnp.einsum('nm,bmo->bno', adj, sup) + p['b1']
    heads = []
    for k in range(HEADS):
        Wh = jnp.einsum('bnc,co->bno', g, p['w_heads'][k])
        f1 = jnp.einsum('bno,oz->bnz', Wh, p['a1'][k])          # (B, N, 1)
        f2 = jnp.einsum('bno,o->bn', Wh, p['a2'][k, 0])         # (B, N)
        e = f1 + f2[:, None, :]
        e = jnp.where(e >= 0, e, NEG_SLOPE * e)
        e = e - jnp.max(e, axis=-1, keepdims=True)
        a = jax.nn.softmax(e, axis=-1)
        heads.append(jnp.einsum('bij,bjo->bio', a, Wh))
    hc = jnp.concatenate(heads, axis=-1)
    out = jnp.einsum('bnf,fo->bno', hc, p['w_mh'])
    feat = out.reshape(b, t, FEAT)

    def conv3(hin, w, dil):
        hp = jnp.pad(hin, ((0, 0), (dil, dil), (0, 0)))
        T = hin.shape[1]
        return sum(jnp.einsum('btc,co->bto', hp[:, k * dil:k * dil + T], w[k])
                   for k in range(3))

    y = jnp.maximum(jnp.einsum('btc,co->bto', feat, p['wc1']) * p['s1'] + p['t1'], 0.0)
    y = jnp.maximum(conv3(y, p['wc2'], 1) * p['s2'] + p['t2'], 0.0)
    y = jnp.maximum(conv3(y, p['wc3'], 2) * p['s3'] + p['t3'], 0.0)
    y = conv3(y, p['wcls'], 2)
    return y.transpose(0, 2, 1)


if __name__ == "__main__":
    key = jax.random.PRNGKey(0)
    kp, kx = jax.random.split(key)
    params = init_params(kp)

    b, t = 2, 8
    x = jax.random.normal(kx, (b, t, N_NODES, C_IN), jnp.float32)

    fwd = jax.jit(auwgcn_forward)
    out = jax.block_until_ready(fwd(x, params))
    assert out.shape == (b, C_CLS, t), out.shape
    assert bool(jnp.all(jnp.isfinite(out)))

    ref = reference_forward(x, params)
    scale = float(jnp.max(jnp.abs(ref))) + 1e-6
    err = float(jnp.max(jnp.abs(out.astype(jnp.float32) - ref)))
    # bf16 matmul operands + approx reciprocal -> loosened (relative) tolerance
    assert err <= 0.08 * scale + 1e-4, f"kernel/reference mismatch: {err} (scale {scale})"

    print("KERNEL_OK")
</pallas_src>

<mosaic_0001>
module attributes {stable_mosaic.version = 11 : i64} {
  func.func @_graph_kernel(%arg0: i32, %arg1: memref<8x24xbf16, #tpu.memory_space<vmem>>, %arg2: memref<24x384xbf16, #tpu.memory_space<vmem>>, %arg3: memref<2x384xf32, #tpu.memory_space<vmem>>, %arg4: memref<384x384xbf16, #tpu.memory_space<vmem>>, %arg5: memref<384x96xbf16, #tpu.memory_space<vmem>>, %arg6: memref<384x1536xbf16, #tpu.memory_space<vmem>>, %arg7: memref<96x576xbf16, #tpu.memory_space<vmem>>, %arg8: memref<576x48xbf16, #tpu.memory_space<vmem>>, %arg9: memref<48x1536xbf16, #tpu.memory_space<vmem>>, %arg10: memref<1536x32xbf16, #tpu.memory_space<vmem>>, %arg11: memref<8x384xbf16, #tpu.memory_space<vmem>>) attributes {dimension_semantics = [#tpu.dimension_semantics<parallel>], iteration_bounds = array<i64: 2>, scalar_prefetch = 0 : i64, scratch_operands = 0 : i64, tpu.core_type = #tpu.core_type<tc>, window_params = [{transform_indices = @transform_0, window_bounds = array<i64: 8, 24>}, {pipeline_mode = #tpu.pipeline_mode<synchronous>, transform_indices = @transform_1, window_bounds = array<i64: 24, 384>}, {pipeline_mode = #tpu.pipeline_mode<synchronous>, transform_indices = @transform_2, window_bounds = array<i64: 2, 384>}, {pipeline_mode = #tpu.pipeline_mode<synchronous>, transform_indices = @transform_3, window_bounds = array<i64: 384, 384>}, {pipeline_mode = #tpu.pipeline_mode<synchronous>, transform_indices = @transform_4, window_bounds = array<i64: 384, 96>}, {pipeline_mode = #tpu.pipeline_mode<synchronous>, transform_indices = @transform_5, window_bounds = array<i64: 384, 1536>}, {pipeline_mode = #tpu.pipeline_mode<synchronous>, transform_indices = @transform_6, window_bounds = array<i64: 96, 576>}, {pipeline_mode = #tpu.pipeline_mode<synchronous>, transform_indices = @transform_7, window_bounds = array<i64: 576, 48>}, {pipeline_mode = #tpu.pipeline_mode<synchronous>, transform_indices = @transform_8, window_bounds = array<i64: 48, 1536>}, {pipeline_mode = #tpu.pipeline_mode<synchronous>, transform_indices = @transform_9, window_bounds = array<i64: 1536, 32>}, {transform_indices = @transform_10, window_bounds = array<i64: 8, 384>}]} {
    %c0 = arith.constant 0 : index
    %c0_0 = arith.constant 0 : index
    %0 = vector.load %arg3[%c0, %c0_0] : memref<2x384xf32, #tpu.memory_space<vmem>>, vector<2x384xf32>
    %c0_1 = arith.constant 0 : index
    %c0_2 = arith.constant 0 : index
    %1 = vector.load %arg1[%c0_1, %c0_2] : memref<8x24xbf16, #tpu.memory_space<vmem>>, vector<8x24xbf16>
    %c0_3 = arith.constant 0 : index
    %c0_4 = arith.constant 0 : index
    %2 = vector.load %arg2[%c0_3, %c0_4] : memref<24x384xbf16, #tpu.memory_space<vmem>>, vector<24x384xbf16>
    %cst = arith.constant dense<0.000000e+00> : vector<8x384xf32>
    %3 = tpu.matmul %1, %2, %cst {dimension_numbers = #tpu.dot_dimension_numbers<[1], [0], [0], [1], [0, 0, 1, 1], [], []>} : vector<8x24xbf16>, vector<24x384xbf16>, vector<8x384xf32> -> vector<8x384xf32>
    %4 = vector.extract_strided_slice %0 {offsets = [0, 0], sizes = [1, 384], strides = [1, 1]} : vector<2x384xf32> to vector<1x384xf32>
    %5 = vector.broadcast %4 : vector<1x384xf32> to vector<8x384xf32>
    %6 = arith.addf %3, %5 : vector<8x384xf32>
    %cst_5 = arith.constant 0.000000e+00 : f32
    %7 = vector.broadcast %cst_5 : f32 to vector<8x384xf32>
    %8 = arith.maximumf %6, %7 : vector<8x384xf32>
    %9 = arith.truncf %8 : vector<8x384xf32> to vector<8x384xbf16>
    %c0_6 = arith.constant 0 : index
    %c0_7 = arith.constant 0 : index
    %10 = vector.load %arg4[%c0_6, %c0_7] : memref<384x384xbf16, #tpu.memory_space<vmem>>, vector<384x384xbf16>
    %cst_8 = arith.constant dense<0.000000e+00> : vector<8x384xf32>
    %11 = tpu.matmul %9, %10, %cst_8 {dimension_numbers = #tpu.dot_dimension_numbers<[1], [0], [0], [1], [0, 0, 1, 1], [], []>} : vector<8x384xbf16>, vector<384x384xbf16>, vector<8x384xf32> -> vector<8x384xf32>
    %12 = vector.extract_strided_slice %0 {offsets = [1, 0], sizes = [1, 384], strides = [1, 1]} : vector<2x384xf32> to vector<1x384xf32>
    %13 = vector.broadcast %12 : vector<1x384xf32> to vector<8x384xf32>
    %14 = arith.addf %11, %13 : vector<8x384xf32>
    %15 = arith.truncf %14 : vector<8x384xf32> to vector<8x384xbf16>
    %c0_9 = arith.constant 0 : index
    %c0_10 = arith.constant 0 : index
    %16 = vector.load %arg5[%c0_9, %c0_10] : memref<384x96xbf16, #tpu.memory_space<vmem>>, vector<384x96xbf16>
    %cst_11 = arith.constant dense<0.000000e+00> : vector<8x96xf32>
    %17 = tpu.matmul %15, %16, %cst_11 {dimension_numbers = #tpu.dot_dimension_numbers<[1], [0], [0], [1], [0, 0, 1, 1], [], []>} : vector<8x384xbf16>, vector<384x96xbf16>, vector<8x96xf32> -> vector<8x96xf32>
    %c0_12 = arith.constant 0 : index
    %c0_13 = arith.constant 0 : index
    %18 = vector.load %arg7[%c0_12, %c0_13] : memref<96x576xbf16, #tpu.memory_space<vmem>>, vector<96x576xbf16>
    %19 = arith.truncf %17 : vector<8x96xf32> to vector<8x96xbf16>
    %cst_14 = arith.constant dense<0.000000e+00> : vector<8x576xf32>
    %20 = tpu.matmul %19, %18, %cst_14 {dimension_numbers = #tpu.dot_dimension_numbers<[1], [0], [0], [1], [0, 0, 1, 1], [], []>} : vector<8x96xbf16>, vector<96x576xbf16>, vector<8x576xf32> -> vector<8x576xf32>
    %cst_15 = arith.constant 0.000000e+00 : f32
    %21 = vector.broadcast %cst_15 : f32 to vector<8x576xf32>
    %22 = arith.cmpf oge, %20, %21 : vector<8x576xf32>
    %cst_16 = arith.constant 0.00999999977 : f32
    %23 = vector.broadcast %cst_16 : f32 to vector<8x576xf32>
    %24 = arith.mulf %23, %20 : vector<8x576xf32>
    %25 = arith.select %22, %20, %24 : vector<8x576xi1>, vector<8x576xf32>
    %26 = vector.extract_strided_slice %17 {offsets = [0, 0], sizes = [8, 48], strides = [1, 1]} : vector<8x96xf32> to vector<8x48xf32>
    %27 = vector.extract_strided_slice %17 {offsets = [0, 48], sizes = [8, 48], strides = [1, 1]} : vector<8x96xf32> to vector<8x48xf32>
    %cst_17 = arith.constant dense<0xFF800000> : vector<8xf32>
    %28 = vector.multi_reduction <maximumf>, %27, %cst_17 [1] : vector<8x48xf32> to vector<8xf32>
    %29 = vector.shape_cast %28 : vector<8xf32> to vector<8x1xf32>
    %30 = vector.broadcast %29 : vector<8x1xf32> to vector<8x48xf32>
    %31 = arith.addf %26, %30 : vector<8x48xf32>
    %cst_18 = arith.constant 0.000000e+00 : f32
    %32 = vector.broadcast %cst_18 : f32 to vector<8x48xf32>
    %33 = arith.cmpf oge, %31, %32 : vector<8x48xf32>
    %cst_19 = arith.constant 0.00999999977 : f32
    %34 = vector.broadcast %cst_19 : f32 to vector<8x48xf32>
    %35 = arith.mulf %34, %31 : vector<8x48xf32>
    %36 = arith.select %33, %31, %35 : vector<8x48xi1>, vector<8x48xf32>
    %37 = vector.extract_strided_slice %18 {offsets = [0, 0], sizes = [48, 576], strides = [1, 1]} : vector<96x576xbf16> to vector<48x576xbf16>
    %38 = arith.truncf %36 : vector<8x48xf32> to vector<8x48xbf16>
    %cst_20 = arith.constant dense<0.000000e+00> : vector<8x576xf32>
    %39 = tpu.matmul %38, %37, %cst_20 {dimension_numbers = #tpu.dot_dimension_numbers<[1], [0], [0], [1], [0, 0, 1, 1], [], []>} : vector<8x48xbf16>, vector<48x576xbf16>, vector<8x576xf32> -> vector<8x576xf32>
    %40 = arith.subf %25, %39 : vector<8x576xf32>
    %41 = math.exp %40 : vector<8x576xf32>
    %42 = arith.truncf %41 : vector<8x576xf32> to vector<8x576xbf16>
    %c0_21 = arith.constant 0 : index
    %c0_22 = arith.constant 0 : index
    %43 = vector.load %arg8[%c0_21, %c0_22] : memref<576x48xbf16, #tpu.memory_space<vmem>>, vector<576x48xbf16>
    %cst_23 = arith.constant dense<0.000000e+00> : vector<8x48xf32>
    %44 = tpu.matmul %42, %43, %cst_23 {dimension_numbers = #tpu.dot_dimension_numbers<[1], [0], [0], [1], [0, 0, 1, 1], [], []>} : vector<8x576xbf16>, vector<576x48xbf16>, vector<8x48xf32> -> vector<8x48xf32>
    %cst_24 = arith.constant 1.000000e-30 : f32
    %45 = vector.broadcast %cst_24 : f32 to vector<8x48xf32>
    %46 = arith.maximumf %44, %45 : vector<8x48xf32>
    %47 = tpu.reciprocal %46 {approx = true} : vector<8x48xf32> -> vector<8x48xf32>
    %48 = arith.truncf %47 : vector<8x48xf32> to vector<8x48xbf16>
    %cst_25 = arith.constant dense<0.000000e+00> : vector<8x576xf32>
    %49 = tpu.matmul %48, %37, %cst_25 {dimension_numbers = #tpu.dot_dimension_numbers<[1], [0], [0], [1], [0, 0, 1, 1], [], []>} : vector<8x48xbf16>, vector<48x576xbf16>, vector<8x576xf32> -> vector<8x576xf32>
    %50 = arith.mulf %41, %49 : vector<8x576xf32>
    %51 = arith.truncf %50 : vector<8x576xf32> to vector<8x576xbf16>
    %c0_26 = arith.constant 0 : index
    %c0_27 = arith.constant 0 : index
    %52 = vector.load %arg6[%c0_26, %c0_27] : memref<384x1536xbf16, #tpu.memory_space<vmem>>, vector<384x1536xbf16>
    %cst_28 = arith.constant dense<0.000000e+00> : vector<8x1536xf32>
    %53 = tpu.matmul %15, %52, %cst_28 {dimension_numbers = #tpu.dot_dimension_numbers<[1], [0], [0], [1], [0, 0, 1, 1], [], []>} : vector<8x384xbf16>, vector<384x1536xbf16>, vector<8x1536xf32> -> vector<8x1536xf32>
    %c0_29 = arith.constant 0 : index
    %c0_30 = arith.constant 0 : index
    %54 = vector.load %arg9[%c0_29, %c0_30] : memref<48x1536xbf16, #tpu.memory_space<vmem>>, vector<48x1536xbf16>
    %c0_31 = arith.constant 0 : index
    %c0_32 = arith.constant 0 : index
    %55 = vector.load %arg10[%c0_31, %c0_32] : memref<1536x32xbf16, #tpu.memory_space<vmem>>, vector<1536x32xbf16>
    %56 = vector.extract_strided_slice %51 {offsets = [0, 0], sizes = [8, 48], strides = [1, 1]} : vector<8x576xbf16> to vector<8x48xbf16>
    %cst_33 = arith.constant dense<0.000000e+00> : vector<8x1536xf32>
    %57 = tpu.matmul %56, %54, %cst_33 {dimension_numbers = #tpu.dot_dimension_numbers<[1], [0], [0], [1], [0, 0, 1, 1], [], []>} : vector<8x48xbf16>, vector<48x1536xbf16>, vector<8x1536xf32> -> vector<8x1536xf32>
    %58 = arith.mulf %57, %53 : vector<8x1536xf32>
    %59 = arith.truncf %58 : vector<8x1536xf32> to vector<8x1536xbf16>
    %cst_34 = arith.constant dense<0.000000e+00> : vector<8x32xf32>
    %60 = tpu.matmul %59, %55, %cst_34 {dimension_numbers = #tpu.dot_dimension_numbers<[1], [0], [0], [1], [0, 0, 1, 1], [], []>} : vector<8x1536xbf16>, vector<1536x32xbf16>, vector<8x32xf32> -> vector<8x32xf32>
    %61 = arith.truncf %60 : vector<8x32xf32> to vector<8x32xbf16>
    %c0_35 = arith.constant 0 : index
    %c0_36 = arith.constant 0 : index
    %62 = vector.load %arg11[%c0_35, %c0_36] : memref<8x384xbf16, #tpu.memory_space<vmem>>, vector<8x32xbf16>
    tpu.vector_store %arg11[%c0_35, %c0_36], %61 {strides = array<i32>} : memref<8x384xbf16, #tpu.memory_space<vmem>>, vector<8x32xbf16>,
    %63 = vector.extract_strided_slice %51 {offsets = [0, 48], sizes = [8, 48], strides = [1, 1]} : vector<8x576xbf16> to vector<8x48xbf16>
    %cst_37 = arith.constant dense<0.000000e+00> : vector<8x1536xf32>
    %64 = tpu.matmul %63, %54, %cst_37 {dimension_numbers = #tpu.dot_dimension_numbers<[1], [0], [0], [1], [0, 0, 1, 1], [], []>} : vector<8x48xbf16>, vector<48x1536xbf16>, vector<8x1536xf32> -> vector<8x1536xf32>
    %65 = arith.mulf %64, %53 : vector<8x1536xf32>
    %66 = arith.truncf %65 : vector<8x1536xf32> to vector<8x1536xbf16>
    %cst_38 = arith.constant dense<0.000000e+00> : vector<8x32xf32>
    %67 = tpu.matmul %66, %55, %cst_38 {dimension_numbers = #tpu.dot_dimension_numbers<[1], [0], [0], [1], [0, 0, 1, 1], [], []>} : vector<8x1536xbf16>, vector<1536x32xbf16>, vector<8x32xf32> -> vector<8x32xf32>
    %68 = arith.truncf %67 : vector<8x32xf32> to vector<8x32xbf16>
    %c0_39 = arith.constant 0 : index
    %c32 = arith.constant 32 : index
    %69 = vector.load %arg11[%c0_39, %c32] : memref<8x384xbf16, #tpu.memory_space<vmem>>, vector<8x32xbf16>
    tpu.vector_store %arg11[%c0_39, %c32], %68 {strides = array<i32>} : memref<8x384xbf16, #tpu.memory_space<vmem>>, vector<8x32xbf16>,
    %70 = vector.extract_strided_slice %51 {offsets = [0, 96], sizes = [8, 48], strides = [1, 1]} : vector<8x576xbf16> to vector<8x48xbf16>
    %cst_40 = arith.constant dense<0.000000e+00> : vector<8x1536xf32>
    %71 = tpu.matmul %70, %54, %cst_40 {dimension_numbers = #tpu.dot_dimension_numbers<[1], [0], [0], [1], [0, 0, 1, 1], [], []>} : vector<8x48xbf16>, vector<48x1536xbf16>, vector<8x1536xf32> -> vector<8x1536xf32>
    %72 = arith.mulf %71, %53 : vector<8x1536xf32>
    %73 = arith.truncf %72 : vector<8x1536xf32> to vector<8x1536xbf16>
    %cst_41 = arith.constant dense<0.000000e+00> : vector<8x32xf32>
    %74 = tpu.matmul %73, %55, %cst_41 {dimension_numbers = #tpu.dot_dimension_numbers<[1], [0], [0], [1], [0, 0, 1, 1], [], []>} : vector<8x1536xbf16>, vector<1536x32xbf16>, vector<8x32xf32> -> vector<8x32xf32>
    %75 = arith.truncf %74 : vector<8x32xf32> to vector<8x32xbf16>
    %c0_42 = arith.constant 0 : index
    %c64 = arith.constant 64 : index
    %76 = vector.load %arg11[%c0_42, %c64] : memref<8x384xbf16, #tpu.memory_space<vmem>>, vector<8x32xbf16>
    tpu.vector_store %arg11[%c0_42, %c64], %75 {strides = array<i32>} : memref<8x384xbf16, #tpu.memory_space<vmem>>, vector<8x32xbf16>,
    %77 = vector.extract_strided_slice %51 {offsets = [0, 144], sizes = [8, 48], strides = [1, 1]} : vector<8x576xbf16> to vector<8x48xbf16>
    %cst_43 = arith.constant dense<0.000000e+00> : vector<8x1536xf32>
    %78 = tpu.matmul %77, %54, %cst_43 {dimension_numbers = #tpu.dot_dimension_numbers<[1], [0], [0], [1], [0, 0, 1, 1], [], []>} : vector<8x48xbf16>, vector<48x1536xbf16>, vector<8x1536xf32> -> vector<8x1536xf32>
    %79 = arith.mulf %78, %53 : vector<8x1536xf32>
    %80 = arith.truncf %79 : vector<8x1536xf32> to vector<8x1536xbf16>
    %cst_44 = arith.constant dense<0.000000e+00> : vector<8x32xf32>
    %81 = tpu.matmul %80, %55, %cst_44 {dimension_numbers = #tpu.dot_dimension_numbers<[1], [0], [0], [1], [0, 0, 1, 1], [], []>} : vector<8x1536xbf16>, vector<1536x32xbf16>, vector<8x32xf32> -> vector<8x32xf32>
    %82 = arith.truncf %81 : vector<8x32xf32> to vector<8x32xbf16>
    %c0_45 = arith.constant 0 : index
    %c96 = arith.constant 96 : index
    %83 = vector.load %arg11[%c0_45, %c96] : memref<8x384xbf16, #tpu.memory_space<vmem>>, vector<8x32xbf16>
    tpu.vector_store %arg11[%c0_45, %c96], %82 {strides = array<i32>} : memref<8x384xbf16, #tpu.memory_space<vmem>>, vector<8x32xbf16>,
    %84 = vector.extract_strided_slice %51 {offsets = [0, 192], sizes = [8, 48], strides = [1, 1]} : vector<8x576xbf16> to vector<8x48xbf16>
    %cst_46 = arith.constant dense<0.000000e+00> : vector<8x1536xf32>
    %85 = tpu.matmul %84, %54, %cst_46 {dimension_numbers = #tpu.dot_dimension_numbers<[1], [0], [0], [1], [0, 0, 1, 1], [], []>} : vector<8x48xbf16>, vector<48x1536xbf16>, vector<8x1536xf32> -> vector<8x1536xf32>
    %86 = arith.mulf %85, %53 : vector<8x1536xf32>
    %87 = arith.truncf %86 : vector<8x1536xf32> to vector<8x1536xbf16>
    %cst_47 = arith.constant dense<0.000000e+00> : vector<8x32xf32>
    %88 = tpu.matmul %87, %55, %cst_47 {dimension_numbers = #tpu.dot_dimension_numbers<[1], [0], [0], [1], [0, 0, 1, 1], [], []>} : vector<8x1536xbf16>, vector<1536x32xbf16>, vector<8x32xf32> -> vector<8x32xf32>
    %89 = arith.truncf %88 : vector<8x32xf32> to vector<8x32xbf16>
    %c0_48 = arith.constant 0 : index
    %c128 = arith.constant 128 : index
    %90 = vector.load %arg11[%c0_48, %c128] : memref<8x384xbf16, #tpu.memory_space<vmem>>, vector<8x32xbf16>
    tpu.vector_store %arg11[%c0_48, %c128], %89 {strides = array<i32>} : memref<8x384xbf16, #tpu.memory_space<vmem>>, vector<8x32xbf16>,
    %91 = vector.extract_strided_slice %51 {offsets = [0, 240], sizes = [8, 48], strides = [1, 1]} : vector<8x576xbf16> to vector<8x48xbf16>
    %cst_49 = arith.constant dense<0.000000e+00> : vector<8x1536xf32>
    %92 = tpu.matmul %91, %54, %cst_49 {dimension_numbers = #tpu.dot_dimension_numbers<[1], [0], [0], [1], [0, 0, 1, 1], [], []>} : vector<8x48xbf16>, vector<48x1536xbf16>, vector<8x1536xf32> -> vector<8x1536xf32>
    %93 = arith.mulf %92, %53 : vector<8x1536xf32>
    %94 = arith.truncf %93 : vector<8x1536xf32> to vector<8x1536xbf16>
    %cst_50 = arith.constant dense<0.000000e+00> : vector<8x32xf32>
    %95 = tpu.matmul %94, %55, %cst_50 {dimension_numbers = #tpu.dot_dimension_numbers<[1], [0], [0], [1], [0, 0, 1, 1], [], []>} : vector<8x1536xbf16>, vector<1536x32xbf16>, vector<8x32xf32> -> vector<8x32xf32>
    %96 = arith.truncf %95 : vector<8x32xf32> to vector<8x32xbf16>
    %c0_51 = arith.constant 0 : index
    %c160 = arith.constant 160 : index
    %97 = vector.load %arg11[%c0_51, %c160] : memref<8x384xbf16, #tpu.memory_space<vmem>>, vector<8x32xbf16>
    tpu.vector_store %arg11[%c0_51, %c160], %96 {strides = array<i32>} : memref<8x384xbf16, #tpu.memory_space<vmem>>, vector<8x32xbf16>,
    %98 = vector.extract_strided_slice %51 {offsets = [0, 288], sizes = [8, 48], strides = [1, 1]} : vector<8x576xbf16> to vector<8x48xbf16>
    %cst_52 = arith.constant dense<0.000000e+00> : vector<8x1536xf32>
    %99 = tpu.matmul %98, %54, %cst_52 {dimension_numbers = #tpu.dot_dimension_numbers<[1], [0], [0], [1], [0, 0, 1, 1], [], []>} : vector<8x48xbf16>, vector<48x1536xbf16>, vector<8x1536xf32> -> vector<8x1536xf32>
    %100 = arith.mulf %99, %53 : vector<8x1536xf32>
    %101 = arith.truncf %100 : vector<8x1536xf32> to vector<8x1536xbf16>
    %cst_53 = arith.constant dense<0.000000e+00> : vector<8x32xf32>
    %102 = tpu.matmul %101, %55, %cst_53 {dimension_numbers = #tpu.dot_dimension_numbers<[1], [0], [0], [1], [0, 0, 1, 1], [], []>} : vector<8x1536xbf16>, vector<1536x32xbf16>, vector<8x32xf32> -> vector<8x32xf32>
    %103 = arith.truncf %102 : vector<8x32xf32> to vector<8x32xbf16>
    %c0_54 = arith.constant 0 : index
    %c192 = arith.constant 192 : index
    %104 = vector.load %arg11[%c0_54, %c192] : memref<8x384xbf16, #tpu.memory_space<vmem>>, vector<8x32xbf16>
    tpu.vector_store %arg11[%c0_54, %c192], %103 {strides = array<i32>} : memref<8x384xbf16, #tpu.memory_space<vmem>>, vector<8x32xbf16>,
    %105 = vector.extract_strided_slice %51 {offsets = [0, 336], sizes = [8, 48], strides = [1, 1]} : vector<8x576xbf16> to vector<8x48xbf16>
    %cst_55 = arith.constant dense<0.000000e+00> : vector<8x1536xf32>
    %106 = tpu.matmul %105, %54, %cst_55 {dimension_numbers = #tpu.dot_dimension_numbers<[1], [0], [0], [1], [0, 0, 1, 1], [], []>} : vector<8x48xbf16>, vector<48x1536xbf16>, vector<8x1536xf32> -> vector<8x1536xf32>
    %107 = arith.mulf %106, %53 : vector<8x1536xf32>
    %108 = arith.truncf %107 : vector<8x1536xf32> to vector<8x1536xbf16>
    %cst_56 = arith.constant dense<0.000000e+00> : vector<8x32xf32>
    %109 = tpu.matmul %108, %55, %cst_56 {dimension_numbers = #tpu.dot_dimension_numbers<[1], [0], [0], [1], [0, 0, 1, 1], [], []>} : vector<8x1536xbf16>, vector<1536x32xbf16>, vector<8x32xf32> -> vector<8x32xf32>
    %110 = arith.truncf %109 : vector<8x32xf32> to vector<8x32xbf16>
    %c0_57 = arith.constant 0 : index
    %c224 = arith.constant 224 : index
    %111 = vector.load %arg11[%c0_57, %c224] : memref<8x384xbf16, #tpu.memory_space<vmem>>, vector<8x32xbf16>
    tpu.vector_store %arg11[%c0_57, %c224], %110 {strides = array<i32>} : memref<8x384xbf16, #tpu.memory_space<vmem>>, vector<8x32xbf16>,
    %112 = vector.extract_strided_slice %51 {offsets = [0, 384], sizes = [8, 48], strides = [1, 1]} : vector<8x576xbf16> to vector<8x48xbf16>
    %cst_58 = arith.constant dense<0.000000e+00> : vector<8x1536xf32>
    %113 = tpu.matmul %112, %54, %cst_58 {dimension_numbers = #tpu.dot_dimension_numbers<[1], [0], [0], [1], [0, 0, 1, 1], [], []>} : vector<8x48xbf16>, vector<48x1536xbf16>, vector<8x1536xf32> -> vector<8x1536xf32>
    %114 = arith.mulf %113, %53 : vector<8x1536xf32>
    %115 = arith.truncf %114 : vector<8x1536xf32> to vector<8x1536xbf16>
    %cst_59 = arith.constant dense<0.000000e+00> : vector<8x32xf32>
    %116 = tpu.matmul %115, %55, %cst_59 {dimension_numbers = #tpu.dot_dimension_numbers<[1], [0], [0], [1], [0, 0, 1, 1], [], []>} : vector<8x1536xbf16>, vector<1536x32xbf16>, vector<8x32xf32> -> vector<8x32xf32>
    %117 = arith.truncf %116 : vector<8x32xf32> to vector<8x32xbf16>
    %c0_60 = arith.constant 0 : index
    %c256 = arith.constant 256 : index
    %118 = vector.load %arg11[%c0_60, %c256] : memref<8x384xbf16, #tpu.memory_space<vmem>>, vector<8x32xbf16>
    tpu.vector_store %arg11[%c0_60, %c256], %117 {strides = array<i32>} : memref<8x384xbf16, #tpu.memory_space<vmem>>, vector<8x32xbf16>,
    %119 = vector.extract_strided_slice %51 {offsets = [0, 432], sizes = [8, 48], strides = [1, 1]} : vector<8x576xbf16> to vector<8x48xbf16>
    %cst_61 = arith.constant dense<0.000000e+00> : vector<8x1536xf32>
    %120 = tpu.matmul %119, %54, %cst_61 {dimension_numbers = #tpu.dot_dimension_numbers<[1], [0], [0], [1], [0, 0, 1, 1], [], []>} : vector<8x48xbf16>, vector<48x1536xbf16>, vector<8x1536xf32> -> vector<8x1536xf32>
    %121 = arith.mulf %120, %53 : vector<8x1536xf32>
    %122 = arith.truncf %121 : vector<8x1536xf32> to vector<8x1536xbf16>
    %cst_62 = arith.constant dense<0.000000e+00> : vector<8x32xf32>
    %123 = tpu.matmul %122, %55, %cst_62 {dimension_numbers = #tpu.dot_dimension_numbers<[1], [0], [0], [1], [0, 0, 1, 1], [], []>} : vector<8x1536xbf16>, vector<1536x32xbf16>, vector<8x32xf32> -> vector<8x32xf32>
    %124 = arith.truncf %123 : vector<8x32xf32> to vector<8x32xbf16>
    %c0_63 = arith.constant 0 : index
    %c288 = arith.constant 288 : index
    %125 = vector.load %arg11[%c0_63, %c288] : memref<8x384xbf16, #tpu.memory_space<vmem>>, vector<8x32xbf16>
    tpu.vector_store %arg11[%c0_63, %c288], %124 {strides = array<i32>} : memref<8x384xbf16, #tpu.memory_space<vmem>>, vector<8x32xbf16>,
    %126 = vector.extract_strided_slice %51 {offsets = [0, 480], sizes = [8, 48], strides = [1, 1]} : vector<8x576xbf16> to vector<8x48xbf16>
    %cst_64 = arith.constant dense<0.000000e+00> : vector<8x1536xf32>
    %127 = tpu.matmul %126, %54, %cst_64 {dimension_numbers = #tpu.dot_dimension_numbers<[1], [0], [0], [1], [0, 0, 1, 1], [], []>} : vector<8x48xbf16>, vector<48x1536xbf16>, vector<8x1536xf32> -> vector<8x1536xf32>
    %128 = arith.mulf %127, %53 : vector<8x1536xf32>
    %129 = arith.truncf %128 : vector<8x1536xf32> to vector<8x1536xbf16>
    %cst_65 = arith.constant dense<0.000000e+00> : vector<8x32xf32>
    %130 = tpu.matmul %129, %55, %cst_65 {dimension_numbers = #tpu.dot_dimension_numbers<[1], [0], [0], [1], [0, 0, 1, 1], [], []>} : vector<8x1536xbf16>, vector<1536x32xbf16>, vector<8x32xf32> -> vector<8x32xf32>
    %131 = arith.truncf %130 : vector<8x32xf32> to vector<8x32xbf16>
    %c0_66 = arith.constant 0 : index
    %c320 = arith.constant 320 : index
    %132 = vector.load %arg11[%c0_66, %c320] : memref<8x384xbf16, #tpu.memory_space<vmem>>, vector<8x32xbf16>
    tpu.vector_store %arg11[%c0_66, %c320], %131 {strides = array<i32>} : memref<8x384xbf16, #tpu.memory_space<vmem>>, vector<8x32xbf16>,
    %133 = vector.extract_strided_slice %51 {offsets = [0, 528], sizes = [8, 48], strides = [1, 1]} : vector<8x576xbf16> to vector<8x48xbf16>
    %cst_67 = arith.constant dense<0.000000e+00> : vector<8x1536xf32>
    %134 = tpu.matmul %133, %54, %cst_67 {dimension_numbers = #tpu.dot_dimension_numbers<[1], [0], [0], [1], [0, 0, 1, 1], [], []>} : vector<8x48xbf16>, vector<48x1536xbf16>, vector<8x1536xf32> -> vector<8x1536xf32>
    %135 = arith.mulf %134, %53 : vector<8x1536xf32>
    %136 = arith.truncf %135 : vector<8x1536xf32> to vector<8x1536xbf16>
    %cst_68 = arith.constant dense<0.000000e+00> : vector<8x32xf32>
    %137 = tpu.matmul %136, %55, %cst_68 {dimension_numbers = #tpu.dot_dimension_numbers<[1], [0], [0], [1], [0, 0, 1, 1], [], []>} : vector<8x1536xbf16>, vector<1536x32xbf16>, vector<8x32xf32> -> vector<8x32xf32>
    %138 = arith.truncf %137 : vector<8x32xf32> to vector<8x32xbf16>
    %c0_69 = arith.constant 0 : index
    %c352 = arith.constant 352 : index
    %139 = vector.load %arg11[%c0_69, %c352] : memref<8x384xbf16, #tpu.memory_space<vmem>>, vector<8x32xbf16>
    tpu.vector_store %arg11[%c0_69, %c352], %138 {strides = array<i32>} : memref<8x384xbf16, #tpu.memory_space<vmem>>, vector<8x32xbf16>,
    return
  }
  func.func @transform_0(%arg0: i32) -> (i32, i32) {
    %c0_i32 = arith.constant 0 : i32
    %c0_i32_0 = arith.constant 0 : i32
    return %arg0, %c0_i32 : i32, i32
  }
  func.func @transform_1(%arg0: i32) -> (i32, i32) {
    %c0_i32 = arith.constant 0 : i32
    %c0_i32_0 = arith.constant 0 : i32
    %c0_i32_1 = arith.constant 0 : i32
    return %c0_i32, %c0_i32_0 : i32, i32
  }
  func.func @transform_2(%arg0: i32) -> (i32, i32) {
    %c0_i32 = arith.constant 0 : i32
    %c0_i32_0 = arith.constant 0 : i32
    %c0_i32_1 = arith.constant 0 : i32
    return %c0_i32, %c0_i32_0 : i32, i32
  }
  func.func @transform_3(%arg0: i32) -> (i32, i32) {
    %c0_i32 = arith.constant 0 : i32
    %c0_i32_0 = arith.constant 0 : i32
    %c0_i32_1 = arith.constant 0 : i32
    return %c0_i32, %c0_i32_0 : i32, i32
  }
  func.func @transform_4(%arg0: i32) -> (i32, i32) {
    %c0_i32 = arith.constant 0 : i32
    %c0_i32_0 = arith.constant 0 : i32
    %c0_i32_1 = arith.constant 0 : i32
    return %c0_i32, %c0_i32_0 : i32, i32
  }
  func.func @transform_5(%arg0: i32) -> (i32, i32) {
    %c0_i32 = arith.constant 0 : i32
    %c0_i32_0 = arith.constant 0 : i32
    %c0_i32_1 = arith.constant 0 : i32
    return %c0_i32, %c0_i32_0 : i32, i32
  }
  func.func @transform_6(%arg0: i32) -> (i32, i32) {
    %c0_i32 = arith.constant 0 : i32
    %c0_i32_0 = arith.constant 0 : i32
    %c0_i32_1 = arith.constant 0 : i32
    return %c0_i32, %c0_i32_0 : i32, i32
  }
  func.func @transform_7(%arg0: i32) -> (i32, i32) {
    %c0_i32 = arith.constant 0 : i32
    %c0_i32_0 = arith.constant 0 : i32
    %c0_i32_1 = arith.constant 0 : i32
    return %c0_i32, %c0_i32_0 : i32, i32
  }
  func.func @transform_8(%arg0: i32) -> (i32, i32) {
    %c0_i32 = arith.constant 0 : i32
    %c0_i32_0 = arith.constant 0 : i32
    %c0_i32_1 = arith.constant 0 : i32
    return %c0_i32, %c0_i32_0 : i32, i32
  }
  func.func @transform_9(%arg0: i32) -> (i32, i32) {
    %c0_i32 = arith.constant 0 : i32
    %c0_i32_0 = arith.constant 0 : i32
    %c0_i32_1 = arith.constant 0 : i32
    return %c0_i32, %c0_i32_0 : i32, i32
  }
  func.func @transform_10(%arg0: i32) -> (i32, i32) {
    %c0_i32 = arith.constant 0 : i32
    %c0_i32_0 = arith.constant 0 : i32
    return %arg0, %c0_i32 : i32, i32
  }
}

module attributes {stable_mosaic.version = 11 : i64} {
  func.func @_conv_kernel(%arg0: i32, %arg1: i32, %arg2: memref<48x384xbf16, #tpu.memory_space<any>>, %arg3: memref<384x128xbf16, #tpu.memory_space<vmem>>, %arg4: memref<3x128xf32, #tpu.memory_space<vmem>>, %arg5: memref<3x128x128xbf16, #tpu.memory_space<vmem>>, %arg6: memref<3x128x128xbf16, #tpu.memory_space<vmem>>, %arg7: memref<3x128x128xbf16, #tpu.memory_space<vmem>>, %arg8: memref<1x8x128xf32, #tpu.memory_space<vmem>>, %arg9: memref<24x384xbf16, #tpu.memory_space<vmem>>, %arg10: memref<!tpu.dma_semaphore, #tpu.memory_space<semaphore_mem>>) attributes {dimension_semantics = [#tpu.dimension_semantics<parallel>, #tpu.dimension_semantics<arbitrary>], iteration_bounds = array<i64: 2, 1>, scalar_prefetch = 0 : i64, scratch_operands = 2 : i64, tpu.core_type = #tpu.core_type<tc>, window_params = [{}, {pipeline_mode = #tpu.pipeline_mode<synchronous>, transform_indices = @transform_1, window_bounds = array<i64: 384, 128>}, {pipeline_mode = #tpu.pipeline_mode<synchronous>, transform_indices = @transform_2, window_bounds = array<i64: 3, 128>}, {pipeline_mode = #tpu.pipeline_mode<synchronous>, transform_indices = @transform_3, window_bounds = array<i64: 3, 128, 128>}, {pipeline_mode = #tpu.pipeline_mode<synchronous>, transform_indices = @transform_4, window_bounds = array<i64: 3, 128, 128>}, {pipeline_mode = #tpu.pipeline_mode<synchronous>, transform_indices = @transform_5, window_bounds = array<i64: 3, 128, 128>}, {transform_indices = @transform_6, window_bounds = array<i64: 1, 8, 128>}]} {
    %c24_i32 = arith.constant 24 : i32
    %0 = arith.muli %arg0, %c24_i32 : i32
    %c8_i32 = arith.constant 8 : i32
    %1 = arith.muli %arg1, %c8_i32 : i32
    %2 = arith.addi %0, %1 : i32
    %3 = tpu.assume_multiple %2, 8 : i32
    %c0_i32 = arith.constant 0 : i32
    %4 = tpu.memref_slice %arg2[%3, %c0_i32] : memref<48x384xbf16, #tpu.memory_space<any>> -> memref<24x384xbf16, #tpu.memory_space<any>>
    tpu.enqueue_dma source(%4 : memref<24x384xbf16, #tpu.memory_space<any>>) target(%arg9 : memref<24x384xbf16, #tpu.memory_space<vmem>>) target_semaphore(%arg10 : memref<!tpu.dma_semaphore, #tpu.memory_space<semaphore_mem>>)
    %c0_i32_0 = arith.constant 0 : i32
    %5 = tpu.memref_slice %arg2[%3, %c0_i32_0] : memref<48x384xbf16, #tpu.memory_space<any>> -> memref<24x384xbf16, #tpu.memory_space<any>>
    tpu.wait_dma2 semaphore(%arg10 : memref<!tpu.dma_semaphore, #tpu.memory_space<semaphore_mem>>) src(%5 : memref<24x384xbf16, #tpu.memory_space<any>>) dst(%arg9 : memref<24x384xbf16, #tpu.memory_space<vmem>>)
    %6 = tpu.iota {dimensions = array<i32: 0>} : vector<24x1xi32>
    %c8_i32_1 = arith.constant 8 : i32
    %7 = arith.muli %arg1, %c8_i32_1 : i32
    %c8_i32_2 = arith.constant 8 : i32
    %8 = arith.subi %7, %c8_i32_2 : i32
    %9 = vector.broadcast %8 : i32 to vector<24x1xi32>
    %10 = arith.addi %6, %9 : vector<24x1xi32>
    %c0_i32_3 = arith.constant 0 : i32
    %11 = vector.broadcast %c0_i32_3 : i32 to vector<24x1xi32>
    %12 = arith.cmpi sge, %10, %11 : vector<24x1xi32>
    %c8_i32_4 = arith.constant 8 : i32
    %13 = vector.broadcast %c8_i32_4 : i32 to vector<24x1xi32>
    %14 = arith.cmpi slt, %10, %13 : vector<24x1xi32>
    %15 = arith.andi %12, %14 : vector<24x1xi1>
    %16 = arith.extui %15 : vector<24x1xi1> to vector<24x1xi32>
    %17 = arith.sitofp %16 : vector<24x1xi32> to vector<24x1xf32>
    %c0 = arith.constant 0 : index
    %c0_5 = arith.constant 0 : index
    %18 = vector.load %arg4[%c0, %c0_5] : memref<3x128xf32, #tpu.memory_space<vmem>>, vector<3x128xf32>
    %c0_6 = arith.constant 0 : index
    %c0_7 = arith.constant 0 : index
    %19 = vector.load %arg9[%c0_6, %c0_7] : memref<24x384xbf16, #tpu.memory_space<vmem>>, vector<24x384xbf16>
    %c0_8 = arith.constant 0 : index
    %c0_9 = arith.constant 0 : index
    %20 = vector.load %arg3[%c0_8, %c0_9] : memref<384x128xbf16, #tpu.memory_space<vmem>>, vector<384x128xbf16>
    %cst = arith.constant dense<0.000000e+00> : vector<24x128xf32>
    %21 = tpu.matmul %19, %20, %cst {dimension_numbers = #tpu.dot_dimension_numbers<[1], [0], [0], [1], [0, 0, 1, 1], [], []>} : vector<24x384xbf16>, vector<384x128xbf16>, vector<24x128xf32> -> vector<24x128xf32>
    %22 = vector.extract_strided_slice %18 {offsets = [0, 0], sizes = [1, 128], strides = [1, 1]} : vector<3x128xf32> to vector<1x128xf32>
    %23 = vector.broadcast %22 : vector<1x128xf32> to vector<24x128xf32>
    %24 = arith.addf %21, %23 : vector<24x128xf32>
    %cst_10 = arith.constant 0.000000e+00 : f32
    %25 = vector.broadcast %cst_10 : f32 to vector<24x128xf32>
    %26 = arith.maximumf %24, %25 : vector<24x128xf32>
    %27 = vector.broadcast %17 : vector<24x1xf32> to vector<24x128xf32>
    %28 = arith.mulf %26, %27 : vector<24x128xf32>
    %29 = arith.truncf %28 : vector<24x128xf32> to vector<24x128xbf16>
    %30 = vector.extract_strided_slice %29 {offsets = [3, 0], sizes = [16, 128], strides = [1, 1]} : vector<24x128xbf16> to vector<16x128xbf16>
    %c0_11 = arith.constant 0 : index
    %c0_12 = arith.constant 0 : index
    %c0_13 = arith.constant 0 : index
    %31 = vector.load %arg5[%c0_11, %c0_12, %c0_13] : memref<3x128x128xbf16, #tpu.memory_space<vmem>>, vector<1x128x128xbf16>
    %32 = vector.shape_cast %31 : vector<1x128x128xbf16> to vector<128x128xbf16>
    %cst_14 = arith.constant dense<0.000000e+00> : vector<16x128xf32>
    %33 = tpu.matmul %30, %32, %cst_14 {dimension_numbers = #tpu.dot_dimension_numbers<[1], [0], [0], [1], [0, 0, 1, 1], [], []>} : vector<16x128xbf16>, vector<128x128xbf16>, vector<16x128xf32> -> vector<16x128xf32>
    %34 = vector.extract_strided_slice %29 {offsets = [4, 0], sizes = [16, 128], strides = [1, 1]} : vector<24x128xbf16> to vector<16x128xbf16>
    %c1 = arith.constant 1 : index
    %c0_15 = arith.constant 0 : index
    %c0_16 = arith.constant 0 : index
    %35 = vector.load %arg5[%c1, %c0_15, %c0_16] : memref<3x128x128xbf16, #tpu.memory_space<vmem>>, vector<1x128x128xbf16>
    %36 = vector.shape_cast %35 : vector<1x128x128xbf16> to vector<128x128xbf16>
    %cst_17 = arith.constant dense<0.000000e+00> : vector<16x128xf32>
    %37 = tpu.matmul %34, %36, %cst_17 {dimension_numbers = #tpu.dot_dimension_numbers<[1], [0], [0], [1], [0, 0, 1, 1], [], []>} : vector<16x128xbf16>, vector<128x128xbf16>, vector<16x128xf32> -> vector<16x128xf32>
    %38 = arith.addf %33, %37 : vector<16x128xf32>
    %39 = vector.extract_strided_slice %29 {offsets = [5, 0], sizes = [16, 128], strides = [1, 1]} : vector<24x128xbf16> to vector<16x128xbf16>
    %c2 = arith.constant 2 : index
    %c0_18 = arith.constant 0 : index
    %c0_19 = arith.constant 0 : index
    %40 = vector.load %arg5[%c2, %c0_18, %c0_19] : memref<3x128x128xbf16, #tpu.memory_space<vmem>>, vector<1x128x128xbf16>
    %41 = vector.shape_cast %40 : vector<1x128x128xbf16> to vector<128x128xbf16>
    %cst_20 = arith.constant dense<0.000000e+00> : vector<16x128xf32>
    %42 = tpu.matmul %39, %41, %cst_20 {dimension_numbers = #tpu.dot_dimension_numbers<[1], [0], [0], [1], [0, 0, 1, 1], [], []>} : vector<16x128xbf16>, vector<128x128xbf16>, vector<16x128xf32> -> vector<16x128xf32>
    %43 = arith.addf %38, %42 : vector<16x128xf32>
    %44 = vector.extract_strided_slice %18 {offsets = [1, 0], sizes = [1, 128], strides = [1, 1]} : vector<3x128xf32> to vector<1x128xf32>
    %45 = vector.broadcast %44 : vector<1x128xf32> to vector<16x128xf32>
    %46 = arith.addf %43, %45 : vector<16x128xf32>
    %cst_21 = arith.constant 0.000000e+00 : f32
    %47 = vector.broadcast %cst_21 : f32 to vector<16x128xf32>
    %48 = arith.maximumf %46, %47 : vector<16x128xf32>
    %49 = vector.extract_strided_slice %17 {offsets = [4, 0], sizes = [16, 1], strides = [1, 1]} : vector<24x1xf32> to vector<16x1xf32>
    %50 = vector.broadcast %49 : vector<16x1xf32> to vector<16x128xf32>
    %51 = arith.mulf %48, %50 : vector<16x128xf32>
    %52 = arith.truncf %51 : vector<16x128xf32> to vector<16x128xbf16>
    %53 = vector.extract_strided_slice %52 {offsets = [0, 0], sizes = [12, 128], strides = [1, 1]} : vector<16x128xbf16> to vector<12x128xbf16>
    %c0_22 = arith.constant 0 : index
    %c0_23 = arith.constant 0 : index
    %c0_24 = arith.constant 0 : index
    %54 = vector.load %arg6[%c0_22, %c0_23, %c0_24] : memref<3x128x128xbf16, #tpu.memory_space<vmem>>, vector<1x128x128xbf16>
    %55 = vector.shape_cast %54 : vector<1x128x128xbf16> to vector<128x128xbf16>
    %cst_25 = arith.constant dense<0.000000e+00> : vector<12x128xf32>
    %56 = tpu.matmul %53, %55, %cst_25 {dimension_numbers = #tpu.dot_dimension_numbers<[1], [0], [0], [1], [0, 0, 1, 1], [], []>} : vector<12x128xbf16>, vector<128x128xbf16>, vector<12x128xf32> -> vector<12x128xf32>
    %57 = vector.extract_strided_slice %52 {offsets = [2, 0], sizes = [12, 128], strides = [1, 1]} : vector<16x128xbf16> to vector<12x128xbf16>
    %c1_26 = arith.constant 1 : index
    %c0_27 = arith.constant 0 : index
    %c0_28 = arith.constant 0 : index
    %58 = vector.load %arg6[%c1_26, %c0_27, %c0_28] : memref<3x128x128xbf16, #tpu.memory_space<vmem>>, vector<1x128x128xbf16>
    %59 = vector.shape_cast %58 : vector<1x128x128xbf16> to vector<128x128xbf16>
    %cst_29 = arith.constant dense<0.000000e+00> : vector<12x128xf32>
    %60 = tpu.matmul %57, %59, %cst_29 {dimension_numbers = #tpu.dot_dimension_numbers<[1], [0], [0], [1], [0, 0, 1, 1], [], []>} : vector<12x128xbf16>, vector<128x128xbf16>, vector<12x128xf32> -> vector<12x128xf32>
    %61 = arith.addf %56, %60 : vector<12x128xf32>
    %62 = vector.extract_strided_slice %52 {offsets = [4, 0], sizes = [12, 128], strides = [1, 1]} : vector<16x128xbf16> to vector<12x128xbf16>
    %c2_30 = arith.constant 2 : index
    %c0_31 = arith.constant 0 : index
    %c0_32 = arith.constant 0 : index
    %63 = vector.load %arg6[%c2_30, %c0_31, %c0_32] : memref<3x128x128xbf16, #tpu.memory_space<vmem>>, vector<1x128x128xbf16>
    %64 = vector.shape_cast %63 : vector<1x128x128xbf16> to vector<128x128xbf16>
    %cst_33 = arith.constant dense<0.000000e+00> : vector<12x128xf32>
    %65 = tpu.matmul %62, %64, %cst_33 {dimension_numbers = #tpu.dot_dimension_numbers<[1], [0], [0], [1], [0, 0, 1, 1], [], []>} : vector<12x128xbf16>, vector<128x128xbf16>, vector<12x128xf32> -> vector<12x128xf32>
    %66 = arith.addf %61, %65 : vector<12x128xf32>
    %67 = vector.extract_strided_slice %18 {offsets = [2, 0], sizes = [1, 128], strides = [1, 1]} : vector<3x128xf32> to vector<1x128xf32>
    %68 = vector.broadcast %67 : vector<1x128xf32> to vector<12x128xf32>
    %69 = arith.addf %66, %68 : vector<12x128xf32>
    %cst_34 = arith.constant 0.000000e+00 : f32
    %70 = vector.broadcast %cst_34 : f32 to vector<12x128xf32>
    %71 = arith.maximumf %69, %70 : vector<12x128xf32>
    %72 = vector.extract_strided_slice %17 {offsets = [6, 0], sizes = [12, 1], strides = [1, 1]} : vector<24x1xf32> to vector<12x1xf32>
    %73 = vector.broadcast %72 : vector<12x1xf32> to vector<12x128xf32>
    %74 = arith.mulf %71, %73 : vector<12x128xf32>
    %75 = arith.truncf %74 : vector<12x128xf32> to vector<12x128xbf16>
    %76 = vector.extract_strided_slice %75 {offsets = [0, 0], sizes = [8, 128], strides = [1, 1]} : vector<12x128xbf16> to vector<8x128xbf16>
    %c0_35 = arith.constant 0 : index
    %c0_36 = arith.constant 0 : index
    %c0_37 = arith.constant 0 : index
    %77 = vector.load %arg7[%c0_35, %c0_36, %c0_37] : memref<3x128x128xbf16, #tpu.memory_space<vmem>>, vector<1x128x128xbf16>
    %78 = vector.shape_cast %77 : vector<1x128x128xbf16> to vector<128x128xbf16>
    %cst_38 = arith.constant dense<0.000000e+00> : vector<8x128xf32>
    %79 = tpu.matmul %76, %78, %cst_38 {dimension_numbers = #tpu.dot_dimension_numbers<[1], [0], [0], [1], [0, 0, 1, 1], [], []>} : vector<8x128xbf16>, vector<128x128xbf16>, vector<8x128xf32> -> vector<8x128xf32>
    %80 = vector.extract_strided_slice %75 {offsets = [2, 0], sizes = [8, 128], strides = [1, 1]} : vector<12x128xbf16> to vector<8x128xbf16>
    %c1_39 = arith.constant 1 : index
    %c0_40 = arith.constant 0 : index
    %c0_41 = arith.constant 0 : index
    %81 = vector.load %arg7[%c1_39, %c0_40, %c0_41] : memref<3x128x128xbf16, #tpu.memory_space<vmem>>, vector<1x128x128xbf16>
    %82 = vector.shape_cast %81 : vector<1x128x128xbf16> to vector<128x128xbf16>
    %cst_42 = arith.constant dense<0.000000e+00> : vector<8x128xf32>
    %83 = tpu.matmul %80, %82, %cst_42 {dimension_numbers = #tpu.dot_dimension_numbers<[1], [0], [0], [1], [0, 0, 1, 1], [], []>} : vector<8x128xbf16>, vector<128x128xbf16>, vector<8x128xf32> -> vector<8x128xf32>
    %84 = arith.addf %79, %83 : vector<8x128xf32>
    %85 = vector.extract_strided_slice %75 {offsets = [4, 0], sizes = [8, 128], strides = [1, 1]} : vector<12x128xbf16> to vector<8x128xbf16>
    %c2_43 = arith.constant 2 : index
    %c0_44 = arith.constant 0 : index
    %c0_45 = arith.constant 0 : index
    %86 = vector.load %arg7[%c2_43, %c0_44, %c0_45] : memref<3x128x128xbf16, #tpu.memory_space<vmem>>, vector<1x128x128xbf16>
    %87 = vector.shape_cast %86 : vector<1x128x128xbf16> to vector<128x128xbf16>
    %cst_46 = arith.constant dense<0.000000e+00> : vector<8x128xf32>
    %88 = tpu.matmul %85, %87, %cst_46 {dimension_numbers = #tpu.dot_dimension_numbers<[1], [0], [0], [1], [0, 0, 1, 1], [], []>} : vector<8x128xbf16>, vector<128x128xbf16>, vector<8x128xf32> -> vector<8x128xf32>
    %89 = arith.addf %84, %88 : vector<8x128xf32>
    %c0_47 = arith.constant 0 : index
    %c0_48 = arith.constant 0 : index
    %c0_49 = arith.constant 0 : index
    %90 = vector.load %arg8[%c0_47, %c0_48, %c0_49] : memref<1x8x128xf32, #tpu.memory_space<vmem>>, vector<1x8x128xf32>
    %91 = vector.shape_cast %90 : vector<1x8x128xf32> to vector<8x128xf32>
    %92 = vector.shape_cast %89 : vector<8x128xf32> to vector<1x8x128xf32>
    tpu.vector_store %arg8[%c0_47, %c0_48, %c0_49], %92 {strides = array<i32>} : memref<1x8x128xf32, #tpu.memory_space<vmem>>, vector<1x8x128xf32>,
    return
  }
  func.func @transform_1(%arg0: i32, %arg1: i32) -> (i32, i32) {
    %c0_i32 = arith.constant 0 : i32
    %c0_i32_0 = arith.constant 0 : i32
    %c0_i32_1 = arith.constant 0 : i32
    return %c0_i32, %c0_i32_0 : i32, i32
  }
  func.func @transform_2(%arg0: i32, %arg1: i32) -> (i32, i32) {
    %c0_i32 = arith.constant 0 : i32
    %c0_i32_0 = arith.constant 0 : i32
    %c0_i32_1 = arith.constant 0 : i32
    return %c0_i32, %c0_i32_0 : i32, i32
  }
  func.func @transform_3(%arg0: i32, %arg1: i32) -> (i32, i32, i32) {
    %c0_i32 = arith.constant 0 : i32
    %c0_i32_0 = arith.constant 0 : i32
    %c0_i32_1 = arith.constant 0 : i32
    %c0_i32_2 = arith.constant 0 : i32
    return %c0_i32, %c0_i32_0, %c0_i32_1 : i32, i32, i32
  }
  func.func @transform_4(%arg0: i32, %arg1: i32) -> (i32, i32, i32) {
    %c0_i32 = arith.constant 0 : i32
    %c0_i32_0 = arith.constant 0 : i32
    %c0_i32_1 = arith.constant 0 : i32
    %c0_i32_2 = arith.constant 0 : i32
    return %c0_i32, %c0_i32_0, %c0_i32_1 : i32, i32, i32
  }
  func.func @transform_5(%arg0: i32, %arg1: i32) -> (i32, i32, i32) {
    %c0_i32 = arith.constant 0 : i32
    %c0_i32_0 = arith.constant 0 : i32
    %c0_i32_1 = arith.constant 0 : i32
    %c0_i32_2 = arith.constant 0 : i32
    return %c0_i32, %c0_i32_0, %c0_i32_1 : i32, i32, i32
  }
  func.func @transform_6(%arg0: i32, %arg1: i32) -> (i32, i32, i32) {
    %c0_i32 = arith.constant 0 : i32
    %c0_i32_0 = arith.constant 0 : i32
    return %arg0, %arg1, %c0_i32 : i32, i32, i32
  }
}

</mosaic_0001>

<bundles_post_ra>
// kernel: tile.14
= control target key start
LH: loop header
LB: loop body
LE: loop exit
PB: predicated region body
PF: predicated region fallthrough
CT: control target
= control target key end

     0   :  { %s28_s0 = inlined_call_operand.vmem [shape: f32[32], index: 0, kind: input, shape index: {}]   ;;  %s29_s1 = inlined_call_operand.vmem [shape: f32[12,32], index: 1, kind: output, shape index: {}]  }
   0x1   :  { %v4_v0 = vld [vmem:[%s28_s0] ss:$0 sm:$0xff] }
   0x2   :  { %5 = vst [vmem:[%s29_s1] sm:$0xff] %v4_v0  ;;  %8 = vst [vmem:[%s29_s1 + $0x8] sm:$0xff] %v4_v0 }

// kernel: mul.46
= control target key start
LH: loop header
LB: loop body
LE: loop exit
PB: predicated region body
PF: predicated region fallthrough
CT: control target
= control target key end

     0   :  { %s35_s8 = smov 96   ;;  %vm3_vm0 = vcmask 261120   ;;  %s37_s15 = smov 64   ;;  %vm9_vm1 = vcmask 1048320   ;;  %vm15_vm2 = vcmask 785920   ;;  %vm21_vm3 = vcmask 523520   ;;  %s63_s0 = inlined_call_operand.vmem [shape: f32[12,32], index: 0, kind: input, shape index: {}]   ;;  %s64_s1 = inlined_call_operand.vmem [shape: f32[384], index: 1, kind: output, shape index: {}]  }
   0x1   :  { %v29_v0 = vld [vmem:[%s63_s0 + $0x3] ss:$4 sm:$0x7]   ;;  %v30_v1 = vld [vmem:[%s63_s0 + $0x2] ss:$4 sm:$0x7]  }
   0x2   :  { %7 = vrot.lane.b32.xlu0 %v29_v0, %s35_s8  ;;  %v31_v2 = vld [vmem:[%s63_s0 + $0x1] ss:$4 sm:$0x7]   ;;  %v2_v3 = vld [vmem:[%s63_s0] ss:$4 sm:$0x7]  }
   0x3   :  { %s36_s0 = smov 32   ;;  %4 = vst.msk [vmem:[#allocation0] sm:$0x7] %vm3_vm0, %v2_v3  }
   0x4   :  { %19 = vrot.lane.b32.xlu1 %v31_v2, %s36_s0 }
   0x6   :  { %13 = vrot.lane.b32.xlu0 %v30_v1, %s37_s15 }
  0x74   :  { %v8_v4 = vpop.permute.xlu0 %7  }
  0x75   :  { %10 = vst.msk [vmem:[#allocation0] sm:$0x7] %vm9_vm1, %v8_v4  }
  0x76   :  { %v20_v5 = vpop.permute.xlu1 %19  }
  0x78   :  { %v14_v6 = vpop.permute.xlu0 %13  }
  0x79   :  { %16 = vst.msk [vmem:[#allocation0] sm:$0x7] %vm15_vm2, %v14_v6  }
  0x7a   :  { %22 = vst.msk [vmem:[#allocation0] sm:$0x7] %vm21_vm3, %v20_v5  }
  0x81   :  { %v26_v7 = vld [vmem:[#allocation0] sm:$0xf] }
  0x82   :  { %28 = vst [vmem:[%s64_s1] sm:$0xf] %v26_v7 }

// kernel: tile.22
= control target key start
LH: loop header
LB: loop body
LE: loop exit
PB: predicated region body
PF: predicated region fallthrough
CT: control target
= control target key end

     0   :  { %s49_s8 = smov 96   ;;  %vm3_vm0 = vcmask 261120   ;;  %s51_s15 = smov 64   ;;  %vm9_vm1 = vcmask 1048320   ;;  %vm15_vm2 = vcmask 785920   ;;  %vm21_vm3 = vcmask 523520   ;;  %s83_s0 = inlined_call_operand.vmem [shape: f32[12,32], index: 0, kind: input, shape index: {}]   ;;  %s84_s1 = inlined_call_operand.vmem [shape: f32[1,384], index: 1, kind: output, shape index: {}]  }
   0x1   :  { %v41_v0 = vld [vmem:[%s83_s0 + $0x3] ss:$4 sm:$0x7]   ;;  %v42_v1 = vld [vmem:[%s83_s0 + $0x2] ss:$4 sm:$0x7]  }
   0x2   :  { %7 = vrot.lane.b32.xlu0 %v41_v0, %s49_s8  ;;  %v43_v2 = vld [vmem:[%s83_s0 + $0x1] ss:$4 sm:$0x7]   ;;  %v2_v3 = vld [vmem:[%s83_s0] ss:$4 sm:$0x7]  }
   0x3   :  { %s50_s0 = smov 32   ;;  %4 = vst.msk [vmem:[#allocation0] ss:$8 sm:$0x7] %vm3_vm0, %v2_v3  }
   0x4   :  { %19 = vrot.lane.b32.xlu1 %v43_v2, %s50_s0 }
   0x6   :  { %13 = vrot.lane.b32.xlu0 %v42_v1, %s51_s15 }
  0x74   :  { %v8_v4 = vpop.permute.xlu0 %7  }
  0x75   :  { %10 = vst.msk [vmem:[#allocation0] ss:$8 sm:$0x7] %vm9_vm1, %v8_v4  }
  0x76   :  { %v20_v5 = vpop.permute.xlu1 %19  }
  0x78   :  { %v14_v6 = vpop.permute.xlu0 %13  }
  0x79   :  { %16 = vst.msk [vmem:[#allocation0] ss:$8 sm:$0x7] %vm15_vm2, %v14_v6  }
  0x7a   :  { %22 = vst.msk [vmem:[#allocation0] ss:$8 sm:$0x7] %vm21_vm3, %v20_v5  }
  0x81   :  { %v26_v7 = vld [vmem:[#allocation0] sm:$0x1]  ;;  %v30_v8 = vld [vmem:[#allocation0 + $0x8] sm:$0x1]  ;;  %v35_v9 = vld [vmem:[#allocation0 + $0x10] sm:$0x1] }
  0x82   :  { %28 = vst [vmem:[%s84_s1] sm:$0x1] %v26_v7  ;;  %44 = vst [vmem:[%s84_s1 + $0x1] sm:$0x1] %v30_v8 }
  0x83   :  { %45 = vst [vmem:[%s84_s1 + $0x2] sm:$0x1] %v35_v9 }

// kernel: auwgcn_forward.2
= control target key start
LH: loop header
LB: loop body
LE: loop exit
PB: predicated region body
PF: predicated region fallthrough
CT: control target
= control target key end

     0   :  { %s15973_s13 = smov 0   ;;  %s22643_s0 = inlined_call_operand.vmem [shape: bf16[16,24], index: 0, kind: input, shape index: {}]   ;;  %s22644_s1 = inlined_call_operand.vmem [shape: bf16[24,384], index: 1, kind: input, shape index: {}]   ;;  %s22645_s2 = inlined_call_operand.vmem [shape: f32[2,384], index: 2, kind: input, shape index: {}]   ;;  %s22646_s3 = inlined_call_operand.vmem [shape: bf16[384,384], index: 3, kind: input, shape index: {}]   ;;  %s22647_s4 = inlined_call_operand.vmem [shape: bf16[384,96], index: 4, kind: input, shape index: {}]   ;;  %s22648_s5 = inlined_call_operand.vmem [shape: bf16[384,1536], index: 5, kind: input, shape index: {}]   ;;  %s22649_s6 = inlined_call_operand.vmem [shape: bf16[96,576], index: 6, kind: input, shape index: {}]   ;;  %s22650_s7 = inlined_call_operand.vmem [shape: bf16[576,48], index: 7, kind: input, shape index: {}]   ;;  %s22651_s8 = inlined_call_operand.vmem [shape: bf16[48,1536], index: 8, kind: input, shape index: {}]   ;;  %s22652_s9 = inlined_call_operand.vmem [shape: bf16[1536,32], index: 9, kind: input, shape index: {}]   ;;  %s22653_s10 = inlined_call_operand.vmem [shape: bf16[16,384], index: 10, kind: output, shape index: {}]  }
   0x1 LB: > { %s12035_s14 = sadd.s32 4294967295, %s15906_s13   ;;  %p12039_p0 = scmp.ge.s32.totalorder %s15906_s13, 1  ;;  %s15906_s13 = sphi %s15973_s13, %s20_s13  }
   0x2   : > { %p311_p1 = scmp.lt.s32.totalorder %s15906_s13, 3 }
   0x4   : > { %p312_p2 = pnand %p12039_p0, %p311_p1 }
   0x6   : > { %315 = sbr.rel (%p312_p2) target bundleno = 5500 (0x157c), region = 60 }
   0xd   : > { %v14593_v0 = vld [vmem:[%s22644_s1 + $0x4] ss:$12 sps:$4 sm:$0xff]   ;;  %v14595_v1 = vld [vmem:[%s22644_s1] ss:$12 sps:$4 sm:$0xff]   ;;  %v364_v2 = vld [vmem:[%s22644_s1 + $0x18] sm:$0xff]  ;;  %vm422_vm0 = vcmask 1043456   ;;  %v367_v61 = vlaneseq }
   0xe   : > { %v22654_v3 = vmov 0   ;;  %p348_p3 = scmp.lt.s32.totalorder %s12035_s14, 1  ;;  %432 = vmatprep.subr.bf16.mxu0 %v14593_v0  ;;  %v12046_v4 = vcombine.high %v364_v2, %v364_v2  ;;  %v12045_v5 = vcombine.low %v364_v2, %v364_v2  ;;  %v15909_v6 = vmov 0.0   ;;  %v14598_v7 = vld [vmem:[%s22644_s1 + $0x8] ss:$12 sps:$4 sm:$0xff]   ;;  %s15911_s11 = smov 32  }
   0xf   : > { %464 = vmatprep.mubr.bf16.mxu0 %v22654_v3  ;;  %14448 = vmatprep.subr.bf16.mxu1 %v15909_v6  ;;  %v14599_v8 = vld [vmem:[%s22644_s1 + $0x20] ss:$0 sps:$4 sm:$0xff]   ;;  %vm15910_vm1 = vmmov 0   ;;  %v14602_v11 = vld [vmem:[%s22646_s3 + $0x4] ss:$12 sps:$4 sm:$0xff]   ;;  %vm418_vm2 = vcmask 195584  }
  0x10   : > { %433 = vmatpush1.bf16.msra.mxu0 %v14595_v1  ;;  %s24460_s14 = smov (!%p348_p3, %s12035_s14), 1  ;;  %v424_v9 = vsel %vm422_vm0, %v12045_v5, 0  ;;  %14449 = vmatpush3.bf16.msra.mxu1 %v14598_v7  ;;  %v430_v10 = vsel %vm422_vm0, %v14599_v8, 0  ;;  %v14600_v12 = vld [vmem:[%s22646_s3] ss:$12 sps:$4 sm:$0xff]   ;;  %v16158_v62 = vshrl.u32 %v367_v61, 7 }
  0x11   : > { %12048 = vmatprep.subr.msk.bf16.mxu0 %vm422_vm0, %v12046_v4  ;;  %s12040_s25 = sshll.u32 %s24460_s14, 2  ;;  %14450 = vmatprep.subr.bf16.mxu1 %v15909_v6  ;;  %v14605_v14 = vld [vmem:[%s22646_s3 + $0x1c] ss:$12 sps:$4 sm:$0xff]   ;;  %v14603_v15 = vld [vmem:[%s22646_s3 + $0x18] ss:$12 sps:$4 sm:$0xff]   ;;  %vm1797_vm3 = vcmask 785792  }
  0x12   : > { %14452 = vmatprep.mubr.msk.bf16.mxu1 %vm15910_vm1, %v15909_v6  ;;  %s351_s30 = scalar_lea.vmem %s22643_s0, %s12040_s25  ;;  %v14608_v16 = vld [vmem:[%s22646_s3 + $0x34] ss:$12 sps:$4 sm:$0xff]   ;;  %v14606_v17 = vld [vmem:[%s22646_s3 + $0x30] ss:$12 sps:$4 sm:$0xff]   ;;  %v14611_v18 = vld [vmem:[%s22646_s3 + $0x4c] ss:$12 sps:$4 sm:$0xff]  }
  0x13   : > { %v359_v13 = vld [vmem:[%s351_s30] sm:$0xf]  ;;  %v14627_v19 = vld [vmem:[%s22646_s3 + $0xc8] ss:$12 sps:$4 sm:$0xff]   ;;  %v14614_v22 = vld [vmem:[%s22646_s3 + $0x64] ss:$12 sps:$4 sm:$0xff]  }
  0x14   : > { %435 = vmatpush1.bf16.msra.mxu0 %v424_v9  ;;  %14451 = vmatpush3.bf16.msra.mxu1 %v430_v10  ;;  %v14628_v20 = vld [vmem:[%s22646_s3 + $0x8] ss:$12 sps:$4 sm:$0xff]   ;;  %v14632_v23 = vld [vmem:[%s22646_s3 + $0xe0] ss:$12 sps:$4 sm:$0xff]   ;;  %v14637_v27 = vld [vmem:[%s22646_s3 + $0xf8] ss:$12 sps:$4 sm:$0xff]  }
  0x15   : > { %1026 = vmatprep.subr.bf16.mxu0 %v14602_v11  ;;  %v14609_v21 = vld [vmem:[%s22646_s3 + $0x48] ss:$12 sps:$4 sm:$0xff]   ;;  %12738 = vmatprep.subr.bf16.mxu1 %v14627_v19  ;;  %v14633_v24 = vld [vmem:[%s22646_s3 + $0x20] ss:$12 sps:$4 sm:$0xff]   ;;  %v14638_v28 = vld [vmem:[%s22646_s3 + $0x38] ss:$12 sps:$4 sm:$0xff]  }
  0x16   : > { %v14612_v25 = vld [vmem:[%s22646_s3 + $0x60] ss:$12 sps:$4 sm:$0xff]   ;;  %v14617_v26 = vld [vmem:[%s22646_s3 + $0x7c] ss:$12 sps:$4 sm:$0xff]   ;;  %v14615_v29 = vld [vmem:[%s22646_s3 + $0x78] ss:$12 sps:$4 sm:$0xff]  }
  0x17   : > { %12049 = vmatmul.mubr.msk.bf16.vlgmr.msra.gmra.mrb[0].mxu0 %vm418_vm2, %v359_v13  ;;  %14453 = vmatmul.mubr.msk.bf16.vlgmr.msra.gmra.mrb[0].mxu1 %vm418_vm2, %v359_v13  ;;  %v14620_v30 = vld [vmem:[%s22646_s3 + $0x94] ss:$12 sps:$4 sm:$0xff]   ;;  %v14642_v31 = vld [vmem:[%s22646_s3 + $0x110] ss:$12 sps:$4 sm:$0xff]   ;;  %v14623_v35 = vld [vmem:[%s22646_s3 + $0xac] ss:$12 sps:$4 sm:$0xff]  }
  0x18   : > { %1027 = vmatpush1.bf16.msra.mxu0 %v14600_v12  ;;  %12739 = vmatpush3.bf16.msra.mxu1 %v14628_v20  ;;  %v14643_v32 = vld [vmem:[%s22646_s3 + $0x50] ss:$12 sps:$4 sm:$0xff]   ;;  %v14647_v34 = vld [vmem:[%s22646_s3 + $0x128] ss:$12 sps:$4 sm:$0xff]   ;;  %v14652_v38 = vld [vmem:[%s22646_s3 + $0x140] ss:$12 sps:$4 sm:$0xff]  }
  0x19   : > { %1028 = vmatprep.subr.bf16.mxu0 %v14605_v14  ;;  %12740 = vmatprep.subr.bf16.mxu1 %v14632_v23  ;;  %v14618_v33 = vld [vmem:[%s22646_s3 + $0x90] ss:$12 sps:$4 sm:$0xff]   ;;  %v14648_v36 = vld [vmem:[%s22646_s3 + $0x68] ss:$12 sps:$4 sm:$0xff]   ;;  %v14653_v40 = vld [vmem:[%s22646_s3 + $0x80] ss:$12 sps:$4 sm:$0xff]  }
  0x1a   : > { %v14621_v37 = vld [vmem:[%s22646_s3 + $0xa8] ss:$12 sps:$4 sm:$0xff]   ;;  %v14626_v39 = vld [vmem:[%s22646_s3 + $0xc4] ss:$12 sps:$4 sm:$0xff]   ;;  %v14624_v41 = vld [vmem:[%s22646_s3 + $0xc0] ss:$12 sps:$4 sm:$0xff]  }
  0x1b   : > { %v14631_v42 = vld [vmem:[%s22646_s3 + $0xdc] ss:$12 sps:$4 sm:$0xff]   ;;  %v14629_v43 = vld [vmem:[%s22646_s3 + $0xd8] ss:$12 sps:$4 sm:$0xff]   ;;  %v14636_v44 = vld [vmem:[%s22646_s3 + $0xf4] ss:$12 sps:$4 sm:$0xff]  }
  0x1c   : > { %1029 = vmatpush1.bf16.msra.mxu0 %v14603_v15  ;;  %12741 = vmatpush3.bf16.msra.mxu1 %v14633_v24  ;;  %v14634_v45 = vld [vmem:[%s22646_s3 + $0xf0] ss:$12 sps:$4 sm:$0xff]   ;;  %v14641_v46 = vld [vmem:[%s22646_s3 + $0x10c] ss:$12 sps:$4 sm:$0xff]   ;;  %v14639_v47 = vld [vmem:[%s22646_s3 + $0x108] ss:$12 sps:$4 sm:$0xff]  }
  0x1d   : > { %1030 = vmatprep.subr.bf16.mxu0 %v14608_v16  ;;  %12742 = vmatprep.subr.bf16.mxu1 %v14637_v27  ;;  %v14646_v48 = vld [vmem:[%s22646_s3 + $0x124] ss:$12 sps:$4 sm:$0xff]   ;;  %v14644_v49 = vld [vmem:[%s22646_s3 + $0x120] ss:$12 sps:$4 sm:$0xff]   ;;  %v14651_v50 = vld [vmem:[%s22646_s3 + $0x13c] ss:$12 sps:$4 sm:$0xff]  }
  0x1e   : > { %v14649_v51 = vld [vmem:[%s22646_s3 + $0x138] ss:$12 sps:$4 sm:$0xff]   ;;  %v14656_v52 = vld [vmem:[%s22646_s3 + $0x154] ss:$12 sps:$4 sm:$0xff]   ;;  %v14654_v54 = vld [vmem:[%s22646_s3 + $0x150] ss:$12 sps:$4 sm:$0xff]  }
  0x1f   : > { %v14657_v53 = vld [vmem:[%s22646_s3 + $0x158] ss:$12 sps:$4 sm:$0xff]   ;;  %v14662_v57 = vld [vmem:[%s22646_s3 + $0x170] ss:$12 sps:$4 sm:$0xff]   ;;  %v14659_v58 = vld [vmem:[%s22646_s3 + $0x168] ss:$12 sps:$4 sm:$0xff]  }
  0x20   : > { %1031 = vmatpush1.bf16.msra.mxu0 %v14606_v17  ;;  %12743 = vmatpush3.bf16.msra.mxu1 %v14638_v28  ;;  %v14658_v55 = vld [vmem:[%s22646_s3 + $0x98] ss:$12 sps:$4 sm:$0xff]   ;;  %v14663_v59 = vld [vmem:[%s22646_s3 + $0xb0] ss:$12 sps:$4 sm:$0xff]   ;;  %v369_v0 = vsub.s32 0, %v16158_v62  ;;  %v373_v1 = vsub.s32 2, %v16158_v62 }
  0x21   : > { %1032 = vmatprep.subr.bf16.mxu0 %v14611_v18  ;;  %12744 = vmatprep.subr.bf16.mxu1 %v14642_v31  ;;  %v14661_v56 = vld [vmem:[%s22646_s3 + $0x16c] ss:$12 sps:$4 sm:$0xff]   ;;  %v14666_v60 = vld [vmem:[%s22646_s3 + $0x184] ss:$12 sps:$4 sm:$0xff]   ;;  %v377_v2 = vsub.s32 4, %v16158_v62  ;;  %vm1656_vm4 = vcmask 785408  }
  0x22   : > { %v16163_v63 = vld [vmem:[%s22645_s2] sm:$0x3f]  ;;  %v14667_v24 = vld [vmem:[%s22646_s3 + $0x188] ss:$12 sps:$4 sm:$0xff]   ;;  %v14705_v61 = vld [vmem:[%s22647_s4 + $0x98] sm:$0xff]   ;;  %vm1806_vm6 = vcmask 392192  }
  0x23   : > { %v370_v4 = vrot.slane %v16163_v63, %v369_v0  ;;  %v374_v5 = vrot.slane %v16163_v63, %v373_v1  ;;  %v378_v7 = vrot.slane %v16163_v63, %v377_v2  ;;  %v14664_v23 = vld [vmem:[%s22646_s3 + $0x180] ss:$12 sps:$4 sm:$0xff]   ;;  %v14670_v27 = vld [vmem:[%s22646_s3 + $0x19c] ss:$12 sps:$4 sm:$0xff]   ;;  %vm2240_vm12 = vcmask 523264   ;;  %s15912_s12 = smov 80  }
  0x24   : > { %1033 = vmatpush1.bf16.msra.mxu0 %v14609_v21  ;;  %12745 = vmatpush3.bf16.msra.mxu1 %v14643_v32  ;;  %v14671_v31 = vld [vmem:[%s22646_s3 + $0x1a0] ss:$12 sps:$4 sm:$0xff]   ;;  %s15913_s23 = smov 48   ;;  %s15914_s16 = smov 112   ;;  %vm8322_vm13 = vcmask 130048   ;;  %vm6752_vm14 = vcmask 261120  }
  0x25   : > { %1034 = vmatprep.subr.bf16.mxu0 %v14614_v22  ;;  %12746 = vmatprep.subr.bf16.mxu1 %v14647_v34  ;;  %v385_v8 = vrot.slane %v370_v4, %v369_v0  ;;  %v389_v9 = vrot.slane %v374_v5, %v369_v0  ;;  %v393_v10 = vrot.slane %v378_v7, %v369_v0  ;;  %v14674_v32 = vld [vmem:[%s22646_s3 + $0x1b4] ss:$12 sps:$4 sm:$0xff]   ;;  %v14675_v34 = vld [vmem:[%s22646_s3 + $0x1b8] ss:$12 sps:$4 sm:$0xff]   ;;  %v14712_v5 = vld [vmem:[%s22647_s4 + $0x68] sm:$0xff]   ;;  %s15915_s25 = smov 64  }
  0x26   : > { %v14707_v0 = vld [vmem:[%s22647_s4 + $0x18] sm:$0xff]   ;;  %v14709_v1 = vld [vmem:[%s22647_s4 + $0x60] sm:$0xff]   ;;  %v14711_v7 = vld [vmem:[%s22647_s4 + $0xa8] sm:$0xff]   ;;  %s14574_s22 = smul.u32 12, %s24460_s14  ;;  %vm6220_vm15 = vcmask 257024   ;;  %vm6745_vm0 = vcmask 519424  }
  0x27   : > { %v14708_v2 = vld [vmem:[%s22647_s4 + $0xa0] sm:$0xff]   ;;  %vm7798_vm2 = vcmask 1044224  }
  0x28   : > { %1035 = vmatpush1.bf16.msra.mxu0 %v14612_v25  ;;  %12747 = vmatpush3.bf16.msra.mxu1 %v14648_v36  ;;  %v14676_v36 = vld [vmem:[%s22646_s3 + $0x1c8] ss:$12 sps:$4 sm:$0xff]   ;;  %v14710_v4 = vld [vmem:[%s22647_s4 + $0x20] sm:$0xff]   ;;  %s18578_s24 = scalar_lea.vmem %s22653_s10, %s14574_s22 }
  0x29   : > { %1036 = vmatprep.subr.bf16.mxu0 %v14617_v26  ;;  %12748 = vmatprep.subr.bf16.mxu1 %v14652_v38  ;;  %v14682_v38 = vld [vmem:[%s22646_s3 + $0x1e4] ss:$12 sps:$4 sm:$0xff]  }
  0x2c   : > { %1037 = vmatpush1.bf16.msra.mxu0 %v14615_v29  ;;  %12749 = vmatpush3.bf16.msra.mxu1 %v14653_v40  ;;  %v14683_v40 = vld [vmem:[%s22646_s3 + $0x1e8] ss:$12 sps:$4 sm:$0xff]  }
  0x2d   : > { %1038 = vmatprep.subr.bf16.mxu0 %v14620_v30  ;;  %12750 = vmatprep.subr.bf16.mxu1 %v14657_v53  ;;  %v14668_v30 = vld [vmem:[%s22646_s3 + $0x198] ss:$12 sps:$4 sm:$0xff]  }
  0x2e   : > { %v14698_v53 = vld [vmem:[%s22647_s4] sm:$0xff]  }
  0x30   : > { %1039 = vmatpush1.bf16.msra.mxu0 %v14618_v33  ;;  %12751 = vmatpush3.bf16.msra.mxu1 %v14658_v55  ;;  %v14672_v33 = vld [vmem:[%s22646_s3 + $0x1b0] ss:$12 sps:$4 sm:$0xff]   ;;  %v14699_v55 = vld [vmem:[%s22647_s4 + $0x88] sm:$0xff]  }
  0x31   : > { %1040 = vmatprep.subr.bf16.mxu0 %v14623_v35  ;;  %12752 = vmatprep.subr.bf16.mxu1 %v14662_v57  ;;  %v14678_v35 = vld [vmem:[%s22646_s3 + $0x1cc] ss:$12 sps:$4 sm:$0xff]   ;;  %v14703_v57 = vld [vmem:[%s22647_s4 + $0x50] sm:$0xff]  }
  0x34   : > { %1041 = vmatpush1.bf16.msra.mxu0 %v14621_v37  ;;  %12753 = vmatpush3.bf16.msra.mxu1 %v14663_v59  ;;  %v14679_v37 = vld [vmem:[%s22646_s3 + $0x1d0] ss:$12 sps:$4 sm:$0xff]  }
  0x35   : > { %1042 = vmatprep.subr.bf16.mxu0 %v14626_v39  ;;  %14456 = vmatprep.subr.bf16.mxu1 %v15909_v6  ;;  %v14680_v39 = vld [vmem:[%s22646_s3 + $0x1e0] ss:$12 sps:$4 sm:$0xff]   ;;  %v14704_v59 = vld [vmem:[%s22647_s4 + $0x10] sm:$0xff]  }
  0x38   : > { %1043 = vmatpush1.bf16.msra.mxu0 %v14624_v41  ;;  %v14686_v41 = vld [vmem:[%s22646_s3 + $0x1fc] ss:$12 sps:$4 sm:$0xff]  }
  0x39   : > { %1044 = vmatprep.subr.bf16.mxu0 %v14631_v42  ;;  %v14684_v42 = vld [vmem:[%s22646_s3 + $0x1f8] ss:$12 sps:$4 sm:$0xff]  }
  0x3c   : > { %1045 = vmatpush1.bf16.msra.mxu0 %v14629_v43  ;;  %v14687_v43 = vld [vmem:[%s22646_s3 + $0x200] ss:$12 sps:$4 sm:$0xff]  }
  0x3d   : > { %1046 = vmatprep.subr.bf16.mxu0 %v14636_v44  ;;  %v14690_v44 = vld [vmem:[%s22646_s3 + $0x214] ss:$12 sps:$4 sm:$0xff]  }
  0x40   : > { %1047 = vmatpush1.bf16.msra.mxu0 %v14634_v45  ;;  %v14688_v45 = vld [vmem:[%s22646_s3 + $0x210] ss:$12 sps:$4 sm:$0xff]  }
  0x41   : > { %1048 = vmatprep.subr.bf16.mxu0 %v14641_v46  ;;  %v14691_v46 = vld [vmem:[%s22646_s3 + $0x218] ss:$12 sps:$4 sm:$0xff]  }
  0x44   : > { %1049 = vmatpush1.bf16.msra.mxu0 %v14639_v47  ;;  %v14694_v47 = vld [vmem:[%s22646_s3 + $0x22c] ss:$12 sps:$4 sm:$0xff]  }
  0x45   : > { %1050 = vmatprep.subr.bf16.mxu0 %v14646_v48  ;;  %v14692_v48 = vld [vmem:[%s22646_s3 + $0x228] ss:$12 sps:$4 sm:$0xff]  }
  0x48   : > { %1051 = vmatpush1.bf16.msra.mxu0 %v14644_v49  ;;  %v14695_v49 = vld [vmem:[%s22646_s3 + $0x230] ss:$12 sps:$4 sm:$0xff]  }
  0x49   : > { %1052 = vmatprep.subr.bf16.mxu0 %v14651_v50 }
  0x4c   : > { %1053 = vmatpush1.bf16.msra.mxu0 %v14649_v51  ;;  %v14696_v51 = vld [vmem:[%s22647_s4 + $0x80] sm:$0xff]  }
  0x4d   : > { %1054 = vmatprep.subr.bf16.mxu0 %v14656_v52  ;;  %v14697_v52 = vld [vmem:[%s22647_s4 + $0x40] sm:$0xff]  }
  0x50   : > { %1055 = vmatpush1.bf16.msra.mxu0 %v14654_v54  ;;  %v14700_v54 = vld [vmem:[%s22647_s4 + $0x48] sm:$0xff]  }
  0x51   : > { %1056 = vmatprep.subr.bf16.mxu0 %v14661_v56  ;;  %v14701_v56 = vld [vmem:[%s22647_s4 + $0x8] sm:$0xff]  }
  0x54   : > { %1057 = vmatpush1.bf16.msra.mxu0 %v14659_v58  ;;  %v14702_v58 = vld [vmem:[%s22647_s4 + $0x90] sm:$0xff]  }
  0x55   : > { %1067 = vmatprep.subr.bf16.mxu0 %v14666_v60  ;;  %v14706_v60 = vld [vmem:[%s22647_s4 + $0x58] sm:$0xff]  }
  0xea   : > { %v466_v11 = vpop.f32.mrb[0].mxu0  ;;  %v507_v14 = vpop.f32.mrb[0].mxu1 }
  0xeb   : > { %v467_v12 = vadd.f32 %v466_v11, %v385_v8  ;;  %v468_v13 = vpop.f32.mrb[1].mxu0  ;;  %v16171_v17 = vadd.f32 %v507_v14, %v393_v10  ;;  %v14454_v18 = vpop.f32.mrb[1].mxu1  ;;  %v14713_v8 = vld [vmem:[%s22647_s4 + $0x28] sm:$0xff]   ;;  %v14714_v10 = vld [vmem:[%s22647_s4 + $0xb0] sm:$0xff]   ;;  %v14719_v14 = vld [vmem:[%s22647_s4 + $0x38] sm:$0xff]  }
  0xec   : > { %v469_v15 = vadd.f32 %v468_v13, %v389_v9  ;;  %v470_v16 = vpop.f32.mrb[2].mxu0  ;;  %v510_v21 = vpop.f32.mrb[2].mxu1  ;;  %v14715_v9 = vld [vmem:[%s22647_s4 + $0x70] sm:$0xff]   ;;  %v14718_v13 = vld [vmem:[%s22647_s4 + $0x78] sm:$0xff]  }
  0xed   : > { %v513_v19 = vmax.f32 %v467_v12, 0.0  ;;  %v471_v20 = vpop.f32.mrb[3].mxu0  ;;  %v515_v25 = vmax.f32 %v16171_v17, 0.0  ;;  %v14455_v26 = vpop.f32.mrb[3].mxu1  ;;  %v14716_v11 = vld [vmem:[%s22647_s4 + $0x30] sm:$0xff]   ;;  %v14717_v12 = vld [vmem:[%s22647_s4 + $0xb8] sm:$0xff]  }
  0xee   : > { %v514_v22 = vmax.f32 %v469_v15, 0.0  ;;  %v16339_v15 = vld [vmem:[%s22649_s6 + $0x4] ss:$20 sps:$4 sm:$0xff]   ;;  %v625_v21 = vsub.s32 5, %v16158_v62 }
  0xef   : > { %v516_v29 = vpack.c.bf16 %v513_v19, %v513_v19  ;;  %v518_v50 = vpack.c.bf16 %v515_v25, %v515_v25 }
  0xf0   : > { %v517_v28 = vpack.c.bf16 %v514_v22, %v514_v22  ;;  %v621_v22 = vsub.s32 3, %v16158_v62 }
  0xf2   : > { %1058 = vmatprep.mubr.bf16.mxu0 %v517_v28  ;;  %1140 = vmatprep.mubr.bf16.mxu1 %v517_v28  ;;  %v622_v26 = vrot.slane %v16163_v63, %v621_v22  ;;  %v14756_v22 = vld [vmem:[%s22649_s6 + $0xa8] ss:$20 sps:$4 sm:$0xff]  }
  0xf3   : > { %1059 = vmatmul.mubr.bf16.vlgmr.msra.gmra.mrb[4].mxu0 %v516_v29  ;;  %1141 = vmatmul.mubr.bf16.vlgmr.msra.gmra.mrb[4].mxu1 %v516_v29 }
  0xf4   : > { %1068 = vmatpush1.bf16.msra.mxu0 %v14664_v23  ;;  %14457 = vmatpush3.bf16.msra.mxu1 %v14667_v24  ;;  %v617_v23 = vsub.s32 1, %v16158_v62  ;;  %v626_v24 = vrot.slane %v16163_v63, %v625_v21  ;;  %v16351_v62 = vld [vmem:[%s22649_s6 + $0x10] ss:$20 sps:$4 sm:$0xff]   ;;  %v14758_v21 = vld [vmem:[%s22649_s6 + $0xac] ss:$20 sps:$4 sm:$0xff]  }
  0xf5   : > { %1069 = vmatprep.subr.bf16.mxu0 %v14670_v27  ;;  %14458 = vmatprep.subr.bf16.mxu1 %v15909_v6 }
  0xf6   : > { %1099 = vmatprep.mubr.bf16.mxu0 %v22654_v3  ;;  %14472 = vmatprep.mubr.msk.bf16.mxu1 %vm15910_vm1, %v15909_v6  ;;  %v618_v25 = vrot.slane %v16163_v63, %v617_v23  ;;  %v641_v27 = vrot.slane %v626_v24, %v617_v23  ;;  %v637_v29 = vrot.slane %v622_v26, %v617_v23  ;;  %v14759_v24 = vld [vmem:[%s22649_s6 + $0xd0] ss:$20 sps:$4 sm:$0xff]  }
  0xf8   : > { %1070 = vmatpush1.bf16.msra.mxu0 %v14668_v30  ;;  %14459 = vmatpush3.bf16.msra.mxu1 %v14671_v31  ;;  %v633_v28 = vrot.slane %v618_v25, %v617_v23  ;;  %v14761_v23 = vld [vmem:[%s22649_s6 + $0xd4] ss:$20 sps:$4 sm:$0xff]   ;;  %v14762_v25 = vld [vmem:[%s22650_s7 + $0x40] sm:$0xff]  }
  0xf9   : > { %1071 = vmatprep.subr.bf16.mxu0 %v14674_v32  ;;  %14460 = vmatprep.subr.bf16.mxu1 %v15909_v6 }
  0xfc   : > { %1072 = vmatpush1.bf16.msra.mxu0 %v14672_v33  ;;  %14461 = vmatpush3.bf16.msra.mxu1 %v14675_v34 }
  0xfd   : > { %1073 = vmatprep.subr.bf16.mxu0 %v14678_v35  ;;  %14462 = vmatprep.subr.bf16.mxu1 %v15909_v6 }
 0x100   : > { %1074 = vmatpush1.bf16.msra.mxu0 %v14676_v36  ;;  %14463 = vmatpush3.bf16.msra.mxu1 %v14679_v37 }
 0x101   : > { %1075 = vmatprep.subr.bf16.mxu0 %v14682_v38  ;;  %14464 = vmatprep.subr.bf16.mxu1 %v15909_v6 }
 0x104   : > { %1076 = vmatpush1.bf16.msra.mxu0 %v14680_v39  ;;  %14465 = vmatpush3.bf16.msra.mxu1 %v14683_v40 }
 0x105   : > { %1077 = vmatprep.subr.bf16.mxu0 %v14686_v41  ;;  %14466 = vmatprep.subr.bf16.mxu1 %v15909_v6 }
 0x108   : > { %1078 = vmatpush1.bf16.msra.mxu0 %v14684_v42  ;;  %14467 = vmatpush3.bf16.msra.mxu1 %v14687_v43  ;;  %v16360_v43 = vld [vmem:[%s22649_s6] ss:$20 sps:$4 sm:$0xff]  }
 0x109   : > { %1079 = vmatprep.subr.bf16.mxu0 %v14690_v44  ;;  %14468 = vmatprep.subr.bf16.mxu1 %v15909_v6 }
 0x10c   : > { %1080 = vmatpush1.bf16.msra.mxu0 %v14688_v45  ;;  %14469 = vmatpush3.bf16.msra.mxu1 %v14691_v46  ;;  %v16368_v45 = vld [vmem:[%s22649_s6 + $0x2c] ss:$20 sps:$4 sm:$0xff]  }
 0x10d   : > { %1081 = vmatprep.subr.bf16.mxu0 %v14694_v47  ;;  %14470 = vmatprep.subr.bf16.mxu1 %v15909_v6  ;;  %v16375_v46 = vld [vmem:[%s22649_s6 + $0x38] ss:$20 sps:$4 sm:$0xff]   ;;  %v16383_v47 = vld [vmem:[%s22649_s6 + $0x28] ss:$20 sps:$4 sm:$0xff]  }
 0x110   : > { %1082 = vmatpush1.bf16.msra.mxu0 %v14692_v48  ;;  %14471 = vmatpush3.bf16.msra.mxu1 %v14695_v49  ;;  %v16390_v48 = vld [vmem:[%s22649_s6 + $0x54] ss:$20 sps:$4 sm:$0xff]  }
 0x111   : > { %14476 = vmatprep.subr.bf16.mxu0 %v15909_v6  ;;  %12769 = vmatprep.subr.bf16.mxu1 %v14697_v52  ;;  %v16398_v49 = vld [vmem:[%s22649_s6 + $0x60] ss:$20 sps:$4 sm:$0xff]   ;;  %v14735_v52 = vld [vmem:[%s22649_s6 + $0x88] ss:$20 sps:$4 sm:$0xff]  }
 0x113   : > { %1100 = vmatmul.mubr.bf16.vlgmr.msra.gmra.mrb[4].mxu0 %v518_v50  ;;  %14473 = vmatmul.mubr.bf16.vlgmr.msra.gmra.mrb[8].mxu1 %v518_v50  ;;  %v16405_v50 = vld [vmem:[%s22649_s6 + $0x50] ss:$20 sps:$4 sm:$0xff]  }
 0x114   : > { %14492 = vmatprep.mubr.msk.bf16.mxu0 %vm15910_vm1, %v15909_v6  ;;  %14477 = vmatpush3.bf16.msra.mxu0 %v14696_v51  ;;  %v14734_v51 = vld [vmem:[%s22649_s6 + $0x7c] ss:$20 sps:$4 sm:$0xff]  }
 0x115   : > { %12770 = vmatpush3.bf16.msra.mxu1 %v14698_v53  ;;  %14478 = vmatprep.subr.bf16.mxu0 %v15909_v6  ;;  %v14732_v53 = vld [vmem:[%s22649_s6 + $0x78] ss:$20 sps:$4 sm:$0xff]  }
 0x116   : > { %12771 = vmatprep.subr.bf16.mxu1 %v14700_v54  ;;  %v14738_v54 = vld [vmem:[%s22649_s6 + $0xa4] ss:$20 sps:$4 sm:$0xff]  }
 0x118   : > { %14479 = vmatpush3.bf16.msra.mxu0 %v14699_v55  ;;  %v14736_v55 = vld [vmem:[%s22649_s6 + $0xa0] ss:$20 sps:$4 sm:$0xff]  }
 0x119   : > { %12772 = vmatpush3.bf16.msra.mxu1 %v14701_v56  ;;  %14480 = vmatprep.subr.bf16.mxu0 %v15909_v6  ;;  %v14739_v56 = vld [vmem:[%s22649_s6 + $0xb0] ss:$20 sps:$4 sm:$0xff]  }
 0x11a   : > { %12773 = vmatprep.subr.bf16.mxu1 %v14703_v57  ;;  %v14742_v57 = vld [vmem:[%s22649_s6 + $0xcc] ss:$20 sps:$4 sm:$0xff]  }
 0x11c   : > { %14481 = vmatpush3.bf16.msra.mxu0 %v14702_v58  ;;  %v14740_v58 = vld [vmem:[%s22649_s6 + $0xc8] ss:$20 sps:$4 sm:$0xff]  }
 0x11d   : > { %12774 = vmatpush3.bf16.msra.mxu1 %v14704_v59  ;;  %14482 = vmatprep.subr.bf16.mxu0 %v15909_v6  ;;  %v14743_v59 = vld [vmem:[%s22649_s6 + $0xd8] ss:$20 sps:$4 sm:$0xff]  }
 0x11e   : > { %12775 = vmatprep.subr.bf16.mxu1 %v14706_v60  ;;  %v16443_v60 = vld [vmem:[%s22649_s6 + $0xc] ss:$20 sps:$4 sm:$0xff]  }
 0x120   : > { %14483 = vmatpush3.bf16.msra.mxu0 %v14705_v61 }
 0x121   : > { %12776 = vmatpush3.bf16.msra.mxu1 %v14707_v0  ;;  %14484 = vmatprep.subr.bf16.mxu0 %v15909_v6 }
 0x122   : > { %12777 = vmatprep.subr.bf16.mxu1 %v14709_v1 }
 0x124   : > { %14485 = vmatpush3.bf16.msra.mxu0 %v14708_v2 }
 0x125   : > { %12778 = vmatpush3.bf16.msra.mxu1 %v14710_v4  ;;  %14486 = vmatprep.subr.bf16.mxu0 %v15909_v6 }
 0x126   : > { %12779 = vmatprep.subr.bf16.mxu1 %v14712_v5 }
 0x128   : > { %14487 = vmatpush3.bf16.msra.mxu0 %v14711_v7 }
 0x129   : > { %12780 = vmatpush3.bf16.msra.mxu1 %v14713_v8  ;;  %14488 = vmatprep.subr.bf16.mxu0 %v15909_v6 }
 0x12a   : > { %12781 = vmatprep.subr.bf16.mxu1 %v14715_v9 }
 0x12c   : > { %14489 = vmatpush3.bf16.msra.mxu0 %v14714_v10 }
 0x12d   : > { %14490 = vmatprep.subr.bf16.mxu0 %v15909_v6  ;;  %12782 = vmatpush3.bf16.msra.mxu1 %v14716_v11  ;;  %v16450_v11 = vld [vmem:[%s22649_s6 + $0x8] ss:$20 sps:$4 sm:$0xff]  }
 0x12e   : > { %12783 = vmatprep.subr.bf16.mxu1 %v14718_v13 }
 0x130   : > { %14491 = vmatpush3.bf16.msra.mxu0 %v14717_v12 }
 0x131   : > { %14496 = vmatprep.subr.bf16.mxu0 %v15909_v6  ;;  %12784 = vmatpush3.bf16.msra.mxu1 %v14719_v14  ;;  %v16455_v14 = vld [vmem:[%s22649_s6 + $0x34] ss:$20 sps:$4 sm:$0xff]  }
 0x132   : > { %1660 = vmatprep.subr.bf16.mxu1 %v16339_v15 }
 0x1c6   : > { %v12754_v16 = vpop.f32.mrb[4].mxu1 }
 0x1c7   : > { %v12755_v17 = vpop.f32.mrb[5].mxu1 }
 0x1c8   : > { %v12756_v18 = vadd.f32 %v12755_v17, %v12754_v16  ;;  %v12757_v19 = vpop.f32.mrb[6].mxu1  ;;  %v16463_v16 = vld [vmem:[%s22649_s6 + $0x30] ss:$20 sps:$4 sm:$0xff]  }
 0x1c9   : > { %v12758_v20 = vpop.f32.mrb[7].mxu1  ;;  %v16470_v17 = vld [vmem:[%s22649_s6 + $0x5c] ss:$20 sps:$4 sm:$0xff]   ;;  %v14755_v19 = vld [vmem:[%s22649_s6 + $0x84] ss:$20 sps:$4 sm:$0xff]  }
 0x1ca   : > { %v1143_v30 = vadd.f32 %v12756_v18, %v641_v27  ;;  %v16479_v18 = vld [vmem:[%s22649_s6 + $0x58] ss:$20 sps:$4 sm:$0xff]   ;;  %v14753_v20 = vld [vmem:[%s22649_s6 + $0x80] ss:$20 sps:$4 sm:$0xff]  }
 0x1e6   : > { %v1101_v31 = vpop.f32.mrb[4].mxu0  ;;  %v1182_v32 = vpop.f32.mrb[8].mxu1 }
 0x1e7   : > { %v14544_v33 = vadd.f32 %v1101_v31, %v633_v28  ;;  %v1183_v34 = vadd.f32 %v1182_v32, %v1143_v30  ;;  %v1103_v35 = vpop.f32.mrb[5].mxu0  ;;  %v14474_v36 = vpop.f32.mrb[9].mxu1  ;;  %v14763_v31 = vld [vmem:[%s22650_s7] sm:$0xff]   ;;  %v14766_v32 = vld [vmem:[%s22650_s7 + $0x48] sm:$0xff]  }
 0x1e8   : > { %v14545_v37 = vadd.f32 %v1103_v35, %v637_v29  ;;  %v1105_v38 = vpop.f32.mrb[6].mxu0  ;;  %v1185_v39 = vpop.f32.mrb[10].mxu1  ;;  %v14764_v35 = vld [vmem:[%s22650_s7 + $0xc0] sm:$0xff]   ;;  %v14771_v36 = vld [vmem:[%s22650_s7 + $0x10] sm:$0xff]  }
 0x1e9   : > { %v16353_v40 = vpack.c.bf16 %v1183_v34, %v1183_v34  ;;  %v1106_v63 = vpop.f32.mrb[7].mxu0  ;;  %v14475_v41 = vpop.f32.mrb[11].mxu1  ;;  %v16362_v44 = vpack.c.bf16 %v14544_v33, %v14544_v33  ;;  %v14767_v33 = vld [vmem:[%s22650_s7 + $0x8] sm:$0xff]   ;;  %v14770_v34 = vld [vmem:[%s22650_s7 + $0x50] sm:$0xff]   ;;  %v14765_v38 = vld [vmem:[%s22650_s7 + $0x80] sm:$0xff]  }
 0x1ea   : > { %v16355_v42 = vpack.c.bf16 %v14545_v37, %v14545_v37  ;;  %v14774_v37 = vld [vmem:[%s22650_s7 + $0x58] sm:$0xff]   ;;  %v14768_v39 = vld [vmem:[%s22650_s7 + $0xc8] sm:$0xff]   ;;  %v14772_v41 = vld [vmem:[%s22650_s7 + $0xd0] sm:$0xff]  }
 0x1eb   : > { %14493 = vmatmul.mubr.bf16.vlgmr.msra.gmra.mrb[8].mxu0 %v16353_v40  ;;  %v14769_v63 = vld [vmem:[%s22650_s7 + $0x88] sm:$0xff]  }
 0x1ec   : > { %1415 = vmatprep.mubr.bf16.mxu1 %v16355_v42  ;;  %14497 = vmatpush3.bf16.msra.mxu0 %v16351_v62 }
 0x1ed   : > { %1416 = vmatmul.mubr.bf16.vlgmr.msra.gmra.mrb[12].mxu1 %v16362_v44  ;;  %14498 = vmatprep.subr.bf16.mxu0 %v15909_v6 }
 0x1ee   : > { %1661 = vmatpush1.bf16.msra.mxu1 %v16360_v43  ;;  %1692 = vmatprep.mubr.bf16.mxu1 %v22654_v3 }
 0x1ef   : > { %1662 = vmatprep.subr.bf16.mxu1 %v16368_v45  ;;  %14508 = vmatprep.mubr.msk.bf16.mxu0 %vm15910_vm1, %v15909_v6 }
 0x1f0   : > { %14499 = vmatpush3.bf16.msra.mxu0 %v16375_v46 }
 0x1f1   : > { %14500 = vmatprep.subr.bf16.mxu0 %v15909_v6 }
 0x1f2   : > { %1663 = vmatpush1.bf16.msra.mxu1 %v16383_v47 }
 0x1f3   : > { %1664 = vmatprep.subr.bf16.mxu1 %v16390_v48 }
 0x1f4   : > { %14501 = vmatpush3.bf16.msra.mxu0 %v16398_v49 }
 0x1f5   : > { %14502 = vmatprep.subr.bf16.mxu0 %v15909_v6 }
 0x1f6   : > { %1665 = vmatpush1.bf16.msra.mxu1 %v16405_v50 }
 0x1f7   : > { %1666 = vmatprep.subr.bf16.mxu1 %v14734_v51  ;;  %v14773_v51 = vld [vmem:[%s22650_s7 + $0x90] sm:$0xff]  }
 0x1f8   : > { %14503 = vmatpush3.bf16.msra.mxu0 %v14735_v52 }
 0x1f9   : > { %14504 = vmatprep.subr.bf16.mxu0 %v15909_v6 }
 0x1fa   : > { %1667 = vmatpush1.bf16.msra.mxu1 %v14732_v53 }
 0x1fb   : > { %1668 = vmatprep.subr.bf16.mxu1 %v14738_v54 }
 0x1fc   : > { %14505 = vmatpush3.bf16.msra.mxu0 %v14739_v56 }
 0x1fd   : > { %14506 = vmatprep.subr.bf16.mxu0 %v15909_v6 }
 0x1fe   : > { %1669 = vmatpush1.bf16.msra.mxu1 %v14736_v55 }
 0x1ff   : > { %1670 = vmatprep.subr.bf16.mxu1 %v14742_v57 }
 0x200   : > { %14507 = vmatpush3.bf16.msra.mxu0 %v14743_v59 }
 0x201   : > { %1851 = vmatprep.subr.bf16.mxu0 %v16443_v60 }
 0x202   : > { %1671 = vmatpush1.bf16.msra.mxu1 %v14740_v58 }
 0x203   : > { %1701 = vmatprep.subr.bf16.mxu1 %v16443_v60 }
 0x2be   : > { %v1457_v61 = vpop.f32.mrb[8].mxu0 }
 0x2bf   : > { %v14494_v0 = vpop.f32.mrb[9].mxu0 }
 0x2c0   : > { %v12785_v1 = vpop.f32.mrb[12].mxu1  ;;  %v1460_v2 = vpop.f32.mrb[10].mxu0  ;;  %v14776_v0 = vld [vmem:[%s22650_s7 + $0xd8] sm:$0xff]  }
 0x2c1   : > { %v12786_v4 = vpop.f32.mrb[13].mxu1  ;;  %v14495_v5 = vpop.f32.mrb[11].mxu0  ;;  %v14778_v2 = vld [vmem:[%s22650_s7 + $0x60] sm:$0xff]  }
 0x2c2   : > { %v12787_v7 = vadd.f32 %v12786_v4, %v12785_v1  ;;  %v12788_v8 = vpop.f32.mrb[14].mxu1  ;;  %v14777_v1 = vld [vmem:[%s22650_s7 + $0x98] sm:$0xff]   ;;  %v14779_v5 = vld [vmem:[%s22650_s7 + $0x20] sm:$0xff]  }
 0x2c3   : > { %v12789_v9 = vpop.f32.mrb[15].mxu1 }
 0x2c4   : > { %v1458_v10 = vadd.f32 %v12787_v7, %v1457_v61  ;;  %v14775_v61 = vld [vmem:[%s22650_s7 + $0x18] sm:$0xff]   ;;  %v14780_v7 = vld [vmem:[%s22650_s7 + $0xe0] sm:$0xff]  }
 0x2c5   : > { %v14781_v9 = vld [vmem:[%s22650_s7 + $0xa0] sm:$0xff]  }
 0x2c6   : > { %v1798_v12 = vsel %vm1797_vm3, %v1458_v10, -inf  ;;  %v1499_v13 = vpack.c.bf16 %v1458_v10, %v1458_v10 }
 0x2c7   : > { %1799 = vmax.xlane.f32.xlu0 %v1798_v12 }
 0x2c8   : > { %12177 = vmatmul.mubr.msk.bf16.vlgmr.msra.gmra.mrb[16].mxu1 %vm1656_vm4, %v1499_v13  ;;  %14509 = vmatmul.mubr.msk.bf16.vlgmr.msra.gmra.mrb[12].mxu0 %vm1656_vm4, %v1499_v13 }
 0x2c9   : > { %1702 = vmatpush1.bf16.msra.mxu1 %v16450_v11  ;;  %1733 = vmatprep.mubr.bf16.mxu1 %v22654_v3 }
 0x2ca   : > { %1703 = vmatprep.subr.bf16.mxu1 %v16455_v14  ;;  %1852 = vmatpush1.bf16.msra.mxu0 %v16450_v11 }
 0x2cb   : > { %1853 = vmatprep.subr.bf16.mxu0 %v16455_v14  ;;  %1883 = vmatprep.mubr.bf16.mxu0 %v22654_v3 }
 0x2cd   : > { %1704 = vmatpush1.bf16.msra.mxu1 %v16463_v16 }
 0x2ce   : > { %1705 = vmatprep.subr.bf16.mxu1 %v16470_v17  ;;  %1854 = vmatpush1.bf16.msra.mxu0 %v16463_v16 }
 0x2cf   : > { %1855 = vmatprep.subr.bf16.mxu0 %v16470_v17 }
 0x2d1   : > { %1706 = vmatpush1.bf16.msra.mxu1 %v16479_v18 }
 0x2d2   : > { %1707 = vmatprep.subr.bf16.mxu1 %v14755_v19  ;;  %1856 = vmatpush1.bf16.msra.mxu0 %v16479_v18  ;;  %v14783_v19 = vld [vmem:[%s22650_s7 + $0x28] sm:$0xff]  }
 0x2d3   : > { %12811 = vmatprep.subr.bf16.mxu0 %v14762_v25  ;;  %v14789_v25 = vld [vmem:[%s22650_s7 + $0xb0] sm:$0xff]  }
 0x2d5   : > { %1708 = vmatpush1.bf16.msra.mxu1 %v14753_v20  ;;  %v14784_v20 = vld [vmem:[%s22650_s7 + $0xe8] sm:$0xff]  }
 0x2d6   : > { %1709 = vmatprep.subr.bf16.mxu1 %v14758_v21  ;;  %v14785_v21 = vld [vmem:[%s22650_s7 + $0xa8] sm:$0xff]  }
 0x2d9   : > { %1710 = vmatpush1.bf16.msra.mxu1 %v14756_v22  ;;  %v14786_v22 = vld [vmem:[%s22650_s7 + $0x70] sm:$0xff]  }
 0x2da   : > { %1711 = vmatprep.subr.bf16.mxu1 %v14761_v23  ;;  %v14787_v23 = vld [vmem:[%s22650_s7 + $0x30] sm:$0xff]  }
 0x2dd   : > { %1712 = vmatpush1.bf16.msra.mxu1 %v14759_v24  ;;  %v14788_v24 = vld [vmem:[%s22650_s7 + $0xf0] sm:$0xff]  }
 0x2de   : > { %1810 = vmatprep.subr.bf16.mxu1 %v16339_v15 }
 0x2e0   : > { %12178 = vmatmul.mubr.msk.bf16.vlgmr.msra.gmra.mrb[20].mxu1 %vm1656_vm4, %v1499_v13  ;;  %v14782_v13 = vld [vmem:[%s22650_s7 + $0x68] sm:$0xff]  }
 0x2e1   : > { %1811 = vmatpush1.bf16.msra.mxu1 %v16360_v43  ;;  %1842 = vmatprep.mubr.bf16.mxu1 %v22654_v3 }
 0x2e2   : > { %1812 = vmatprep.subr.bf16.mxu1 %v16368_v45 }
 0x2e5   : > { %1813 = vmatpush1.bf16.msra.mxu1 %v16383_v47 }
 0x2e6   : > { %1814 = vmatprep.subr.bf16.mxu1 %v16390_v48 }
 0x2e9   : > { %1815 = vmatpush1.bf16.msra.mxu1 %v16405_v50 }
 0x2ea   : > { %14512 = vmatprep.subr.bf16.mxu1 %v15909_v6 }
 0x354   : > { %v1800_v26 = vpop.xlane.xlu0 %1799 }
 0x355   : > { %v1801_v27 = vadd.f32 %v1800_v26, %v1458_v10  ;;  %v14790_v26 = vld [vmem:[%s22650_s7 + $0x78] sm:$0xff]  }
 0x357   : > { %vm1802_vm5 = vcmp.ge.f32.partialorder %v1801_v27, 0.0  ;;  %v1803_v28 = vmul.f32 0.01, %v1801_v27 }
 0x359   : > { %v1804_v29 = vsel %vm1802_vm5, %v1801_v27, %v1803_v28  ;;  %v14791_v27 = vld [vmem:[%s22650_s7 + $0x38] sm:$0xff]  }
 0x35a   : > { %v1805_v30 = vpack.c.bf16 %v1804_v29, %v1804_v29  ;;  %v14792_v28 = vld [vmem:[%s22650_s7 + $0xf8] sm:$0xff]  }
 0x35b   : > { %v14793_v29 = vld [vmem:[%s22650_s7 + $0xb8] sm:$0xff]  }
 0x35c   : > { %12180 = vmatmul.mubr.msk.bf16.vlgmr.msra.gmra.mrb[24].mxu1 %vm1806_vm6, %v1805_v30  ;;  %12181 = vmatmul.mubr.msk.bf16.vlgmr.msra.gmra.mrb[16].mxu0 %vm1806_vm6, %v1805_v30 }
 0x35d   : > { %14513 = vmatpush3.bf16.msra.mxu1 %v16351_v62  ;;  %14518 = vmatprep.mubr.msk.bf16.mxu1 %vm15910_vm1, %v15909_v6 }
 0x35e   : > { %14514 = vmatprep.subr.bf16.mxu1 %v15909_v6  ;;  %12812 = vmatpush3.bf16.msra.mxu0 %v14763_v31 }
 0x35f   : > { %12813 = vmatprep.subr.bf16.mxu0 %v14766_v32 }
 0x361   : > { %14515 = vmatpush3.bf16.msra.mxu1 %v16375_v46 }
 0x362   : > { %14516 = vmatprep.subr.bf16.mxu1 %v15909_v6  ;;  %12814 = vmatpush3.bf16.msra.mxu0 %v14767_v33 }
 0x363   : > { %12815 = vmatprep.subr.bf16.mxu0 %v14770_v34 }
 0x365   : > { %14517 = vmatpush3.bf16.msra.mxu1 %v16398_v49 }
 0x366   : > { %12833 = vmatprep.subr.bf16.mxu1 %v14764_v35  ;;  %12816 = vmatpush3.bf16.msra.mxu0 %v14771_v36 }
 0x367   : > { %12817 = vmatprep.subr.bf16.mxu0 %v14774_v37 }
 0x368   : > { %14519 = vmatmul.mubr.msk.bf16.vlgmr.msra.gmra.mrb[28].mxu1 %vm1806_vm6, %v1805_v30 }
 0x369   : > { %12834 = vmatpush3.bf16.msra.mxu1 %v14765_v38 }
 0x36a   : > { %12835 = vmatprep.subr.bf16.mxu1 %v14768_v39  ;;  %12818 = vmatpush3.bf16.msra.mxu0 %v14775_v61 }
 0x36b   : > { %12819 = vmatprep.subr.bf16.mxu0 %v14778_v2 }
 0x36d   : > { %12836 = vmatpush3.bf16.msra.mxu1 %v14769_v63 }
 0x36e   : > { %12837 = vmatprep.subr.bf16.mxu1 %v14772_v41  ;;  %12820 = vmatpush3.bf16.msra.mxu0 %v14779_v5 }
 0x36f   : > { %12821 = vmatprep.subr.bf16.mxu0 %v14782_v13 }
 0x371   : > { %12838 = vmatpush3.bf16.msra.mxu1 %v14773_v51 }
 0x372   : > { %12839 = vmatprep.subr.bf16.mxu1 %v14776_v0  ;;  %12822 = vmatpush3.bf16.msra.mxu0 %v14783_v19 }
 0x373   : > { %12823 = vmatprep.subr.bf16.mxu0 %v14786_v22 }
 0x375   : > { %12840 = vmatpush3.bf16.msra.mxu1 %v14777_v1 }
 0x376   : > { %12841 = vmatprep.subr.bf16.mxu1 %v14780_v7  ;;  %12824 = vmatpush3.bf16.msra.mxu0 %v14787_v23 }
 0x377   : > { %12825 = vmatprep.subr.bf16.mxu0 %v14790_v26  ;;  %v14795_v26 = vld [vmem:[%s22650_s7 + $0x108] sm:$0xff]  }
 0x379   : > { %12842 = vmatpush3.bf16.msra.mxu1 %v14781_v9 }
 0x37a   : > { %12843 = vmatprep.subr.bf16.mxu1 %v14784_v20  ;;  %12826 = vmatpush3.bf16.msra.mxu0 %v14791_v27  ;;  %v14796_v27 = vld [vmem:[%s22650_s7 + $0x110] sm:$0xff]  }
 0x37b   : > { %14522 = vmatprep.subr.bf16.mxu0 %v15909_v6 }
 0x37d   : > { %12844 = vmatpush3.bf16.msra.mxu1 %v14785_v21 }
 0x37e   : > { %12845 = vmatprep.subr.bf16.mxu1 %v14788_v24 }
 0x381   : > { %12846 = vmatpush3.bf16.msra.mxu1 %v14789_v25 }
 0x382   : > { %12847 = vmatprep.subr.bf16.mxu1 %v14792_v28 }
 0x385   : > { %12848 = vmatpush3.bf16.msra.mxu1 %v14793_v29 }
 0x386   : > { %2370 = vmatprep.subr.bf16.mxu1 %v16339_v15 }
 0x39b   : > { %v1694_v52 = vpop.f32.mrb[16].mxu1  ;;  %v16562_v53 = vpop.f32.mrb[12].mxu0 }
 0x39c   : > { %v16564_v54 = vpop.f32.mrb[17].mxu1  ;;  %v14510_v55 = vpop.f32.mrb[13].mxu0  ;;  %v1787_v30 = vmul.f32 0.01, %v1694_v52  ;;  %vm1782_vm7 = vcmp.ge.f32.partialorder %v1694_v52, 0.0  ;;  %vm1786_vm11 = vcmp.ge.f32.partialorder %v16562_v53, 0.0 }
 0x39d   : > { %v1698_v56 = vpop.f32.mrb[18].mxu1  ;;  %v1779_v57 = vpop.f32.mrb[14].mxu0  ;;  %v1788_v32 = vmul.f32 0.01, %v16564_v54  ;;  %vm1783_vm9 = vcmp.ge.f32.partialorder %v16564_v54, 0.0 }
 0x39e   : > { %v1699_v58 = vpop.f32.mrb[19].mxu1  ;;  %v14511_v59 = vpop.f32.mrb[15].mxu0  ;;  %v1792_v34 = vsel %vm1782_vm7, %v1694_v52, %v1787_v30 }
 0x39f   : > { %v1793_v63 = vsel %vm1783_vm9, %v16564_v54, %v1788_v32 }
 0x3b3   : > { %v1735_v4 = vpop.f32.mrb[20].mxu1 }
 0x3b4   : > { %v1737_v8 = vpop.f32.mrb[21].mxu1  ;;  %v1789_v31 = vmul.f32 0.01, %v1735_v4  ;;  %vm1784_vm8 = vcmp.ge.f32.partialorder %v1735_v4, 0.0 }
 0x3b5   : > { %v1739_v10 = vpop.f32.mrb[22].mxu1  ;;  %v1790_v33 = vmul.f32 0.01, %v1737_v8  ;;  %vm1785_vm10 = vcmp.ge.f32.partialorder %v1737_v8, 0.0 }
 0x3b6   : > { %v1740_v12 = vpop.f32.mrb[23].mxu1  ;;  %v1794_v36 = vsel %vm1784_vm8, %v1735_v4, %v1789_v31  ;;  %v1791_v4 = vmul.f32 0.01, %v16562_v53 }
 0x3b7   : > { %v1795_v15 = vsel %vm1785_vm10, %v1737_v8, %v1790_v33 }
 0x3b8   : > { %v1796_v54 = vsel %vm1786_vm11, %v16562_v53, %v1791_v4  ;;  %v14794_v53 = vld [vmem:[%s22650_s7 + $0x100] sm:$0xff]   ;;  %v14830_v4 = vld [vmem:[%s22648_s5 + $0x12c] ss:$48 sps:$4 sm:$0xff]  }
 0x42f   : > { %v1844_v35 = vpop.f32.mrb[24].mxu1  ;;  %v1885_v37 = vpop.f32.mrb[16].mxu0 }
 0x430   : > { %v1932_v38 = vsub.f32 %v1792_v34, %v1844_v35  ;;  %v1934_v39 = vsub.f32 %v1794_v36, %v1885_v37  ;;  %v1846_v41 = vpop.f32.mrb[25].mxu1  ;;  %v1887_v51 = vpop.f32.mrb[17].mxu0 }
 0x431   : > { %v1933_v55 = vsub.f32 %v1793_v63, %v1846_v41  ;;  %v1935_v56 = vsub.f32 %v1795_v15, %v1887_v51  ;;  %v1848_v57 = vpop.f32.mrb[26].mxu1  ;;  %v1889_v58 = vpop.f32.mrb[18].mxu0  ;;  %v14803_v41 = vld [vmem:[%s22648_s5 + $0x64] ss:$48 sps:$4 sm:$0xff]   ;;  %v14801_v15 = vld [vmem:[%s22648_s5 + $0x60] ss:$48 sps:$4 sm:$0xff]  }
 0x432   : > { %v1937_v59 = vmul.f32 1.442695, %v1932_v38  ;;  %v1941_v61 = vmul.f32 1.442695, %v1934_v39  ;;  %v1849_v0 = vpop.f32.mrb[27].mxu1  ;;  %v1890_v1 = vpop.f32.mrb[19].mxu0 }
 0x433   : > { %v1939_v2 = vmul.f32 1.442695, %v1933_v55  ;;  %v1943_v52 = vmul.f32 1.442695, %v1935_v56  ;;  %v14798_v39 = vld [vmem:[%s22648_s5] ss:$48 sps:$4 sm:$0xff]  }
 0x434   : > { %15380 = vpow2.f32 %v1937_v59  ;;  %v14806_v51 = vld [vmem:[%s22648_s5 + $0xc4] ss:$48 sps:$4 sm:$0xff]   ;;  %v14812_v56 = vld [vmem:[%s22648_s5 + $0xc] ss:$48 sps:$4 sm:$0xff]   ;;  %v14816_v59 = vld [vmem:[%s22648_s5 + $0x68] ss:$48 sps:$4 sm:$0xff]  }
 0x435   : > { %15382 = vpow2.f32 %v1941_v61  ;;  %v14809_v55 = vld [vmem:[%s22648_s5 + $0x124] ss:$48 sps:$4 sm:$0xff]   ;;  %v14818_v58 = vld [vmem:[%s22648_s5 + $0x6c] ss:$48 sps:$4 sm:$0xff]   ;;  %v14819_v1 = vld [vmem:[%s22648_s5 + $0x1e0] ss:$48 sps:$4 sm:$0xff]  }
 0x436   : > { %15384 = vpow2.f32 %v1939_v2  ;;  %v14815_v57 = vld [vmem:[%s22648_s5 + $0x184] ss:$48 sps:$4 sm:$0xff]   ;;  %v14824_v0 = vld [vmem:[%s22648_s5 + $0xcc] ss:$48 sps:$4 sm:$0xff]   ;;  %v14822_v2 = vld [vmem:[%s22648_s5 + $0xc8] ss:$48 sps:$4 sm:$0xff]  }
 0x437   : > { %15386 = vpow2.f32 %v1943_v52  ;;  %v14821_v61 = vld [vmem:[%s22648_s5 + $0x1e4] ss:$48 sps:$4 sm:$0xff]  }
 0x438   : > { %v14827_v52 = vld [vmem:[%s22648_s5 + $0x244] ss:$48 sps:$4 sm:$0xff]  }
 0x43b   : > { %v1926_v5 = vpop.f32.mrb[28].mxu1 }
 0x43c   : > { %v1936_v7 = vsub.f32 %v1796_v54, %v1926_v5  ;;  %v14520_v8 = vpop.f32.mrb[29].mxu1  ;;  %v14825_v54 = vld [vmem:[%s22648_s5 + $0x240] ss:$48 sps:$4 sm:$0xff]   ;;  %v14828_v5 = vld [vmem:[%s22648_s5 + $0x128] ss:$48 sps:$4 sm:$0xff]  }
 0x43d   : > { %v1929_v9 = vpop.f32.mrb[30].mxu1  ;;  %v14836_v8 = vld [vmem:[%s22648_s5 + $0x18c] ss:$48 sps:$4 sm:$0xff]  }
 0x43e   : > { %v16631_v10 = vpop.eup %15380  ;;  %v14521_v12 = vpop.f32.mrb[31].mxu1  ;;  %v1945_v21 = vmul.f32 1.442695, %v1936_v7  ;;  %v14833_v7 = vld [vmem:[%s22648_s5 + $0x2a4] ss:$48 sps:$4 sm:$0xff]  }
 0x43f   : > { %v16633_v13 = vpop.eup %15382  ;;  %v1947_v24 = vpack.c.bf16 %v16631_v10, %v16631_v10  ;;  %v14831_v9 = vld [vmem:[%s22648_s5 + $0x2a0] ss:$48 sps:$4 sm:$0xff]   ;;  %v14834_v12 = vld [vmem:[%s22648_s5 + $0x188] ss:$48 sps:$4 sm:$0xff]  }
 0x440   : > { %v16635_v19 = vpop.eup %15384  ;;  %v1949_v25 = vpack.c.bf16 %v16633_v13, %v16633_v13  ;;  %15388 = vpow2.f32 %v1945_v21  ;;  %v14839_v21 = vld [vmem:[%s22648_s5 + $0x304] ss:$48 sps:$4 sm:$0xff]  }
 0x441   : > { %v16637_v20 = vpop.eup %15386  ;;  %v1948_v22 = vpack.c.bf16 %v16635_v19, %v16635_v19 }
 0x442   : > { %v1950_v23 = vpack.c.bf16 %v16637_v20, %v16637_v20 }
 0x443   : > { %2276 = vmatprep.mubr.bf16.mxu0 %v1948_v22  ;;  %v14842_v22 = vld [vmem:[%s22648_s5 + $0x1ec] ss:$48 sps:$4 sm:$0xff]  }
 0x444   : > { %2316 = vmatprep.mubr.bf16.mxu1 %v1950_v23  ;;  %2277 = vmatmul.mubr.bf16.vlgmr.msra.gmra.mrb[20].mxu0 %v1947_v24  ;;  %v14840_v23 = vld [vmem:[%s22648_s5 + $0x1e8] ss:$48 sps:$4 sm:$0xff]   ;;  %v14845_v24 = vld [vmem:[%s22648_s5 + $0x364] ss:$48 sps:$4 sm:$0xff]  }
 0x445   : > { %2317 = vmatmul.mubr.bf16.vlgmr.msra.gmra.mrb[32].mxu1 %v1949_v25  ;;  %14523 = vmatpush3.bf16.msra.mxu0 %v14794_v53  ;;  %v14837_v53 = vld [vmem:[%s22648_s5 + $0x300] ss:$48 sps:$4 sm:$0xff]   ;;  %v14848_v25 = vld [vmem:[%s22648_s5 + $0x24c] ss:$48 sps:$4 sm:$0xff]  }
 0x446   : > { %14524 = vmatprep.subr.bf16.mxu0 %v15909_v6  ;;  %14530 = vmatprep.mubr.msk.bf16.mxu0 %vm15910_vm1, %v15909_v6 }
 0x447   : > { %2371 = vmatpush1.bf16.msra.mxu1 %v16360_v43  ;;  %2402 = vmatprep.mubr.bf16.mxu1 %v22654_v3  ;;  %v14797_v43 = vld [vmem:[%s22650_s7 + $0x118] sm:$0xff]  }
 0x448   : > { %2372 = vmatprep.subr.bf16.mxu1 %v16368_v45 }
 0x449   : > { %14525 = vmatpush3.bf16.msra.mxu0 %v14795_v26  ;;  %v14843_v26 = vld [vmem:[%s22648_s5 + $0x360] ss:$48 sps:$4 sm:$0xff]  }
 0x44a   : > { %14526 = vmatprep.subr.bf16.mxu0 %v15909_v6  ;;  %v16669_v28 = vpop.eup %15388 }
 0x44b   : > { %2373 = vmatpush1.bf16.msra.mxu1 %v16383_v47  ;;  %v1951_v45 = vpack.c.bf16 %v16669_v28, %v16669_v28  ;;  %v14800_v47 = vld [vmem:[%s22648_s5 + $0x4] ss:$48 sps:$4 sm:$0xff]  }
 0x44c   : > { %2374 = vmatprep.subr.bf16.mxu1 %v16390_v48 }
 0x44d   : > { %14527 = vmatpush3.bf16.msra.mxu0 %v14796_v27  ;;  %v14846_v27 = vld [vmem:[%s22648_s5 + $0x248] ss:$48 sps:$4 sm:$0xff]  }
 0x44e   : > { %14528 = vmatprep.subr.bf16.mxu0 %v15909_v6 }
 0x44f   : > { %2375 = vmatpush1.bf16.msra.mxu1 %v16405_v50 }
 0x450   : > { %14534 = vmatprep.subr.bf16.mxu1 %v15909_v6 }
 0x451   : > { %14529 = vmatpush3.bf16.msra.mxu0 %v14797_v43  ;;  %v14851_v43 = vld [vmem:[%s22648_s5 + $0x3c4] ss:$48 sps:$4 sm:$0xff]  }
 0x452   : > { %2411 = vmatprep.subr.bf16.mxu0 %v16443_v60 }
 0x454   : > { %14531 = vmatmul.mubr.msk.bf16.vlgmr.msra.gmra.mrb[24].mxu0 %vm2240_vm12, %v1951_v45  ;;  %v14854_v45 = vld [vmem:[%s22648_s5 + $0x2ac] ss:$48 sps:$4 sm:$0xff]  }
 0x455   : > { %2412 = vmatpush1.bf16.msra.mxu0 %v16450_v11  ;;  %2443 = vmatprep.mubr.bf16.mxu0 %v22654_v3 }
 0x456   : > { %2413 = vmatprep.subr.bf16.mxu0 %v16455_v14 }
 0x459   : > { %2414 = vmatpush1.bf16.msra.mxu0 %v16463_v16 }
 0x45a   : > { %2415 = vmatprep.subr.bf16.mxu0 %v16470_v17 }
 0x45d   : > { %2416 = vmatpush1.bf16.msra.mxu0 %v16479_v18 }
 0x45e   : > { %4230 = vmatprep.subr.bf16.mxu0 %v14800_v47  ;;  %v14849_v47 = vld [vmem:[%s22648_s5 + $0x3c0] ss:$48 sps:$4 sm:$0xff]  }
 0x517   : > { %v12827_v48 = vpop.f32.mrb[20].mxu0 }
 0x518   : > { %v12849_v50 = vpop.f32.mrb[32].mxu1  ;;  %v12828_v60 = vpop.f32.mrb[21].mxu0 }
 0x519   : > { %v12829_v29 = vadd.f32 %v12828_v60, %v12827_v48  ;;  %v12850_v11 = vpop.f32.mrb[33].mxu1  ;;  %v12830_v30 = vpop.f32.mrb[22].mxu0  ;;  %v14852_v48 = vld [vmem:[%s22648_s5 + $0x2a8] ss:$48 sps:$4 sm:$0xff]   ;;  %v14860_v60 = vld [vmem:[%s22648_s5 + $0x30c] ss:$48 sps:$4 sm:$0xff]  }
 0x51a   : > { %v12851_v31 = vadd.f32 %v12850_v11, %v12849_v50  ;;  %v12852_v32 = vpop.f32.mrb[34].mxu1  ;;  %v12831_v14 = vpop.f32.mrb[23].mxu0  ;;  %v14857_v50 = vld [vmem:[%s22648_s5 + $0x424] ss:$48 sps:$4 sm:$0xff]   ;;  %v14858_v11 = vld [vmem:[%s22648_s5 + $0x308] ss:$48 sps:$4 sm:$0xff]  }
 0x51b   : > { %v12853_v33 = vpop.f32.mrb[35].mxu1  ;;  %v14863_v30 = vld [vmem:[%s22648_s5 + $0x484] ss:$48 sps:$4 sm:$0xff]   ;;  %v14861_v32 = vld [vmem:[%s22648_s5 + $0x480] ss:$48 sps:$4 sm:$0xff]  }
 0x51c   : > { %v2319_v16 = vadd.f32 %v12851_v31, %v12829_v29  ;;  %v14855_v29 = vld [vmem:[%s22648_s5 + $0x420] ss:$48 sps:$4 sm:$0xff]   ;;  %v14866_v31 = vld [vmem:[%s22648_s5 + $0x36c] ss:$48 sps:$4 sm:$0xff]   ;;  %v14864_v14 = vld [vmem:[%s22648_s5 + $0x368] ss:$48 sps:$4 sm:$0xff]  }
 0x51d   : > { %v14869_v33 = vld [vmem:[%s22648_s5 + $0x4e4] ss:$48 sps:$4 sm:$0xff]  }
 0x527   : > { %v2358_v34 = vpop.f32.mrb[24].mxu0 }
 0x528   : > { %v2359_v17 = vadd.f32 %v2358_v34, %v2319_v16  ;;  %v14532_v35 = vpop.f32.mrb[25].mxu0  ;;  %v14872_v16 = vld [vmem:[%s22648_s5 + $0x3cc] ss:$48 sps:$4 sm:$0xff]   ;;  %v14867_v34 = vld [vmem:[%s22648_s5 + $0x4e0] ss:$48 sps:$4 sm:$0xff]  }
 0x529   : > { %v2361_v18 = vpop.f32.mrb[26].mxu0  ;;  %v14875_v35 = vld [vmem:[%s22648_s5 + $0x544] ss:$48 sps:$4 sm:$0xff]  }
 0x52a   : > { %v2364_v36 = vmax.f32 %v2359_v17, 1e-30  ;;  %v14533_v37 = vpop.f32.mrb[27].mxu0  ;;  %v14870_v17 = vld [vmem:[%s22648_s5 + $0x3c8] ss:$48 sps:$4 sm:$0xff]  }
 0x52b   : > { %v14878_v18 = vld [vmem:[%s22648_s5 + $0x42c] ss:$48 sps:$4 sm:$0xff]   ;;  %v14876_v37 = vld [vmem:[%s22648_s5 + $0x428] ss:$48 sps:$4 sm:$0xff]  }
 0x52c   : > { %15390 = vrcp.f32 %v2364_v36  ;;  %v14873_v36 = vld [vmem:[%s22648_s5 + $0x540] ss:$48 sps:$4 sm:$0xff]  }
 0x536   : > { %v15391_v38 = vpop.eup %15390 }
 0x537   : > { %v2366_v63 = vpack.c.bf16 %v15391_v38, %v15391_v38  ;;  %v14881_v38 = vld [vmem:[%s22648_s5 + $0x5a4] ss:$48 sps:$4 sm:$0xff]  }
 0x539   : > { %12220 = vmatmul.mubr.msk.bf16.vlgmr.msra.gmra.mrb[36].mxu1 %vm1806_vm6, %v2366_v63  ;;  %12221 = vmatmul.mubr.msk.bf16.vlgmr.msra.gmra.mrb[28].mxu0 %vm1806_vm6, %v2366_v63 }
 0x53a   : > { %14535 = vmatpush3.bf16.msra.mxu1 %v16351_v62  ;;  %4231 = vmatpush1.bf16.msra.mxu0 %v14798_v39  ;;  %v14804_v62 = vld [vmem:[%s22648_s5 + $0xc0] ss:$48 sps:$4 sm:$0xff]   ;;  %v14884_v39 = vld [vmem:[%s22648_s5 + $0x48c] ss:$48 sps:$4 sm:$0xff]  }
 0x53b   : > { %4262 = vmatprep.mubr.bf16.mxu0 %v16355_v42  ;;  %14536 = vmatprep.subr.bf16.mxu1 %v15909_v6 }
 0x53c   : > { %4232 = vmatprep.subr.bf16.mxu0 %v14803_v41  ;;  %14540 = vmatprep.mubr.msk.bf16.mxu1 %vm15910_vm1, %v15909_v6  ;;  %v14882_v41 = vld [vmem:[%s22648_s5 + $0x488] ss:$48 sps:$4 sm:$0xff]   ;;  %vm7274_vm1 = vcmask 781824  }
 0x53e   : > { %14537 = vmatpush3.bf16.msra.mxu1 %v16375_v46  ;;  %4233 = vmatpush1.bf16.msra.mxu0 %v14801_v15  ;;  %v14807_v46 = vld [vmem:[%s22648_s5 + $0x120] ss:$48 sps:$4 sm:$0xff]   ;;  %v14887_v15 = vld [vmem:[%s22648_s5 + $0x604] ss:$48 sps:$4 sm:$0xff]  }
 0x53f   : > { %14538 = vmatprep.subr.bf16.mxu1 %v15909_v6  ;;  %4234 = vmatprep.subr.bf16.mxu0 %v14806_v51  ;;  %v14810_v6 = vld [vmem:[%s22648_s5 + $0x8] ss:$48 sps:$4 sm:$0xff]   ;;  %v14890_v51 = vld [vmem:[%s22648_s5 + $0x4ec] ss:$48 sps:$4 sm:$0xff]  }
 0x542   : > { %14539 = vmatpush3.bf16.msra.mxu1 %v16398_v49  ;;  %4235 = vmatpush1.bf16.msra.mxu0 %v14804_v62  ;;  %v14813_v49 = vld [vmem:[%s22648_s5 + $0x180] ss:$48 sps:$4 sm:$0xff]  }
 0x543   : > { %4236 = vmatprep.subr.bf16.mxu0 %v14809_v55  ;;  %4312 = vmatprep.subr.bf16.mxu1 %v14812_v56  ;;  %v14885_v62 = vld [vmem:[%s22648_s5 + $0x600] ss:$48 sps:$4 sm:$0xff]   ;;  %v14888_v55 = vld [vmem:[%s22648_s5 + $0x4e8] ss:$48 sps:$4 sm:$0xff]   ;;  %v14893_v56 = vld [vmem:[%s22648_s5 + $0x664] ss:$48 sps:$4 sm:$0xff]  }
 0x545   : > { %14541 = vmatmul.mubr.msk.bf16.vlgmr.msra.gmra.mrb[40].mxu1 %vm1806_vm6, %v2366_v63  ;;  %v14879_v63 = vld [vmem:[%s22648_s5 + $0x5a0] ss:$48 sps:$4 sm:$0xff]  }
 0x546   : > { %4237 = vmatpush1.bf16.msra.mxu0 %v14807_v46  ;;  %4313 = vmatpush1.bf16.msra.mxu1 %v14810_v6  ;;  %v14896_v46 = vld [vmem:[%s22648_s5 + $0x54c] ss:$48 sps:$4 sm:$0xff]   ;;  %v14891_v6 = vld [vmem:[%s22648_s5 + $0x660] ss:$48 sps:$4 sm:$0xff]  }
 0x547   : > { %4344 = vmatprep.mubr.bf16.mxu1 %v16355_v42  ;;  %4238 = vmatprep.subr.bf16.mxu0 %v14815_v57  ;;  %v14894_v57 = vld [vmem:[%s22648_s5 + $0x548] ss:$48 sps:$4 sm:$0xff]  }
 0x548   : > { %4314 = vmatprep.subr.bf16.mxu1 %v14818_v58  ;;  %v14899_v58 = vld [vmem:[%s22648_s5 + $0x6c4] ss:$48 sps:$4 sm:$0xff]  }
 0x54a   : > { %4239 = vmatpush1.bf16.msra.mxu0 %v14813_v49  ;;  %4315 = vmatpush1.bf16.msra.mxu1 %v14816_v59  ;;  %v14902_v49 = vld [vmem:[%s22648_s5 + $0x5ac] ss:$48 sps:$4 sm:$0xff]   ;;  %v14897_v59 = vld [vmem:[%s22648_s5 + $0x6c0] ss:$48 sps:$4 sm:$0xff]  }
 0x54b   : > { %4240 = vmatprep.subr.bf16.mxu0 %v14821_v61  ;;  %4316 = vmatprep.subr.bf16.mxu1 %v14824_v0  ;;  %v14900_v61 = vld [vmem:[%s22648_s5 + $0x5a8] ss:$48 sps:$4 sm:$0xff]   ;;  %v14905_v0 = vld [vmem:[%s22648_s5 + $0x724] ss:$48 sps:$4 sm:$0xff]  }
 0x54e   : > { %4241 = vmatpush1.bf16.msra.mxu0 %v14819_v1  ;;  %4317 = vmatpush1.bf16.msra.mxu1 %v14822_v2  ;;  %v14908_v1 = vld [vmem:[%s22648_s5 + $0x60c] ss:$48 sps:$4 sm:$0xff]   ;;  %v14903_v2 = vld [vmem:[%s22648_s5 + $0x720] ss:$48 sps:$4 sm:$0xff]  }
 0x54f   : > { %4242 = vmatprep.subr.bf16.mxu0 %v14827_v52  ;;  %4318 = vmatprep.subr.bf16.mxu1 %v14830_v4  ;;  %v14906_v52 = vld [vmem:[%s22648_s5 + $0x608] ss:$48 sps:$4 sm:$0xff]   ;;  %v14911_v4 = vld [vmem:[%s22648_s5 + $0x784] ss:$48 sps:$4 sm:$0xff]  }
 0x552   : > { %4243 = vmatpush1.bf16.msra.mxu0 %v14825_v54  ;;  %4319 = vmatpush1.bf16.msra.mxu1 %v14828_v5  ;;  %v14914_v54 = vld [vmem:[%s22648_s5 + $0x66c] ss:$48 sps:$4 sm:$0xff]   ;;  %v14909_v5 = vld [vmem:[%s22648_s5 + $0x780] ss:$48 sps:$4 sm:$0xff]  }
 0x553   : > { %4244 = vmatprep.subr.bf16.mxu0 %v14833_v7  ;;  %4320 = vmatprep.subr.bf16.mxu1 %v14836_v8  ;;  %v14912_v7 = vld [vmem:[%s22648_s5 + $0x668] ss:$48 sps:$4 sm:$0xff]   ;;  %v14917_v8 = vld [vmem:[%s22648_s5 + $0x7e4] ss:$48 sps:$4 sm:$0xff]  }
 0x556   : > { %4245 = vmatpush1.bf16.msra.mxu0 %v14831_v9  ;;  %4321 = vmatpush1.bf16.msra.mxu1 %v14834_v12  ;;  %v14920_v9 = vld [vmem:[%s22648_s5 + $0x6cc] ss:$48 sps:$4 sm:$0xff]   ;;  %v14915_v12 = vld [vmem:[%s22648_s5 + $0x7e0] ss:$48 sps:$4 sm:$0xff]  }
 0x557   : > { %4246 = vmatprep.subr.bf16.mxu0 %v14839_v21  ;;  %4322 = vmatprep.subr.bf16.mxu1 %v14842_v22  ;;  %v14918_v21 = vld [vmem:[%s22648_s5 + $0x6c8] ss:$48 sps:$4 sm:$0xff]   ;;  %v14923_v22 = vld [vmem:[%s22648_s5 + $0x844] ss:$48 sps:$4 sm:$0xff]  }
 0x55a   : > { %4247 = vmatpush1.bf16.msra.mxu0 %v14837_v53  ;;  %4323 = vmatpush1.bf16.msra.mxu1 %v14840_v23  ;;  %v14926_v53 = vld [vmem:[%s22648_s5 + $0x72c] ss:$48 sps:$4 sm:$0xff]   ;;  %v14921_v23 = vld [vmem:[%s22648_s5 + $0x840] ss:$48 sps:$4 sm:$0xff]  }
 0x55b   : > { %4248 = vmatprep.subr.bf16.mxu0 %v14845_v24  ;;  %4324 = vmatprep.subr.bf16.mxu1 %v14848_v25  ;;  %v14924_v24 = vld [vmem:[%s22648_s5 + $0x728] ss:$48 sps:$4 sm:$0xff]   ;;  %v14929_v25 = vld [vmem:[%s22648_s5 + $0x8a4] ss:$48 sps:$4 sm:$0xff]  }
 0x55e   : > { %4249 = vmatpush1.bf16.msra.mxu0 %v14843_v26  ;;  %4325 = vmatpush1.bf16.msra.mxu1 %v14846_v27  ;;  %v14932_v26 = vld [vmem:[%s22648_s5 + $0x78c] ss:$48 sps:$4 sm:$0xff]   ;;  %v14927_v27 = vld [vmem:[%s22648_s5 + $0x8a0] ss:$48 sps:$4 sm:$0xff]  }
 0x55f   : > { %4250 = vmatprep.subr.bf16.mxu0 %v14851_v43  ;;  %4326 = vmatprep.subr.bf16.mxu1 %v14854_v45  ;;  %v14930_v43 = vld [vmem:[%s22648_s5 + $0x788] ss:$48 sps:$4 sm:$0xff]   ;;  %v14935_v45 = vld [vmem:[%s22648_s5 + $0x7ec] ss:$48 sps:$4 sm:$0xff]  }
 0x562   : > { %4251 = vmatpush1.bf16.msra.mxu0 %v14849_v47  ;;  %4327 = vmatpush1.bf16.msra.mxu1 %v14852_v48  ;;  %v14938_v47 = vld [vmem:[%s22648_s5 + $0x14] ss:$48 sps:$4 sm:$0xff]   ;;  %v14933_v48 = vld [vmem:[%s22648_s5 + $0x7e8] ss:$48 sps:$4 sm:$0xff]  }
 0x563   : > { %4252 = vmatprep.subr.bf16.mxu0 %v14857_v50  ;;  %4328 = vmatprep.subr.bf16.mxu1 %v14860_v60  ;;  %v14936_v50 = vld [vmem:[%s22648_s5 + $0x10] ss:$48 sps:$4 sm:$0xff]   ;;  %v14941_v60 = vld [vmem:[%s22648_s5 + $0x84c] ss:$48 sps:$4 sm:$0xff]  }
 0x566   : > { %4253 = vmatpush1.bf16.msra.mxu0 %v14855_v29  ;;  %4329 = vmatpush1.bf16.msra.mxu1 %v14858_v11  ;;  %v14944_v29 = vld [vmem:[%s22648_s5 + $0x74] ss:$48 sps:$4 sm:$0xff]   ;;  %v14939_v11 = vld [vmem:[%s22648_s5 + $0x848] ss:$48 sps:$4 sm:$0xff]  }
 0x567   : > { %4254 = vmatprep.subr.bf16.mxu0 %v14863_v30  ;;  %4330 = vmatprep.subr.bf16.mxu1 %v14866_v31  ;;  %v14942_v30 = vld [vmem:[%s22648_s5 + $0x70] ss:$48 sps:$4 sm:$0xff]   ;;  %v14947_v31 = vld [vmem:[%s22648_s5 + $0x8ac] ss:$48 sps:$4 sm:$0xff]  }
 0x56a   : > { %4255 = vmatpush1.bf16.msra.mxu0 %v14861_v32  ;;  %4331 = vmatpush1.bf16.msra.mxu1 %v14864_v14  ;;  %v14950_v32 = vld [vmem:[%s22648_s5 + $0xd4] ss:$48 sps:$4 sm:$0xff]   ;;  %v14945_v14 = vld [vmem:[%s22648_s5 + $0x8a8] ss:$48 sps:$4 sm:$0xff]  }
 0x56b   : > { %4256 = vmatprep.subr.bf16.mxu0 %v14869_v33  ;;  %4332 = vmatprep.subr.bf16.mxu1 %v14872_v16  ;;  %v14948_v33 = vld [vmem:[%s22648_s5 + $0xd0] ss:$48 sps:$4 sm:$0xff]   ;;  %v14953_v16 = vld [vmem:[%s22648_s5 + $0x134] ss:$48 sps:$4 sm:$0xff]  }
 0x56e   : > { %4257 = vmatpush1.bf16.msra.mxu0 %v14867_v34  ;;  %4333 = vmatpush1.bf16.msra.mxu1 %v14870_v17  ;;  %v14956_v34 = vld [vmem:[%s22648_s5 + $0x1c] ss:$48 sps:$4 sm:$0xff]   ;;  %v14951_v17 = vld [vmem:[%s22648_s5 + $0x130] ss:$48 sps:$4 sm:$0xff]  }
 0x56f   : > { %4258 = vmatprep.subr.bf16.mxu0 %v14875_v35  ;;  %4334 = vmatprep.subr.bf16.mxu1 %v14878_v18  ;;  %v14954_v35 = vld [vmem:[%s22648_s5 + $0x18] ss:$48 sps:$4 sm:$0xff]   ;;  %v14959_v18 = vld [vmem:[%s22648_s5 + $0x194] ss:$48 sps:$4 sm:$0xff]  }
 0x572   : > { %4259 = vmatpush1.bf16.msra.mxu0 %v14873_v36  ;;  %4335 = vmatpush1.bf16.msra.mxu1 %v14876_v37  ;;  %v14962_v36 = vld [vmem:[%s22648_s5 + $0x7c] ss:$48 sps:$4 sm:$0xff]   ;;  %v14957_v37 = vld [vmem:[%s22648_s5 + $0x190] ss:$48 sps:$4 sm:$0xff]  }
 0x573   : > { %4260 = vmatprep.subr.bf16.mxu0 %v14881_v38  ;;  %4336 = vmatprep.subr.bf16.mxu1 %v14884_v39  ;;  %v14960_v38 = vld [vmem:[%s22648_s5 + $0x78] ss:$48 sps:$4 sm:$0xff]   ;;  %v14965_v39 = vld [vmem:[%s22648_s5 + $0x1f4] ss:$48 sps:$4 sm:$0xff]  }
 0x576   : > { %4261 = vmatpush1.bf16.msra.mxu0 %v14879_v63  ;;  %4337 = vmatpush1.bf16.msra.mxu1 %v14882_v41  ;;  %v14968_v63 = vld [vmem:[%s22648_s5 + $0xdc] ss:$48 sps:$4 sm:$0xff]   ;;  %v14963_v41 = vld [vmem:[%s22648_s5 + $0x1f0] ss:$48 sps:$4 sm:$0xff]  }
 0x577   : > { %4271 = vmatprep.subr.bf16.mxu0 %v14887_v15  ;;  %4338 = vmatprep.subr.bf16.mxu1 %v14890_v51  ;;  %v14966_v15 = vld [vmem:[%s22648_s5 + $0xd8] ss:$48 sps:$4 sm:$0xff]   ;;  %v14971_v51 = vld [vmem:[%s22648_s5 + $0x254] ss:$48 sps:$4 sm:$0xff]  }
 0x579   : > { %4263 = vmatmul.mubr.bf16.vlgmr.msra.gmra.mrb[32].mxu0 %v16362_v44 }
 0x57a   : > { %4272 = vmatpush1.bf16.msra.mxu0 %v14885_v62  ;;  %4339 = vmatpush1.bf16.msra.mxu1 %v14888_v55  ;;  %v14974_v62 = vld [vmem:[%s22648_s5 + $0x13c] ss:$48 sps:$4 sm:$0xff]   ;;  %v14969_v55 = vld [vmem:[%s22648_s5 + $0x250] ss:$48 sps:$4 sm:$0xff]  }
 0x57b   : > { %4273 = vmatprep.subr.bf16.mxu0 %v14893_v56  ;;  %4340 = vmatprep.subr.bf16.mxu1 %v14896_v46  ;;  %v14972_v56 = vld [vmem:[%s22648_s5 + $0x138] ss:$48 sps:$4 sm:$0xff]   ;;  %v14977_v46 = vld [vmem:[%s22648_s5 + $0x2b4] ss:$48 sps:$4 sm:$0xff]  }
 0x57c   : > { %4303 = vmatprep.mubr.bf16.mxu0 %v22654_v3 }
 0x57e   : > { %4274 = vmatpush1.bf16.msra.mxu0 %v14891_v6  ;;  %4341 = vmatpush1.bf16.msra.mxu1 %v14894_v57  ;;  %v14980_v6 = vld [vmem:[%s22648_s5 + $0x19c] ss:$48 sps:$4 sm:$0xff]   ;;  %v14975_v57 = vld [vmem:[%s22648_s5 + $0x2b0] ss:$48 sps:$4 sm:$0xff]  }
 0x57f   : > { %4275 = vmatprep.subr.bf16.mxu0 %v14899_v58  ;;  %4342 = vmatprep.subr.bf16.mxu1 %v14902_v49  ;;  %v14978_v58 = vld [vmem:[%s22648_s5 + $0x198] ss:$48 sps:$4 sm:$0xff]   ;;  %v14983_v49 = vld [vmem:[%s22648_s5 + $0x314] ss:$48 sps:$4 sm:$0xff]  }
 0x582   : > { %4276 = vmatpush1.bf16.msra.mxu0 %v14897_v59  ;;  %4343 = vmatpush1.bf16.msra.mxu1 %v14900_v61  ;;  %v14986_v59 = vld [vmem:[%s22648_s5 + $0x1fc] ss:$48 sps:$4 sm:$0xff]   ;;  %v14981_v61 = vld [vmem:[%s22648_s5 + $0x310] ss:$48 sps:$4 sm:$0xff]  }
 0x583   : > { %4277 = vmatprep.subr.bf16.mxu0 %v14905_v0  ;;  %4353 = vmatprep.subr.bf16.mxu1 %v14908_v1  ;;  %v14984_v0 = vld [vmem:[%s22648_s5 + $0x1f8] ss:$48 sps:$4 sm:$0xff]   ;;  %v14989_v1 = vld [vmem:[%s22648_s5 + $0x374] ss:$48 sps:$4 sm:$0xff]  }
 0x585   : > { %4345 = vmatmul.mubr.bf16.vlgmr.msra.gmra.mrb[44].mxu1 %v16362_v44 }
 0x586   : > { %4278 = vmatpush1.bf16.msra.mxu0 %v14903_v2  ;;  %4354 = vmatpush1.bf16.msra.mxu1 %v14906_v52  ;;  %v14992_v2 = vld [vmem:[%s22648_s5 + $0x25c] ss:$48 sps:$4 sm:$0xff]   ;;  %v14987_v52 = vld [vmem:[%s22648_s5 + $0x370] ss:$48 sps:$4 sm:$0xff]  }
 0x587   : > { %4279 = vmatprep.subr.bf16.mxu0 %v14911_v4  ;;  %4355 = vmatprep.subr.bf16.mxu1 %v14914_v54  ;;  %v14990_v4 = vld [vmem:[%s22648_s5 + $0x258] ss:$48 sps:$4 sm:$0xff]   ;;  %v14995_v54 = vld [vmem:[%s22648_s5 + $0x3d4] ss:$48 sps:$4 sm:$0xff]  }
 0x588   : > { %4385 = vmatprep.mubr.bf16.mxu1 %v22654_v3 }
 0x58a   : > { %4280 = vmatpush1.bf16.msra.mxu0 %v14909_v5  ;;  %4356 = vmatpush1.bf16.msra.mxu1 %v14912_v7  ;;  %v14998_v5 = vld [vmem:[%s22648_s5 + $0x2bc] ss:$48 sps:$4 sm:$0xff]   ;;  %v14993_v7 = vld [vmem:[%s22648_s5 + $0x3d0] ss:$48 sps:$4 sm:$0xff]  }
 0x58b   : > { %4281 = vmatprep.subr.bf16.mxu0 %v14917_v8  ;;  %4357 = vmatprep.subr.bf16.mxu1 %v14920_v9  ;;  %v14996_v8 = vld [vmem:[%s22648_s5 + $0x2b8] ss:$48 sps:$4 sm:$0xff]   ;;  %v15001_v9 = vld [vmem:[%s22648_s5 + $0x434] ss:$48 sps:$4 sm:$0xff]  }
 0x58e   : > { %4282 = vmatpush1.bf16.msra.mxu0 %v14915_v12  ;;  %4358 = vmatpush1.bf16.msra.mxu1 %v14918_v21  ;;  %v15004_v12 = vld [vmem:[%s22648_s5 + $0x31c] ss:$48 sps:$4 sm:$0xff]   ;;  %v14999_v21 = vld [vmem:[%s22648_s5 + $0x430] ss:$48 sps:$4 sm:$0xff]  }
 0x58f   : > { %4283 = vmatprep.subr.bf16.mxu0 %v14923_v22  ;;  %4359 = vmatprep.subr.bf16.mxu1 %v14926_v53  ;;  %v15002_v22 = vld [vmem:[%s22648_s5 + $0x318] ss:$48 sps:$4 sm:$0xff]   ;;  %v15007_v53 = vld [vmem:[%s22648_s5 + $0x494] ss:$48 sps:$4 sm:$0xff]  }
 0x592   : > { %4284 = vmatpush1.bf16.msra.mxu0 %v14921_v23  ;;  %4360 = vmatpush1.bf16.msra.mxu1 %v14924_v24  ;;  %v15010_v23 = vld [vmem:[%s22648_s5 + $0x37c] ss:$48 sps:$4 sm:$0xff]   ;;  %v15005_v24 = vld [vmem:[%s22648_s5 + $0x490] ss:$48 sps:$4 sm:$0xff]  }
 0x593   : > { %4285 = vmatprep.subr.bf16.mxu0 %v14929_v25  ;;  %4361 = vmatprep.subr.bf16.mxu1 %v14932_v26  ;;  %v15008_v25 = vld [vmem:[%s22648_s5 + $0x378] ss:$48 sps:$4 sm:$0xff]   ;;  %v15013_v26 = vld [vmem:[%s22648_s5 + $0x4f4] ss:$48 sps:$4 sm:$0xff]  }
 0x596   : > { %4286 = vmatpush1.bf16.msra.mxu0 %v14927_v27  ;;  %4362 = vmatpush1.bf16.msra.mxu1 %v14930_v43  ;;  %v15016_v27 = vld [vmem:[%s22648_s5 + $0x3dc] ss:$48 sps:$4 sm:$0xff]   ;;  %v15011_v43 = vld [vmem:[%s22648_s5 + $0x4f0] ss:$48 sps:$4 sm:$0xff]  }
 0x597   : > { %4363 = vmatprep.subr.bf16.mxu1 %v14935_v45  ;;  %4394 = vmatprep.subr.bf16.mxu0 %v14938_v47  ;;  %v15014_v45 = vld [vmem:[%s22648_s5 + $0x3d8] ss:$48 sps:$4 sm:$0xff]   ;;  %v15019_v47 = vld [vmem:[%s22648_s5 + $0x554] ss:$48 sps:$4 sm:$0xff]  }
 0x599   : > { %4304 = vmatmul.mubr.bf16.vlgmr.msra.gmra.mrb[32].mxu0 %v16353_v40 }
 0x59a   : > { %4364 = vmatpush1.bf16.msra.mxu1 %v14933_v48  ;;  %4395 = vmatpush1.bf16.msra.mxu0 %v14936_v50  ;;  %v15022_v48 = vld [vmem:[%s22648_s5 + $0x43c] ss:$48 sps:$4 sm:$0xff]   ;;  %v15017_v50 = vld [vmem:[%s22648_s5 + $0x550] ss:$48 sps:$4 sm:$0xff]  }
 0x59b   : > { %4426 = vmatprep.mubr.bf16.mxu0 %v16355_v42  ;;  %4365 = vmatprep.subr.bf16.mxu1 %v14941_v60  ;;  %v15020_v60 = vld [vmem:[%s22648_s5 + $0x438] ss:$48 sps:$4 sm:$0xff]  }
 0x59c   : > { %4396 = vmatprep.subr.bf16.mxu0 %v14944_v29  ;;  %v15025_v29 = vld [vmem:[%s22648_s5 + $0x5b4] ss:$48 sps:$4 sm:$0xff]  }
 0x59e   : > { %4366 = vmatpush1.bf16.msra.mxu1 %v14939_v11  ;;  %4397 = vmatpush1.bf16.msra.mxu0 %v14942_v30  ;;  %v15028_v11 = vld [vmem:[%s22648_s5 + $0x49c] ss:$48 sps:$4 sm:$0xff]   ;;  %v15023_v30 = vld [vmem:[%s22648_s5 + $0x5b0] ss:$48 sps:$4 sm:$0xff]  }
 0x59f   : > { %4367 = vmatprep.subr.bf16.mxu1 %v14947_v31  ;;  %4398 = vmatprep.subr.bf16.mxu0 %v14950_v32  ;;  %v15026_v31 = vld [vmem:[%s22648_s5 + $0x498] ss:$48 sps:$4 sm:$0xff]   ;;  %v15031_v32 = vld [vmem:[%s22648_s5 + $0x614] ss:$48 sps:$4 sm:$0xff]  }
 0x5a2   : > { %4368 = vmatpush1.bf16.msra.mxu1 %v14945_v14  ;;  %4399 = vmatpush1.bf16.msra.mxu0 %v14948_v33  ;;  %v15034_v14 = vld [vmem:[%s22648_s5 + $0x4fc] ss:$48 sps:$4 sm:$0xff]   ;;  %v15029_v33 = vld [vmem:[%s22648_s5 + $0x610] ss:$48 sps:$4 sm:$0xff]  }
 0x5a3   : > { %4400 = vmatprep.subr.bf16.mxu0 %v14953_v16  ;;  %4476 = vmatprep.subr.bf16.mxu1 %v14956_v34  ;;  %v15032_v16 = vld [vmem:[%s22648_s5 + $0x4f8] ss:$48 sps:$4 sm:$0xff]   ;;  %v15037_v34 = vld [vmem:[%s22648_s5 + $0x674] ss:$48 sps:$4 sm:$0xff]  }
 0x5a5   : > { %4386 = vmatmul.mubr.bf16.vlgmr.msra.gmra.mrb[44].mxu1 %v16353_v40 }
 0x5a6   : > { %4401 = vmatpush1.bf16.msra.mxu0 %v14951_v17  ;;  %4477 = vmatpush1.bf16.msra.mxu1 %v14954_v35  ;;  %v15040_v17 = vld [vmem:[%s22648_s5 + $0x55c] ss:$48 sps:$4 sm:$0xff]   ;;  %v15035_v35 = vld [vmem:[%s22648_s5 + $0x670] ss:$48 sps:$4 sm:$0xff]  }
 0x5a7   : > { %4508 = vmatprep.mubr.bf16.mxu1 %v16355_v42  ;;  %4402 = vmatprep.subr.bf16.mxu0 %v14959_v18  ;;  %v15038_v18 = vld [vmem:[%s22648_s5 + $0x558] ss:$48 sps:$4 sm:$0xff]  }
 0x5a8   : > { %4478 = vmatprep.subr.bf16.mxu1 %v14962_v36  ;;  %v15043_v36 = vld [vmem:[%s22648_s5 + $0x6d4] ss:$48 sps:$4 sm:$0xff]  }
 0x5aa   : > { %4403 = vmatpush1.bf16.msra.mxu0 %v14957_v37  ;;  %4479 = vmatpush1.bf16.msra.mxu1 %v14960_v38  ;;  %v15046_v37 = vld [vmem:[%s22648_s5 + $0x5bc] ss:$48 sps:$4 sm:$0xff]   ;;  %v15041_v38 = vld [vmem:[%s22648_s5 + $0x6d0] ss:$48 sps:$4 sm:$0xff]  }
 0x5ab   : > { %4404 = vmatprep.subr.bf16.mxu0 %v14965_v39  ;;  %4480 = vmatprep.subr.bf16.mxu1 %v14968_v63  ;;  %v15044_v39 = vld [vmem:[%s22648_s5 + $0x5b8] ss:$48 sps:$4 sm:$0xff]   ;;  %v15049_v63 = vld [vmem:[%s22648_s5 + $0x734] ss:$48 sps:$4 sm:$0xff]  }
 0x5ae   : > { %4405 = vmatpush1.bf16.msra.mxu0 %v14963_v41  ;;  %4481 = vmatpush1.bf16.msra.mxu1 %v14966_v15  ;;  %v15052_v41 = vld [vmem:[%s22648_s5 + $0x61c] ss:$48 sps:$4 sm:$0xff]   ;;  %v15047_v15 = vld [vmem:[%s22648_s5 + $0x730] ss:$48 sps:$4 sm:$0xff]  }
 0x5af   : > { %4406 = vmatprep.subr.bf16.mxu0 %v14971_v51  ;;  %4482 = vmatprep.subr.bf16.mxu1 %v14974_v62  ;;  %v15050_v51 = vld [vmem:[%s22648_s5 + $0x618] ss:$48 sps:$4 sm:$0xff]   ;;  %v15055_v62 = vld [vmem:[%s22648_s5 + $0x794] ss:$48 sps:$4 sm:$0xff]  }
 0x5b2   : > { %4407 = vmatpush1.bf16.msra.mxu0 %v14969_v55  ;;  %4483 = vmatpush1.bf16.msra.mxu1 %v14972_v56  ;;  %v15058_v55 = vld [vmem:[%s22648_s5 + $0x67c] ss:$48 sps:$4 sm:$0xff]   ;;  %v15053_v56 = vld [vmem:[%s22648_s5 + $0x790] ss:$48 sps:$4 sm:$0xff]  }
 0x5b3   : > { %4408 = vmatprep.subr.bf16.mxu0 %v14977_v46  ;;  %4484 = vmatprep.subr.bf16.mxu1 %v14980_v6  ;;  %v15056_v46 = vld [vmem:[%s22648_s5 + $0x678] ss:$48 sps:$4 sm:$0xff]   ;;  %v15061_v6 = vld [vmem:[%s22648_s5 + $0x7f4] ss:$48 sps:$4 sm:$0xff]  }
 0x5b6   : > { %4409 = vmatpush1.bf16.msra.mxu0 %v14975_v57  ;;  %4485 = vmatpush1.bf16.msra.mxu1 %v14978_v58  ;;  %v15064_v57 = vld [vmem:[%s22648_s5 + $0x6dc] ss:$48 sps:$4 sm:$0xff]   ;;  %v15059_v58 = vld [vmem:[%s22648_s5 + $0x7f0] ss:$48 sps:$4 sm:$0xff]  }
 0x5b7   : > { %4410 = vmatprep.subr.bf16.mxu0 %v14983_v49  ;;  %4486 = vmatprep.subr.bf16.mxu1 %v14986_v59  ;;  %v15062_v49 = vld [vmem:[%s22648_s5 + $0x6d8] ss:$48 sps:$4 sm:$0xff]   ;;  %v15067_v59 = vld [vmem:[%s22648_s5 + $0x854] ss:$48 sps:$4 sm:$0xff]  }
 0x5ba   : > { %4411 = vmatpush1.bf16.msra.mxu0 %v14981_v61  ;;  %4487 = vmatpush1.bf16.msra.mxu1 %v14984_v0  ;;  %v15070_v61 = vld [vmem:[%s22648_s5 + $0x73c] ss:$48 sps:$4 sm:$0xff]   ;;  %v15065_v0 = vld [vmem:[%s22648_s5 + $0x850] ss:$48 sps:$4 sm:$0xff]  }
 0x5bb   : > { %4412 = vmatprep.subr.bf16.mxu0 %v14989_v1  ;;  %4488 = vmatprep.subr.bf16.mxu1 %v14992_v2  ;;  %v15068_v1 = vld [vmem:[%s22648_s5 + $0x738] ss:$48 sps:$4 sm:$0xff]   ;;  %v15073_v2 = vld [vmem:[%s22648_s5 + $0x8b4] ss:$48 sps:$4 sm:$0xff]  }
 0x5be   : > { %4413 = vmatpush1.bf16.msra.mxu0 %v14987_v52  ;;  %4489 = vmatpush1.bf16.msra.mxu1 %v14990_v4  ;;  %v15076_v52 = vld [vmem:[%s22648_s5 + $0x79c] ss:$48 sps:$4 sm:$0xff]   ;;  %v15071_v4 = vld [vmem:[%s22648_s5 + $0x8b0] ss:$48 sps:$4 sm:$0xff]  }
 0x5bf   : > { %4414 = vmatprep.subr.bf16.mxu0 %v14995_v54  ;;  %4490 = vmatprep.subr.bf16.mxu1 %v14998_v5  ;;  %v15074_v54 = vld [vmem:[%s22648_s5 + $0x798] ss:$48 sps:$4 sm:$0xff]   ;;  %v15079_v5 = vld [vmem:[%s22648_s5 + $0x7fc] ss:$48 sps:$4 sm:$0xff]  }
 0x5c2   : > { %4415 = vmatpush1.bf16.msra.mxu0 %v14993_v7  ;;  %4491 = vmatpush1.bf16.msra.mxu1 %v14996_v8  ;;  %v15082_v7 = vld [vmem:[%s22648_s5 + $0x24] ss:$48 sps:$4 sm:$0xff]   ;;  %v15077_v8 = vld [vmem:[%s22648_s5 + $0x7f8] ss:$48 sps:$4 sm:$0xff]  }
 0x5c3   : > { %4416 = vmatprep.subr.bf16.mxu0 %v15001_v9  ;;  %4492 = vmatprep.subr.bf16.mxu1 %v15004_v12  ;;  %v15080_v9 = vld [vmem:[%s22648_s5 + $0x20] ss:$48 sps:$4 sm:$0xff]   ;;  %v15085_v12 = vld [vmem:[%s22648_s5 + $0x85c] ss:$48 sps:$4 sm:$0xff]  }
 0x5c6   : > { %4417 = vmatpush1.bf16.msra.mxu0 %v14999_v21  ;;  %4493 = vmatpush1.bf16.msra.mxu1 %v15002_v22  ;;  %v15088_v21 = vld [vmem:[%s22648_s5 + $0x84] ss:$48 sps:$4 sm:$0xff]   ;;  %v15083_v22 = vld [vmem:[%s22648_s5 + $0x858] ss:$48 sps:$4 sm:$0xff]  }
 0x5c7   : > { %4418 = vmatprep.subr.bf16.mxu0 %v15007_v53  ;;  %4494 = vmatprep.subr.bf16.mxu1 %v15010_v23  ;;  %v15086_v53 = vld [vmem:[%s22648_s5 + $0x80] ss:$48 sps:$4 sm:$0xff]   ;;  %v15091_v23 = vld [vmem:[%s22648_s5 + $0x8bc] ss:$48 sps:$4 sm:$0xff]  }
 0x5ca   : > { %4419 = vmatpush1.bf16.msra.mxu0 %v15005_v24  ;;  %4495 = vmatpush1.bf16.msra.mxu1 %v15008_v25  ;;  %v15094_v24 = vld [vmem:[%s22648_s5 + $0xe4] ss:$48 sps:$4 sm:$0xff]   ;;  %v15089_v25 = vld [vmem:[%s22648_s5 + $0x8b8] ss:$48 sps:$4 sm:$0xff]  }
 0x5cb   : > { %4420 = vmatprep.subr.bf16.mxu0 %v15013_v26  ;;  %4496 = vmatprep.subr.bf16.mxu1 %v15016_v27  ;;  %v15092_v26 = vld [vmem:[%s22648_s5 + $0xe0] ss:$48 sps:$4 sm:$0xff]   ;;  %v15097_v27 = vld [vmem:[%s22648_s5 + $0x144] ss:$48 sps:$4 sm:$0xff]  }
 0x5ce   : > { %4421 = vmatpush1.bf16.msra.mxu0 %v15011_v43  ;;  %4497 = vmatpush1.bf16.msra.mxu1 %v15014_v45  ;;  %v15100_v43 = vld [vmem:[%s22648_s5 + $0x2c] ss:$48 sps:$4 sm:$0xff]   ;;  %v15095_v45 = vld [vmem:[%s22648_s5 + $0x140] ss:$48 sps:$4 sm:$0xff]  }
 0x5cf   : > { %4422 = vmatprep.subr.bf16.mxu0 %v15019_v47  ;;  %4498 = vmatprep.subr.bf16.mxu1 %v15022_v48  ;;  %v15098_v47 = vld [vmem:[%s22648_s5 + $0x28] ss:$48 sps:$4 sm:$0xff]   ;;  %v15103_v48 = vld [vmem:[%s22648_s5 + $0x1a4] ss:$48 sps:$4 sm:$0xff]  }
 0x5d2   : > { %4423 = vmatpush1.bf16.msra.mxu0 %v15017_v50  ;;  %4499 = vmatpush1.bf16.msra.mxu1 %v15020_v60  ;;  %v15106_v50 = vld [vmem:[%s22648_s5 + $0x8c] ss:$48 sps:$4 sm:$0xff]   ;;  %v15101_v60 = vld [vmem:[%s22648_s5 + $0x1a0] ss:$48 sps:$4 sm:$0xff]  }
 0x5d3   : > { %4424 = vmatprep.subr.bf16.mxu0 %v15025_v29  ;;  %4500 = vmatprep.subr.bf16.mxu1 %v15028_v11  ;;  %v15104_v29 = vld [vmem:[%s22648_s5 + $0x88] ss:$48 sps:$4 sm:$0xff]   ;;  %v15109_v11 = vld [vmem:[%s22648_s5 + $0x204] ss:$48 sps:$4 sm:$0xff]  }
 0x5d6   : > { %4425 = vmatpush1.bf16.msra.mxu0 %v15023_v30  ;;  %4501 = vmatpush1.bf16.msra.mxu1 %v15026_v31  ;;  %v15112_v30 = vld [vmem:[%s22648_s5 + $0xec] ss:$48 sps:$4 sm:$0xff]   ;;  %v15107_v31 = vld [vmem:[%s22648_s5 + $0x200] ss:$48 sps:$4 sm:$0xff]  }
 0x5d7   : > { %4435 = vmatprep.subr.bf16.mxu0 %v15031_v32  ;;  %4502 = vmatprep.subr.bf16.mxu1 %v15034_v14  ;;  %v15115_v32 = vld [vmem:[%s22648_s5 + $0x264] ss:$48 sps:$4 sm:$0xff]   ;;  %v15118_v14 = vld [vmem:[%s22648_s5 + $0x14c] ss:$48 sps:$4 sm:$0xff]  }
 0x5d9   : > { %4427 = vmatmul.mubr.bf16.vlgmr.msra.gmra.mrb[36].mxu0 %v16362_v44 }
 0x5da   : > { %4436 = vmatpush1.bf16.msra.mxu0 %v15029_v33  ;;  %4503 = vmatpush1.bf16.msra.mxu1 %v15032_v16 }
 0x5db   : > { %4437 = vmatprep.subr.bf16.mxu0 %v15037_v34  ;;  %4504 = vmatprep.subr.bf16.mxu1 %v15040_v17 }
 0x5dc   : > { %4467 = vmatprep.mubr.bf16.mxu0 %v22654_v3 }
 0x5de   : > { %4438 = vmatpush1.bf16.msra.mxu0 %v15035_v35  ;;  %4505 = vmatpush1.bf16.msra.mxu1 %v15038_v18  ;;  %v15113_v18 = vld [vmem:[%s22648_s5 + $0x260] ss:$48 sps:$4 sm:$0xff]  }
 0x5df   : > { %4439 = vmatprep.subr.bf16.mxu0 %v15043_v36  ;;  %4506 = vmatprep.subr.bf16.mxu1 %v15046_v37 }
 0x5e2   : > { %4440 = vmatpush1.bf16.msra.mxu0 %v15041_v38  ;;  %4507 = vmatpush1.bf16.msra.mxu1 %v15044_v39  ;;  %v15116_v38 = vld [vmem:[%s22648_s5 + $0x148] ss:$48 sps:$4 sm:$0xff]  }
 0x5e3   : > { %4441 = vmatprep.subr.bf16.mxu0 %v15049_v63  ;;  %4517 = vmatprep.subr.bf16.mxu1 %v15052_v41 }
 0x5e5   : > { %4509 = vmatmul.mubr.bf16.vlgmr.msra.gmra.mrb[48].mxu1 %v16362_v44 }
 0x5e6   : > { %4442 = vmatpush1.bf16.msra.mxu0 %v15047_v15  ;;  %4518 = vmatpush1.bf16.msra.mxu1 %v15050_v51  ;;  %v15121_v51 = vld [vmem:[%s22648_s5 + $0x2c4] ss:$48 sps:$4 sm:$0xff]  }
 0x5e7   : > { %4443 = vmatprep.subr.bf16.mxu0 %v15055_v62  ;;  %4519 = vmatprep.subr.bf16.mxu1 %v15058_v55  ;;  %v15124_v62 = vld [vmem:[%s22648_s5 + $0x1ac] ss:$48 sps:$4 sm:$0xff]  }
 0x5e8   : > { %4549 = vmatprep.mubr.bf16.mxu1 %v22654_v3 }
 0x5ea   : > { %4444 = vmatpush1.bf16.msra.mxu0 %v15053_v56  ;;  %4520 = vmatpush1.bf16.msra.mxu1 %v15056_v46 }
 0x5eb   : > { %4445 = vmatprep.subr.bf16.mxu0 %v15061_v6  ;;  %4521 = vmatprep.subr.bf16.mxu1 %v15064_v57  ;;  %v15127_v6 = vld [vmem:[%s22648_s5 + $0x324] ss:$48 sps:$4 sm:$0xff]   ;;  %v15130_v57 = vld [vmem:[%s22648_s5 + $0x20c] ss:$48 sps:$4 sm:$0xff]  }
 0x5ee   : > { %4446 = vmatpush1.bf16.msra.mxu0 %v15059_v58  ;;  %4522 = vmatpush1.bf16.msra.mxu1 %v15062_v49  ;;  %v15128_v58 = vld [vmem:[%s22648_s5 + $0x208] ss:$48 sps:$4 sm:$0xff]  }
 0x5ef   : > { %4447 = vmatprep.subr.bf16.mxu0 %v15067_v59  ;;  %4523 = vmatprep.subr.bf16.mxu1 %v15070_v61  ;;  %v15133_v59 = vld [vmem:[%s22648_s5 + $0x384] ss:$48 sps:$4 sm:$0xff]   ;;  %v15136_v61 = vld [vmem:[%s22648_s5 + $0x26c] ss:$48 sps:$4 sm:$0xff]  }
 0x5f2   : > { %4448 = vmatpush1.bf16.msra.mxu0 %v15065_v0  ;;  %4524 = vmatpush1.bf16.msra.mxu1 %v15068_v1 }
 0x5f3   : > { %4449 = vmatprep.subr.bf16.mxu0 %v15073_v2  ;;  %4525 = vmatprep.subr.bf16.mxu1 %v15076_v52 }
 0x5f6   : > { %4450 = vmatpush1.bf16.msra.mxu0 %v15071_v4  ;;  %4526 = vmatpush1.bf16.msra.mxu1 %v15074_v54  ;;  %v15131_v4 = vld [vmem:[%s22648_s5 + $0x380] ss:$48 sps:$4 sm:$0xff]   ;;  %v15134_v54 = vld [vmem:[%s22648_s5 + $0x268] ss:$48 sps:$4 sm:$0xff]  }
 0x5f7   : > { %4527 = vmatprep.subr.bf16.mxu1 %v15079_v5  ;;  %4558 = vmatprep.subr.bf16.mxu0 %v15082_v7  ;;  %v15139_v7 = vld [vmem:[%s22648_s5 + $0x3e4] ss:$48 sps:$4 sm:$0xff]  }
 0x5f9   : > { %4468 = vmatmul.mubr.bf16.vlgmr.msra.gmra.mrb[36].mxu0 %v16353_v40 }
 0x5fa   : > { %4528 = vmatpush1.bf16.msra.mxu1 %v15077_v8  ;;  %4559 = vmatpush1.bf16.msra.mxu0 %v15080_v9  ;;  %v15142_v8 = vld [vmem:[%s22648_s5 + $0x2cc] ss:$48 sps:$4 sm:$0xff]   ;;  %v15137_v9 = vld [vmem:[%s22648_s5 + $0x3e0] ss:$48 sps:$4 sm:$0xff]  }
 0x5fb   : > { %4590 = vmatprep.mubr.bf16.mxu0 %v16355_v42  ;;  %4529 = vmatprep.subr.bf16.mxu1 %v15085_v12  ;;  %v15140_v12 = vld [vmem:[%s22648_s5 + $0x2c8] ss:$48 sps:$4 sm:$0xff]  }
 0x5fc   : > { %4560 = vmatprep.subr.bf16.mxu0 %v15088_v21  ;;  %v15145_v21 = vld [vmem:[%s22648_s5 + $0x444] ss:$48 sps:$4 sm:$0xff]  }
 0x5fe   : > { %4530 = vmatpush1.bf16.msra.mxu1 %v15083_v22  ;;  %4561 = vmatpush1.bf16.msra.mxu0 %v15086_v53  ;;  %v15148_v22 = vld [vmem:[%s22648_s5 + $0x32c] ss:$48 sps:$4 sm:$0xff]   ;;  %v15143_v53 = vld [vmem:[%s22648_s5 + $0x440] ss:$48 sps:$4 sm:$0xff]  }
 0x5ff   : > { %4531 = vmatprep.subr.bf16.mxu1 %v15091_v23  ;;  %4562 = vmatprep.subr.bf16.mxu0 %v15094_v24  ;;  %v15146_v23 = vld [vmem:[%s22648_s5 + $0x328] ss:$48 sps:$4 sm:$0xff]   ;;  %v15151_v24 = vld [vmem:[%s22648_s5 + $0x4a4] ss:$48 sps:$4 sm:$0xff]  }
 0x602   : > { %4532 = vmatpush1.bf16.msra.mxu1 %v15089_v25  ;;  %4563 = vmatpush1.bf16.msra.mxu0 %v15092_v26  ;;  %v15154_v25 = vld [vmem:[%s22648_s5 + $0x38c] ss:$48 sps:$4 sm:$0xff]   ;;  %v15149_v26 = vld [vmem:[%s22648_s5 + $0x4a0] ss:$48 sps:$4 sm:$0xff]  }
 0x603   : > { %4564 = vmatprep.subr.bf16.mxu0 %v15097_v27  ;;  %4640 = vmatprep.subr.bf16.mxu1 %v15100_v43  ;;  %v15152_v27 = vld [vmem:[%s22648_s5 + $0x388] ss:$48 sps:$4 sm:$0xff]   ;;  %v15157_v43 = vld [vmem:[%s22648_s5 + $0x504] ss:$48 sps:$4 sm:$0xff]  }
 0x605   : > { %4550 = vmatmul.mubr.bf16.vlgmr.msra.gmra.mrb[48].mxu1 %v16353_v40 }
 0x606   : > { %4565 = vmatpush1.bf16.msra.mxu0 %v15095_v45  ;;  %4641 = vmatpush1.bf16.msra.mxu1 %v15098_v47  ;;  %v15160_v45 = vld [vmem:[%s22648_s5 + $0x3ec] ss:$48 sps:$4 sm:$0xff]   ;;  %v15155_v47 = vld [vmem:[%s22648_s5 + $0x500] ss:$48 sps:$4 sm:$0xff]  }
 0x607   : > { %4672 = vmatprep.mubr.bf16.mxu1 %v16355_v42  ;;  %4566 = vmatprep.subr.bf16.mxu0 %v15103_v48  ;;  %v15110_v42 = vld [vmem:[%s22648_s5 + $0xe8] ss:$48 sps:$4 sm:$0xff]  }
 0x608   : > { %4642 = vmatprep.subr.bf16.mxu1 %v15106_v50  ;;  %v15158_v48 = vld [vmem:[%s22648_s5 + $0x3e8] ss:$48 sps:$4 sm:$0xff]   ;;  %v15163_v50 = vld [vmem:[%s22648_s5 + $0x564] ss:$48 sps:$4 sm:$0xff]  }
 0x60a   : > { %4567 = vmatpush1.bf16.msra.mxu0 %v15101_v60  ;;  %4643 = vmatpush1.bf16.msra.mxu1 %v15104_v29  ;;  %v15166_v60 = vld [vmem:[%s22648_s5 + $0x44c] ss:$48 sps:$4 sm:$0xff]   ;;  %v15161_v29 = vld [vmem:[%s22648_s5 + $0x560] ss:$48 sps:$4 sm:$0xff]  }
 0x60b   : > { %4568 = vmatprep.subr.bf16.mxu0 %v15109_v11  ;;  %4644 = vmatprep.subr.bf16.mxu1 %v15112_v30  ;;  %v15164_v11 = vld [vmem:[%s22648_s5 + $0x448] ss:$48 sps:$4 sm:$0xff]   ;;  %v15169_v30 = vld [vmem:[%s22648_s5 + $0x5c4] ss:$48 sps:$4 sm:$0xff]  }
 0x60c   : > { %v2404_v33 = vpop.f32.mrb[36].mxu1  ;;  %v2445_v16 = vpop.f32.mrb[28].mxu0 }
 0x60d   : > { %v2492_v34 = vmul.f32 %v16631_v10, %v2404_v33  ;;  %v2406_v17 = vpop.f32.mrb[37].mxu1  ;;  %v2447_v35 = vpop.f32.mrb[29].mxu0  ;;  %v2494_v63 = vmul.f32 %v16633_v13, %v2445_v16  ;;  %v15119_v13 = vld [vmem:[%s22648_s5 + $0x2c0] ss:$48 sps:$4 sm:$0xff]   ;;  %v15178_v33 = vld [vmem:[%s22648_s5 + $0x50c] ss:$48 sps:$4 sm:$0xff]  }
 0x60e   : > { %4569 = vmatpush1.bf16.msra.mxu0 %v15107_v31  ;;  %4645 = vmatpush1.bf16.msra.mxu1 %v15110_v42  ;;  %v2408_v36 = vpop.f32.mrb[38].mxu1  ;;  %v2449_v37 = vpop.f32.mrb[30].mxu0  ;;  %v2493_v10 = vmul.f32 %v16635_v19, %v2406_v17  ;;  %v15122_v19 = vld [vmem:[%s22648_s5 + $0x1a8] ss:$48 sps:$4 sm:$0xff]   ;;  %v2495_v56 = vmul.f32 %v16637_v20, %v2447_v35  ;;  %v15125_v20 = vld [vmem:[%s22648_s5 + $0x320] ss:$48 sps:$4 sm:$0xff]  }
 0x60f   : > { %v17353_v39 = vpack.c.bf16 %v2492_v34, %v2492_v34  ;;  %v2409_v41 = vpop.f32.mrb[39].mxu1  ;;  %v2450_v15 = vpop.f32.mrb[31].mxu0  ;;  %4570 = vmatprep.subr.bf16.mxu0 %v15115_v32  ;;  %4646 = vmatprep.subr.bf16.mxu1 %v15118_v14  ;;  %v2499_v46 = vpack.c.bf16 %v2494_v63, %v2494_v63  ;;  %v15172_v31 = vld [vmem:[%s22648_s5 + $0x4ac] ss:$48 sps:$4 sm:$0xff]   ;;  %v15167_v42 = vld [vmem:[%s22648_s5 + $0x5c0] ss:$48 sps:$4 sm:$0xff]  }
 0x610   : > { %v2498_v55 = vpack.c.bf16 %v2493_v10, %v2493_v10  ;;  %v17387_v49 = vpack.c.bf16 %v2495_v56, %v2495_v56  ;;  %v15170_v32 = vld [vmem:[%s22648_s5 + $0x4a8] ss:$48 sps:$4 sm:$0xff]   ;;  %v15175_v14 = vld [vmem:[%s22648_s5 + $0x624] ss:$48 sps:$4 sm:$0xff]   ;;  %v15173_v16 = vld [vmem:[%s22648_s5 + $0x620] ss:$48 sps:$4 sm:$0xff]  }
 0x611   : > { %6748 = vrot.lane.b32.xlu1 %v17353_v39, %s15911_s11  ;;  %6223 = vrot.lane.b32.xlu0 %v17353_v39, %s15912_s12  ;;  %v15176_v34 = vld [vmem:[%s22648_s5 + $0x508] ss:$48 sps:$4 sm:$0xff]   ;;  %v15181_v17 = vld [vmem:[%s22648_s5 + $0x684] ss:$48 sps:$4 sm:$0xff]  }
 0x612   : > { %4571 = vmatpush1.bf16.msra.mxu0 %v15113_v18  ;;  %4647 = vmatpush1.bf16.msra.mxu1 %v15116_v38  ;;  %23406 = vst [vmem:[#allocation2_spill] sm:$0xff] %v17387_v49  ;;  %v15184_v35 = vld [vmem:[%s22648_s5 + $0x56c] ss:$48 sps:$4 sm:$0xff]   ;;  %v15179_v18 = vld [vmem:[%s22648_s5 + $0x680] ss:$48 sps:$4 sm:$0xff]  }
 0x613   : > { %4572 = vmatprep.subr.bf16.mxu0 %v15121_v51  ;;  %4648 = vmatprep.subr.bf16.mxu1 %v15124_v62  ;;  %v15182_v36 = vld [vmem:[%s22648_s5 + $0x568] ss:$48 sps:$4 sm:$0xff]   ;;  %v15187_v37 = vld [vmem:[%s22648_s5 + $0x6e4] ss:$48 sps:$4 sm:$0xff]   ;;  %v15190_v38 = vld [vmem:[%s22648_s5 + $0x5cc] ss:$48 sps:$4 sm:$0xff]  }
 0x614   : > { %v15185_v63 = vld [vmem:[%s22648_s5 + $0x6e0] ss:$48 sps:$4 sm:$0xff]   ;;  %v15188_v10 = vld [vmem:[%s22648_s5 + $0x5c8] ss:$48 sps:$4 sm:$0xff]   ;;  %v15193_v41 = vld [vmem:[%s22648_s5 + $0x744] ss:$48 sps:$4 sm:$0xff]  }
 0x615   : > { %9368 = vrot.lane.b32.xlu0 %v2499_v46, %s15913_s23  ;;  %6750 = vrot.lane.b32.xlu1 %v2498_v55, %s15911_s11  ;;  %v15196_v15 = vld [vmem:[%s22648_s5 + $0x62c] ss:$48 sps:$4 sm:$0xff]   ;;  %v15191_v51 = vld [vmem:[%s22648_s5 + $0x740] ss:$48 sps:$4 sm:$0xff]  }
 0x616   : > { %4573 = vmatpush1.bf16.msra.mxu0 %v15119_v13  ;;  %4649 = vmatpush1.bf16.msra.mxu1 %v15122_v19  ;;  %v15194_v62 = vld [vmem:[%s22648_s5 + $0x628] ss:$48 sps:$4 sm:$0xff]   ;;  %v15199_v13 = vld [vmem:[%s22648_s5 + $0x7a4] ss:$48 sps:$4 sm:$0xff]   ;;  %v15202_v19 = vld [vmem:[%s22648_s5 + $0x68c] ss:$48 sps:$4 sm:$0xff]  }
 0x617   : > { %4574 = vmatprep.subr.bf16.mxu0 %v15127_v6  ;;  %4650 = vmatprep.subr.bf16.mxu1 %v15130_v57  ;;  %v15200_v56 = vld [vmem:[%s22648_s5 + $0x688] ss:$48 sps:$4 sm:$0xff]   ;;  %v15203_v6 = vld [vmem:[%s22648_s5 + $0x800] ss:$48 sps:$4 sm:$0xff]  }
 0x618   : > { %v2486_v0 = vpop.f32.mrb[40].mxu1  ;;  %v15206_v57 = vld [vmem:[%s22648_s5 + $0x6e8] ss:$48 sps:$4 sm:$0xff]  }
 0x619   : > { %v2496_v1 = vmul.f32 %v16669_v28, %v2486_v0  ;;  %v14542_v2 = vpop.f32.mrb[41].mxu1  ;;  %10931 = vrot.lane.b32.xlu0 %v17387_v49, %s15911_s11  ;;  %7276 = vrot.lane.b32.xlu1 %v2498_v55, %s15914_s16  ;;  %v15217_v0 = vld [vmem:[%s22648_s5 + $0x8c4] ss:$48 sps:$4 sm:$0xff]  }
 0x61a   : > { %4575 = vmatpush1.bf16.msra.mxu0 %v15125_v20  ;;  %4651 = vmatpush1.bf16.msra.mxu1 %v15128_v58  ;;  %v2489_v52 = vpop.f32.mrb[42].mxu1  ;;  %v15211_v20 = vld [vmem:[%s22648_s5 + $0x864] ss:$48 sps:$4 sm:$0xff]   ;;  %v15214_v58 = vld [vmem:[%s22648_s5 + $0x74c] ss:$48 sps:$4 sm:$0xff]  }
 0x61b   : > { %v14543_v5 = vpop.f32.mrb[43].mxu1  ;;  %4576 = vmatprep.subr.bf16.mxu0 %v15133_v59  ;;  %4652 = vmatprep.subr.bf16.mxu1 %v15136_v61  ;;  %v2501_v28 = vpack.c.bf16 %v2496_v1, %v2496_v1  ;;  %v15209_v59 = vld [vmem:[%s22648_s5 + $0x860] ss:$48 sps:$4 sm:$0xff]   ;;  %v15212_v61 = vld [vmem:[%s22648_s5 + $0x748] ss:$48 sps:$4 sm:$0xff]  }
 0x61c   : > { %v15220_v1 = vld [vmem:[%s22648_s5 + $0x7ac] ss:$48 sps:$4 sm:$0xff]   ;;  %v15215_v2 = vld [vmem:[%s22648_s5 + $0x8c0] ss:$48 sps:$4 sm:$0xff]   ;;  %v15218_v52 = vld [vmem:[%s22648_s5 + $0x7a8] ss:$48 sps:$4 sm:$0xff]  }
 0x61d   : > { %7800 = vrot.lane.b32.xlu1 %v2498_v55, %s15915_s25  ;;  %11457 = vrot.lane.b32.xlu0 %v2501_v28, %s15914_s16  ;;  %s15916_s16 = smov 16   ;;  %v15221_v5 = vld [vmem:[%s22648_s5 + $0x808] ss:$48 sps:$4 sm:$0xff]  }
 0x61e   : > { %4577 = vmatpush1.bf16.msra.mxu0 %v15131_v4  ;;  %4653 = vmatpush1.bf16.msra.mxu1 %v15134_v54  ;;  %v15223_v4 = vld [vmem:[%s22648_s5 + $0x80c] ss:$48 sps:$4 sm:$0xff]   ;;  %v17587_v54 = vld [vmem:[%s22651_s8 + $0x4] ss:$48 sps:$4 sm:$0xff]  }
 0x61f   : > { %4578 = vmatprep.subr.bf16.mxu0 %v15139_v7  ;;  %4654 = vmatprep.subr.bf16.mxu1 %v15142_v8  ;;  %v15229_v7 = vld [vmem:[%s22648_s5 + $0x86c] ss:$48 sps:$4 sm:$0xff]   ;;  %v17604_v8 = vld [vmem:[%s22651_s8 + $0x64] ss:$48 sps:$4 sm:$0xff]  }
 0x621   : > { %8318 = vrot.lane.b32.xlu1 %v2498_v55, %s15916_s16  ;;  %v15197_v55 = vld [vmem:[%s22648_s5 + $0x7a0] ss:$48 sps:$4 sm:$0xff]  }
 0x622   : > { %4579 = vmatpush1.bf16.msra.mxu0 %v15137_v9  ;;  %4655 = vmatpush1.bf16.msra.mxu1 %v15140_v12  ;;  %v15227_v9 = vld [vmem:[%s22648_s5 + $0x868] ss:$48 sps:$4 sm:$0xff]   ;;  %v17614_v12 = vld [vmem:[%s22651_s8 + $0x60] ss:$48 sps:$4 sm:$0xff]  }
 0x623   : > { %4580 = vmatprep.subr.bf16.mxu0 %v15145_v21  ;;  %4656 = vmatprep.subr.bf16.mxu1 %v15148_v22  ;;  %v15235_v21 = vld [vmem:[%s22648_s5 + $0x8cc] ss:$48 sps:$4 sm:$0xff]   ;;  %v17623_v22 = vld [vmem:[%s22651_s8 + $0xc4] ss:$48 sps:$4 sm:$0xff]  }
 0x625   : > { %8320 = vrot.lane.b32.xlu1 %v2499_v46, %s15916_s16  ;;  %s15917_s16 = smov 96  }
 0x626   : > { %4581 = vmatpush1.bf16.msra.mxu0 %v15143_v53  ;;  %4657 = vmatpush1.bf16.msra.mxu1 %v15146_v23  ;;  %v15233_v53 = vld [vmem:[%s22648_s5 + $0x8c8] ss:$48 sps:$4 sm:$0xff]   ;;  %v17633_v23 = vld [vmem:[%s22651_s8 + $0xc0] ss:$48 sps:$4 sm:$0xff]  }
 0x627   : > { %4582 = vmatprep.subr.bf16.mxu0 %v15151_v24  ;;  %4658 = vmatprep.subr.bf16.mxu1 %v15154_v25  ;;  %v17639_v24 = vld [vmem:[%s22651_s8 + $0xc] ss:$48 sps:$4 sm:$0xff]   ;;  %v17644_v25 = vld [vmem:[%s22651_s8 + $0x14] ss:$48 sps:$4 sm:$0xff]  }
 0x629   : > { %8845 = vrot.lane.b32.xlu1 %v2499_v46, %s15917_s16  ;;  %v15205_v46 = vld [vmem:[%s22648_s5 + $0x804] ss:$48 sps:$4 sm:$0xff]  }
 0x62a   : > { %4583 = vmatpush1.bf16.msra.mxu0 %v15149_v26  ;;  %4659 = vmatpush1.bf16.msra.mxu1 %v15152_v27  ;;  %v17650_v26 = vld [vmem:[%s22651_s8 + $0x8] ss:$48 sps:$4 sm:$0xff]   ;;  %v17655_v27 = vld [vmem:[%s22651_s8 + $0x10] ss:$48 sps:$4 sm:$0xff]  }
 0x62b   : > { %4584 = vmatprep.subr.bf16.mxu0 %v15157_v43  ;;  %4660 = vmatprep.subr.bf16.mxu1 %v15160_v45  ;;  %v17662_v43 = vld [vmem:[%s22651_s8 + $0x6c] ss:$48 sps:$4 sm:$0xff]   ;;  %v17667_v45 = vld [vmem:[%s22651_s8 + $0x74] ss:$48 sps:$4 sm:$0xff]  }
 0x62d   : > { %10407 = vrot.lane.b32.xlu1 %v17387_v49, %s15912_s12 }
 0x62e   : > { %4585 = vmatpush1.bf16.msra.mxu0 %v15155_v47  ;;  %4661 = vmatpush1.bf16.msra.mxu1 %v15158_v48  ;;  %v17677_v47 = vld [vmem:[%s22651_s8 + $0x68] ss:$48 sps:$4 sm:$0xff]   ;;  %v17682_v48 = vld [vmem:[%s22651_s8 + $0x70] ss:$48 sps:$4 sm:$0xff]  }
 0x62f   : > { %4586 = vmatprep.subr.bf16.mxu0 %v15163_v50  ;;  %4662 = vmatprep.subr.bf16.mxu1 %v15166_v60  ;;  %v17694_v50 = vld [vmem:[%s22651_s8 + $0xd4] ss:$48 sps:$4 sm:$0xff]   ;;  %v17703_v60 = vld [vmem:[%s22651_s8 + $0xc8] ss:$48 sps:$4 sm:$0xff]  }
 0x631   : > { %10933 = vrot.lane.b32.xlu1 %v2501_v28, %s15911_s11  ;;  %v17595_v28 = vld [vmem:[%s22651_s8] ss:$48 sps:$4 sm:$0xff]  }
 0x632   : > { %4587 = vmatpush1.bf16.msra.mxu0 %v15161_v29  ;;  %4663 = vmatpush1.bf16.msra.mxu1 %v15164_v11  ;;  %v17708_v29 = vld [vmem:[%s22651_s8 + $0xd0] ss:$48 sps:$4 sm:$0xff]   ;;  %v17715_v11 = vld [vmem:[%s22651_s8 + $0x1c] ss:$48 sps:$4 sm:$0xff]  }
 0x633   : > { %4588 = vmatprep.subr.bf16.mxu0 %v15169_v30  ;;  %4664 = vmatprep.subr.bf16.mxu1 %v15172_v31  ;;  %v17720_v30 = vld [vmem:[%s22651_s8 + $0x24] ss:$48 sps:$4 sm:$0xff]  }
 0x636   : > { %4589 = vmatpush1.bf16.msra.mxu0 %v15167_v42  ;;  %4665 = vmatpush1.bf16.msra.mxu1 %v15170_v32 }
 0x637   : > { %4599 = vmatprep.subr.bf16.mxu0 %v15175_v14  ;;  %4666 = vmatprep.subr.bf16.mxu1 %v15178_v33  ;;  %v17731_v14 = vld [vmem:[%s22651_s8 + $0x18] ss:$48 sps:$4 sm:$0xff]   ;;  %v17736_v33 = vld [vmem:[%s22651_s8 + $0x20] ss:$48 sps:$4 sm:$0xff]  }
 0x639   : > { %4591 = vmatmul.mubr.bf16.vlgmr.msra.gmra.mrb[40].mxu0 %v16362_v44 }
 0x63a   : > { %4600 = vmatpush1.bf16.msra.mxu0 %v15173_v16  ;;  %4667 = vmatpush1.bf16.msra.mxu1 %v15176_v34  ;;  %v17743_v34 = vld [vmem:[%s22651_s8 + $0x7c] ss:$48 sps:$4 sm:$0xff]  }
 0x63b   : > { %4601 = vmatprep.subr.bf16.mxu0 %v15181_v17  ;;  %4668 = vmatprep.subr.bf16.mxu1 %v15184_v35  ;;  %v17748_v17 = vld [vmem:[%s22651_s8 + $0x84] ss:$48 sps:$4 sm:$0xff]   ;;  %v17759_v35 = vld [vmem:[%s22651_s8 + $0x78] ss:$48 sps:$4 sm:$0xff]  }
 0x63c   : > { %4631 = vmatprep.mubr.bf16.mxu0 %v22654_v3 }
 0x63e   : > { %4602 = vmatpush1.bf16.msra.mxu0 %v15179_v18  ;;  %4669 = vmatpush1.bf16.msra.mxu1 %v15182_v36  ;;  %v17764_v18 = vld [vmem:[%s22651_s8 + $0x80] ss:$48 sps:$4 sm:$0xff]   ;;  %v17771_v36 = vld [vmem:[%s22651_s8 + $0xdc] ss:$48 sps:$4 sm:$0xff]  }
 0x63f   : > { %4603 = vmatprep.subr.bf16.mxu0 %v15187_v37  ;;  %4670 = vmatprep.subr.bf16.mxu1 %v15190_v38  ;;  %v17776_v37 = vld [vmem:[%s22651_s8 + $0xe4] ss:$48 sps:$4 sm:$0xff]   ;;  %v17785_v38 = vld [vmem:[%s22651_s8 + $0xd8] ss:$48 sps:$4 sm:$0xff]  }
 0x642   : > { %4604 = vmatpush1.bf16.msra.mxu0 %v15185_v63  ;;  %4671 = vmatpush1.bf16.msra.mxu1 %v15188_v10  ;;  %v17790_v63 = vld [vmem:[%s22651_s8 + $0xe0] ss:$48 sps:$4 sm:$0xff]   ;;  %v17797_v10 = vld [vmem:[%s22651_s8 + $0x2c] ss:$48 sps:$4 sm:$0xff]  }
 0x643   : > { %4605 = vmatprep.subr.bf16.mxu0 %v15193_v41  ;;  %4681 = vmatprep.subr.bf16.mxu1 %v15196_v15  ;;  %v17802_v41 = vld [vmem:[%s22652_s9 + $0x40] sm:$0xff]  }
 0x645   : > { %4673 = vmatmul.mubr.bf16.vlgmr.msra.gmra.mrb[52].mxu1 %v16362_v44  ;;  %v15208_v44 = vld [vmem:[%s22648_s5 + $0x6ec] ss:$48 sps:$4 sm:$0xff]  }
 0x646   : > { %4606 = vmatpush1.bf16.msra.mxu0 %v15191_v51  ;;  %4682 = vmatpush1.bf16.msra.mxu1 %v15194_v62 }
 0x647   : > { %4607 = vmatprep.subr.bf16.mxu0 %v15199_v13  ;;  %4683 = vmatprep.subr.bf16.mxu1 %v15202_v19  ;;  %v17813_v13 = vld [vmem:[%s22651_s8 + $0x28] ss:$48 sps:$4 sm:$0xff]  }
 0x648   : > { %4713 = vmatprep.mubr.bf16.mxu1 %v22654_v3 }
 0x64a   : > { %4608 = vmatpush1.bf16.msra.mxu0 %v15197_v55  ;;  %4684 = vmatpush1.bf16.msra.mxu1 %v15200_v56  ;;  %v17819_v55 = vld [vmem:[%s22651_s8 + $0x8c] ss:$48 sps:$4 sm:$0xff]   ;;  %v17825_v56 = vld [vmem:[%s22652_s9] sm:$0xff]  }
 0x64b   : > { %4609 = vmatprep.subr.bf16.mxu0 %v15205_v46  ;;  %4685 = vmatprep.subr.bf16.mxu1 %v15208_v44  ;;  %v17830_v46 = vld [vmem:[%s22652_s9 + $0x48] sm:$0xff]  }
 0x64c   : > { %v17840_v44 = vld [vmem:[%s22651_s8 + $0x88] ss:$48 sps:$4 sm:$0xff]  }
 0x64e   : > { %4610 = vmatpush1.bf16.msra.mxu0 %v15203_v6  ;;  %4686 = vmatpush1.bf16.msra.mxu1 %v15206_v57  ;;  %v17847_v6 = vld [vmem:[%s22651_s8 + $0xec] ss:$48 sps:$4 sm:$0xff]  }
 0x64f   : > { %4611 = vmatprep.subr.bf16.mxu0 %v15211_v20  ;;  %4687 = vmatprep.subr.bf16.mxu1 %v15214_v58  ;;  %v17853_v57 = vld [vmem:[%s22652_s9 + $0x8] sm:$0xff]   ;;  %v17859_v20 = vld [vmem:[%s22652_s9 + $0x50] sm:$0xff]  }
 0x650   : > { %23410 = vst [vmem:[#allocation6_spill] sm:$0xff] %v17859_v20  ;;  %v17865_v58 = vld [vmem:[%s22651_s8 + $0xe8] ss:$48 sps:$4 sm:$0xff]  }
 0x651   : > { %23411 = vst [vmem:[#allocation7_spill] sm:$0xff] %v17865_v58 }
 0x652   : > { %4612 = vmatpush1.bf16.msra.mxu0 %v15209_v59  ;;  %4688 = vmatpush1.bf16.msra.mxu1 %v15212_v61  ;;  %v17874_v61 = vld [vmem:[%s22652_s9 + $0x10] sm:$0xff]  }
 0x653   : > { %4613 = vmatprep.subr.bf16.mxu0 %v15217_v0  ;;  %4689 = vmatprep.subr.bf16.mxu1 %v15220_v1  ;;  %23413 = vst [vmem:[#allocation9_spill] sm:$0xff] %v17874_v61  ;;  %v17879_v0 = vld [vmem:[%s22652_s9 + $0xc0] sm:$0xff]   ;;  %v17885_v1 = vld [vmem:[%s22652_s9 + $0x58] sm:$0xff]  }
 0x654   : > { %23414 = vst [vmem:[#allocation10_spill] sm:$0xff] %v17879_v0  ;;  %23415 = vst [vmem:[#allocation11_spill] sm:$0xff] %v17885_v1 }
 0x656   : > { %4614 = vmatpush1.bf16.msra.mxu0 %v15215_v2  ;;  %4690 = vmatpush1.bf16.msra.mxu1 %v15218_v52  ;;  %v17891_v2 = vld [vmem:[%s22652_s9 + $0x80] sm:$0xff]  }
 0x657   : > { %4691 = vmatprep.subr.bf16.mxu1 %v15223_v4  ;;  %5133 = vmatprep.subr.bf16.mxu0 %v17587_v54  ;;  %23416 = vst [vmem:[#allocation12_spill] sm:$0xff] %v17891_v2  ;;  %v17900_v4 = vld [vmem:[%s22652_s9 + $0x18] sm:$0xff]  }
 0x658   : > { %23418 = vst [vmem:[#allocation14_spill] sm:$0xff] %v17900_v4 }
 0x659   : > { %4632 = vmatmul.mubr.bf16.vlgmr.msra.gmra.mrb[40].mxu0 %v16353_v40 }
 0x65a   : > { %4692 = vmatpush1.bf16.msra.mxu1 %v15221_v5  ;;  %5134 = vmatpush1.bf16.msra.mxu0 %v17595_v28 }
 0x65b   : > { %4693 = vmatprep.subr.bf16.mxu1 %v15229_v7  ;;  %5135 = vmatprep.subr.bf16.mxu0 %v17604_v8 }
 0x65c   : > { %5165 = vmatprep.mubr.bf16.mxu0 %v22654_v3 }
 0x65e   : > { %4694 = vmatpush1.bf16.msra.mxu1 %v15227_v9  ;;  %5136 = vmatpush1.bf16.msra.mxu0 %v17614_v12 }
 0x65f   : > { %4695 = vmatprep.subr.bf16.mxu1 %v15235_v21  ;;  %5137 = vmatprep.subr.bf16.mxu0 %v17623_v22 }
 0x662   : > { %4696 = vmatpush1.bf16.msra.mxu1 %v15233_v53  ;;  %5138 = vmatpush1.bf16.msra.mxu0 %v17633_v23 }
 0x663   : > { %5174 = vmatprep.subr.bf16.mxu1 %v17639_v24  ;;  %5215 = vmatprep.subr.bf16.mxu0 %v17644_v25 }
 0x665   : > { %4714 = vmatmul.mubr.bf16.vlgmr.msra.gmra.mrb[52].mxu1 %v16353_v40  ;;  %12547 = vmatmul.mubr.msk.bf16.vlgmr.msra.gmra.mrb[44].mxu0 %vm1806_vm6, %v17353_v39  ;;  %v17689_v40 = vld [vmem:[%s22651_s8 + $0xcc] ss:$48 sps:$4 sm:$0xff]  }
 0x666   : > { %5175 = vmatpush1.bf16.msra.mxu1 %v17650_v26  ;;  %5216 = vmatpush1.bf16.msra.mxu0 %v17655_v27 }
 0x667   : > { %5176 = vmatprep.subr.bf16.mxu1 %v17662_v43  ;;  %5217 = vmatprep.subr.bf16.mxu0 %v17667_v45 }
 0x668   : > { %5206 = vmatprep.mubr.bf16.mxu1 %v22654_v3  ;;  %5247 = vmatprep.mubr.bf16.mxu0 %v22654_v3 }
 0x66a   : > { %5177 = vmatpush1.bf16.msra.mxu1 %v17677_v47  ;;  %5218 = vmatpush1.bf16.msra.mxu0 %v17682_v48 }
 0x66b   : > { %5178 = vmatprep.subr.bf16.mxu1 %v17689_v40  ;;  %5219 = vmatprep.subr.bf16.mxu0 %v17694_v50 }
 0x66c   : > { %v17722_v31 = vpop.f32.mrb[32].mxu0 }
 0x66d   : > { %23407 = vst [vmem:[#allocation3_spill] sm:$0xff] %v17722_v31  ;;  %v17724_v42 = vpop.f32.mrb[33].mxu0 }
 0x66e   : > { %23408 = vst [vmem:[#allocation4_spill] sm:$0xff] %v17724_v42  ;;  %v4309_v32 = vpop.f32.mrb[34].mxu0  ;;  %5179 = vmatpush1.bf16.msra.mxu1 %v17703_v60  ;;  %5220 = vmatpush1.bf16.msra.mxu0 %v17708_v29 }
 0x66f   : > { %v4310_v16 = vpop.f32.mrb[35].mxu0  ;;  %5256 = vmatprep.subr.bf16.mxu1 %v17715_v11  ;;  %5297 = vmatprep.subr.bf16.mxu0 %v17720_v30 }
 0x671   : > { %12548 = vmatmul.mubr.msk.bf16.vlgmr.msra.gmra.mrb[56].mxu1 %vm1806_vm6, %v17353_v39  ;;  %12549 = vmatmul.mubr.msk.bf16.vlgmr.msra.gmra.mrb[48].mxu0 %vm1806_vm6, %v17353_v39 }
 0x672   : > { %5257 = vmatpush1.bf16.msra.mxu1 %v17731_v14  ;;  %5298 = vmatpush1.bf16.msra.mxu0 %v17736_v33 }
 0x673   : > { %5258 = vmatprep.subr.bf16.mxu1 %v17743_v34  ;;  %5299 = vmatprep.subr.bf16.mxu0 %v17748_v17 }
 0x674   : > { %5288 = vmatprep.mubr.bf16.mxu1 %v22654_v3  ;;  %5329 = vmatprep.mubr.bf16.mxu0 %v22654_v3 }
 0x676   : > { %5259 = vmatpush1.bf16.msra.mxu1 %v17759_v35  ;;  %5300 = vmatpush1.bf16.msra.mxu0 %v17764_v18 }
 0x677   : > { %5260 = vmatprep.subr.bf16.mxu1 %v17771_v36  ;;  %5301 = vmatprep.subr.bf16.mxu0 %v17776_v37 }
 0x678   : > { %v17804_v15 = vpop.f32.mrb[44].mxu1 }
 0x679   : > { %23409 = vst [vmem:[#allocation5_spill] sm:$0xff] %v17804_v15  ;;  %v17806_v51 = vpop.f32.mrb[45].mxu1 }
 0x67a   : > { %v4391_v62 = vpop.f32.mrb[46].mxu1  ;;  %5261 = vmatpush1.bf16.msra.mxu1 %v17785_v38  ;;  %5302 = vmatpush1.bf16.msra.mxu0 %v17790_v63 }
 0x67b   : > { %v4392_v19 = vpop.f32.mrb[47].mxu1  ;;  %5338 = vmatprep.subr.bf16.mxu1 %v17797_v10  ;;  %12864 = vmatprep.subr.bf16.mxu0 %v17802_v41 }
 0x67d   : > { %12550 = vmatmul.mubr.msk.bf16.vlgmr.msra.gmra.mrb[60].mxu1 %vm1806_vm6, %v17353_v39  ;;  %12551 = vmatmul.mubr.msk.bf16.vlgmr.msra.gmra.mrb[52].mxu0 %vm1806_vm6, %v17353_v39 }
 0x67e   : > { %5339 = vmatpush1.bf16.msra.mxu1 %v17813_v13  ;;  %5370 = vmatprep.mubr.bf16.mxu1 %v22654_v3 }
 0x67f   : > { %5340 = vmatprep.subr.bf16.mxu1 %v17819_v55  ;;  %12865 = vmatpush3.bf16.msra.mxu0 %v17825_v56 }
 0x680   : > { %12866 = vmatprep.subr.bf16.mxu0 %v17830_v46 }
 0x682   : > { %5341 = vmatpush1.bf16.msra.mxu1 %v17840_v44 }
 0x683   : > { %v17867_v59 = vpop.permute.xlu1 %6748  ;;  %5342 = vmatprep.subr.bf16.mxu1 %v17847_v6  ;;  %12867 = vmatpush3.bf16.msra.mxu0 %v17853_v57  ;;  %v17911_v21 = vpop.permute.xlu0 %6223 }
 0x684   : > { %23412 = vst [vmem:[#allocation8_spill] sm:$0xff] %v17867_v59  ;;  %12868 = vmatprep.subr.bf16.mxu0 %v17859_v20  ;;  %v17990_v59 = vld [vmem:[%s22652_s9 + $0x98] sm:$0xff]  }
 0x685   : > { %23437 = vst [vmem:[#allocation33_spill] sm:$0xff] %v17990_v59 }
 0x686   : > { %5343 = vmatpush1.bf16.msra.mxu1 %v17865_v58 }
 0x687   : > { %v17893_v52 = vpop.permute.xlu1 %6750  ;;  %12869 = vmatpush3.bf16.msra.mxu0 %v17874_v61  ;;  %12886 = vmatprep.subr.bf16.mxu1 %v17879_v0  ;;  %v17917_v62 = vpop.permute.xlu0 %9368 }
 0x688   : > { %23417 = vst [vmem:[#allocation13_spill] sm:$0xff] %v17893_v52  ;;  %12870 = vmatprep.subr.bf16.mxu0 %v17885_v1  ;;  %23423 = vst [vmem:[#allocation19_spill] sm:$0xff] %v17917_v62  ;;  %v17966_v62 = vld [vmem:[%s22652_s9 + $0x90] sm:$0xff]   ;;  %v17999_v52 = vld [vmem:[%s22652_s9 + $0x78] sm:$0xff]  }
 0x689   : > { %12552 = vmatmul.mubr.msk.bf16.vlgmr.msra.gmra.mrb[64].mxu1 %vm1806_vm6, %v17353_v39  ;;  %23433 = vst [vmem:[#allocation29_spill] sm:$0xff] %v17966_v62  ;;  %23438 = vst [vmem:[#allocation34_spill] sm:$0xff] %v17999_v52 }
 0x68a   : > { %12887 = vmatpush3.bf16.msra.mxu1 %v17891_v2 }
 0x68b   : > { %v17906_v5 = vpop.permute.xlu1 %7276  ;;  %12871 = vmatpush3.bf16.msra.mxu0 %v17900_v4  ;;  %v10932_v19 = vpop.permute.xlu0 %10931 }
 0x68c   : > { %23419 = vst [vmem:[#allocation15_spill] sm:$0xff] %v17906_v5  ;;  %v17985_v5 = vld [vmem:[%s22652_s9 + $0x30] sm:$0xff]  }
 0x68d   : > { %23436 = vst [vmem:[#allocation32_spill] sm:$0xff] %v17985_v5 }
 0x68f   : > { %v17909_v7 = vpop.permute.xlu1 %7800 }
 0x690   : > { %23420 = vst [vmem:[#allocation16_spill] sm:$0xff] %v17909_v7  ;;  %v17927_v7 = vld [vmem:[%s22652_s9 + $0x60] sm:$0xff]  }
 0x691   : > { %23426 = vst [vmem:[#allocation22_spill] sm:$0xff] %v17927_v7  ;;  %12872 = vmatprep.subr.bf16.mxu0 %v17927_v7 }
 0x693   : > { %v8319_v9 = vpop.permute.xlu1 %8318 }
 0x697   : > { %v8321_v53 = vpop.permute.xlu1 %8320 }
 0x698   : > { %v17913_v32 = vsel %vm8322_vm13, %v8319_v9, %v8321_v53  ;;  %v17932_v9 = vld [vmem:[%s22652_s9 + $0xc8] sm:$0xff]   ;;  %v17937_v53 = vld [vmem:[%s22652_s9 + $0x20] sm:$0xff]  }
 0x699   : > { %23421 = vst [vmem:[#allocation17_spill] sm:$0xff] %v17913_v32  ;;  %23427 = vst [vmem:[#allocation23_spill] sm:$0xff] %v17932_v9  ;;  %12888 = vmatprep.subr.bf16.mxu1 %v17932_v9  ;;  %12873 = vmatpush3.bf16.msra.mxu0 %v17937_v53  ;;  %v17978_v32 = vld [vmem:[%s22652_s9 + $0xd8] sm:$0xff]  }
 0x69a   : > { %23428 = vst [vmem:[#allocation24_spill] sm:$0xff] %v17937_v53  ;;  %23435 = vst [vmem:[#allocation31_spill] sm:$0xff] %v17978_v32 }
 0x69b   : > { %v17915_v16 = vpop.permute.xlu1 %8845 }
 0x69c   : > { %23422 = vst [vmem:[#allocation18_spill] sm:$0xff] %v17915_v16  ;;  %v17973_v16 = vld [vmem:[%s22652_s9 + $0x70] sm:$0xff]  }
 0x69d   : > { %23434 = vst [vmem:[#allocation30_spill] sm:$0xff] %v17973_v16 }
 0x69f   : > { %v17919_v39 = vpop.permute.xlu1 %10407 }
 0x6a0   : > { %23424 = vst [vmem:[#allocation20_spill] sm:$0xff] %v17919_v39  ;;  %v17961_v39 = vld [vmem:[%s22652_s9 + $0x28] sm:$0xff]  }
 0x6a1   : > { %23432 = vst [vmem:[#allocation28_spill] sm:$0xff] %v17961_v39 }
 0x6a3   : > { %v10934_v3 = vpop.permute.xlu1 %10933 }
 0x6a4   : > { %v17922_v49 = vsel %vm6752_vm14, %v10932_v19, %v10934_v3  ;;  %v17942_v3 = vld [vmem:[%s22652_s9 + $0x88] sm:$0xff]  }
 0x6a5   : > { %23425 = vst [vmem:[#allocation21_spill] sm:$0xff] %v17922_v49  ;;  %23429 = vst [vmem:[#allocation25_spill] sm:$0xff] %v17942_v3  ;;  %v17949_v19 = vld [vmem:[%s22652_s9 + $0x68] sm:$0xff]   ;;  %v17954_v49 = vld [vmem:[%s22652_s9 + $0xd0] sm:$0xff]   ;;  %12889 = vmatpush3.bf16.msra.mxu1 %v17942_v3 }
 0x6a6   : > { %23430 = vst [vmem:[#allocation26_spill] sm:$0xff] %v17949_v19  ;;  %23431 = vst [vmem:[#allocation27_spill] sm:$0xff] %v17954_v49  ;;  %12874 = vmatprep.subr.bf16.mxu0 %v17949_v19  ;;  %12890 = vmatprep.subr.bf16.mxu1 %v17954_v49 }
 0x6a7   : > { %12875 = vmatpush3.bf16.msra.mxu0 %v17961_v39  ;;  %v18004_v39 = vld [vmem:[%s22652_s9 + $0xe0] sm:$0xff]  }
 0x6a8   : > { %12876 = vmatprep.subr.bf16.mxu0 %v17973_v16  ;;  %23439 = vst [vmem:[#allocation35_spill] sm:$0xff] %v18004_v39  ;;  %v18009_v16 = vld [vmem:[%s22652_s9 + $0x38] sm:$0xff]  }
 0x6a9   : > { %12891 = vmatpush3.bf16.msra.mxu1 %v17966_v62  ;;  %23440 = vst [vmem:[#allocation36_spill] sm:$0xff] %v18009_v16 }
 0x6aa   : > { %12892 = vmatprep.subr.bf16.mxu1 %v17978_v32  ;;  %v18028_v32 = vld [vmem:[%s22652_s9 + $0x140] sm:$0xff]  }
 0x6ab   : > { %12877 = vmatpush3.bf16.msra.mxu0 %v17985_v5  ;;  %v18014_v5 = vld [vmem:[%s22652_s9 + $0xa0] sm:$0xff]   ;;  %23443 = vst [vmem:[#allocation39_spill] sm:$0xff] %v18028_v32 }
 0x6ac   : > { %23441 = vst [vmem:[#allocation37_spill] sm:$0xff] %v18014_v5  ;;  %12878 = vmatprep.subr.bf16.mxu0 %v17999_v52  ;;  %v18033_v52 = vld [vmem:[%s22652_s9 + $0xa8] sm:$0xff]  }
 0x6ad   : > { %12893 = vmatpush3.bf16.msra.mxu1 %v17990_v59  ;;  %v18023_v59 = vld [vmem:[%s22652_s9 + $0xe8] sm:$0xff]   ;;  %23444 = vst [vmem:[#allocation40_spill] sm:$0xff] %v18033_v52 }
 0x6ae   : > { %12894 = vmatprep.subr.bf16.mxu1 %v18004_v39  ;;  %23442 = vst [vmem:[#allocation38_spill] sm:$0xff] %v18023_v59 }
 0x6af   : > { %12879 = vmatpush3.bf16.msra.mxu0 %v18009_v16  ;;  %v18041_v16 = vld [vmem:[%s22652_s9 + $0xf0] sm:$0xff]  }
 0x6b0   : > { %12908 = vmatprep.subr.bf16.mxu0 %v18028_v32  ;;  %23445 = vst [vmem:[#allocation41_spill] sm:$0xff] %v18041_v16  ;;  %v18053_v32 = vld [vmem:[%s22652_s9 + $0xf8] sm:$0xff]  }
 0x6b1   : > { %12895 = vmatpush3.bf16.msra.mxu1 %v18014_v5  ;;  %v18046_v5 = vld [vmem:[%s22652_s9 + $0xb0] sm:$0xff]   ;;  %23447 = vst [vmem:[#allocation43_spill] sm:$0xff] %v18053_v32 }
 0x6b2   : > { %12896 = vmatprep.subr.bf16.mxu1 %v18023_v59  ;;  %23446 = vst [vmem:[#allocation42_spill] sm:$0xff] %v18046_v5 }
 0x6b5   : > { %12897 = vmatpush3.bf16.msra.mxu1 %v18033_v52  ;;  %v18058_v52 = vld [vmem:[%s22652_s9 + $0xb8] sm:$0xff]  }
 0x6b6   : > { %12898 = vmatprep.subr.bf16.mxu1 %v18041_v16  ;;  %23448 = vst [vmem:[#allocation44_spill] sm:$0xff] %v18058_v52  ;;  %v18065_v16 = vld [vmem:[%s22652_s9 + $0x1c0] sm:$0xff]  }
 0x6b7   : > { %23449 = vst [vmem:[#allocation45_spill] sm:$0xff] %v18065_v16 }
 0x6b9   : > { %12899 = vmatpush3.bf16.msra.mxu1 %v18046_v5 }
 0x6ba   : > { %12900 = vmatprep.subr.bf16.mxu1 %v18053_v32 }
 0x6bd   : > { %12901 = vmatpush3.bf16.msra.mxu1 %v18058_v52 }
 0x6be   : > { %12930 = vmatprep.subr.bf16.mxu1 %v18065_v16 }
 0x6cc   : > { %v18068_v5 = vpop.f32.mrb[36].mxu0 }
 0x6cd   : > { %23450 = vst [vmem:[#allocation46_spill] sm:$0xff] %v18068_v5  ;;  %v18070_v59 = vpop.f32.mrb[37].mxu0 }
 0x6ce   : > { %v4473_v39 = vpop.f32.mrb[38].mxu0 }
 0x6cf   : > { %v4474_v62 = vpop.f32.mrb[39].mxu0 }
 0x6d8   : > { %v18072_v19 = vpop.f32.mrb[48].mxu1 }
 0x6d9   : > { %23451 = vst [vmem:[#allocation47_spill] sm:$0xff] %v18072_v19  ;;  %v18074_v49 = vpop.f32.mrb[49].mxu1 }
 0x6da   : > { %v4555_v32 = vpop.f32.mrb[50].mxu1 }
 0x6db   : > { %v4556_v53 = vpop.f32.mrb[51].mxu1 }
 0x72c   : > { %v18076_v52 = vpop.f32.mrb[40].mxu0 }
 0x72d   : > { %23452 = vst [vmem:[#allocation48_spill] sm:$0xff] %v18076_v52  ;;  %v18078_v3 = vpop.f32.mrb[41].mxu0 }
 0x72e   : > { %v4637_v7 = vpop.f32.mrb[42].mxu0 }
 0x72f   : > { %v4638_v9 = vpop.f32.mrb[43].mxu0  ;;  %v18089_v7 = vld [vmem:[%s22652_s9 + $0x100] sm:$0xff]  }
 0x730   : > { %23454 = vst [vmem:[#allocation50_spill] sm:$0xff] %v18089_v7 }
 0x738   : > { %v18080_v4 = vpop.f32.mrb[52].mxu1  ;;  %v5167_v16 = vpop.f32.mrb[44].mxu0 }
 0x739   : > { %23453 = vst [vmem:[#allocation49_spill] sm:$0xff] %v18080_v4  ;;  %v5379_v2 = vmul.f32 %v5167_v16, %v17722_v31  ;;  %v18083_v1 = vpop.f32.mrb[53].mxu1  ;;  %v5169_v62 = vpop.f32.mrb[45].mxu0  ;;  %v18094_v16 = vld [vmem:[%s22652_s9 + $0x148] sm:$0xff]  }
 0x73a   : > { %v5380_v39 = vmul.f32 %v5169_v62, %v17724_v42  ;;  %v4719_v0 = vpop.f32.mrb[54].mxu1  ;;  %v5171_v61 = vpop.f32.mrb[46].mxu0  ;;  %23455 = vst [vmem:[#allocation51_spill] sm:$0xff] %v18094_v16 }
 0x73b   : > { %v4720_v32 = vpop.f32.mrb[55].mxu1  ;;  %v5172_v53 = vpop.f32.mrb[47].mxu0  ;;  %v5391_v9 = vpack.c.bf16 %v5379_v2, %v5379_v2  ;;  %v18100_v61 = vld [vmem:[%s22652_s9 + $0x108] sm:$0xff]   ;;  %v18106_v0 = vld [vmem:[%s22652_s9 + $0x150] sm:$0xff]  }
 0x73c   : > { %v5392_v58 = vpack.c.bf16 %v5380_v39, %v5380_v39  ;;  %23456 = vst [vmem:[#allocation52_spill] sm:$0xff] %v18100_v61  ;;  %23457 = vst [vmem:[#allocation53_spill] sm:$0xff] %v18106_v0 }
 0x73e   : > { %6011 = vmatprep.mubr.bf16.mxu0 %v5392_v58  ;;  %v18112_v58 = vld [vmem:[%s22652_s9 + $0x110] sm:$0xff]  }
 0x73f   : > { %6012 = vmatmul.mubr.bf16.vlgmr.msra.gmra.mrb[56].mxu0 %v5391_v9 }
 0x740   : > { %12909 = vmatpush3.bf16.msra.mxu0 %v18089_v7 }
 0x741   : > { %12910 = vmatprep.subr.bf16.mxu0 %v18094_v16 }
 0x744   : > { %12911 = vmatpush3.bf16.msra.mxu0 %v18100_v61  ;;  %v5208_v2 = vpop.f32.mrb[56].mxu1  ;;  %v5249_v62 = vpop.f32.mrb[48].mxu0  ;;  %v18122_v61 = vld [vmem:[%s22652_s9 + $0x158] sm:$0xff]  }
 0x745   : > { %v5381_v39 = vmul.f32 %v5208_v2, %v17804_v15  ;;  %v18116_v32 = vmul.f32 %v5249_v62, %v18068_v5  ;;  %v5210_v53 = vpop.f32.mrb[57].mxu1  ;;  %v5251_v9 = vpop.f32.mrb[49].mxu0  ;;  %12912 = vmatprep.subr.bf16.mxu0 %v18106_v0  ;;  %23458 = vst [vmem:[#allocation54_spill] sm:$0xff] %v18122_v61  ;;  %v18130_v0 = vld [vmem:[%s22652_s9 + $0x118] sm:$0xff]   ;;  %v18135_v15 = vld [vmem:[%s22652_s9 + $0x180] sm:$0xff]  }
 0x746   : > { %v5382_v16 = vmul.f32 %v5210_v53, %v17806_v51  ;;  %v5384_v7 = vmul.f32 %v5251_v9, %v18070_v59  ;;  %v5212_v42 = vpop.f32.mrb[58].mxu1  ;;  %v5253_v31 = vpop.f32.mrb[50].mxu0  ;;  %23459 = vst [vmem:[#allocation55_spill] sm:$0xff] %v18130_v0  ;;  %23460 = vst [vmem:[#allocation56_spill] sm:$0xff] %v18135_v15 }
 0x747   : > { %v5213_v20 = vpop.f32.mrb[59].mxu1  ;;  %v5254_v2 = vpop.f32.mrb[51].mxu0  ;;  %v5393_v53 = vpack.c.bf16 %v5381_v39, %v5381_v39  ;;  %v18141_v31 = vld [vmem:[%s22652_s9 + $0x160] sm:$0xff]   ;;  %v18146_v42 = vld [vmem:[%s22652_s9 + $0x1c8] sm:$0xff]  }
 0x748   : > { %12913 = vmatpush3.bf16.msra.mxu0 %v18112_v58  ;;  %v5394_v62 = vpack.c.bf16 %v5382_v16, %v5382_v16  ;;  %v5396_v5 = vpack.c.bf16 %v5384_v7, %v5384_v7  ;;  %23461 = vst [vmem:[#allocation57_spill] sm:$0xff] %v18141_v31  ;;  %23462 = vst [vmem:[#allocation58_spill] sm:$0xff] %v18146_v42  ;;  %v18153_v20 = vld [vmem:[%s22652_s9 + $0x120] sm:$0xff]   ;;  %v18158_v7 = vld [vmem:[%s22652_s9 + $0x188] sm:$0xff]  }
 0x749   : > { %12914 = vmatprep.subr.bf16.mxu0 %v18122_v61  ;;  %23463 = vst [vmem:[#allocation59_spill] sm:$0xff] %v18153_v20  ;;  %23464 = vst [vmem:[#allocation60_spill] sm:$0xff] %v18158_v7  ;;  %v18170_v16 = vld [vmem:[%s22652_s9 + $0x1d0] sm:$0xff]   ;;  %v18177_v2 = vld [vmem:[%s22652_s9 + $0x128] sm:$0xff]  }
 0x74a   : > { %6051 = vmatprep.mubr.bf16.mxu1 %v5394_v62  ;;  %6091 = vmatprep.mubr.bf16.mxu0 %v5396_v5  ;;  %v18165_v5 = vld [vmem:[%s22652_s9 + $0x168] sm:$0xff]   ;;  %23466 = vst [vmem:[#allocation62_spill] sm:$0xff] %v18170_v16  ;;  %v18182_v62 = vld [vmem:[%s22652_s9 + $0x190] sm:$0xff]  }
 0x74b   : > { %6052 = vmatmul.mubr.bf16.vlgmr.msra.gmra.mrb[68].mxu1 %v5393_v53  ;;  %23465 = vst [vmem:[#allocation61_spill] sm:$0xff] %v18165_v5  ;;  %v18209_v61 = vld [vmem:[%s22652_s9 + $0x130] sm:$0xff]  }
 0x74c   : > { %12915 = vmatpush3.bf16.msra.mxu0 %v18130_v0  ;;  %12931 = vmatpush3.bf16.msra.mxu1 %v18135_v15  ;;  %v18200_v15 = vld [vmem:[%s22652_s9 + $0x1d8] sm:$0xff]   ;;  %23469 = vst [vmem:[#allocation65_spill] sm:$0xff] %v18209_v61 }
 0x74d   : > { %12916 = vmatprep.subr.bf16.mxu0 %v18141_v31  ;;  %12932 = vmatprep.subr.bf16.mxu1 %v18146_v42  ;;  %v18195_v31 = vld [vmem:[%s22652_s9 + $0x170] sm:$0xff]   ;;  %23468 = vst [vmem:[#allocation64_spill] sm:$0xff] %v18200_v15 }
 0x74e   : > { %23467 = vst [vmem:[#allocation63_spill] sm:$0xff] %v18195_v31 }
 0x750   : > { %12917 = vmatpush3.bf16.msra.mxu0 %v18153_v20  ;;  %12933 = vmatpush3.bf16.msra.mxu1 %v18158_v7  ;;  %v5290_v39 = vpop.f32.mrb[60].mxu1  ;;  %v5331_v9 = vpop.f32.mrb[52].mxu0 }
 0x751   : > { %v18185_v53 = vmul.f32 %v5290_v39, %v18072_v19  ;;  %v18188_v42 = vmul.f32 %v5331_v9, %v18076_v52  ;;  %v5292_v20 = vpop.f32.mrb[61].mxu1  ;;  %v5333_v7 = vpop.f32.mrb[53].mxu0  ;;  %12918 = vmatprep.subr.bf16.mxu0 %v18165_v5  ;;  %12934 = vmatprep.subr.bf16.mxu1 %v18170_v16 }
 0x752   : > { %v5386_v39 = vmul.f32 %v5292_v20, %v18074_v49  ;;  %v5388_v9 = vmul.f32 %v5333_v7, %v18078_v3  ;;  %v5294_v52 = vpop.f32.mrb[62].mxu1  ;;  %v5335_v19 = vpop.f32.mrb[54].mxu0  ;;  %v18214_v20 = vld [vmem:[%s22652_s9 + $0x198] sm:$0xff]   ;;  %v18238_v7 = vld [vmem:[%s22652_s9 + $0x1a0] sm:$0xff]  }
 0x753   : > { %v5295_v0 = vpop.f32.mrb[63].mxu1  ;;  %v5336_v5 = vpop.f32.mrb[55].mxu0  ;;  %23470 = vst [vmem:[#allocation66_spill] sm:$0xff] %v18214_v20  ;;  %v18221_v52 = vld [vmem:[%s22652_s9 + $0x178] sm:$0xff]   ;;  %v18226_v19 = vld [vmem:[%s22652_s9 + $0x1e0] sm:$0xff]   ;;  %23474 = vst [vmem:[#allocation70_spill] sm:$0xff] %v18238_v7 }
 0x754   : > { %12919 = vmatpush3.bf16.msra.mxu0 %v18177_v2  ;;  %12935 = vmatpush3.bf16.msra.mxu1 %v18182_v62  ;;  %v5398_v16 = vpack.c.bf16 %v5386_v39, %v5386_v39  ;;  %23471 = vst [vmem:[#allocation67_spill] sm:$0xff] %v18221_v52  ;;  %23472 = vst [vmem:[#allocation68_spill] sm:$0xff] %v18226_v19  ;;  %v18233_v0 = vld [vmem:[%s22652_s9 + $0x138] sm:$0xff]   ;;  %v18245_v5 = vld [vmem:[%s22652_s9 + $0x1e8] sm:$0xff]  }
 0x755   : > { %12920 = vmatprep.subr.bf16.mxu0 %v18195_v31  ;;  %12936 = vmatprep.subr.bf16.mxu1 %v18200_v15  ;;  %23473 = vst [vmem:[#allocation69_spill] sm:$0xff] %v18233_v0 }
 0x756   : > { %6131 = vmatprep.mubr.bf16.mxu1 %v5398_v16  ;;  %v18250_v16 = vld [vmem:[%s22652_s9 + $0x240] sm:$0xff]  }
 0x757   : > { %23475 = vst [vmem:[#allocation71_spill] sm:$0xff] %v18250_v16 }
 0x758   : > { %12921 = vmatpush3.bf16.msra.mxu0 %v18209_v61  ;;  %12937 = vmatpush3.bf16.msra.mxu1 %v18214_v20  ;;  %v5395_v20 = vpack.c.bf16 %v18116_v32, %v18116_v32  ;;  %v18280_v32 = vld [vmem:[%s22652_s9 + $0x248] sm:$0xff]  }
 0x759   : > { %12922 = vmatprep.subr.bf16.mxu0 %v18221_v52  ;;  %12938 = vmatprep.subr.bf16.mxu1 %v18226_v19  ;;  %v18257_v52 = vld [vmem:[%s22652_s9 + $0x1a8] sm:$0xff]   ;;  %v18262_v19 = vld [vmem:[%s22652_s9 + $0x200] sm:$0xff]   ;;  %23476 = vst [vmem:[#allocation72_spill] sm:$0xff] %v18280_v32 }
 0x75c   : > { %12923 = vmatpush3.bf16.msra.mxu0 %v18233_v0  ;;  %12939 = vmatpush3.bf16.msra.mxu1 %v18238_v7  ;;  %v5372_v39 = vpop.f32.mrb[64].mxu1  ;;  %v18274_v7 = vld [vmem:[%s22652_s9 + $0x1f0] sm:$0xff]  }
 0x75d   : > { %v18267_v61 = vmul.f32 %v5372_v39, %v18080_v4  ;;  %v5374_v0 = vpop.f32.mrb[65].mxu1  ;;  %12940 = vmatprep.subr.bf16.mxu1 %v18245_v5  ;;  %12952 = vmatprep.subr.bf16.mxu0 %v18250_v16  ;;  %v5400_v4 = vpack.c.bf16 %v5388_v9, %v5388_v9  ;;  %v18287_v16 = vld [vmem:[%s22652_s9 + $0x1b0] sm:$0xff]   ;;  %v18298_v9 = vld [vmem:[%s22652_s9 + $0x1f8] sm:$0xff]  }
 0x75e   : > { %v5390_v15 = vmul.f32 %v5374_v0, %v18083_v1  ;;  %v5376_v31 = vpop.f32.mrb[66].mxu1  ;;  %23477 = vst [vmem:[#allocation73_spill] sm:$0xff] %v18287_v16  ;;  %23479 = vst [vmem:[#allocation75_spill] sm:$0xff] %v18298_v9  ;;  %v18316_v0 = vld [vmem:[%s22652_s9 + $0x210] sm:$0xff]  }
 0x75f   : > { %6092 = vmatmul.mubr.bf16.vlgmr.msra.gmra.mrb[60].mxu0 %v5395_v20  ;;  %v5377_v39 = vpop.f32.mrb[67].mxu1  ;;  %v18292_v31 = vld [vmem:[%s22652_s9 + $0x208] sm:$0xff]   ;;  %v18303_v20 = vld [vmem:[%s22652_s9 + $0x250] sm:$0xff]   ;;  %23482 = vst [vmem:[#allocation78_spill] sm:$0xff] %v18316_v0 }
 0x760   : > { %12941 = vmatpush3.bf16.msra.mxu1 %v18257_v52  ;;  %12953 = vmatpush3.bf16.msra.mxu0 %v18262_v19  ;;  %23478 = vst [vmem:[#allocation74_spill] sm:$0xff] %v18292_v31  ;;  %23480 = vst [vmem:[#allocation76_spill] sm:$0xff] %v18303_v20  ;;  %v18323_v39 = vld [vmem:[%s22652_s9 + $0x258] sm:$0xff]  }
 0x761   : > { %6171 = vmatprep.mubr.bf16.mxu0 %v5400_v4  ;;  %12942 = vmatprep.subr.bf16.mxu1 %v18274_v7  ;;  %v18311_v4 = vld [vmem:[%s22652_s9 + $0x1b8] sm:$0xff]  }
 0x762   : > { %12954 = vmatprep.subr.bf16.mxu0 %v18280_v32  ;;  %23481 = vst [vmem:[#allocation77_spill] sm:$0xff] %v18311_v4  ;;  %v5402_v32 = vpack.c.bf16 %v5390_v15, %v5390_v15  ;;  %v18372_v15 = vld [vmem:[%s22652_s9 + $0x268] sm:$0xff]  }
 0x763   : > { %23488 = vst [vmem:[#allocation84_spill] sm:$0xff] %v18372_v15 }
 0x764   : > { %12943 = vmatpush3.bf16.msra.mxu1 %v18287_v16  ;;  %12955 = vmatpush3.bf16.msra.mxu0 %v18292_v31  ;;  %v18328_v31 = vld [vmem:[%s22652_s9 + $0x2c0] sm:$0xff]   ;;  %v5397_v16 = vpack.c.bf16 %v18185_v53, %v18185_v53 }
 0x765   : > { %12944 = vmatprep.subr.bf16.mxu1 %v18298_v9  ;;  %12956 = vmatprep.subr.bf16.mxu0 %v18303_v20  ;;  %23483 = vst [vmem:[#allocation79_spill] sm:$0xff] %v18328_v31  ;;  %v18335_v9 = vld [vmem:[%s22652_s9 + $0x218] sm:$0xff]   ;;  %v18340_v20 = vld [vmem:[%s22652_s9 + $0x280] sm:$0xff]  }
 0x766   : > { %v18361_v53 = vld [vmem:[%s22652_s9 + $0x220] sm:$0xff]  }
 0x767   : > { %23486 = vst [vmem:[#allocation82_spill] sm:$0xff] %v18361_v53 }
 0x768   : > { %12945 = vmatpush3.bf16.msra.mxu1 %v18311_v4  ;;  %12957 = vmatpush3.bf16.msra.mxu0 %v18316_v0  ;;  %v18349_v0 = vld [vmem:[%s22652_s9 + $0x260] sm:$0xff]   ;;  %v18354_v4 = vld [vmem:[%s22652_s9 + $0x2c8] sm:$0xff]  }
 0x769   : > { %12958 = vmatprep.subr.bf16.mxu0 %v18323_v39  ;;  %12974 = vmatprep.subr.bf16.mxu1 %v18328_v31  ;;  %23484 = vst [vmem:[#allocation80_spill] sm:$0xff] %v18349_v0  ;;  %23485 = vst [vmem:[#allocation81_spill] sm:$0xff] %v18354_v4  ;;  %v18366_v31 = vld [vmem:[%s22652_s9 + $0x288] sm:$0xff]  }
 0x76a   : > { %23487 = vst [vmem:[#allocation83_spill] sm:$0xff] %v18366_v31 }
 0x76b   : > { %6132 = vmatmul.mubr.bf16.vlgmr.msra.gmra.mrb[72].mxu1 %v5397_v16  ;;  %v18377_v16 = vld [vmem:[%s22652_s9 + $0x2d0] sm:$0xff]  }
 0x76c   : > { %12959 = vmatpush3.bf16.msra.mxu0 %v18335_v9  ;;  %12975 = vmatpush3.bf16.msra.mxu1 %v18340_v20  ;;  %23489 = vst [vmem:[#allocation85_spill] sm:$0xff] %v18377_v16 }
 0x76d   : > { %6211 = vmatprep.mubr.bf16.mxu1 %v5402_v32  ;;  %12960 = vmatprep.subr.bf16.mxu0 %v18349_v0  ;;  %v18385_v32 = vld [vmem:[%s22652_s9 + $0x228] sm:$0xff]   ;;  %v18390_v0 = vld [vmem:[%s22652_s9 + $0x290] sm:$0xff]  }
 0x76e   : > { %12976 = vmatprep.subr.bf16.mxu1 %v18354_v4  ;;  %23490 = vst [vmem:[#allocation86_spill] sm:$0xff] %v18385_v32  ;;  %23491 = vst [vmem:[#allocation87_spill] sm:$0xff] %v18390_v0  ;;  %v5399_v4 = vpack.c.bf16 %v18188_v42, %v18188_v42  ;;  %v23498_v42 = vmov 0  }
 0x770   : > { %12961 = vmatpush3.bf16.msra.mxu0 %v18361_v53  ;;  %12977 = vmatpush3.bf16.msra.mxu1 %v18366_v31  ;;  %v18397_v53 = vld [vmem:[%s22652_s9 + $0x270] sm:$0xff]   ;;  %v18402_v31 = vld [vmem:[%s22652_s9 + $0x2d8] sm:$0xff]  }
 0x771   : > { %12962 = vmatprep.subr.bf16.mxu0 %v18372_v15  ;;  %12978 = vmatprep.subr.bf16.mxu1 %v18377_v16  ;;  %23492 = vst [vmem:[#allocation88_spill] sm:$0xff] %v18397_v53  ;;  %23493 = vst [vmem:[#allocation89_spill] sm:$0xff] %v18402_v31  ;;  %v18409_v15 = vld [vmem:[%s22652_s9 + $0x230] sm:$0xff]   ;;  %v18414_v16 = vld [vmem:[%s22652_s9 + $0x298] sm:$0xff]  }
 0x772   : > { %23494 = vst [vmem:[#allocation90_spill] sm:$0xff] %v18409_v15  ;;  %23495 = vst [vmem:[#allocation91_spill] sm:$0xff] %v18414_v16 }
 0x774   : > { %12963 = vmatpush3.bf16.msra.mxu0 %v18385_v32  ;;  %12979 = vmatpush3.bf16.msra.mxu1 %v18390_v0  ;;  %v18421_v32 = vld [vmem:[%s22652_s9 + $0x278] sm:$0xff]   ;;  %v18426_v0 = vld [vmem:[%s22652_s9 + $0x2e0] sm:$0xff]  }
 0x775   : > { %12964 = vmatprep.subr.bf16.mxu0 %v18397_v53  ;;  %12980 = vmatprep.subr.bf16.mxu1 %v18402_v31  ;;  %23496 = vst [vmem:[#allocation92_spill] sm:$0xff] %v18426_v0  ;;  %v18433_v53 = vld [vmem:[%s22652_s9 + $0x238] sm:$0xff]   ;;  %v18438_v31 = vld [vmem:[%s22652_s9 + $0x2a0] sm:$0xff]  }
 0x776   : > { %23497 = vst [vmem:[#allocation93_spill] sm:$0xff] %v18438_v31 }
 0x778   : > { %12965 = vmatpush3.bf16.msra.mxu0 %v18409_v15  ;;  %12981 = vmatpush3.bf16.msra.mxu1 %v18414_v16  ;;  %v18445_v15 = vld [vmem:[%s22652_s9 + $0x2e8] sm:$0xff]  }
 0x779   : > { %12966 = vmatprep.subr.bf16.mxu0 %v18421_v32  ;;  %12982 = vmatprep.subr.bf16.mxu1 %v18426_v0  ;;  %v18452_v16 = vld [vmem:[%s22652_s9 + $0x2a8] sm:$0xff]   ;;  %v18461_v0 = vld [vmem:[%s22652_s9 + $0x2f0] sm:$0xff]  }
 0x77c   : > { %12967 = vmatpush3.bf16.msra.mxu0 %v18433_v53  ;;  %12983 = vmatpush3.bf16.msra.mxu1 %v18438_v31  ;;  %v18468_v31 = vld [vmem:[%s22652_s9 + $0x2b0] sm:$0xff]  }
 0x77d   : > { %12984 = vmatprep.subr.bf16.mxu1 %v18445_v15  ;;  %6228 = vmatprep.subr.bf16.mxu0 %v17587_v54  ;;  %v18475_v54 = vld [vmem:[%s22652_s9 + $0x2f8] sm:$0xff]  }
 0x77f   : > { %6172 = vmatmul.mubr.bf16.vlgmr.msra.gmra.mrb[64].mxu0 %v5399_v4 }
 0x780   : > { %12985 = vmatpush3.bf16.msra.mxu1 %v18452_v16  ;;  %6229 = vmatpush1.bf16.msra.mxu0 %v17595_v28  ;;  %v18483_v28 = vld [vmem:[%s22652_s9 + $0x2b8] sm:$0xff]  }
 0x781   : > { %12986 = vmatprep.subr.bf16.mxu1 %v18461_v0  ;;  %6230 = vmatprep.subr.bf16.mxu0 %v17604_v8  ;;  %v5401_v8 = vpack.c.bf16 %v18267_v61, %v18267_v61 }
 0x782   : > { %6260 = vmatprep.mubr.bf16.mxu0 %v23498_v42 }
 0x784   : > { %12987 = vmatpush3.bf16.msra.mxu1 %v18468_v31  ;;  %6231 = vmatpush1.bf16.msra.mxu0 %v17614_v12  ;;  %v23499_v12 = vld [vmem:[#allocation6_spill] sm:$0xff] }
 0x785   : > { %12988 = vmatprep.subr.bf16.mxu1 %v18475_v54  ;;  %6232 = vmatprep.subr.bf16.mxu0 %v17623_v22  ;;  %v23500_v22 = vld [vmem:[#allocation7_spill] sm:$0xff] }
 0x788   : > { %12989 = vmatpush3.bf16.msra.mxu1 %v18483_v28  ;;  %6233 = vmatpush1.bf16.msra.mxu0 %v17633_v23  ;;  %v23501_v23 = vld [vmem:[#allocation9_spill] sm:$0xff] }
 0x789   : > { %6269 = vmatprep.subr.bf16.mxu1 %v17639_v24  ;;  %6310 = vmatprep.subr.bf16.mxu0 %v17644_v25  ;;  %v23502_v24 = vld [vmem:[#allocation10_spill] sm:$0xff]  ;;  %v23503_v25 = vld [vmem:[#allocation11_spill] sm:$0xff] }
 0x78b   : > { %6212 = vmatmul.mubr.bf16.vlgmr.msra.gmra.mrb[76].mxu1 %v5401_v8  ;;  %12649 = vmatmul.mubr.msk.bf16.vlgmr.msra.gmra.mrb[68].mxu0 %vm1806_vm6, %v17911_v21 }
 0x78c   : > { %6270 = vmatpush1.bf16.msra.mxu1 %v17650_v26  ;;  %6311 = vmatpush1.bf16.msra.mxu0 %v17655_v27  ;;  %v23504_v26 = vld [vmem:[#allocation12_spill] sm:$0xff]  ;;  %v23505_v27 = vld [vmem:[#allocation14_spill] sm:$0xff] }
 0x78d   : > { %6271 = vmatprep.subr.bf16.mxu1 %v17662_v43  ;;  %6312 = vmatprep.subr.bf16.mxu0 %v17667_v45  ;;  %v23506_v43 = vld [vmem:[#allocation23_spill] sm:$0xff]  ;;  %v23507_v45 = vld [vmem:[#allocation22_spill] sm:$0xff] }
 0x78e   : > { %6301 = vmatprep.mubr.bf16.mxu1 %v23498_v42  ;;  %6342 = vmatprep.mubr.bf16.mxu0 %v23498_v42 }
 0x790   : > { %6272 = vmatpush1.bf16.msra.mxu1 %v17677_v47  ;;  %6313 = vmatpush1.bf16.msra.mxu0 %v17682_v48  ;;  %v23508_v47 = vld [vmem:[#allocation25_spill] sm:$0xff]  ;;  %v23509_v48 = vld [vmem:[#allocation24_spill] sm:$0xff] }
 0x791   : > { %6273 = vmatprep.subr.bf16.mxu1 %v17689_v40  ;;  %6314 = vmatprep.subr.bf16.mxu0 %v17694_v50  ;;  %v23510_v40 = vld [vmem:[#allocation27_spill] sm:$0xff]  ;;  %v23511_v50 = vld [vmem:[#allocation26_spill] sm:$0xff] }
 0x794   : > { %6274 = vmatpush1.bf16.msra.mxu1 %v17703_v60  ;;  %6315 = vmatpush1.bf16.msra.mxu0 %v17708_v29  ;;  %v23512_v60 = vld [vmem:[#allocation29_spill] sm:$0xff]  ;;  %v23513_v29 = vld [vmem:[#allocation28_spill] sm:$0xff] }
 0x795   : > { %6351 = vmatprep.subr.bf16.mxu1 %v17715_v11  ;;  %6392 = vmatprep.subr.bf16.mxu0 %v17720_v30  ;;  %v23514_v11 = vld [vmem:[#allocation31_spill] sm:$0xff]  ;;  %v23515_v30 = vld [vmem:[#allocation30_spill] sm:$0xff] }
 0x797   : > { %12650 = vmatmul.mubr.msk.bf16.vlgmr.msra.gmra.mrb[80].mxu1 %vm1806_vm6, %v17911_v21  ;;  %12651 = vmatmul.mubr.msk.bf16.vlgmr.msra.gmra.mrb[72].mxu0 %vm1806_vm6, %v17911_v21 }
 0x798   : > { %6352 = vmatpush1.bf16.msra.mxu1 %v17731_v14  ;;  %6393 = vmatpush1.bf16.msra.mxu0 %v17736_v33  ;;  %v23516_v14 = vld [vmem:[#allocation33_spill] sm:$0xff]  ;;  %v23517_v33 = vld [vmem:[#allocation32_spill] sm:$0xff] }
 0x799   : > { %6353 = vmatprep.subr.bf16.mxu1 %v17743_v34  ;;  %6394 = vmatprep.subr.bf16.mxu0 %v17748_v17  ;;  %v23518_v34 = vld [vmem:[#allocation35_spill] sm:$0xff]  ;;  %v23519_v17 = vld [vmem:[#allocation34_spill] sm:$0xff] }
 0x79a   : > { %6383 = vmatprep.mubr.bf16.mxu1 %v23498_v42  ;;  %6424 = vmatprep.mubr.bf16.mxu0 %v23498_v42 }
 0x79c   : > { %6354 = vmatpush1.bf16.msra.mxu1 %v17759_v35  ;;  %6395 = vmatpush1.bf16.msra.mxu0 %v17764_v18  ;;  %v23520_v35 = vld [vmem:[#allocation37_spill] sm:$0xff]  ;;  %v23521_v18 = vld [vmem:[#allocation36_spill] sm:$0xff] }
 0x79d   : > { %6355 = vmatprep.subr.bf16.mxu1 %v17771_v36  ;;  %6396 = vmatprep.subr.bf16.mxu0 %v17776_v37  ;;  %v23522_v36 = vld [vmem:[#allocation38_spill] sm:$0xff]  ;;  %v23523_v37 = vld [vmem:[#allocation39_spill] sm:$0xff] }
 0x7a0   : > { %6356 = vmatpush1.bf16.msra.mxu1 %v17785_v38  ;;  %6397 = vmatpush1.bf16.msra.mxu0 %v17790_v63  ;;  %v23524_v38 = vld [vmem:[#allocation40_spill] sm:$0xff]  ;;  %v23525_v63 = vld [vmem:[#allocation41_spill] sm:$0xff] }
 0x7a1   : > { %6433 = vmatprep.subr.bf16.mxu1 %v17797_v10  ;;  %12996 = vmatprep.subr.bf16.mxu0 %v17802_v41  ;;  %v23526_v10 = vld [vmem:[#allocation42_spill] sm:$0xff]  ;;  %v23527_v41 = vld [vmem:[#allocation43_spill] sm:$0xff] }
 0x7a3   : > { %12652 = vmatmul.mubr.msk.bf16.vlgmr.msra.gmra.mrb[84].mxu1 %vm1806_vm6, %v17911_v21  ;;  %12653 = vmatmul.mubr.msk.bf16.vlgmr.msra.gmra.mrb[76].mxu0 %vm1806_vm6, %v17911_v21 }
 0x7a4   : > { %6434 = vmatpush1.bf16.msra.mxu1 %v17813_v13  ;;  %6465 = vmatprep.mubr.bf16.mxu1 %v23498_v42  ;;  %v23528_v13 = vld [vmem:[#allocation44_spill] sm:$0xff] }
 0x7a5   : > { %6435 = vmatprep.subr.bf16.mxu1 %v17819_v55  ;;  %12997 = vmatpush3.bf16.msra.mxu0 %v17825_v56  ;;  %v23529_v55 = vld [vmem:[#allocation45_spill] sm:$0xff] }
 0x7a6   : > { %12998 = vmatprep.subr.bf16.mxu0 %v17830_v46 }
 0x7a8   : > { %6436 = vmatpush1.bf16.msra.mxu1 %v17840_v44 }
 0x7a9   : > { %6437 = vmatprep.subr.bf16.mxu1 %v17847_v6  ;;  %12999 = vmatpush3.bf16.msra.mxu0 %v17853_v57 }
 0x7aa   : > { %13000 = vmatprep.subr.bf16.mxu0 %v23499_v12 }
 0x7ac   : > { %6438 = vmatpush1.bf16.msra.mxu1 %v23500_v22 }
 0x7ad   : > { %13001 = vmatpush3.bf16.msra.mxu0 %v23501_v23  ;;  %13018 = vmatprep.subr.bf16.mxu1 %v23502_v24 }
 0x7ae   : > { %13002 = vmatprep.subr.bf16.mxu0 %v23503_v25 }
 0x7af   : > { %12654 = vmatmul.mubr.msk.bf16.vlgmr.msra.gmra.mrb[88].mxu1 %vm1806_vm6, %v17911_v21 }
 0x7b0   : > { %13019 = vmatpush3.bf16.msra.mxu1 %v23504_v26 }
 0x7b1   : > { %13003 = vmatpush3.bf16.msra.mxu0 %v23505_v27  ;;  %13020 = vmatprep.subr.bf16.mxu1 %v23506_v43 }
 0x7b2   : > { %13004 = vmatprep.subr.bf16.mxu0 %v23507_v45 }
 0x7b4   : > { %13021 = vmatpush3.bf16.msra.mxu1 %v23508_v47 }
 0x7b5   : > { %13005 = vmatpush3.bf16.msra.mxu0 %v23509_v48  ;;  %13022 = vmatprep.subr.bf16.mxu1 %v23510_v40 }
 0x7b6   : > { %13006 = vmatprep.subr.bf16.mxu0 %v23511_v50 }
 0x7b8   : > { %13023 = vmatpush3.bf16.msra.mxu1 %v23512_v60 }
 0x7b9   : > { %13007 = vmatpush3.bf16.msra.mxu0 %v23513_v29  ;;  %13024 = vmatprep.subr.bf16.mxu1 %v23514_v11 }
 0x7ba   : > { %13008 = vmatprep.subr.bf16.mxu0 %v23515_v30 }
 0x7bc   : > { %13025 = vmatpush3.bf16.msra.mxu1 %v23516_v14 }
 0x7bd   : > { %13009 = vmatpush3.bf16.msra.mxu0 %v23517_v33  ;;  %13026 = vmatprep.subr.bf16.mxu1 %v23518_v34 }
 0x7be   : > { %13010 = vmatprep.subr.bf16.mxu0 %v23519_v17 }
 0x7c0   : > { %13027 = vmatpush3.bf16.msra.mxu1 %v23520_v35 }
 0x7c1   : > { %13011 = vmatpush3.bf16.msra.mxu0 %v23521_v18  ;;  %13028 = vmatprep.subr.bf16.mxu1 %v23522_v36  ;;  %v23530_v18 = vld [vmem:[#allocation3_spill] sm:$0xff] }
 0x7c2   : > { %13040 = vmatprep.subr.bf16.mxu0 %v23523_v37 }
 0x7c4   : > { %13029 = vmatpush3.bf16.msra.mxu1 %v23524_v38 }
 0x7c5   : > { %13030 = vmatprep.subr.bf16.mxu1 %v23525_v63 }
 0x7c8   : > { %13031 = vmatpush3.bf16.msra.mxu1 %v23526_v10  ;;  %v23531_v10 = vld [vmem:[#allocation4_spill] sm:$0xff] }
 0x7c9   : > { %13032 = vmatprep.subr.bf16.mxu1 %v23527_v41 }
 0x7cc   : > { %13033 = vmatpush3.bf16.msra.mxu1 %v23528_v13 }
 0x7cd   : > { %13062 = vmatprep.subr.bf16.mxu1 %v23529_v55 }
 0x812   : > { %v12880_v56 = vpop.f32.mrb[56].mxu0 }
 0x813   : > { %v12881_v46 = vpop.f32.mrb[57].mxu0 }
 0x814   : > { %v12882_v44 = vadd.f32 %v12881_v46, %v12880_v56  ;;  %v12883_v6 = vpop.f32.mrb[58].mxu0 }
 0x815   : > { %v12884_v57 = vpop.f32.mrb[59].mxu0 }
 0x81e   : > { %v12902_v21 = vpop.f32.mrb[68].mxu1 }
 0x81f   : > { %v12903_v61 = vpop.f32.mrb[69].mxu1 }
 0x820   : > { %v12904_v4 = vadd.f32 %v12903_v61, %v12902_v21  ;;  %v12905_v8 = vpop.f32.mrb[70].mxu1  ;;  %v23532_v61 = vld [vmem:[#allocation50_spill] sm:$0xff] }
 0x821   : > { %v12906_v12 = vpop.f32.mrb[71].mxu1  ;;  %v23534_v8 = vld [vmem:[#allocation52_spill] sm:$0xff] }
 0x822   : > { %v6054_v22 = vadd.f32 %v12904_v4, %v12882_v44  ;;  %v23533_v4 = vld [vmem:[#allocation51_spill] sm:$0xff] }
 0x832   : > { %v12924_v23 = vpop.f32.mrb[60].mxu0 }
 0x833   : > { %v12925_v24 = vpop.f32.mrb[61].mxu0 }
 0x834   : > { %v12926_v25 = vadd.f32 %v12925_v24, %v12924_v23  ;;  %v12927_v26 = vpop.f32.mrb[62].mxu0  ;;  %v23535_v23 = vld [vmem:[#allocation5_spill] sm:$0xff] }
 0x835   : > { %v12928_v27 = vpop.f32.mrb[63].mxu0 }
 0x836   : > { %v6094_v43 = vadd.f32 %v12926_v25, %v6054_v22  ;;  %v23536_v25 = vld [vmem:[#allocation46_spill] sm:$0xff] }
 0x83e   : > { %v12946_v45 = vpop.f32.mrb[72].mxu1 }
 0x83f   : > { %v12947_v47 = vpop.f32.mrb[73].mxu1 }
 0x840   : > { %v12948_v48 = vadd.f32 %v12947_v47, %v12946_v45  ;;  %v12949_v40 = vpop.f32.mrb[74].mxu1  ;;  %v23537_v45 = vld [vmem:[#allocation53_spill] sm:$0xff] }
 0x841   : > { %v12950_v50 = vpop.f32.mrb[75].mxu1 }
 0x842   : > { %v6134_v60 = vadd.f32 %v12948_v48, %v6094_v43 }
 0x852   : > { %v12968_v29 = vpop.f32.mrb[64].mxu0 }
 0x853   : > { %v12969_v11 = vpop.f32.mrb[65].mxu0 }
 0x854   : > { %v12970_v30 = vadd.f32 %v12969_v11, %v12968_v29  ;;  %v12971_v14 = vpop.f32.mrb[66].mxu0 }
 0x855   : > { %v12972_v33 = vpop.f32.mrb[67].mxu0 }
 0x856   : > { %v6174_v34 = vadd.f32 %v12970_v30, %v6134_v60  ;;  %v23538_v33 = vld [vmem:[#allocation54_spill] sm:$0xff] }
 0x85e   : > { %v12990_v17 = vpop.f32.mrb[76].mxu1  ;;  %v6262_v35 = vpop.f32.mrb[68].mxu0 }
 0x85f   : > { %v6474_v36 = vmul.f32 %v6262_v35, %v23530_v18  ;;  %v12991_v37 = vpop.f32.mrb[77].mxu1  ;;  %v6264_v38 = vpop.f32.mrb[69].mxu0  ;;  %v23541_v35 = vld [vmem:[#allocation57_spill] sm:$0xff] }
 0x860   : > { %v12992_v63 = vadd.f32 %v12991_v37, %v12990_v17  ;;  %v6475_v41 = vmul.f32 %v6264_v38, %v23531_v10  ;;  %v12993_v13 = vpop.f32.mrb[78].mxu1  ;;  %v6266_v55 = vpop.f32.mrb[70].mxu0  ;;  %v23540_v17 = vld [vmem:[#allocation56_spill] sm:$0xff]  ;;  %v23543_v37 = vld [vmem:[#allocation59_spill] sm:$0xff] }
 0x861   : > { %v12994_v56 = vpop.f32.mrb[79].mxu1  ;;  %v6267_v46 = vpop.f32.mrb[71].mxu0  ;;  %v6486_v57 = vpack.c.bf16 %v6474_v36, %v6474_v36  ;;  %v23542_v36 = vld [vmem:[#allocation58_spill] sm:$0xff]  ;;  %v23544_v38 = vld [vmem:[#allocation60_spill] sm:$0xff] }
 0x862   : > { %v6214_v44 = vadd.f32 %v12992_v63, %v6174_v34  ;;  %v6487_v6 = vpack.c.bf16 %v6475_v41, %v6475_v41  ;;  %v23539_v34 = vld [vmem:[#allocation55_spill] sm:$0xff]  ;;  %v23546_v55 = vld [vmem:[#allocation48_spill] sm:$0xff] }
 0x863   : > { %v23545_v41 = vld [vmem:[#allocation47_spill] sm:$0xff] }
 0x864   : > { %v6219_v21 = vpack.c.bf16 %v6214_v44, %v6214_v44  ;;  %6530 = vmatprep.mubr.bf16.mxu0 %v6487_v6  ;;  %v23547_v6 = vld [vmem:[#allocation61_spill] sm:$0xff] }
 0x865   : > { %6531 = vmatmul.mubr.bf16.vlgmr.msra.gmra.mrb[80].mxu0 %v6486_v57  ;;  %v23548_v57 = vld [vmem:[#allocation62_spill] sm:$0xff] }
 0x866   : > { %13041 = vmatpush3.bf16.msra.mxu0 %v23532_v61  ;;  %6221 = vst.msk [vmem:[%s18578_s24] sm:$0xf] %vm6220_vm15, %v6219_v21 }
 0x867   : > { %13042 = vmatprep.subr.bf16.mxu0 %v23533_v4 }
 0x86a   : > { %13043 = vmatpush3.bf16.msra.mxu0 %v23534_v8  ;;  %v6303_v12 = vpop.f32.mrb[80].mxu1  ;;  %v6344_v22 = vpop.f32.mrb[72].mxu0 }
 0x86b   : > { %v6476_v24 = vmul.f32 %v6303_v12, %v23535_v23  ;;  %v6478_v26 = vmul.f32 %v6344_v22, %v23536_v25  ;;  %v6305_v27 = vpop.f32.mrb[81].mxu1  ;;  %v6346_v43 = vpop.f32.mrb[73].mxu0  ;;  %13044 = vmatprep.subr.bf16.mxu0 %v23537_v45  ;;  %v23551_v45 = vld [vmem:[#allocation65_spill] sm:$0xff] }
 0x86c   : > { %v6477_v47 = vmul.f32 %v6305_v27, %v17806_v51  ;;  %v6479_v48 = vmul.f32 %v6346_v43, %v18070_v59  ;;  %v6307_v40 = vpop.f32.mrb[82].mxu1  ;;  %v6348_v50 = vpop.f32.mrb[74].mxu0  ;;  %v23549_v27 = vld [vmem:[#allocation63_spill] sm:$0xff]  ;;  %v23550_v43 = vld [vmem:[#allocation64_spill] sm:$0xff] }
 0x86d   : > { %v6308_v60 = vpop.f32.mrb[83].mxu1  ;;  %v6349_v29 = vpop.f32.mrb[75].mxu0  ;;  %v6488_v14 = vpack.c.bf16 %v6476_v24, %v6476_v24  ;;  %v23554_v40 = vld [vmem:[#allocation68_spill] sm:$0xff]  ;;  %v23555_v50 = vld [vmem:[#allocation69_spill] sm:$0xff] }
 0x86e   : > { %13045 = vmatpush3.bf16.msra.mxu0 %v18112_v58  ;;  %v6489_v11 = vpack.c.bf16 %v6477_v47, %v6477_v47  ;;  %v6491_v30 = vpack.c.bf16 %v6479_v48, %v6479_v48  ;;  %v23552_v47 = vld [vmem:[#allocation66_spill] sm:$0xff]  ;;  %v23553_v48 = vld [vmem:[#allocation67_spill] sm:$0xff]  ;;  %v23557_v29 = vld [vmem:[#allocation49_spill] sm:$0xff] }
 0x86f   : > { %13046 = vmatprep.subr.bf16.mxu0 %v23538_v33  ;;  %v23556_v60 = vld [vmem:[#allocation70_spill] sm:$0xff] }
 0x870   : > { %6570 = vmatprep.mubr.bf16.mxu1 %v6489_v11  ;;  %6610 = vmatprep.mubr.bf16.mxu0 %v6491_v30 }
 0x871   : > { %6571 = vmatmul.mubr.bf16.vlgmr.msra.gmra.mrb[92].mxu1 %v6488_v14  ;;  %v23558_v14 = vld [vmem:[#allocation71_spill] sm:$0xff] }
 0x872   : > { %13047 = vmatpush3.bf16.msra.mxu0 %v23539_v34  ;;  %13063 = vmatpush3.bf16.msra.mxu1 %v23540_v17 }
 0x873   : > { %13048 = vmatprep.subr.bf16.mxu0 %v23541_v35  ;;  %13064 = vmatprep.subr.bf16.mxu1 %v23542_v36  ;;  %v23560_v36 = vld [vmem:[#allocation73_spill] sm:$0xff] }
 0x876   : > { %13049 = vmatpush3.bf16.msra.mxu0 %v23543_v37  ;;  %13065 = vmatpush3.bf16.msra.mxu1 %v23544_v38  ;;  %v6385_v58 = vpop.f32.mrb[84].mxu1  ;;  %v6426_v63 = vpop.f32.mrb[76].mxu0  ;;  %v23562_v37 = vld [vmem:[#allocation75_spill] sm:$0xff]  ;;  %v23563_v38 = vld [vmem:[#allocation76_spill] sm:$0xff] }
 0x877   : > { %v6480_v13 = vmul.f32 %v6385_v58, %v23545_v41  ;;  %v18600_v56 = vmul.f32 %v6426_v63, %v23546_v55  ;;  %v6387_v46 = vpop.f32.mrb[85].mxu1  ;;  %v6428_v44 = vpop.f32.mrb[77].mxu0  ;;  %13050 = vmatprep.subr.bf16.mxu0 %v23547_v6  ;;  %13066 = vmatprep.subr.bf16.mxu1 %v23548_v57  ;;  %v23564_v58 = vld [vmem:[#allocation77_spill] sm:$0xff]  ;;  %v23565_v63 = vld [vmem:[#allocation78_spill] sm:$0xff]  ;;  %v23570_v57 = vld [vmem:[#allocation83_spill] sm:$0xff] }
 0x878   : > { %v6481_v21 = vmul.f32 %v6387_v46, %v18074_v49  ;;  %v6483_v61 = vmul.f32 %v6428_v44, %v18078_v3  ;;  %v6389_v4 = vpop.f32.mrb[86].mxu1  ;;  %v6430_v8 = vpop.f32.mrb[78].mxu0  ;;  %v23567_v46 = vld [vmem:[#allocation80_spill] sm:$0xff]  ;;  %v23568_v44 = vld [vmem:[#allocation81_spill] sm:$0xff]  ;;  %v23569_v6 = vld [vmem:[#allocation82_spill] sm:$0xff] }
 0x879   : > { %v6390_v12 = vpop.f32.mrb[87].mxu1  ;;  %v6431_v22 = vpop.f32.mrb[79].mxu0  ;;  %v23577_v4 = vld [vmem:[#allocation90_spill] sm:$0xff]  ;;  %v23578_v8 = vld [vmem:[#allocation91_spill] sm:$0xff] }
 0x87a   : > { %13051 = vmatpush3.bf16.msra.mxu0 %v18177_v2  ;;  %13067 = vmatpush3.bf16.msra.mxu1 %v18182_v62  ;;  %v6493_v24 = vpack.c.bf16 %v6481_v21, %v6481_v21  ;;  %v6490_v62 = vpack.c.bf16 %v6478_v26, %v6478_v26  ;;  %v6495_v17 = vpack.c.bf16 %v6483_v61, %v6483_v61  ;;  %v23559_v26 = vld [vmem:[#allocation72_spill] sm:$0xff]  ;;  %v23573_v21 = vld [vmem:[#allocation86_spill] sm:$0xff]  ;;  %v23574_v61 = vld [vmem:[#allocation87_spill] sm:$0xff] }
 0x87b   : > { %13052 = vmatprep.subr.bf16.mxu0 %v23549_v27  ;;  %13068 = vmatprep.subr.bf16.mxu1 %v23550_v43  ;;  %v23579_v12 = vld [vmem:[#allocation92_spill] sm:$0xff]  ;;  %v23580_v22 = vld [vmem:[#allocation93_spill] sm:$0xff] }
 0x87c   : > { %6650 = vmatprep.mubr.bf16.mxu1 %v6493_v24  ;;  %v6494_v24 = vpack.c.bf16 %v18600_v56, %v18600_v56  ;;  %v18658_v27 = vld [vmem:[%s22651_s8 + $0x4] ss:$48 sps:$4 sm:$0xff]   ;;  %v18665_v43 = vld [vmem:[%s22651_s8] ss:$48 sps:$4 sm:$0xff]  }
 0x87d   : > { %v18672_v56 = vld [vmem:[%s22651_s8 + $0x64] ss:$48 sps:$4 sm:$0xff]  }
 0x87e   : > { %13053 = vmatpush3.bf16.msra.mxu0 %v23551_v45  ;;  %13069 = vmatpush3.bf16.msra.mxu1 %v23552_v47  ;;  %v18680_v45 = vld [vmem:[%s22651_s8 + $0x60] ss:$48 sps:$4 sm:$0xff]   ;;  %v18687_v47 = vld [vmem:[%s22651_s8 + $0xc4] ss:$48 sps:$4 sm:$0xff]  }
 0x87f   : > { %13054 = vmatprep.subr.bf16.mxu0 %v23553_v48  ;;  %13070 = vmatprep.subr.bf16.mxu1 %v23554_v40  ;;  %v18694_v48 = vld [vmem:[%s22651_s8 + $0xc0] ss:$48 sps:$4 sm:$0xff]  }
 0x882   : > { %13055 = vmatpush3.bf16.msra.mxu0 %v23555_v50  ;;  %13071 = vmatpush3.bf16.msra.mxu1 %v23556_v60  ;;  %v6467_v2 = vpop.f32.mrb[88].mxu1  ;;  %v18702_v50 = vld [vmem:[%s22651_s8 + $0xc] ss:$48 sps:$4 sm:$0xff]   ;;  %v18708_v60 = vld [vmem:[%s22651_s8 + $0x14] ss:$48 sps:$4 sm:$0xff]  }
 0x883   : > { %v18617_v11 = vmul.f32 %v6467_v2, %v23557_v29  ;;  %v6469_v30 = vpop.f32.mrb[89].mxu1  ;;  %13072 = vmatprep.subr.bf16.mxu1 %v18245_v5  ;;  %13084 = vmatprep.subr.bf16.mxu0 %v23558_v14  ;;  %v23561_v5 = vld [vmem:[#allocation74_spill] sm:$0xff]  ;;  %v23581_v2 = vld [vmem:[#allocation13_spill] sm:$0xff] }
 0x884   : > { %v6485_v33 = vmul.f32 %v6469_v30, %v18083_v1  ;;  %v6471_v34 = vpop.f32.mrb[90].mxu1  ;;  %v18727_v14 = vld [vmem:[%s22651_s8 + $0x10] ss:$48 sps:$4 sm:$0xff]  }
 0x885   : > { %6611 = vmatmul.mubr.bf16.vlgmr.msra.gmra.mrb[84].mxu0 %v6490_v62  ;;  %v6472_v35 = vpop.f32.mrb[91].mxu1  ;;  %v6496_v40 = vpack.c.bf16 %v18617_v11, %v18617_v11  ;;  %v23582_v62 = vld [vmem:[#allocation8_spill] sm:$0xff]  ;;  %v18721_v11 = vld [vmem:[%s22651_s8 + $0x8] ss:$48 sps:$4 sm:$0xff]   ;;  %23584 = vst [vmem:[#allocation7_spill] sm:$0xff] %v18727_v14 }
 0x886   : > { %13073 = vmatpush3.bf16.msra.mxu1 %v18257_v52  ;;  %13085 = vmatpush3.bf16.msra.mxu0 %v18262_v19  ;;  %v6492_v52 = vpack.c.bf16 %v6480_v13, %v6480_v13  ;;  %v23566_v19 = vld [vmem:[#allocation79_spill] sm:$0xff]  ;;  %v23571_v13 = vld [vmem:[#allocation84_spill] sm:$0xff]  ;;  %v18714_v30 = vsel %vm6752_vm14, %v23582_v62, %v23581_v2  ;;  %23583 = vst [vmem:[#allocation6_spill] sm:$0xff] %v18721_v11 }
 0x887   : > { %6690 = vmatprep.mubr.bf16.mxu0 %v6495_v17  ;;  %13074 = vmatprep.subr.bf16.mxu1 %v18274_v7  ;;  %v6497_v7 = vpack.c.bf16 %v6485_v33, %v6485_v33  ;;  %v18733_v33 = vld [vmem:[%s22651_s8 + $0x6c] ss:$48 sps:$4 sm:$0xff]   ;;  %v18739_v34 = vld [vmem:[%s22651_s8 + $0x74] ss:$48 sps:$4 sm:$0xff]   ;;  %v18747_v17 = vld [vmem:[%s22651_s8 + $0x68] ss:$48 sps:$4 sm:$0xff]  }
 0x888   : > { %13086 = vmatprep.subr.bf16.mxu0 %v23559_v26  ;;  %23585 = vst [vmem:[#allocation9_spill] sm:$0xff] %v18733_v33  ;;  %23586 = vst [vmem:[#allocation10_spill] sm:$0xff] %v18739_v34  ;;  %v18753_v35 = vld [vmem:[%s22651_s8 + $0x70] ss:$48 sps:$4 sm:$0xff]   ;;  %v18759_v26 = vld [vmem:[%s22651_s8 + $0xcc] ss:$48 sps:$4 sm:$0xff]  }
 0x889   : > { %23587 = vst [vmem:[#allocation11_spill] sm:$0xff] %v18747_v17  ;;  %23588 = vst [vmem:[#allocation12_spill] sm:$0xff] %v18753_v35  ;;  %v18849_v2 = vld [vmem:[%s22651_s8 + $0xd8] ss:$48 sps:$4 sm:$0xff]   ;;  %v18855_v62 = vld [vmem:[%s22651_s8 + $0xe0] ss:$48 sps:$4 sm:$0xff]  }
 0x88a   : > { %13075 = vmatpush3.bf16.msra.mxu1 %v23560_v36  ;;  %13087 = vmatpush3.bf16.msra.mxu0 %v23561_v5  ;;  %23589 = vst [vmem:[#allocation14_spill] sm:$0xff] %v18759_v26  ;;  %v18765_v36 = vld [vmem:[%s22651_s8 + $0xd4] ss:$48 sps:$4 sm:$0xff]   ;;  %v18771_v5 = vld [vmem:[%s22651_s8 + $0xc8] ss:$48 sps:$4 sm:$0xff]   ;;  %23603 = vst [vmem:[#allocation34_spill] sm:$0xff] %v18849_v2 }
 0x88b   : > { %13076 = vmatprep.subr.bf16.mxu1 %v23562_v37  ;;  %13088 = vmatprep.subr.bf16.mxu0 %v23563_v38  ;;  %23590 = vst [vmem:[#allocation23_spill] sm:$0xff] %v18765_v36  ;;  %23591 = vst [vmem:[#allocation22_spill] sm:$0xff] %v18771_v5  ;;  %v18777_v37 = vld [vmem:[%s22651_s8 + $0xd0] ss:$48 sps:$4 sm:$0xff]   ;;  %v18783_v38 = vld [vmem:[%s22651_s8 + $0x1c] ss:$48 sps:$4 sm:$0xff]  }
 0x88c   : > { %23592 = vst [vmem:[#allocation25_spill] sm:$0xff] %v18777_v37  ;;  %23593 = vst [vmem:[#allocation24_spill] sm:$0xff] %v18783_v38 }
 0x88d   : > { %23604 = vst [vmem:[#allocation37_spill] sm:$0xff] %v18855_v62 }
 0x88e   : > { %13077 = vmatpush3.bf16.msra.mxu1 %v23564_v58  ;;  %13089 = vmatpush3.bf16.msra.mxu0 %v23565_v63  ;;  %v18789_v58 = vld [vmem:[%s22651_s8 + $0x24] ss:$48 sps:$4 sm:$0xff]   ;;  %v18799_v63 = vld [vmem:[%s22651_s8 + $0x18] ss:$48 sps:$4 sm:$0xff]  }
 0x88f   : > { %13090 = vmatprep.subr.bf16.mxu0 %v18323_v39  ;;  %13106 = vmatprep.subr.bf16.mxu1 %v23566_v19  ;;  %v23572_v39 = vld [vmem:[#allocation85_spill] sm:$0xff]  ;;  %23594 = vst [vmem:[#allocation27_spill] sm:$0xff] %v18789_v58  ;;  %23595 = vst [vmem:[#allocation26_spill] sm:$0xff] %v18799_v63 }
 0x890   : > { %v18811_v19 = vld [vmem:[%s22651_s8 + $0x7c] ss:$48 sps:$4 sm:$0xff]  }
 0x891   : > { %6651 = vmatmul.mubr.bf16.vlgmr.msra.gmra.mrb[96].mxu1 %v6492_v52  ;;  %v18805_v52 = vld [vmem:[%s22651_s8 + $0x20] ss:$48 sps:$4 sm:$0xff]   ;;  %23597 = vst [vmem:[#allocation28_spill] sm:$0xff] %v18811_v19 }
 0x892   : > { %13091 = vmatpush3.bf16.msra.mxu0 %v18335_v9  ;;  %13107 = vmatpush3.bf16.msra.mxu1 %v18340_v20  ;;  %v23575_v9 = vld [vmem:[#allocation88_spill] sm:$0xff]  ;;  %v23576_v20 = vld [vmem:[#allocation89_spill] sm:$0xff]  ;;  %23596 = vst [vmem:[#allocation29_spill] sm:$0xff] %v18805_v52 }
 0x893   : > { %6730 = vmatprep.mubr.bf16.mxu1 %v6497_v7  ;;  %13092 = vmatprep.subr.bf16.mxu0 %v23567_v46  ;;  %v18817_v7 = vld [vmem:[%s22651_s8 + $0x84] ss:$48 sps:$4 sm:$0xff]   ;;  %v18825_v46 = vld [vmem:[%s22651_s8 + $0x78] ss:$48 sps:$4 sm:$0xff]  }
 0x894   : > { %13108 = vmatprep.subr.bf16.mxu1 %v23568_v44  ;;  %23598 = vst [vmem:[#allocation31_spill] sm:$0xff] %v18817_v7  ;;  %23599 = vst [vmem:[#allocation30_spill] sm:$0xff] %v18825_v46  ;;  %v18831_v44 = vld [vmem:[%s22651_s8 + $0x80] ss:$48 sps:$4 sm:$0xff]  }
 0x895   : > { %23600 = vst [vmem:[#allocation33_spill] sm:$0xff] %v18831_v44 }
 0x896   : > { %13093 = vmatpush3.bf16.msra.mxu0 %v23569_v6  ;;  %13109 = vmatpush3.bf16.msra.mxu1 %v23570_v57 }
 0x897   : > { %13094 = vmatprep.subr.bf16.mxu0 %v23571_v13  ;;  %13110 = vmatprep.subr.bf16.mxu1 %v23572_v39 }
 0x89a   : > { %13095 = vmatpush3.bf16.msra.mxu0 %v23573_v21  ;;  %13111 = vmatpush3.bf16.msra.mxu1 %v23574_v61 }
 0x89b   : > { %13096 = vmatprep.subr.bf16.mxu0 %v23575_v9  ;;  %13112 = vmatprep.subr.bf16.mxu1 %v23576_v20 }
 0x89e   : > { %13097 = vmatpush3.bf16.msra.mxu0 %v23577_v4  ;;  %13113 = vmatpush3.bf16.msra.mxu1 %v23578_v8 }
 0x89f   : > { %13098 = vmatprep.subr.bf16.mxu0 %v18421_v32  ;;  %13114 = vmatprep.subr.bf16.mxu1 %v23579_v12 }
 0x8a2   : > { %13099 = vmatpush3.bf16.msra.mxu0 %v18433_v53  ;;  %13115 = vmatpush3.bf16.msra.mxu1 %v23580_v22 }
 0x8a3   : > { %13116 = vmatprep.subr.bf16.mxu1 %v18445_v15  ;;  %6757 = vmatprep.subr.bf16.mxu0 %v18658_v27 }
 0x8a5   : > { %6691 = vmatmul.mubr.bf16.vlgmr.msra.gmra.mrb[88].mxu0 %v6494_v24  ;;  %v18837_v24 = vld [vmem:[%s22651_s8 + $0xdc] ss:$48 sps:$4 sm:$0xff]  }
 0x8a6   : > { %13117 = vmatpush3.bf16.msra.mxu1 %v18452_v16  ;;  %6758 = vmatpush1.bf16.msra.mxu0 %v18665_v43  ;;  %23601 = vst [vmem:[#allocation32_spill] sm:$0xff] %v18837_v24 }
 0x8a7   : > { %13118 = vmatprep.subr.bf16.mxu1 %v18461_v0  ;;  %6759 = vmatprep.subr.bf16.mxu0 %v18672_v56 }
 0x8a8   : > { %6789 = vmatprep.mubr.bf16.mxu0 %v23498_v42 }
 0x8aa   : > { %13119 = vmatpush3.bf16.msra.mxu1 %v18468_v31  ;;  %6760 = vmatpush1.bf16.msra.mxu0 %v18680_v45 }
 0x8ab   : > { %13120 = vmatprep.subr.bf16.mxu1 %v18475_v54  ;;  %6761 = vmatprep.subr.bf16.mxu0 %v18687_v47 }
 0x8ae   : > { %13121 = vmatpush3.bf16.msra.mxu1 %v18483_v28  ;;  %6762 = vmatpush1.bf16.msra.mxu0 %v18694_v48 }
 0x8af   : > { %6798 = vmatprep.subr.bf16.mxu1 %v18702_v50  ;;  %6839 = vmatprep.subr.bf16.mxu0 %v18708_v60 }
 0x8b1   : > { %6731 = vmatmul.mubr.bf16.vlgmr.msra.gmra.mrb[100].mxu1 %v6496_v40  ;;  %12656 = vmatmul.mubr.msk.bf16.vlgmr.msra.gmra.mrb[92].mxu0 %vm1806_vm6, %v18714_v30  ;;  %v18843_v40 = vld [vmem:[%s22651_s8 + $0xe4] ss:$48 sps:$4 sm:$0xff]  }
 0x8b2   : > { %6799 = vmatpush1.bf16.msra.mxu1 %v18721_v11  ;;  %6840 = vmatpush1.bf16.msra.mxu0 %v18727_v14  ;;  %23602 = vst [vmem:[#allocation35_spill] sm:$0xff] %v18843_v40 }
 0x8b3   : > { %6800 = vmatprep.subr.bf16.mxu1 %v18733_v33  ;;  %6841 = vmatprep.subr.bf16.mxu0 %v18739_v34 }
 0x8b4   : > { %6830 = vmatprep.mubr.bf16.mxu1 %v23498_v42  ;;  %6871 = vmatprep.mubr.bf16.mxu0 %v23498_v42 }
 0x8b6   : > { %6801 = vmatpush1.bf16.msra.mxu1 %v18747_v17  ;;  %6842 = vmatpush1.bf16.msra.mxu0 %v18753_v35 }
 0x8b7   : > { %6802 = vmatprep.subr.bf16.mxu1 %v18759_v26  ;;  %6843 = vmatprep.subr.bf16.mxu0 %v18765_v36 }
 0x8ba   : > { %6803 = vmatpush1.bf16.msra.mxu1 %v18771_v5  ;;  %6844 = vmatpush1.bf16.msra.mxu0 %v18777_v37 }
 0x8bb   : > { %6880 = vmatprep.subr.bf16.mxu1 %v18783_v38  ;;  %6921 = vmatprep.subr.bf16.mxu0 %v18789_v58 }
 0x8bd   : > { %12657 = vmatmul.mubr.msk.bf16.vlgmr.msra.gmra.mrb[104].mxu1 %vm1806_vm6, %v18714_v30  ;;  %12658 = vmatmul.mubr.msk.bf16.vlgmr.msra.gmra.mrb[96].mxu0 %vm1806_vm6, %v18714_v30 }
 0x8be   : > { %6881 = vmatpush1.bf16.msra.mxu1 %v18799_v63  ;;  %6922 = vmatpush1.bf16.msra.mxu0 %v18805_v52 }
 0x8bf   : > { %6882 = vmatprep.subr.bf16.mxu1 %v18811_v19  ;;  %6923 = vmatprep.subr.bf16.mxu0 %v18817_v7 }
 0x8c0   : > { %6912 = vmatprep.mubr.bf16.mxu1 %v23498_v42  ;;  %6953 = vmatprep.mubr.bf16.mxu0 %v23498_v42 }
 0x8c2   : > { %6883 = vmatpush1.bf16.msra.mxu1 %v18825_v46  ;;  %6924 = vmatpush1.bf16.msra.mxu0 %v18831_v44 }
 0x8c3   : > { %6884 = vmatprep.subr.bf16.mxu1 %v18837_v24  ;;  %6925 = vmatprep.subr.bf16.mxu0 %v18843_v40  ;;  %v18861_v24 = vld [vmem:[%s22651_s8 + $0x2c] ss:$48 sps:$4 sm:$0xff]   ;;  %v18867_v40 = vld [vmem:[%s22652_s9 + $0x40] sm:$0xff]  }
 0x8c4   : > { %23605 = vst [vmem:[#allocation36_spill] sm:$0xff] %v18861_v24  ;;  %23606 = vst [vmem:[#allocation38_spill] sm:$0xff] %v18867_v40 }
 0x8c6   : > { %6885 = vmatpush1.bf16.msra.mxu1 %v18849_v2  ;;  %6926 = vmatpush1.bf16.msra.mxu0 %v18855_v62  ;;  %v18877_v62 = vld [vmem:[%s22651_s8 + $0x28] ss:$48 sps:$4 sm:$0xff]  }
 0x8c7   : > { %6962 = vmatprep.subr.bf16.mxu1 %v18861_v24  ;;  %13128 = vmatprep.subr.bf16.mxu0 %v18867_v40  ;;  %23607 = vst [vmem:[#allocation39_spill] sm:$0xff] %v18877_v62  ;;  %v18884_v24 = vld [vmem:[%s22651_s8 + $0x8c] ss:$48 sps:$4 sm:$0xff]   ;;  %v18890_v40 = vld [vmem:[%s22652_s9] sm:$0xff]   ;;  %v18902_v2 = vld [vmem:[%s22651_s8 + $0x88] ss:$48 sps:$4 sm:$0xff]  }
 0x8c8   : > { %23608 = vst [vmem:[#allocation40_spill] sm:$0xff] %v18884_v24  ;;  %23609 = vst [vmem:[#allocation41_spill] sm:$0xff] %v18890_v40 }
 0x8c9   : > { %12659 = vmatmul.mubr.msk.bf16.vlgmr.msra.gmra.mrb[108].mxu1 %vm1806_vm6, %v18714_v30  ;;  %12660 = vmatmul.mubr.msk.bf16.vlgmr.msra.gmra.mrb[100].mxu0 %vm1806_vm6, %v18714_v30  ;;  %23611 = vst [vmem:[#allocation43_spill] sm:$0xff] %v18902_v2 }
 0x8ca   : > { %6963 = vmatpush1.bf16.msra.mxu1 %v18877_v62  ;;  %6994 = vmatprep.mubr.bf16.mxu1 %v23498_v42  ;;  %v18896_v62 = vld [vmem:[%s22652_s9 + $0x48] sm:$0xff]  }
 0x8cb   : > { %6964 = vmatprep.subr.bf16.mxu1 %v18884_v24  ;;  %13129 = vmatpush3.bf16.msra.mxu0 %v18890_v40  ;;  %23610 = vst [vmem:[#allocation42_spill] sm:$0xff] %v18896_v62  ;;  %v18908_v24 = vld [vmem:[%s22651_s8 + $0xec] ss:$48 sps:$4 sm:$0xff]  }
 0x8cc   : > { %13130 = vmatprep.subr.bf16.mxu0 %v18896_v62  ;;  %23612 = vst [vmem:[#allocation44_spill] sm:$0xff] %v18908_v24  ;;  %v18914_v40 = vld [vmem:[%s22652_s9 + $0x8] sm:$0xff]   ;;  %v18920_v62 = vld [vmem:[%s22652_s9 + $0x50] sm:$0xff]  }
 0x8cd   : > { %23613 = vst [vmem:[#allocation45_spill] sm:$0xff] %v18914_v40  ;;  %23614 = vst [vmem:[#allocation3_spill] sm:$0xff] %v18920_v62 }
 0x8ce   : > { %6965 = vmatpush1.bf16.msra.mxu1 %v18902_v2  ;;  %v18926_v2 = vld [vmem:[%s22651_s8 + $0xe8] ss:$48 sps:$4 sm:$0xff]  }
 0x8cf   : > { %6966 = vmatprep.subr.bf16.mxu1 %v18908_v24  ;;  %13131 = vmatpush3.bf16.msra.mxu0 %v18914_v40  ;;  %23615 = vst [vmem:[#allocation4_spill] sm:$0xff] %v18926_v2  ;;  %v18932_v24 = vld [vmem:[%s22652_s9 + $0x10] sm:$0xff]   ;;  %v18938_v40 = vld [vmem:[%s22652_s9 + $0xc0] sm:$0xff]  }
 0x8d0   : > { %13132 = vmatprep.subr.bf16.mxu0 %v18920_v62  ;;  %23616 = vst [vmem:[#allocation50_spill] sm:$0xff] %v18932_v24  ;;  %23617 = vst [vmem:[#allocation51_spill] sm:$0xff] %v18938_v40  ;;  %v18944_v62 = vld [vmem:[%s22652_s9 + $0x58] sm:$0xff]  }
 0x8d1   : > { %23618 = vst [vmem:[#allocation52_spill] sm:$0xff] %v18944_v62 }
 0x8d2   : > { %6967 = vmatpush1.bf16.msra.mxu1 %v18926_v2 }
 0x8d3   : > { %13133 = vmatpush3.bf16.msra.mxu0 %v18932_v24  ;;  %13150 = vmatprep.subr.bf16.mxu1 %v18938_v40  ;;  %v18952_v24 = vld [vmem:[%s22652_s9 + $0x80] sm:$0xff]   ;;  %v18958_v40 = vld [vmem:[%s22652_s9 + $0x18] sm:$0xff]  }
 0x8d4   : > { %13134 = vmatprep.subr.bf16.mxu0 %v18944_v62  ;;  %23619 = vst [vmem:[#allocation5_spill] sm:$0xff] %v18952_v24  ;;  %23620 = vst [vmem:[#allocation46_spill] sm:$0xff] %v18958_v40  ;;  %v18964_v62 = vld [vmem:[%s22652_s9 + $0xc8] sm:$0xff]  }
 0x8d5   : > { %12661 = vmatmul.mubr.msk.bf16.vlgmr.msra.gmra.mrb[112].mxu1 %vm1806_vm6, %v18714_v30  ;;  %23621 = vst [vmem:[#allocation53_spill] sm:$0xff] %v18964_v62  ;;  %v18970_v30 = vld [vmem:[%s22652_s9 + $0x60] sm:$0xff]  }
 0x8d6   : > { %13151 = vmatpush3.bf16.msra.mxu1 %v18952_v24  ;;  %23622 = vst [vmem:[#allocation54_spill] sm:$0xff] %v18970_v30  ;;  %v18976_v24 = vld [vmem:[%s22652_s9 + $0x88] sm:$0xff]  }
 0x8d7   : > { %13135 = vmatpush3.bf16.msra.mxu0 %v18958_v40  ;;  %13152 = vmatprep.subr.bf16.mxu1 %v18964_v62  ;;  %23623 = vst [vmem:[#allocation55_spill] sm:$0xff] %v18976_v24  ;;  %v18982_v40 = vld [vmem:[%s22652_s9 + $0x20] sm:$0xff]   ;;  %v18988_v62 = vld [vmem:[%s22652_s9 + $0xd0] sm:$0xff]  }
 0x8d8   : > { %13136 = vmatprep.subr.bf16.mxu0 %v18970_v30  ;;  %23624 = vst [vmem:[#allocation56_spill] sm:$0xff] %v18982_v40  ;;  %23625 = vst [vmem:[#allocation57_spill] sm:$0xff] %v18988_v62  ;;  %v18994_v30 = vld [vmem:[%s22652_s9 + $0x68] sm:$0xff]  }
 0x8d9   : > { %23626 = vst [vmem:[#allocation58_spill] sm:$0xff] %v18994_v30 }
 0x8da   : > { %13153 = vmatpush3.bf16.msra.mxu1 %v18976_v24  ;;  %v19000_v24 = vld [vmem:[%s22652_s9 + $0x90] sm:$0xff]  }
 0x8db   : > { %13137 = vmatpush3.bf16.msra.mxu0 %v18982_v40  ;;  %13154 = vmatprep.subr.bf16.mxu1 %v18988_v62  ;;  %23627 = vst [vmem:[#allocation59_spill] sm:$0xff] %v19000_v24  ;;  %v19006_v40 = vld [vmem:[%s22652_s9 + $0x28] sm:$0xff]   ;;  %v19012_v62 = vld [vmem:[%s22652_s9 + $0xd8] sm:$0xff]  }
 0x8dc   : > { %13138 = vmatprep.subr.bf16.mxu0 %v18994_v30  ;;  %23628 = vst [vmem:[#allocation60_spill] sm:$0xff] %v19006_v40  ;;  %23629 = vst [vmem:[#allocation61_spill] sm:$0xff] %v19012_v62  ;;  %v19018_v30 = vld [vmem:[%s22652_s9 + $0x70] sm:$0xff]  }
 0x8dd   : > { %23630 = vst [vmem:[#allocation62_spill] sm:$0xff] %v19018_v30 }
 0x8de   : > { %13155 = vmatpush3.bf16.msra.mxu1 %v19000_v24  ;;  %v19024_v24 = vld [vmem:[%s22652_s9 + $0x98] sm:$0xff]  }
 0x8df   : > { %13139 = vmatpush3.bf16.msra.mxu0 %v19006_v40  ;;  %13156 = vmatprep.subr.bf16.mxu1 %v19012_v62  ;;  %23631 = vst [vmem:[#allocation63_spill] sm:$0xff] %v19024_v24  ;;  %v19030_v40 = vld [vmem:[%s22652_s9 + $0x30] sm:$0xff]   ;;  %v19036_v62 = vld [vmem:[%s22652_s9 + $0xe0] sm:$0xff]  }
 0x8e0   : > { %13140 = vmatprep.subr.bf16.mxu0 %v19018_v30  ;;  %23632 = vst [vmem:[#allocation64_spill] sm:$0xff] %v19030_v40  ;;  %23633 = vst [vmem:[#allocation65_spill] sm:$0xff] %v19036_v62  ;;  %v19042_v30 = vld [vmem:[%s22652_s9 + $0x78] sm:$0xff]  }
 0x8e1   : > { %23634 = vst [vmem:[#allocation66_spill] sm:$0xff] %v19042_v30 }
 0x8e2   : > { %13157 = vmatpush3.bf16.msra.mxu1 %v19024_v24  ;;  %v19048_v24 = vld [vmem:[%s22652_s9 + $0xa0] sm:$0xff]  }
 0x8e3   : > { %13141 = vmatpush3.bf16.msra.mxu0 %v19030_v40  ;;  %13158 = vmatprep.subr.bf16.mxu1 %v19036_v62  ;;  %23635 = vst [vmem:[#allocation67_spill] sm:$0xff] %v19048_v24  ;;  %v19054_v40 = vld [vmem:[%s22652_s9 + $0x38] sm:$0xff]   ;;  %v19060_v62 = vld [vmem:[%s22652_s9 + $0xe8] sm:$0xff]  }
 0x8e4   : > { %13142 = vmatprep.subr.bf16.mxu0 %v19042_v30  ;;  %23636 = vst [vmem:[#allocation68_spill] sm:$0xff] %v19054_v40  ;;  %23637 = vst [vmem:[#allocation69_spill] sm:$0xff] %v19060_v62  ;;  %v19066_v30 = vld [vmem:[%s22652_s9 + $0x140] sm:$0xff]  }
 0x8e5   : > { %23638 = vst [vmem:[#allocation70_spill] sm:$0xff] %v19066_v30 }
 0x8e6   : > { %13159 = vmatpush3.bf16.msra.mxu1 %v19048_v24  ;;  %v19072_v24 = vld [vmem:[%s22652_s9 + $0xa8] sm:$0xff]  }
 0x8e7   : > { %13143 = vmatpush3.bf16.msra.mxu0 %v19054_v40  ;;  %13160 = vmatprep.subr.bf16.mxu1 %v19060_v62  ;;  %23639 = vst [vmem:[#allocation71_spill] sm:$0xff] %v19072_v24  ;;  %v19078_v40 = vld [vmem:[%s22652_s9 + $0xf0] sm:$0xff]  }
 0x8e8   : > { %13172 = vmatprep.subr.bf16.mxu0 %v19066_v30  ;;  %23640 = vst [vmem:[#allocation72_spill] sm:$0xff] %v19078_v40  ;;  %v19084_v62 = vld [vmem:[%s22652_s9 + $0xb0] sm:$0xff]   ;;  %v19090_v30 = vld [vmem:[%s22652_s9 + $0xf8] sm:$0xff]  }
 0x8e9   : > { %23641 = vst [vmem:[#allocation73_spill] sm:$0xff] %v19084_v62  ;;  %23642 = vst [vmem:[#allocation74_spill] sm:$0xff] %v19090_v30 }
 0x8ea   : > { %13161 = vmatpush3.bf16.msra.mxu1 %v19072_v24  ;;  %v19096_v24 = vld [vmem:[%s22652_s9 + $0xb8] sm:$0xff]  }
 0x8eb   : > { %13162 = vmatprep.subr.bf16.mxu1 %v19078_v40  ;;  %23643 = vst [vmem:[#allocation75_spill] sm:$0xff] %v19096_v24  ;;  %v19102_v40 = vld [vmem:[%s22652_s9 + $0x1c0] sm:$0xff]  }
 0x8ec   : > { %23644 = vst [vmem:[#allocation76_spill] sm:$0xff] %v19102_v40 }
 0x8ee   : > { %13163 = vmatpush3.bf16.msra.mxu1 %v19084_v62 }
 0x8ef   : > { %13164 = vmatprep.subr.bf16.mxu1 %v19090_v30 }
 0x8f2   : > { %13165 = vmatpush3.bf16.msra.mxu1 %v19096_v24 }
 0x8f3   : > { %13194 = vmatprep.subr.bf16.mxu1 %v19102_v40 }
 0x938   : > { %v13012_v62 = vpop.f32.mrb[80].mxu0 }
 0x939   : > { %v13013_v2 = vpop.f32.mrb[81].mxu0 }
 0x93a   : > { %v13014_v44 = vadd.f32 %v13013_v2, %v13012_v62  ;;  %v13015_v46 = vpop.f32.mrb[82].mxu0 }
 0x93b   : > { %v13016_v7 = vpop.f32.mrb[83].mxu0 }
 0x944   : > { %v13034_v30 = vpop.f32.mrb[92].mxu1 }
 0x945   : > { %v13035_v19 = vpop.f32.mrb[93].mxu1 }
 0x946   : > { %v13036_v52 = vadd.f32 %v13035_v19, %v13034_v30  ;;  %v13037_v63 = vpop.f32.mrb[94].mxu1  ;;  %v19117_v30 = vld [vmem:[%s22652_s9 + $0x148] sm:$0xff]  }
 0x947   : > { %v13038_v58 = vpop.f32.mrb[95].mxu1 }
 0x948   : > { %v6573_v38 = vadd.f32 %v13036_v52, %v13014_v44 }
 0x958   : > { %v13056_v37 = vpop.f32.mrb[84].mxu0 }
 0x959   : > { %v13057_v24 = vpop.f32.mrb[85].mxu0 }
 0x95a   : > { %v13058_v5 = vadd.f32 %v13057_v24, %v13056_v37  ;;  %v13059_v36 = vpop.f32.mrb[86].mxu0 }
 0x95b   : > { %v13060_v26 = vpop.f32.mrb[87].mxu0 }
 0x95c   : > { %v6613_v35 = vadd.f32 %v13058_v5, %v6573_v38 }
 0x964   : > { %v13078_v17 = vpop.f32.mrb[96].mxu1 }
 0x965   : > { %v13079_v34 = vpop.f32.mrb[97].mxu1 }
 0x966   : > { %v13080_v40 = vadd.f32 %v13079_v34, %v13078_v17  ;;  %v13081_v33 = vpop.f32.mrb[98].mxu1 }
 0x967   : > { %v13082_v14 = vpop.f32.mrb[99].mxu1 }
 0x968   : > { %v6653_v2 = vadd.f32 %v13080_v40, %v6613_v35 }
 0x978   : > { %v13100_v46 = vpop.f32.mrb[88].mxu0 }
 0x979   : > { %v13101_v7 = vpop.f32.mrb[89].mxu0 }
 0x97a   : > { %v13102_v62 = vadd.f32 %v13101_v7, %v13100_v46  ;;  %v13103_v11 = vpop.f32.mrb[90].mxu0 }
 0x97b   : > { %v13104_v19 = vpop.f32.mrb[91].mxu0  ;;  %v19110_v11 = vld [vmem:[%s22652_s9 + $0x100] sm:$0xff]  }
 0x97c   : > { %v6693_v63 = vadd.f32 %v13102_v62, %v6653_v2  ;;  %v19123_v2 = vld [vmem:[%s22652_s9 + $0x108] sm:$0xff]  }
 0x984   : > { %v13122_v58 = vpop.f32.mrb[100].mxu1  ;;  %v6791_v52 = vpop.f32.mrb[92].mxu0 }
 0x985   : > { %v7003_v44 = vmul.f32 %v6791_v52, %v23530_v18  ;;  %v13123_v37 = vpop.f32.mrb[101].mxu1  ;;  %v6793_v36 = vpop.f32.mrb[93].mxu0  ;;  %v19133_v52 = vld [vmem:[%s22652_s9 + $0x150] sm:$0xff]  }
 0x986   : > { %v13124_v26 = vadd.f32 %v13123_v37, %v13122_v58  ;;  %v7004_v5 = vmul.f32 %v6793_v36, %v23531_v10  ;;  %v13125_v38 = vpop.f32.mrb[102].mxu1  ;;  %v6795_v34 = vpop.f32.mrb[94].mxu0 }
 0x987   : > { %v13126_v33 = vpop.f32.mrb[103].mxu1  ;;  %v6796_v14 = vpop.f32.mrb[95].mxu0  ;;  %v7015_v24 = vpack.c.bf16 %v7003_v44, %v7003_v44 }
 0x988   : > { %v6733_v17 = vadd.f32 %v13124_v26, %v6693_v63  ;;  %v7016_v35 = vpack.c.bf16 %v7004_v5, %v7004_v5  ;;  %v19141_v14 = vld [vmem:[%s22652_s9 + $0x110] sm:$0xff]  }
 0x98a   : > { %v12726_v40 = vpack.c.bf16 %v6733_v17, %v6733_v17  ;;  %7059 = vmatprep.mubr.bf16.mxu0 %v7016_v35  ;;  %v19147_v35 = vld [vmem:[%s22652_s9 + $0x158] sm:$0xff]  }
 0x98b   : > { %7060 = vmatmul.mubr.bf16.vlgmr.msra.gmra.mrb[104].mxu0 %v7015_v24  ;;  %v19153_v24 = vld [vmem:[%s22652_s9 + $0x118] sm:$0xff]  }
 0x98c   : > { %13173 = vmatpush3.bf16.msra.mxu0 %v19110_v11  ;;  %6742 = vrot.lane.b32.xlu1 %v12726_v40, %s15911_s11  ;;  %v19159_v40 = vld [vmem:[%s22652_s9 + $0x180] sm:$0xff]  }
 0x98d   : > { %13174 = vmatprep.subr.bf16.mxu0 %v19117_v30 }
 0x990   : > { %13175 = vmatpush3.bf16.msra.mxu0 %v19123_v2  ;;  %v6832_v46 = vpop.f32.mrb[104].mxu1  ;;  %v6873_v7 = vpop.f32.mrb[96].mxu0 }
 0x991   : > { %v7005_v62 = vmul.f32 %v6832_v46, %v23535_v23  ;;  %v19128_v19 = vmul.f32 %v6873_v7, %v23536_v25  ;;  %v6834_v63 = vpop.f32.mrb[105].mxu1  ;;  %v6875_v58 = vpop.f32.mrb[97].mxu0  ;;  %13176 = vmatprep.subr.bf16.mxu0 %v19133_v52  ;;  %v19165_v46 = vld [vmem:[%s22652_s9 + $0x160] sm:$0xff]   ;;  %v19171_v7 = vld [vmem:[%s22652_s9 + $0x1c8] sm:$0xff]  }
 0x992   : > { %v7006_v44 = vmul.f32 %v6834_v63, %v17806_v51  ;;  %v7008_v37 = vmul.f32 %v6875_v58, %v18070_v59  ;;  %v6836_v36 = vpop.f32.mrb[106].mxu1  ;;  %v6877_v26 = vpop.f32.mrb[98].mxu0  ;;  %v19183_v63 = vld [vmem:[%s22652_s9 + $0x188] sm:$0xff]  }
 0x993   : > { %v6837_v5 = vpop.f32.mrb[107].mxu1  ;;  %v6878_v38 = vpop.f32.mrb[99].mxu0  ;;  %v7017_v17 = vpack.c.bf16 %v7005_v62, %v7005_v62  ;;  %v19177_v62 = vld [vmem:[%s22652_s9 + $0x120] sm:$0xff]   ;;  %23645 = vst [vmem:[#allocation77_spill] sm:$0xff] %v19183_v63 }
 0x994   : > { %v7018_v34 = vpack.c.bf16 %v7006_v44, %v7006_v44  ;;  %v7020_v33 = vpack.c.bf16 %v7008_v37, %v7008_v37  ;;  %13177 = vmatpush3.bf16.msra.mxu0 %v19141_v14  ;;  %v19195_v38 = vld [vmem:[%s22652_s9 + $0x168] sm:$0xff]  }
 0x995   : > { %13178 = vmatprep.subr.bf16.mxu0 %v19147_v35  ;;  %23646 = vst [vmem:[#allocation78_spill] sm:$0xff] %v19195_v38 }
 0x996   : > { %7099 = vmatprep.mubr.bf16.mxu1 %v7018_v34  ;;  %7139 = vmatprep.mubr.bf16.mxu0 %v7020_v33  ;;  %v19201_v34 = vld [vmem:[%s22652_s9 + $0x1d0] sm:$0xff]  }
 0x997   : > { %7100 = vmatmul.mubr.bf16.vlgmr.msra.gmra.mrb[116].mxu1 %v7017_v17  ;;  %23647 = vst [vmem:[#allocation79_spill] sm:$0xff] %v19201_v34 }
 0x998   : > { %13179 = vmatpush3.bf16.msra.mxu0 %v19153_v24  ;;  %13195 = vmatpush3.bf16.msra.mxu1 %v19159_v40 }
 0x999   : > { %13180 = vmatprep.subr.bf16.mxu0 %v19165_v46  ;;  %13196 = vmatprep.subr.bf16.mxu1 %v19171_v7 }
 0x99c   : > { %13181 = vmatpush3.bf16.msra.mxu0 %v19177_v62  ;;  %13197 = vmatpush3.bf16.msra.mxu1 %v19183_v63  ;;  %v6914_v58 = vpop.f32.mrb[108].mxu1  ;;  %v6955_v44 = vpop.f32.mrb[100].mxu0 }
 0x99d   : > { %v19187_v37 = vmul.f32 %v6914_v58, %v23545_v41  ;;  %v19190_v36 = vmul.f32 %v6955_v44, %v23546_v55  ;;  %v6916_v26 = vpop.f32.mrb[109].mxu1  ;;  %v6957_v5 = vpop.f32.mrb[101].mxu0  ;;  %13182 = vmatprep.subr.bf16.mxu0 %v19195_v38  ;;  %13198 = vmatprep.subr.bf16.mxu1 %v19201_v34  ;;  %v19209_v38 = vld [vmem:[%s22652_s9 + $0x128] sm:$0xff]   ;;  %v19215_v34 = vld [vmem:[%s22652_s9 + $0x190] sm:$0xff]  }
 0x99e   : > { %v7010_v33 = vmul.f32 %v6916_v26, %v18074_v49  ;;  %v7012_v17 = vmul.f32 %v6957_v5, %v18078_v3  ;;  %v6918_v58 = vpop.f32.mrb[110].mxu1  ;;  %v6959_v44 = vpop.f32.mrb[102].mxu0  ;;  %v19233_v26 = vld [vmem:[%s22652_s9 + $0x130] sm:$0xff]   ;;  %v19239_v5 = vld [vmem:[%s22652_s9 + $0x198] sm:$0xff]  }
 0x99f   : > { %v6919_v55 = vpop.f32.mrb[111].mxu1  ;;  %v6960_v41 = vpop.f32.mrb[103].mxu0  ;;  %23650 = vst [vmem:[#allocation82_spill] sm:$0xff] %v19233_v26  ;;  %23651 = vst [vmem:[#allocation83_spill] sm:$0xff] %v19239_v5  ;;  %v19257_v58 = vld [vmem:[%s22652_s9 + $0x138] sm:$0xff]   ;;  %v19263_v44 = vld [vmem:[%s22652_s9 + $0x1a0] sm:$0xff]  }
 0x9a0   : > { %v7022_v63 = vpack.c.bf16 %v7010_v33, %v7010_v33  ;;  %13183 = vmatpush3.bf16.msra.mxu0 %v19209_v38  ;;  %13199 = vmatpush3.bf16.msra.mxu1 %v19215_v34  ;;  %v19221_v55 = vld [vmem:[%s22652_s9 + $0x170] sm:$0xff]   ;;  %v19227_v41 = vld [vmem:[%s22652_s9 + $0x1d8] sm:$0xff]   ;;  %23654 = vst [vmem:[#allocation86_spill] sm:$0xff] %v19257_v58  ;;  %23655 = vst [vmem:[#allocation87_spill] sm:$0xff] %v19263_v44 }
 0x9a1   : > { %23648 = vst [vmem:[#allocation80_spill] sm:$0xff] %v19221_v55  ;;  %13184 = vmatprep.subr.bf16.mxu0 %v19221_v55  ;;  %23649 = vst [vmem:[#allocation81_spill] sm:$0xff] %v19227_v41  ;;  %13200 = vmatprep.subr.bf16.mxu1 %v19227_v41  ;;  %v19245_v33 = vld [vmem:[%s22652_s9 + $0x178] sm:$0xff]   ;;  %v19274_v41 = vld [vmem:[%s22652_s9 + $0x1e8] sm:$0xff]  }
 0x9a2   : > { %7179 = vmatprep.mubr.bf16.mxu1 %v7022_v63  ;;  %23652 = vst [vmem:[#allocation84_spill] sm:$0xff] %v19245_v33  ;;  %v19251_v63 = vld [vmem:[%s22652_s9 + $0x1e0] sm:$0xff]   ;;  %23656 = vst [vmem:[#allocation88_spill] sm:$0xff] %v19274_v41  ;;  %v19287_v55 = vld [vmem:[%s22652_s9 + $0x1a8] sm:$0xff]  }
 0x9a3   : > { %23653 = vst [vmem:[#allocation85_spill] sm:$0xff] %v19251_v63 }
 0x9a4   : > { %13185 = vmatpush3.bf16.msra.mxu0 %v19233_v26  ;;  %13201 = vmatpush3.bf16.msra.mxu1 %v19239_v5  ;;  %v7019_v5 = vpack.c.bf16 %v19128_v19, %v19128_v19 }
 0x9a5   : > { %13186 = vmatprep.subr.bf16.mxu0 %v19245_v33  ;;  %13202 = vmatprep.subr.bf16.mxu1 %v19251_v63 }
 0x9a8   : > { %13187 = vmatpush3.bf16.msra.mxu0 %v19257_v58  ;;  %13203 = vmatpush3.bf16.msra.mxu1 %v19263_v44  ;;  %v6996_v33 = vpop.f32.mrb[112].mxu1  ;;  %v19280_v58 = vld [vmem:[%s22652_s9 + $0x240] sm:$0xff]  }
 0x9a9   : > { %v19269_v63 = vmul.f32 %v6996_v33, %v23557_v29  ;;  %v6998_v26 = vpop.f32.mrb[113].mxu1  ;;  %13204 = vmatprep.subr.bf16.mxu1 %v19274_v41  ;;  %23657 = vst [vmem:[#allocation89_spill] sm:$0xff] %v19280_v58  ;;  %13216 = vmatprep.subr.bf16.mxu0 %v19280_v58  ;;  %v7024_v33 = vpack.c.bf16 %v7012_v17, %v7012_v17  ;;  %v19293_v41 = vld [vmem:[%s22652_s9 + $0x200] sm:$0xff]   ;;  %v19299_v17 = vld [vmem:[%s22652_s9 + $0x1f0] sm:$0xff]  }
 0x9aa   : > { %v7014_v19 = vmul.f32 %v6998_v26, %v18083_v1  ;;  %v7000_v44 = vpop.f32.mrb[114].mxu1  ;;  %v19311_v26 = vld [vmem:[%s22652_s9 + $0x1b0] sm:$0xff]  }
 0x9ab   : > { %7140 = vmatmul.mubr.bf16.vlgmr.msra.gmra.mrb[108].mxu0 %v7019_v5  ;;  %v7001_v29 = vpop.f32.mrb[115].mxu1  ;;  %23659 = vst [vmem:[#allocation91_spill] sm:$0xff] %v19311_v26  ;;  %v19317_v5 = vld [vmem:[%s22652_s9 + $0x208] sm:$0xff]   ;;  %v19323_v44 = vld [vmem:[%s22652_s9 + $0x1f8] sm:$0xff]  }
 0x9ac   : > { %13205 = vmatpush3.bf16.msra.mxu1 %v19287_v55  ;;  %13217 = vmatpush3.bf16.msra.mxu0 %v19293_v41  ;;  %v19305_v29 = vld [vmem:[%s22652_s9 + $0x248] sm:$0xff]   ;;  %23660 = vst [vmem:[#allocation92_spill] sm:$0xff] %v19317_v5  ;;  %23661 = vst [vmem:[#allocation93_spill] sm:$0xff] %v19323_v44 }
 0x9ad   : > { %7219 = vmatprep.mubr.bf16.mxu0 %v7024_v33  ;;  %13206 = vmatprep.subr.bf16.mxu1 %v19299_v17  ;;  %23658 = vst [vmem:[#allocation90_spill] sm:$0xff] %v19305_v29  ;;  %v19329_v33 = vld [vmem:[%s22652_s9 + $0x250] sm:$0xff]  }
 0x9ae   : > { %13218 = vmatprep.subr.bf16.mxu0 %v19305_v29  ;;  %23662 = vst [vmem:[#allocation13_spill] sm:$0xff] %v19329_v33  ;;  %v7026_v29 = vpack.c.bf16 %v7014_v19, %v7014_v19  ;;  %v19373_v19 = vld [vmem:[%s22652_s9 + $0x260] sm:$0xff]  }
 0x9af   : > { %23669 = vst [vmem:[#allocation99_spill] sm:$0xff] %v19373_v19 }
 0x9b0   : > { %13207 = vmatpush3.bf16.msra.mxu1 %v19311_v26  ;;  %13219 = vmatpush3.bf16.msra.mxu0 %v19317_v5  ;;  %v19335_v26 = vld [vmem:[%s22652_s9 + $0x1b8] sm:$0xff]   ;;  %v19341_v5 = vld [vmem:[%s22652_s9 + $0x210] sm:$0xff]  }
 0x9b1   : > { %13208 = vmatprep.subr.bf16.mxu1 %v19323_v44  ;;  %13220 = vmatprep.subr.bf16.mxu0 %v19329_v33  ;;  %23663 = vst [vmem:[#allocation8_spill] sm:$0xff] %v19335_v26  ;;  %23664 = vst [vmem:[#allocation94_spill] sm:$0xff] %v19341_v5  ;;  %v7021_v44 = vpack.c.bf16 %v19187_v37, %v19187_v37  ;;  %v19349_v33 = vld [vmem:[%s22652_s9 + $0x258] sm:$0xff]  }
 0x9b2   : > { %23665 = vst [vmem:[#allocation95_spill] sm:$0xff] %v19349_v33  ;;  %v19361_v37 = vld [vmem:[%s22652_s9 + $0x218] sm:$0xff]  }
 0x9b3   : > { %23667 = vst [vmem:[#allocation97_spill] sm:$0xff] %v19361_v37 }
 0x9b4   : > { %13209 = vmatpush3.bf16.msra.mxu1 %v19335_v26  ;;  %13221 = vmatpush3.bf16.msra.mxu0 %v19341_v5  ;;  %v19355_v26 = vld [vmem:[%s22652_s9 + $0x2c0] sm:$0xff]  }
 0x9b5   : > { %13222 = vmatprep.subr.bf16.mxu0 %v19349_v33  ;;  %23666 = vst [vmem:[#allocation96_spill] sm:$0xff] %v19355_v26  ;;  %13238 = vmatprep.subr.bf16.mxu1 %v19355_v26  ;;  %v19367_v33 = vld [vmem:[%s22652_s9 + $0x280] sm:$0xff]  }
 0x9b6   : > { %23668 = vst [vmem:[#allocation98_spill] sm:$0xff] %v19367_v33 }
 0x9b7   : > { %7180 = vmatmul.mubr.bf16.vlgmr.msra.gmra.mrb[120].mxu1 %v7021_v44  ;;  %v19379_v44 = vld [vmem:[%s22652_s9 + $0x2c8] sm:$0xff]  }
 0x9b8   : > { %13223 = vmatpush3.bf16.msra.mxu0 %v19361_v37  ;;  %13239 = vmatpush3.bf16.msra.mxu1 %v19367_v33  ;;  %23670 = vst [vmem:[#allocation100_spill] sm:$0xff] %v19379_v44 }
 0x9b9   : > { %7259 = vmatprep.mubr.bf16.mxu1 %v7026_v29  ;;  %13224 = vmatprep.subr.bf16.mxu0 %v19373_v19  ;;  %v23691_v29 = vld [vmem:[#allocation35_spill] sm:$0xff] }
 0x9ba   : > { %13240 = vmatprep.subr.bf16.mxu1 %v19379_v44 }
 0x9bc   : > { %13225 = vmatpush3.bf16.msra.mxu0 %v23569_v6  ;;  %13241 = vmatpush3.bf16.msra.mxu1 %v23570_v57  ;;  %v7023_v6 = vpack.c.bf16 %v19190_v36, %v19190_v36  ;;  %v23678_v57 = vld [vmem:[#allocation14_spill] sm:$0xff]  ;;  %v23689_v36 = vld [vmem:[#allocation33_spill] sm:$0xff] }
 0x9bd   : > { %13226 = vmatprep.subr.bf16.mxu0 %v23571_v13  ;;  %13242 = vmatprep.subr.bf16.mxu1 %v23572_v39  ;;  %v23679_v13 = vld [vmem:[#allocation23_spill] sm:$0xff]  ;;  %v23680_v39 = vld [vmem:[#allocation22_spill] sm:$0xff] }
 0x9c0   : > { %13227 = vmatpush3.bf16.msra.mxu0 %v23573_v21  ;;  %13243 = vmatpush3.bf16.msra.mxu1 %v23574_v61  ;;  %v23681_v21 = vld [vmem:[#allocation25_spill] sm:$0xff]  ;;  %v23682_v61 = vld [vmem:[#allocation24_spill] sm:$0xff] }
 0x9c1   : > { %13228 = vmatprep.subr.bf16.mxu0 %v23575_v9  ;;  %13244 = vmatprep.subr.bf16.mxu1 %v23576_v20  ;;  %v23683_v9 = vld [vmem:[#allocation27_spill] sm:$0xff]  ;;  %v23684_v20 = vld [vmem:[#allocation26_spill] sm:$0xff] }
 0x9c4   : > { %13229 = vmatpush3.bf16.msra.mxu0 %v23577_v4  ;;  %13245 = vmatpush3.bf16.msra.mxu1 %v23578_v8  ;;  %v23685_v4 = vld [vmem:[#allocation29_spill] sm:$0xff]  ;;  %v23686_v8 = vld [vmem:[#allocation28_spill] sm:$0xff] }
 0x9c5   : > { %13230 = vmatprep.subr.bf16.mxu0 %v18421_v32  ;;  %13246 = vmatprep.subr.bf16.mxu1 %v23579_v12  ;;  %v23675_v32 = vld [vmem:[#allocation10_spill] sm:$0xff]  ;;  %v23687_v12 = vld [vmem:[#allocation31_spill] sm:$0xff] }
 0x9c8   : > { %13231 = vmatpush3.bf16.msra.mxu0 %v18433_v53  ;;  %13247 = vmatpush3.bf16.msra.mxu1 %v23580_v22  ;;  %v7025_v53 = vpack.c.bf16 %v19269_v63, %v19269_v63  ;;  %v23688_v22 = vld [vmem:[#allocation30_spill] sm:$0xff]  ;;  %v23690_v63 = vld [vmem:[#allocation32_spill] sm:$0xff] }
 0x9c9   : > { %13248 = vmatprep.subr.bf16.mxu1 %v18445_v15  ;;  %7281 = vmatprep.subr.bf16.mxu0 %v18658_v27  ;;  %v23673_v15 = vld [vmem:[#allocation7_spill] sm:$0xff] }
 0x9cb   : > { %7220 = vmatmul.mubr.bf16.vlgmr.msra.gmra.mrb[112].mxu0 %v7023_v6  ;;  %v23692_v6 = vld [vmem:[#allocation34_spill] sm:$0xff] }
 0x9cc   : > { %13249 = vmatpush3.bf16.msra.mxu1 %v18452_v16  ;;  %7282 = vmatpush1.bf16.msra.mxu0 %v18665_v43  ;;  %v23674_v16 = vld [vmem:[#allocation9_spill] sm:$0xff] }
 0x9cd   : > { %13250 = vmatprep.subr.bf16.mxu1 %v18461_v0  ;;  %7283 = vmatprep.subr.bf16.mxu0 %v18672_v56  ;;  %v23671_v0 = vld [vmem:[#allocation15_spill] sm:$0xff] }
 0x9ce   : > { %7313 = vmatprep.mubr.bf16.mxu0 %v23498_v42 }
 0x9d0   : > { %13251 = vmatpush3.bf16.msra.mxu1 %v18468_v31  ;;  %7284 = vmatpush1.bf16.msra.mxu0 %v18680_v45  ;;  %v23672_v31 = vld [vmem:[#allocation6_spill] sm:$0xff] }
 0x9d1   : > { %13252 = vmatprep.subr.bf16.mxu1 %v18475_v54  ;;  %7285 = vmatprep.subr.bf16.mxu0 %v18687_v47  ;;  %v23676_v54 = vld [vmem:[#allocation11_spill] sm:$0xff] }
 0x9d4   : > { %13253 = vmatpush3.bf16.msra.mxu1 %v18483_v28  ;;  %7286 = vmatpush1.bf16.msra.mxu0 %v18694_v48  ;;  %v23677_v28 = vld [vmem:[#allocation12_spill] sm:$0xff] }
 0x9d5   : > { %7322 = vmatprep.subr.bf16.mxu1 %v18702_v50  ;;  %7363 = vmatprep.subr.bf16.mxu0 %v18708_v60 }
 0x9d7   : > { %7260 = vmatmul.mubr.bf16.vlgmr.msra.gmra.mrb[124].mxu1 %v7025_v53  ;;  %12663 = vmatmul.mubr.msk.bf16.vlgmr.msra.gmra.mrb[116].mxu0 %vm1806_vm6, %v23671_v0  ;;  %v23693_v53 = vld [vmem:[#allocation37_spill] sm:$0xff] }
 0x9d8   : > { %7323 = vmatpush1.bf16.msra.mxu1 %v23672_v31  ;;  %7364 = vmatpush1.bf16.msra.mxu0 %v23673_v15 }
 0x9d9   : > { %7324 = vmatprep.subr.bf16.mxu1 %v23674_v16  ;;  %7365 = vmatprep.subr.bf16.mxu0 %v23675_v32 }
 0x9da   : > { %7354 = vmatprep.mubr.bf16.mxu1 %v23498_v42  ;;  %7395 = vmatprep.mubr.bf16.mxu0 %v23498_v42 }
 0x9dc   : > { %7325 = vmatpush1.bf16.msra.mxu1 %v23676_v54  ;;  %7366 = vmatpush1.bf16.msra.mxu0 %v23677_v28 }
 0x9dd   : > { %7326 = vmatprep.subr.bf16.mxu1 %v23678_v57  ;;  %7367 = vmatprep.subr.bf16.mxu0 %v23679_v13 }
 0x9e0   : > { %7327 = vmatpush1.bf16.msra.mxu1 %v23680_v39  ;;  %7368 = vmatpush1.bf16.msra.mxu0 %v23681_v21 }
 0x9e1   : > { %7404 = vmatprep.subr.bf16.mxu1 %v23682_v61  ;;  %7445 = vmatprep.subr.bf16.mxu0 %v23683_v9 }
 0x9e3   : > { %12664 = vmatmul.mubr.msk.bf16.vlgmr.msra.gmra.mrb[128].mxu1 %vm1806_vm6, %v23671_v0  ;;  %12665 = vmatmul.mubr.msk.bf16.vlgmr.msra.gmra.mrb[120].mxu0 %vm1806_vm6, %v23671_v0 }
 0x9e4   : > { %7405 = vmatpush1.bf16.msra.mxu1 %v23684_v20  ;;  %7446 = vmatpush1.bf16.msra.mxu0 %v23685_v4  ;;  %v23694_v4 = vld [vmem:[#allocation36_spill] sm:$0xff]  ;;  %v23706_v20 = vld [vmem:[#allocation51_spill] sm:$0xff] }
 0x9e5   : > { %7406 = vmatprep.subr.bf16.mxu1 %v23686_v8  ;;  %7447 = vmatprep.subr.bf16.mxu0 %v23687_v12  ;;  %v23695_v8 = vld [vmem:[#allocation38_spill] sm:$0xff]  ;;  %v23704_v12 = vld [vmem:[#allocation4_spill] sm:$0xff] }
 0x9e6   : > { %7436 = vmatprep.mubr.bf16.mxu1 %v23498_v42  ;;  %7477 = vmatprep.mubr.bf16.mxu0 %v23498_v42 }
 0x9e8   : > { %7407 = vmatpush1.bf16.msra.mxu1 %v23688_v22  ;;  %7448 = vmatpush1.bf16.msra.mxu0 %v23689_v36  ;;  %v23696_v22 = vld [vmem:[#allocation39_spill] sm:$0xff] }
 0x9e9   : > { %7408 = vmatprep.subr.bf16.mxu1 %v23690_v63  ;;  %7449 = vmatprep.subr.bf16.mxu0 %v23691_v29  ;;  %v23697_v63 = vld [vmem:[#allocation40_spill] sm:$0xff]  ;;  %v23698_v29 = vld [vmem:[#allocation41_spill] sm:$0xff]  ;;  %v23703_v36 = vld [vmem:[#allocation3_spill] sm:$0xff] }
 0x9ec   : > { %7409 = vmatpush1.bf16.msra.mxu1 %v23692_v6  ;;  %7450 = vmatpush1.bf16.msra.mxu0 %v23693_v53  ;;  %v23699_v6 = vld [vmem:[#allocation42_spill] sm:$0xff]  ;;  %v23700_v53 = vld [vmem:[#allocation43_spill] sm:$0xff] }
 0x9ed   : > { %7486 = vmatprep.subr.bf16.mxu1 %v23694_v4  ;;  %13260 = vmatprep.subr.bf16.mxu0 %v23695_v8  ;;  %v23701_v8 = vld [vmem:[#allocation44_spill] sm:$0xff]  ;;  %v23702_v4 = vld [vmem:[#allocation45_spill] sm:$0xff] }
 0x9ef   : > { %12666 = vmatmul.mubr.msk.bf16.vlgmr.msra.gmra.mrb[132].mxu1 %vm1806_vm6, %v23671_v0  ;;  %12667 = vmatmul.mubr.msk.bf16.vlgmr.msra.gmra.mrb[124].mxu0 %vm1806_vm6, %v23671_v0 }
 0x9f0   : > { %7487 = vmatpush1.bf16.msra.mxu1 %v23696_v22  ;;  %7518 = vmatprep.mubr.bf16.mxu1 %v23498_v42  ;;  %v23705_v22 = vld [vmem:[#allocation50_spill] sm:$0xff] }
 0x9f1   : > { %7488 = vmatprep.subr.bf16.mxu1 %v23697_v63  ;;  %13261 = vmatpush3.bf16.msra.mxu0 %v23698_v29  ;;  %v23707_v63 = vld [vmem:[#allocation52_spill] sm:$0xff]  ;;  %v23720_v29 = vld [vmem:[#allocation63_spill] sm:$0xff] }
 0x9f2   : > { %13262 = vmatprep.subr.bf16.mxu0 %v23699_v6  ;;  %v23708_v6 = vld [vmem:[#allocation5_spill] sm:$0xff] }
 0x9f4   : > { %7489 = vmatpush1.bf16.msra.mxu1 %v23700_v53  ;;  %v23709_v53 = vld [vmem:[#allocation46_spill] sm:$0xff] }
 0x9f5   : > { %7490 = vmatprep.subr.bf16.mxu1 %v23701_v8  ;;  %13263 = vmatpush3.bf16.msra.mxu0 %v23702_v4  ;;  %v23710_v8 = vld [vmem:[#allocation53_spill] sm:$0xff] }
 0x9f6   : > { %13264 = vmatprep.subr.bf16.mxu0 %v23703_v36  ;;  %v23711_v36 = vld [vmem:[#allocation54_spill] sm:$0xff] }
 0x9f8   : > { %7491 = vmatpush1.bf16.msra.mxu1 %v23704_v12  ;;  %v23715_v12 = vld [vmem:[#allocation58_spill] sm:$0xff] }
 0x9f9   : > { %13265 = vmatpush3.bf16.msra.mxu0 %v23705_v22  ;;  %13282 = vmatprep.subr.bf16.mxu1 %v23706_v20  ;;  %v23712_v22 = vld [vmem:[#allocation55_spill] sm:$0xff]  ;;  %v23713_v20 = vld [vmem:[#allocation56_spill] sm:$0xff] }
 0x9fa   : > { %13266 = vmatprep.subr.bf16.mxu0 %v23707_v63  ;;  %v23714_v63 = vld [vmem:[#allocation57_spill] sm:$0xff] }
 0x9fb   : > { %12668 = vmatmul.mubr.msk.bf16.vlgmr.msra.gmra.mrb[136].mxu1 %vm1806_vm6, %v23671_v0  ;;  %v23716_v0 = vld [vmem:[#allocation59_spill] sm:$0xff] }
 0x9fc   : > { %13283 = vmatpush3.bf16.msra.mxu1 %v23708_v6  ;;  %v23717_v6 = vld [vmem:[#allocation60_spill] sm:$0xff] }
 0x9fd   : > { %13267 = vmatpush3.bf16.msra.mxu0 %v23709_v53  ;;  %13284 = vmatprep.subr.bf16.mxu1 %v23710_v8  ;;  %v23718_v53 = vld [vmem:[#allocation61_spill] sm:$0xff]  ;;  %v23719_v8 = vld [vmem:[#allocation62_spill] sm:$0xff] }
 0x9fe   : > { %v6743_v4 = vpop.permute.xlu1 %6742  ;;  %13268 = vmatprep.subr.bf16.mxu0 %v23711_v36  ;;  %v23721_v36 = vld [vmem:[#allocation64_spill] sm:$0xff] }
 0x9ff   : > { %6746 = vst.msk [vmem:[%s18578_s24] sm:$0xf] %vm6745_vm0, %v6743_v4  ;;  %v23722_v4 = vld [vmem:[#allocation65_spill] sm:$0xff] }
 0xa00   : > { %13285 = vmatpush3.bf16.msra.mxu1 %v23712_v22  ;;  %v23723_v22 = vld [vmem:[#allocation66_spill] sm:$0xff] }
 0xa01   : > { %13269 = vmatpush3.bf16.msra.mxu0 %v23713_v20  ;;  %13286 = vmatprep.subr.bf16.mxu1 %v23714_v63  ;;  %v23724_v20 = vld [vmem:[#allocation67_spill] sm:$0xff]  ;;  %v23725_v63 = vld [vmem:[#allocation68_spill] sm:$0xff] }
 0xa02   : > { %13270 = vmatprep.subr.bf16.mxu0 %v23715_v12  ;;  %v23726_v12 = vld [vmem:[#allocation69_spill] sm:$0xff] }
 0xa04   : > { %13287 = vmatpush3.bf16.msra.mxu1 %v23716_v0  ;;  %v23727_v0 = vld [vmem:[#allocation70_spill] sm:$0xff] }
 0xa05   : > { %13271 = vmatpush3.bf16.msra.mxu0 %v23717_v6  ;;  %13288 = vmatprep.subr.bf16.mxu1 %v23718_v53  ;;  %v23728_v6 = vld [vmem:[#allocation71_spill] sm:$0xff]  ;;  %v23729_v53 = vld [vmem:[#allocation72_spill] sm:$0xff] }
 0xa06   : > { %13272 = vmatprep.subr.bf16.mxu0 %v23719_v8  ;;  %v23730_v8 = vld [vmem:[#allocation73_spill] sm:$0xff] }
 0xa08   : > { %13289 = vmatpush3.bf16.msra.mxu1 %v23720_v29  ;;  %v23731_v29 = vld [vmem:[#allocation74_spill] sm:$0xff] }
 0xa09   : > { %13273 = vmatpush3.bf16.msra.mxu0 %v23721_v36  ;;  %13290 = vmatprep.subr.bf16.mxu1 %v23722_v4  ;;  %v23732_v36 = vld [vmem:[#allocation75_spill] sm:$0xff]  ;;  %v23733_v4 = vld [vmem:[#allocation76_spill] sm:$0xff] }
 0xa0a   : > { %13274 = vmatprep.subr.bf16.mxu0 %v23723_v22 }
 0xa0c   : > { %13291 = vmatpush3.bf16.msra.mxu1 %v23724_v20 }
 0xa0d   : > { %13275 = vmatpush3.bf16.msra.mxu0 %v23725_v63  ;;  %13292 = vmatprep.subr.bf16.mxu1 %v23726_v12 }
 0xa0e   : > { %13304 = vmatprep.subr.bf16.mxu0 %v23727_v0 }
 0xa10   : > { %13293 = vmatpush3.bf16.msra.mxu1 %v23728_v6 }
 0xa11   : > { %13294 = vmatprep.subr.bf16.mxu1 %v23729_v53 }
 0xa14   : > { %13295 = vmatpush3.bf16.msra.mxu1 %v23730_v8 }
 0xa15   : > { %13296 = vmatprep.subr.bf16.mxu1 %v23731_v29 }
 0xa18   : > { %13297 = vmatpush3.bf16.msra.mxu1 %v23732_v36 }
 0xa19   : > { %13326 = vmatprep.subr.bf16.mxu1 %v23733_v4 }
 0xa5e   : > { %v13144_v22 = vpop.f32.mrb[104].mxu0 }
 0xa5f   : > { %v13145_v20 = vpop.f32.mrb[105].mxu0 }
 0xa60   : > { %v13146_v9 = vadd.f32 %v13145_v20, %v13144_v22  ;;  %v13147_v63 = vpop.f32.mrb[106].mxu0 }
 0xa61   : > { %v13148_v61 = vpop.f32.mrb[107].mxu0 }
 0xa6a   : > { %v13166_v12 = vpop.f32.mrb[116].mxu1 }
 0xa6b   : > { %v13167_v21 = vpop.f32.mrb[117].mxu1 }
 0xa6c   : > { %v13168_v0 = vadd.f32 %v13167_v21, %v13166_v12  ;;  %v13169_v39 = vpop.f32.mrb[118].mxu1 }
 0xa6d   : > { %v13170_v6 = vpop.f32.mrb[119].mxu1 }
 0xa6e   : > { %v7102_v13 = vadd.f32 %v13168_v0, %v13146_v9 }
 0xa7e   : > { %v13188_v53 = vpop.f32.mrb[108].mxu0 }
 0xa7f   : > { %v13189_v57 = vpop.f32.mrb[109].mxu0 }
 0xa80   : > { %v13190_v8 = vadd.f32 %v13189_v57, %v13188_v53  ;;  %v13191_v28 = vpop.f32.mrb[110].mxu0 }
 0xa81   : > { %v13192_v29 = vpop.f32.mrb[111].mxu0 }
 0xa82   : > { %v7142_v54 = vadd.f32 %v13190_v8, %v7102_v13 }
 0xa8a   : > { %v13210_v36 = vpop.f32.mrb[120].mxu1 }
 0xa8b   : > { %v13211_v32 = vpop.f32.mrb[121].mxu1 }
 0xa8c   : > { %v13212_v4 = vadd.f32 %v13211_v32, %v13210_v36  ;;  %v13213_v16 = vpop.f32.mrb[122].mxu1 }
 0xa8d   : > { %v13214_v15 = vpop.f32.mrb[123].mxu1 }
 0xa8e   : > { %v7182_v20 = vadd.f32 %v13212_v4, %v7142_v54 }
 0xa9e   : > { %v13232_v22 = vpop.f32.mrb[112].mxu0 }
 0xa9f   : > { %v13233_v61 = vpop.f32.mrb[113].mxu0 }
 0xaa0   : > { %v13234_v63 = vadd.f32 %v13233_v61, %v13232_v22  ;;  %v13235_v31 = vpop.f32.mrb[114].mxu0 }
 0xaa1   : > { %v13236_v21 = vpop.f32.mrb[115].mxu0 }
 0xaa2   : > { %v7222_v39 = vadd.f32 %v13234_v63, %v7182_v20 }
 0xaaa   : > { %v13254_v12 = vpop.f32.mrb[124].mxu1  ;;  %v7315_v9 = vpop.f32.mrb[116].mxu0 }
 0xaab   : > { %v7527_v6 = vmul.f32 %v7315_v9, %v23530_v18  ;;  %v13255_v57 = vpop.f32.mrb[125].mxu1  ;;  %v7317_v28 = vpop.f32.mrb[117].mxu0 }
 0xaac   : > { %v13256_v29 = vadd.f32 %v13255_v57, %v13254_v12  ;;  %v7528_v13 = vmul.f32 %v7317_v28, %v23531_v10  ;;  %v13257_v8 = vpop.f32.mrb[126].mxu1  ;;  %v7319_v32 = vpop.f32.mrb[118].mxu0 }
 0xaad   : > { %v13258_v16 = vpop.f32.mrb[127].mxu1  ;;  %v7320_v15 = vpop.f32.mrb[119].mxu0  ;;  %v7539_v53 = vpack.c.bf16 %v7527_v6, %v7527_v6  ;;  %v23734_v8 = vld [vmem:[#allocation77_spill] sm:$0xff] }
 0xaae   : > { %v7262_v54 = vadd.f32 %v13256_v29, %v7222_v39  ;;  %v7540_v36 = vpack.c.bf16 %v7528_v13, %v7528_v13  ;;  %v23735_v15 = vld [vmem:[#allocation47_spill] sm:$0xff] }
 0xab0   : > { %v12727_v0 = vpack.c.bf16 %v7262_v54, %v7262_v54  ;;  %7583 = vmatprep.mubr.bf16.mxu0 %v7540_v36  ;;  %v23736_v36 = vld [vmem:[#allocation48_spill] sm:$0xff] }
 0xab1   : > { %7584 = vmatmul.mubr.bf16.vlgmr.msra.gmra.mrb[128].mxu0 %v7539_v53 }
 0xab2   : > { %13305 = vmatpush3.bf16.msra.mxu0 %v19110_v11  ;;  %7271 = vrot.lane.b32.xlu0 %v12727_v0, %s15915_s25 }
 0xab3   : > { %13306 = vmatprep.subr.bf16.mxu0 %v19117_v30 }
 0xab6   : > { %13307 = vmatpush3.bf16.msra.mxu0 %v19123_v2  ;;  %v7356_v31 = vpop.f32.mrb[128].mxu1  ;;  %v7397_v4 = vpop.f32.mrb[120].mxu0 }
 0xab7   : > { %v7529_v20 = vmul.f32 %v7356_v31, %v23535_v23  ;;  %v7531_v22 = vmul.f32 %v7397_v4, %v23536_v25  ;;  %v7358_v61 = vpop.f32.mrb[129].mxu1  ;;  %v7399_v63 = vpop.f32.mrb[121].mxu0  ;;  %13308 = vmatprep.subr.bf16.mxu0 %v19133_v52  ;;  %v23737_v4 = vld [vmem:[#allocation78_spill] sm:$0xff] }
 0xab8   : > { %v7530_v21 = vmul.f32 %v7358_v61, %v17806_v51  ;;  %v7532_v39 = vmul.f32 %v7399_v63, %v18070_v59  ;;  %v7360_v12 = vpop.f32.mrb[130].mxu1  ;;  %v7401_v9 = vpop.f32.mrb[122].mxu0 }
 0xab9   : > { %v7361_v6 = vpop.f32.mrb[131].mxu1  ;;  %v7402_v57 = vpop.f32.mrb[123].mxu0  ;;  %v7541_v13 = vpack.c.bf16 %v7529_v20, %v7529_v20  ;;  %v23738_v20 = vld [vmem:[#allocation79_spill] sm:$0xff] }
 0xaba   : > { %v7542_v28 = vpack.c.bf16 %v7530_v21, %v7530_v21  ;;  %v7544_v29 = vpack.c.bf16 %v7532_v39, %v7532_v39  ;;  %13309 = vmatpush3.bf16.msra.mxu0 %v19141_v14  ;;  %v23739_v57 = vld [vmem:[#allocation80_spill] sm:$0xff] }
 0xabb   : > { %13310 = vmatprep.subr.bf16.mxu0 %v19147_v35 }
 0xabc   : > { %7623 = vmatprep.mubr.bf16.mxu1 %v7542_v28  ;;  %7663 = vmatprep.mubr.bf16.mxu0 %v7544_v29  ;;  %v23740_v28 = vld [vmem:[#allocation81_spill] sm:$0xff]  ;;  %v23741_v29 = vld [vmem:[#allocation82_spill] sm:$0xff] }
 0xabd   : > { %7624 = vmatmul.mubr.bf16.vlgmr.msra.gmra.mrb[140].mxu1 %v7541_v13  ;;  %v23742_v13 = vld [vmem:[#allocation83_spill] sm:$0xff] }
 0xabe   : > { %13311 = vmatpush3.bf16.msra.mxu0 %v19153_v24  ;;  %13327 = vmatpush3.bf16.msra.mxu1 %v19159_v40 }
 0xabf   : > { %13312 = vmatprep.subr.bf16.mxu0 %v19165_v46  ;;  %13328 = vmatprep.subr.bf16.mxu1 %v19171_v7 }
 0xac2   : > { %13313 = vmatpush3.bf16.msra.mxu0 %v19177_v62  ;;  %13329 = vmatpush3.bf16.msra.mxu1 %v23734_v8  ;;  %v7438_v32 = vpop.f32.mrb[132].mxu1  ;;  %v7479_v16 = vpop.f32.mrb[124].mxu0 }
 0xac3   : > { %v7533_v54 = vmul.f32 %v7438_v32, %v23735_v15  ;;  %v19517_v53 = vmul.f32 %v7479_v16, %v23736_v36  ;;  %v7440_v0 = vpop.f32.mrb[133].mxu1  ;;  %v7481_v31 = vpop.f32.mrb[125].mxu0  ;;  %13314 = vmatprep.subr.bf16.mxu0 %v23737_v4  ;;  %13330 = vmatprep.subr.bf16.mxu1 %v23738_v20  ;;  %v23743_v32 = vld [vmem:[#allocation84_spill] sm:$0xff]  ;;  %v23744_v16 = vld [vmem:[#allocation85_spill] sm:$0xff] }
 0xac4   : > { %v7534_v61 = vmul.f32 %v7440_v0, %v18074_v49  ;;  %v7536_v63 = vmul.f32 %v7481_v31, %v18078_v3  ;;  %v7442_v21 = vpop.f32.mrb[134].mxu1  ;;  %v7483_v39 = vpop.f32.mrb[126].mxu0  ;;  %v23745_v0 = vld [vmem:[#allocation86_spill] sm:$0xff]  ;;  %v23746_v31 = vld [vmem:[#allocation87_spill] sm:$0xff] }
 0xac5   : > { %v7443_v12 = vpop.f32.mrb[135].mxu1  ;;  %v7484_v9 = vpop.f32.mrb[127].mxu0  ;;  %v7543_v21 = vpack.c.bf16 %v7531_v22, %v7531_v22  ;;  %v23747_v39 = vld [vmem:[#allocation49_spill] sm:$0xff]  ;;  %v23749_v22 = vld [vmem:[#allocation90_spill] sm:$0xff] }
 0xac6   : > { %v7546_v6 = vpack.c.bf16 %v7534_v61, %v7534_v61  ;;  %13315 = vmatpush3.bf16.msra.mxu0 %v19209_v38  ;;  %13331 = vmatpush3.bf16.msra.mxu1 %v19215_v34 }
 0xac7   : > { %13316 = vmatprep.subr.bf16.mxu0 %v23739_v57  ;;  %13332 = vmatprep.subr.bf16.mxu1 %v23740_v28  ;;  %v23748_v28 = vld [vmem:[#allocation88_spill] sm:$0xff] }
 0xac8   : > { %7703 = vmatprep.mubr.bf16.mxu1 %v7546_v6 }
 0xaca   : > { %13317 = vmatpush3.bf16.msra.mxu0 %v23741_v29  ;;  %13333 = vmatpush3.bf16.msra.mxu1 %v23742_v13 }
 0xacb   : > { %13318 = vmatprep.subr.bf16.mxu0 %v23743_v32  ;;  %13334 = vmatprep.subr.bf16.mxu1 %v23744_v16  ;;  %v7548_v32 = vpack.c.bf16 %v7536_v63, %v7536_v63  ;;  %v23754_v63 = vld [vmem:[#allocation8_spill] sm:$0xff] }
 0xace   : > { %13319 = vmatpush3.bf16.msra.mxu0 %v23745_v0  ;;  %13335 = vmatpush3.bf16.msra.mxu1 %v23746_v31  ;;  %v7520_v61 = vpop.f32.mrb[136].mxu1 }
 0xacf   : > { %v19534_v12 = vmul.f32 %v7520_v61, %v23747_v39  ;;  %v7522_v9 = vpop.f32.mrb[137].mxu1  ;;  %13336 = vmatprep.subr.bf16.mxu1 %v23748_v28  ;;  %13348 = vmatprep.subr.bf16.mxu0 %v19280_v58  ;;  %v23750_v61 = vld [vmem:[#allocation91_spill] sm:$0xff]  ;;  %v23751_v28 = vld [vmem:[#allocation92_spill] sm:$0xff]  ;;  %v23752_v58 = vld [vmem:[#allocation93_spill] sm:$0xff] }
 0xad0   : > { %v7538_v6 = vmul.f32 %v7522_v9, %v18083_v1  ;;  %v7524_v13 = vpop.f32.mrb[138].mxu1  ;;  %v23753_v9 = vld [vmem:[#allocation13_spill] sm:$0xff] }
 0xad1   : > { %7664 = vmatmul.mubr.bf16.vlgmr.msra.gmra.mrb[132].mxu0 %v7543_v21  ;;  %v7525_v16 = vpop.f32.mrb[139].mxu1  ;;  %v7545_v13 = vpack.c.bf16 %v7533_v54, %v7533_v54  ;;  %v19558_v21 = vld [vmem:[%s22652_s9 + $0x220] sm:$0xff]   ;;  %v19564_v54 = vld [vmem:[%s22652_s9 + $0x288] sm:$0xff]  }
 0xad2   : > { %13337 = vmatpush3.bf16.msra.mxu1 %v19287_v55  ;;  %13349 = vmatpush3.bf16.msra.mxu0 %v19293_v41  ;;  %v23755_v16 = vld [vmem:[#allocation95_spill] sm:$0xff]  ;;  %23756 = vst [vmem:[#allocation15_spill] sm:$0xff] %v19558_v21  ;;  %23757 = vst [vmem:[#allocation77_spill] sm:$0xff] %v19564_v54 }
 0xad3   : > { %7743 = vmatprep.mubr.bf16.mxu0 %v7548_v32  ;;  %13338 = vmatprep.subr.bf16.mxu1 %v19299_v17  ;;  %v7550_v32 = vpack.c.bf16 %v7538_v6, %v7538_v6  ;;  %v19570_v6 = vld [vmem:[%s22652_s9 + $0x268] sm:$0xff]  }
 0xad4   : > { %13350 = vmatprep.subr.bf16.mxu0 %v23749_v22  ;;  %23758 = vst [vmem:[#allocation78_spill] sm:$0xff] %v19570_v6 }
 0xad6   : > { %13339 = vmatpush3.bf16.msra.mxu1 %v23750_v61  ;;  %13351 = vmatpush3.bf16.msra.mxu0 %v23751_v28 }
 0xad7   : > { %13340 = vmatprep.subr.bf16.mxu1 %v23752_v58  ;;  %13352 = vmatprep.subr.bf16.mxu0 %v23753_v9 }
 0xada   : > { %13341 = vmatpush3.bf16.msra.mxu1 %v23754_v63  ;;  %13353 = vmatpush3.bf16.msra.mxu0 %v19341_v5 }
 0xadb   : > { %13354 = vmatprep.subr.bf16.mxu0 %v23755_v16  ;;  %13370 = vmatprep.subr.bf16.mxu1 %v19355_v26 }
 0xadd   : > { %7704 = vmatmul.mubr.bf16.vlgmr.msra.gmra.mrb[144].mxu1 %v7545_v13  ;;  %v19576_v13 = vld [vmem:[%s22652_s9 + $0x2d0] sm:$0xff]  }
 0xade   : > { %13355 = vmatpush3.bf16.msra.mxu0 %v19361_v37  ;;  %13371 = vmatpush3.bf16.msra.mxu1 %v19367_v33  ;;  %23759 = vst [vmem:[#allocation79_spill] sm:$0xff] %v19576_v13 }
 0xadf   : > { %7783 = vmatprep.mubr.bf16.mxu1 %v7550_v32  ;;  %13356 = vmatprep.subr.bf16.mxu0 %v19373_v19  ;;  %v19582_v32 = vld [vmem:[%s22652_s9 + $0x228] sm:$0xff]  }
 0xae0   : > { %13372 = vmatprep.subr.bf16.mxu1 %v19379_v44  ;;  %23760 = vst [vmem:[#allocation80_spill] sm:$0xff] %v19582_v32 }
 0xae2   : > { %13357 = vmatpush3.bf16.msra.mxu0 %v19558_v21  ;;  %13373 = vmatpush3.bf16.msra.mxu1 %v19564_v54  ;;  %v19588_v54 = vld [vmem:[%s22652_s9 + $0x290] sm:$0xff]  }
 0xae3   : > { %13358 = vmatprep.subr.bf16.mxu0 %v19570_v6  ;;  %13374 = vmatprep.subr.bf16.mxu1 %v19576_v13  ;;  %23761 = vst [vmem:[#allocation82_spill] sm:$0xff] %v19588_v54  ;;  %v19594_v6 = vld [vmem:[%s22652_s9 + $0x270] sm:$0xff]   ;;  %v19600_v13 = vld [vmem:[%s22652_s9 + $0x2d8] sm:$0xff]  }
 0xae4   : > { %23762 = vst [vmem:[#allocation86_spill] sm:$0xff] %v19594_v6  ;;  %23763 = vst [vmem:[#allocation87_spill] sm:$0xff] %v19600_v13 }
 0xae6   : > { %13359 = vmatpush3.bf16.msra.mxu0 %v19582_v32  ;;  %13375 = vmatpush3.bf16.msra.mxu1 %v19588_v54  ;;  %v19606_v32 = vld [vmem:[%s22652_s9 + $0x230] sm:$0xff]   ;;  %v19612_v54 = vld [vmem:[%s22652_s9 + $0x298] sm:$0xff]  }
 0xae7   : > { %13360 = vmatprep.subr.bf16.mxu0 %v19594_v6  ;;  %13376 = vmatprep.subr.bf16.mxu1 %v19600_v13  ;;  %23764 = vst [vmem:[#allocation90_spill] sm:$0xff] %v19606_v32  ;;  %23765 = vst [vmem:[#allocation91_spill] sm:$0xff] %v19612_v54  ;;  %v19618_v6 = vld [vmem:[%s22652_s9 + $0x278] sm:$0xff]   ;;  %v19624_v13 = vld [vmem:[%s22652_s9 + $0x2e0] sm:$0xff]  }
 0xae8   : > { %23766 = vst [vmem:[#allocation92_spill] sm:$0xff] %v19618_v6  ;;  %23767 = vst [vmem:[#allocation93_spill] sm:$0xff] %v19624_v13 }
 0xaea   : > { %13361 = vmatpush3.bf16.msra.mxu0 %v19606_v32  ;;  %13377 = vmatpush3.bf16.msra.mxu1 %v19612_v54  ;;  %v19630_v32 = vld [vmem:[%s22652_s9 + $0x238] sm:$0xff]   ;;  %v19636_v54 = vld [vmem:[%s22652_s9 + $0x2a0] sm:$0xff]  }
 0xaeb   : > { %13362 = vmatprep.subr.bf16.mxu0 %v19618_v6  ;;  %13378 = vmatprep.subr.bf16.mxu1 %v19624_v13  ;;  %23768 = vst [vmem:[#allocation13_spill] sm:$0xff] %v19630_v32  ;;  %23769 = vst [vmem:[#allocation8_spill] sm:$0xff] %v19636_v54  ;;  %v7547_v6 = vpack.c.bf16 %v19517_v53, %v19517_v53  ;;  %v19644_v13 = vld [vmem:[%s22652_s9 + $0x2e8] sm:$0xff]   ;;  %v19658_v53 = vld [vmem:[%s22652_s9 + $0x2f0] sm:$0xff]  }
 0xaec   : > { %23770 = vst [vmem:[#allocation101_spill] sm:$0xff] %v19644_v13  ;;  %23772 = vst [vmem:[#allocation103_spill] sm:$0xff] %v19658_v53 }
 0xaee   : > { %13363 = vmatpush3.bf16.msra.mxu0 %v19630_v32  ;;  %13379 = vmatpush3.bf16.msra.mxu1 %v19636_v54  ;;  %v19651_v32 = vld [vmem:[%s22652_s9 + $0x2a8] sm:$0xff]  }
 0xaef   : > { %13380 = vmatprep.subr.bf16.mxu1 %v19644_v13  ;;  %7805 = vmatprep.subr.bf16.mxu0 %v18658_v27  ;;  %23771 = vst [vmem:[#allocation102_spill] sm:$0xff] %v19651_v32  ;;  %v19666_v27 = vld [vmem:[%s22652_s9 + $0x2b0] sm:$0xff]  }
 0xaf0   : > { %23773 = vst [vmem:[#allocation104_spill] sm:$0xff] %v19666_v27 }
 0xaf1   : > { %7744 = vmatmul.mubr.bf16.vlgmr.msra.gmra.mrb[136].mxu0 %v7547_v6  ;;  %v23776_v6 = vld [vmem:[#allocation16_spill] sm:$0xff] }
 0xaf2   : > { %13381 = vmatpush3.bf16.msra.mxu1 %v19651_v32  ;;  %7806 = vmatpush1.bf16.msra.mxu0 %v18665_v43  ;;  %v19673_v43 = vld [vmem:[%s22652_s9 + $0x2f8] sm:$0xff]  }
 0xaf3   : > { %13382 = vmatprep.subr.bf16.mxu1 %v19658_v53  ;;  %7807 = vmatprep.subr.bf16.mxu0 %v18672_v56  ;;  %23774 = vst [vmem:[#allocation105_spill] sm:$0xff] %v19673_v43  ;;  %v19680_v56 = vld [vmem:[%s22652_s9 + $0x2b8] sm:$0xff]  }
 0xaf4   : > { %7837 = vmatprep.mubr.bf16.mxu0 %v23498_v42  ;;  %23775 = vst [vmem:[#allocation106_spill] sm:$0xff] %v19680_v56 }
 0xaf6   : > { %13383 = vmatpush3.bf16.msra.mxu1 %v19666_v27  ;;  %7808 = vmatpush1.bf16.msra.mxu0 %v18680_v45  ;;  %v7549_v45 = vpack.c.bf16 %v19534_v12, %v19534_v12  ;;  %v23779_v27 = vld [vmem:[#allocation9_spill] sm:$0xff]  ;;  %v23784_v12 = vld [vmem:[#allocation23_spill] sm:$0xff] }
 0xaf7   : > { %13384 = vmatprep.subr.bf16.mxu1 %v19673_v43  ;;  %7809 = vmatprep.subr.bf16.mxu0 %v18687_v47  ;;  %v23777_v47 = vld [vmem:[#allocation6_spill] sm:$0xff]  ;;  %v23778_v43 = vld [vmem:[#allocation7_spill] sm:$0xff] }
 0xafa   : > { %13385 = vmatpush3.bf16.msra.mxu1 %v19680_v56  ;;  %7810 = vmatpush1.bf16.msra.mxu0 %v18694_v48  ;;  %v23780_v56 = vld [vmem:[#allocation10_spill] sm:$0xff]  ;;  %v23781_v48 = vld [vmem:[#allocation11_spill] sm:$0xff] }
 0xafb   : > { %7846 = vmatprep.subr.bf16.mxu1 %v18702_v50  ;;  %7887 = vmatprep.subr.bf16.mxu0 %v18708_v60  ;;  %v23782_v50 = vld [vmem:[#allocation12_spill] sm:$0xff]  ;;  %v23783_v60 = vld [vmem:[#allocation14_spill] sm:$0xff] }
 0xafd   : > { %7784 = vmatmul.mubr.bf16.vlgmr.msra.gmra.mrb[148].mxu1 %v7549_v45  ;;  %12670 = vmatmul.mubr.msk.bf16.vlgmr.msra.gmra.mrb[140].mxu0 %vm1806_vm6, %v23776_v6  ;;  %v23785_v45 = vld [vmem:[#allocation22_spill] sm:$0xff] }
 0xafe   : > { %7847 = vmatpush1.bf16.msra.mxu1 %v23777_v47  ;;  %7888 = vmatpush1.bf16.msra.mxu0 %v23778_v43  ;;  %v23786_v47 = vld [vmem:[#allocation25_spill] sm:$0xff]  ;;  %v23787_v43 = vld [vmem:[#allocation24_spill] sm:$0xff] }
 0xaff   : > { %7848 = vmatprep.subr.bf16.mxu1 %v23779_v27  ;;  %7889 = vmatprep.subr.bf16.mxu0 %v23780_v56  ;;  %v23788_v27 = vld [vmem:[#allocation27_spill] sm:$0xff]  ;;  %v23789_v56 = vld [vmem:[#allocation26_spill] sm:$0xff] }
 0xb00   : > { %7878 = vmatprep.mubr.bf16.mxu1 %v23498_v42  ;;  %7919 = vmatprep.mubr.bf16.mxu0 %v23498_v42 }
 0xb02   : > { %7849 = vmatpush1.bf16.msra.mxu1 %v23781_v48  ;;  %7890 = vmatpush1.bf16.msra.mxu0 %v23782_v50  ;;  %v23790_v48 = vld [vmem:[#allocation29_spill] sm:$0xff]  ;;  %v23791_v50 = vld [vmem:[#allocation28_spill] sm:$0xff] }
 0xb03   : > { %7850 = vmatprep.subr.bf16.mxu1 %v23783_v60  ;;  %7891 = vmatprep.subr.bf16.mxu0 %v23784_v12  ;;  %v23792_v60 = vld [vmem:[#allocation31_spill] sm:$0xff]  ;;  %v23793_v12 = vld [vmem:[#allocation30_spill] sm:$0xff] }
 0xb06   : > { %7851 = vmatpush1.bf16.msra.mxu1 %v23785_v45  ;;  %7892 = vmatpush1.bf16.msra.mxu0 %v23786_v47  ;;  %v23794_v45 = vld [vmem:[#allocation33_spill] sm:$0xff]  ;;  %v23795_v47 = vld [vmem:[#allocation32_spill] sm:$0xff] }
 0xb07   : > { %7928 = vmatprep.subr.bf16.mxu1 %v23787_v43  ;;  %7969 = vmatprep.subr.bf16.mxu0 %v23788_v27  ;;  %v23796_v43 = vld [vmem:[#allocation35_spill] sm:$0xff]  ;;  %v23797_v27 = vld [vmem:[#allocation34_spill] sm:$0xff] }
 0xb09   : > { %12671 = vmatmul.mubr.msk.bf16.vlgmr.msra.gmra.mrb[152].mxu1 %vm1806_vm6, %v23776_v6  ;;  %12672 = vmatmul.mubr.msk.bf16.vlgmr.msra.gmra.mrb[144].mxu0 %vm1806_vm6, %v23776_v6 }
 0xb0a   : > { %7929 = vmatpush1.bf16.msra.mxu1 %v23789_v56  ;;  %7970 = vmatpush1.bf16.msra.mxu0 %v23790_v48  ;;  %v23798_v56 = vld [vmem:[#allocation37_spill] sm:$0xff]  ;;  %v23799_v48 = vld [vmem:[#allocation36_spill] sm:$0xff] }
 0xb0b   : > { %7930 = vmatprep.subr.bf16.mxu1 %v23791_v50  ;;  %7971 = vmatprep.subr.bf16.mxu0 %v23792_v60  ;;  %v23800_v50 = vld [vmem:[#allocation38_spill] sm:$0xff]  ;;  %v23801_v60 = vld [vmem:[#allocation39_spill] sm:$0xff] }
 0xb0c   : > { %7960 = vmatprep.mubr.bf16.mxu1 %v23498_v42  ;;  %8001 = vmatprep.mubr.bf16.mxu0 %v23498_v42 }
 0xb0e   : > { %7931 = vmatpush1.bf16.msra.mxu1 %v23793_v12  ;;  %7972 = vmatpush1.bf16.msra.mxu0 %v23794_v45  ;;  %v23802_v12 = vld [vmem:[#allocation40_spill] sm:$0xff]  ;;  %v23803_v45 = vld [vmem:[#allocation41_spill] sm:$0xff] }
 0xb0f   : > { %7932 = vmatprep.subr.bf16.mxu1 %v23795_v47  ;;  %7973 = vmatprep.subr.bf16.mxu0 %v23796_v43  ;;  %v23804_v47 = vld [vmem:[#allocation42_spill] sm:$0xff]  ;;  %v23805_v43 = vld [vmem:[#allocation43_spill] sm:$0xff] }
 0xb12   : > { %7933 = vmatpush1.bf16.msra.mxu1 %v23797_v27  ;;  %7974 = vmatpush1.bf16.msra.mxu0 %v23798_v56  ;;  %v23806_v27 = vld [vmem:[#allocation44_spill] sm:$0xff]  ;;  %v23807_v56 = vld [vmem:[#allocation45_spill] sm:$0xff] }
 0xb13   : > { %8010 = vmatprep.subr.bf16.mxu1 %v23799_v48  ;;  %13392 = vmatprep.subr.bf16.mxu0 %v23800_v50  ;;  %v23808_v48 = vld [vmem:[#allocation3_spill] sm:$0xff]  ;;  %v23809_v50 = vld [vmem:[#allocation4_spill] sm:$0xff] }
 0xb15   : > { %12673 = vmatmul.mubr.msk.bf16.vlgmr.msra.gmra.mrb[156].mxu1 %vm1806_vm6, %v23776_v6  ;;  %12674 = vmatmul.mubr.msk.bf16.vlgmr.msra.gmra.mrb[148].mxu0 %vm1806_vm6, %v23776_v6 }
 0xb16   : > { %8011 = vmatpush1.bf16.msra.mxu1 %v23801_v60  ;;  %8042 = vmatprep.mubr.bf16.mxu1 %v23498_v42  ;;  %v23810_v60 = vld [vmem:[#allocation50_spill] sm:$0xff]  ;;  %v23811_v42 = vld [vmem:[#allocation51_spill] sm:$0xff] }
 0xb17   : > { %8012 = vmatprep.subr.bf16.mxu1 %v23802_v12  ;;  %13393 = vmatpush3.bf16.msra.mxu0 %v23803_v45  ;;  %v19738_v12 = vpop.permute.xlu0 %11457  ;;  %v23813_v45 = vld [vmem:[#allocation52_spill] sm:$0xff] }
 0xb18   : > { %13394 = vmatprep.subr.bf16.mxu0 %v23804_v47  ;;  %23812 = vst [vmem:[#allocation16_spill] sm:$0xff] %v19738_v12  ;;  %v23814_v47 = vld [vmem:[#allocation5_spill] sm:$0xff]  ;;  %v23826_v12 = vld [vmem:[#allocation63_spill] sm:$0xff] }
 0xb1a   : > { %8013 = vmatpush1.bf16.msra.mxu1 %v23805_v43  ;;  %v23815_v43 = vld [vmem:[#allocation46_spill] sm:$0xff] }
 0xb1b   : > { %8014 = vmatprep.subr.bf16.mxu1 %v23806_v27  ;;  %13395 = vmatpush3.bf16.msra.mxu0 %v23807_v56  ;;  %v23816_v27 = vld [vmem:[#allocation53_spill] sm:$0xff] }
 0xb1c   : > { %13396 = vmatprep.subr.bf16.mxu0 %v23808_v48  ;;  %v23817_v48 = vld [vmem:[#allocation54_spill] sm:$0xff] }
 0xb1e   : > { %8015 = vmatpush1.bf16.msra.mxu1 %v23809_v50  ;;  %v23819_v50 = vld [vmem:[#allocation56_spill] sm:$0xff] }
 0xb1f   : > { %13397 = vmatpush3.bf16.msra.mxu0 %v23810_v60  ;;  %13414 = vmatprep.subr.bf16.mxu1 %v23811_v42  ;;  %v23818_v42 = vld [vmem:[#allocation55_spill] sm:$0xff]  ;;  %v23820_v60 = vld [vmem:[#allocation57_spill] sm:$0xff] }
 0xb20   : > { %13398 = vmatprep.subr.bf16.mxu0 %v23813_v45  ;;  %v23821_v45 = vld [vmem:[#allocation58_spill] sm:$0xff] }
 0xb21   : > { %12675 = vmatmul.mubr.msk.bf16.vlgmr.msra.gmra.mrb[160].mxu1 %vm1806_vm6, %v23776_v6  ;;  %v23822_v6 = vld [vmem:[#allocation59_spill] sm:$0xff] }
 0xb22   : > { %13415 = vmatpush3.bf16.msra.mxu1 %v23814_v47  ;;  %v23823_v47 = vld [vmem:[#allocation60_spill] sm:$0xff] }
 0xb23   : > { %13399 = vmatpush3.bf16.msra.mxu0 %v23815_v43  ;;  %13416 = vmatprep.subr.bf16.mxu1 %v23816_v27  ;;  %v23824_v43 = vld [vmem:[#allocation61_spill] sm:$0xff]  ;;  %v23825_v27 = vld [vmem:[#allocation62_spill] sm:$0xff] }
 0xb24   : > { %v7272_v56 = vpop.permute.xlu0 %7271  ;;  %13400 = vmatprep.subr.bf16.mxu0 %v23817_v48  ;;  %v23827_v48 = vld [vmem:[#allocation64_spill] sm:$0xff] }
 0xb25   : > { %7275 = vst.msk [vmem:[%s18578_s24] sm:$0xf] %vm7274_vm1, %v7272_v56  ;;  %v23828_v56 = vld [vmem:[#allocation65_spill] sm:$0xff] }
 0xb26   : > { %13417 = vmatpush3.bf16.msra.mxu1 %v23818_v42  ;;  %v23829_v42 = vld [vmem:[#allocation66_spill] sm:$0xff] }
 0xb27   : > { %13401 = vmatpush3.bf16.msra.mxu0 %v23819_v50  ;;  %13418 = vmatprep.subr.bf16.mxu1 %v23820_v60  ;;  %v23830_v50 = vld [vmem:[#allocation67_spill] sm:$0xff]  ;;  %v23831_v60 = vld [vmem:[#allocation68_spill] sm:$0xff] }
 0xb28   : > { %13402 = vmatprep.subr.bf16.mxu0 %v23821_v45  ;;  %v23832_v45 = vld [vmem:[#allocation69_spill] sm:$0xff] }
 0xb2a   : > { %13419 = vmatpush3.bf16.msra.mxu1 %v23822_v6  ;;  %v23833_v6 = vld [vmem:[#allocation70_spill] sm:$0xff] }
 0xb2b   : > { %13403 = vmatpush3.bf16.msra.mxu0 %v23823_v47  ;;  %13420 = vmatprep.subr.bf16.mxu1 %v23824_v43  ;;  %v23834_v47 = vld [vmem:[#allocation71_spill] sm:$0xff]  ;;  %v23835_v43 = vld [vmem:[#allocation72_spill] sm:$0xff] }
 0xb2c   : > { %13404 = vmatprep.subr.bf16.mxu0 %v23825_v27  ;;  %v23836_v27 = vld [vmem:[#allocation73_spill] sm:$0xff] }
 0xb2e   : > { %13421 = vmatpush3.bf16.msra.mxu1 %v23826_v12  ;;  %v23837_v12 = vld [vmem:[#allocation74_spill] sm:$0xff] }
 0xb2f   : > { %13405 = vmatpush3.bf16.msra.mxu0 %v23827_v48  ;;  %13422 = vmatprep.subr.bf16.mxu1 %v23828_v56  ;;  %v23838_v48 = vld [vmem:[#allocation75_spill] sm:$0xff]  ;;  %v23839_v56 = vld [vmem:[#allocation76_spill] sm:$0xff] }
 0xb30   : > { %13406 = vmatprep.subr.bf16.mxu0 %v23829_v42 }
 0xb32   : > { %13423 = vmatpush3.bf16.msra.mxu1 %v23830_v50 }
 0xb33   : > { %13407 = vmatpush3.bf16.msra.mxu0 %v23831_v60  ;;  %13424 = vmatprep.subr.bf16.mxu1 %v23832_v45 }
 0xb34   : > { %13436 = vmatprep.subr.bf16.mxu0 %v23833_v6 }
 0xb36   : > { %13425 = vmatpush3.bf16.msra.mxu1 %v23834_v47 }
 0xb37   : > { %13426 = vmatprep.subr.bf16.mxu1 %v23835_v43 }
 0xb3a   : > { %13427 = vmatpush3.bf16.msra.mxu1 %v23836_v27 }
 0xb3b   : > { %13428 = vmatprep.subr.bf16.mxu1 %v23837_v12 }
 0xb3e   : > { %13429 = vmatpush3.bf16.msra.mxu1 %v23838_v48 }
 0xb3f   : > { %13458 = vmatprep.subr.bf16.mxu1 %v23839_v56 }
 0xb84   : > { %v13276_v42 = vpop.f32.mrb[128].mxu0 }
 0xb85   : > { %v13277_v50 = vpop.f32.mrb[129].mxu0 }
 0xb86   : > { %v13278_v53 = vadd.f32 %v13277_v50, %v13276_v42  ;;  %v13279_v60 = vpop.f32.mrb[130].mxu0 }
 0xb87   : > { %v13280_v32 = vpop.f32.mrb[131].mxu0 }
 0xb90   : > { %v13298_v45 = vpop.f32.mrb[140].mxu1 }
 0xb91   : > { %v13299_v13 = vpop.f32.mrb[141].mxu1 }
 0xb92   : > { %v13300_v6 = vadd.f32 %v13299_v13, %v13298_v45  ;;  %v13301_v54 = vpop.f32.mrb[142].mxu1 }
 0xb93   : > { %v13302_v47 = vpop.f32.mrb[143].mxu1 }
 0xb94   : > { %v7626_v21 = vadd.f32 %v13300_v6, %v13278_v53 }
 0xba4   : > { %v13320_v43 = vpop.f32.mrb[132].mxu0 }
 0xba5   : > { %v13321_v44 = vpop.f32.mrb[133].mxu0 }
 0xba6   : > { %v13322_v27 = vadd.f32 %v13321_v44, %v13320_v43  ;;  %v13323_v19 = vpop.f32.mrb[134].mxu0 }
 0xba7   : > { %v13324_v12 = vpop.f32.mrb[135].mxu0 }
 0xba8   : > { %v7666_v33 = vadd.f32 %v13322_v27, %v7626_v21 }
 0xbb0   : > { %v13342_v48 = vpop.f32.mrb[144].mxu1 }
 0xbb1   : > { %v13343_v37 = vpop.f32.mrb[145].mxu1 }
 0xbb2   : > { %v13344_v56 = vadd.f32 %v13343_v37, %v13342_v48  ;;  %v13345_v26 = vpop.f32.mrb[146].mxu1 }
 0xbb3   : > { %v13346_v16 = vpop.f32.mrb[147].mxu1 }
 0xbb4   : > { %v7706_v42 = vadd.f32 %v13344_v56, %v7666_v33 }
 0xbc4   : > { %v13364_v50 = vpop.f32.mrb[136].mxu0 }
 0xbc5   : > { %v13365_v32 = vpop.f32.mrb[137].mxu0 }
 0xbc6   : > { %v13366_v60 = vadd.f32 %v13365_v32, %v13364_v50  ;;  %v13367_v5 = vpop.f32.mrb[138].mxu0 }
 0xbc7   : > { %v13368_v13 = vpop.f32.mrb[139].mxu0 }
 0xbc8   : > { %v7746_v54 = vadd.f32 %v13366_v60, %v7706_v42 }
 0xbd0   : > { %v13386_v45 = vpop.f32.mrb[148].mxu1  ;;  %v7839_v53 = vpop.f32.mrb[140].mxu0 }
 0xbd1   : > { %v8051_v6 = vmul.f32 %v7839_v53, %v23530_v18  ;;  %v13387_v44 = vpop.f32.mrb[149].mxu1  ;;  %v7841_v19 = vpop.f32.mrb[141].mxu0 }
 0xbd2   : > { %v13388_v47 = vadd.f32 %v13387_v44, %v13386_v45  ;;  %v8052_v21 = vmul.f32 %v7841_v19, %v23531_v10  ;;  %v13389_v43 = vpop.f32.mrb[150].mxu1  ;;  %v7843_v37 = vpop.f32.mrb[142].mxu0 }
 0xbd3   : > { %v13390_v26 = vpop.f32.mrb[151].mxu1  ;;  %v7844_v16 = vpop.f32.mrb[143].mxu0  ;;  %v8063_v12 = vpack.c.bf16 %v8051_v6, %v8051_v6  ;;  %v23840_v37 = vld [vmem:[#allocation81_spill] sm:$0xff] }
 0xbd4   : > { %v7786_v33 = vadd.f32 %v13388_v47, %v7746_v54  ;;  %v8064_v27 = vpack.c.bf16 %v8052_v21, %v8052_v21  ;;  %v23843_v26 = vld [vmem:[#allocation85_spill] sm:$0xff] }
 0xbd6   : > { %v12728_v48 = vpack.c.bf16 %v7786_v33, %v7786_v33  ;;  %8107 = vmatprep.mubr.bf16.mxu0 %v8064_v27  ;;  %v23844_v33 = vld [vmem:[#allocation88_spill] sm:$0xff]  ;;  %v23845_v27 = vld [vmem:[#allocation89_spill] sm:$0xff] }
 0xbd7   : > { %8108 = vmatmul.mubr.bf16.vlgmr.msra.gmra.mrb[152].mxu0 %v8063_v12 }
 0xbd8   : > { %13437 = vmatpush3.bf16.msra.mxu0 %v19110_v11  ;;  %7795 = vrot.lane.b32.xlu1 %v12728_v48, %s15917_s16 }
 0xbd9   : > { %13438 = vmatprep.subr.bf16.mxu0 %v19117_v30 }
 0xbdc   : > { %13439 = vmatpush3.bf16.msra.mxu0 %v19123_v2  ;;  %v7880_v5 = vpop.f32.mrb[152].mxu1  ;;  %v7921_v56 = vpop.f32.mrb[144].mxu0 }
 0xbdd   : > { %v8053_v42 = vmul.f32 %v7880_v5, %v23535_v23  ;;  %v8055_v50 = vmul.f32 %v7921_v56, %v23536_v25  ;;  %v7882_v32 = vpop.f32.mrb[153].mxu1  ;;  %v7923_v60 = vpop.f32.mrb[145].mxu0  ;;  %13440 = vmatprep.subr.bf16.mxu0 %v19133_v52  ;;  %v23855_v56 = vld [vmem:[#allocation78_spill] sm:$0xff] }
 0xbde   : > { %v8054_v13 = vmul.f32 %v7882_v32, %v17806_v51  ;;  %v8056_v11 = vmul.f32 %v7923_v60, %v18070_v59  ;;  %v7884_v54 = vpop.f32.mrb[154].mxu1  ;;  %v7925_v45 = vpop.f32.mrb[146].mxu0  ;;  %v23858_v32 = vld [vmem:[#allocation82_spill] sm:$0xff] }
 0xbdf   : > { %v7885_v53 = vpop.f32.mrb[155].mxu1  ;;  %v7926_v30 = vpop.f32.mrb[147].mxu0  ;;  %v8065_v44 = vpack.c.bf16 %v8053_v42, %v8053_v42  ;;  %v8067_v16 = vpack.c.bf16 %v8055_v50, %v8055_v50  ;;  %v23856_v42 = vld [vmem:[#allocation79_spill] sm:$0xff]  ;;  %v23857_v50 = vld [vmem:[#allocation80_spill] sm:$0xff]  ;;  %v23859_v60 = vld [vmem:[#allocation86_spill] sm:$0xff] }
 0xbe0   : > { %v8066_v6 = vpack.c.bf16 %v8054_v13, %v8054_v13  ;;  %v8068_v2 = vpack.c.bf16 %v8056_v11, %v8056_v11  ;;  %13441 = vmatpush3.bf16.msra.mxu0 %v19141_v14  ;;  %v23860_v13 = vld [vmem:[#allocation87_spill] sm:$0xff]  ;;  %v23861_v11 = vld [vmem:[#allocation90_spill] sm:$0xff]  ;;  %v23863_v45 = vld [vmem:[#allocation92_spill] sm:$0xff] }
 0xbe1   : > { %13442 = vmatprep.subr.bf16.mxu0 %v19147_v35  ;;  %v23862_v54 = vld [vmem:[#allocation91_spill] sm:$0xff]  ;;  %v23864_v53 = vld [vmem:[#allocation93_spill] sm:$0xff] }
 0xbe2   : > { %8147 = vmatprep.mubr.bf16.mxu1 %v8066_v6  ;;  %8187 = vmatprep.mubr.bf16.mxu0 %v8068_v2  ;;  %v23865_v30 = vld [vmem:[#allocation13_spill] sm:$0xff]  ;;  %v23866_v6 = vld [vmem:[#allocation8_spill] sm:$0xff] }
 0xbe3   : > { %8148 = vmatmul.mubr.bf16.vlgmr.msra.gmra.mrb[164].mxu1 %v8065_v44  ;;  %v23867_v44 = vld [vmem:[#allocation101_spill] sm:$0xff] }
 0xbe4   : > { %13443 = vmatpush3.bf16.msra.mxu0 %v19153_v24  ;;  %13459 = vmatpush3.bf16.msra.mxu1 %v19159_v40 }
 0xbe5   : > { %13444 = vmatprep.subr.bf16.mxu0 %v19165_v46  ;;  %13460 = vmatprep.subr.bf16.mxu1 %v19171_v7 }
 0xbe8   : > { %13445 = vmatpush3.bf16.msra.mxu0 %v19177_v62  ;;  %13461 = vmatpush3.bf16.msra.mxu1 %v23734_v8  ;;  %v7962_v52 = vpop.f32.mrb[156].mxu1  ;;  %v8003_v14 = vpop.f32.mrb[148].mxu0 }
 0xbe9   : > { %v8057_v19 = vmul.f32 %v7962_v52, %v23735_v15  ;;  %v19792_v35 = vmul.f32 %v8003_v14, %v23736_v36  ;;  %v7964_v47 = vpop.f32.mrb[157].mxu1  ;;  %v8005_v21 = vpop.f32.mrb[149].mxu0  ;;  %13446 = vmatprep.subr.bf16.mxu0 %v23737_v4  ;;  %13462 = vmatprep.subr.bf16.mxu1 %v23738_v20  ;;  %v23841_v4 = vld [vmem:[#allocation83_spill] sm:$0xff]  ;;  %v23842_v20 = vld [vmem:[#allocation84_spill] sm:$0xff]  ;;  %v23868_v14 = vld [vmem:[#allocation102_spill] sm:$0xff] }
 0xbea   : > { %v8058_v24 = vmul.f32 %v7964_v47, %v18074_v49  ;;  %v8060_v40 = vmul.f32 %v8005_v21, %v18078_v3  ;;  %v7966_v46 = vpop.f32.mrb[158].mxu1  ;;  %v8007_v7 = vpop.f32.mrb[150].mxu0  ;;  %v19850_v52 = vld [vmem:[%s22651_s8 + $0x4] ss:$48 sps:$4 sm:$0xff]   ;;  %v23870_v21 = vmov 0  }
 0xbeb   : > { %v7967_v62 = vpop.f32.mrb[159].mxu1  ;;  %v8008_v8 = vpop.f32.mrb[151].mxu0  ;;  %v8071_v2 = vpack.c.bf16 %v19792_v35, %v19792_v35  ;;  %v23869_v35 = vld [vmem:[#allocation103_spill] sm:$0xff]  ;;  %v19864_v47 = vld [vmem:[%s22651_s8 + $0x64] ss:$48 sps:$4 sm:$0xff]   ;;  %v23872_v46 = vld [vmem:[#allocation105_spill] sm:$0xff] }
 0xbec   : > { %v8070_v43 = vpack.c.bf16 %v8058_v24, %v8058_v24  ;;  %13447 = vmatpush3.bf16.msra.mxu0 %v19209_v38  ;;  %13463 = vmatpush3.bf16.msra.mxu1 %v19215_v34  ;;  %v8072_v48 = vpack.c.bf16 %v8060_v40, %v8060_v40  ;;  %v23871_v24 = vld [vmem:[#allocation104_spill] sm:$0xff]  ;;  %v23873_v62 = vld [vmem:[#allocation106_spill] sm:$0xff] }
 0xbed   : > { %13448 = vmatprep.subr.bf16.mxu0 %v23739_v57  ;;  %13464 = vmatprep.subr.bf16.mxu1 %v23840_v37  ;;  %v19872_v40 = vld [vmem:[%s22651_s8 + $0x60] ss:$48 sps:$4 sm:$0xff]   ;;  %v19879_v7 = vld [vmem:[%s22651_s8 + $0xc4] ss:$48 sps:$4 sm:$0xff]   ;;  %v19894_v37 = vld [vmem:[%s22651_s8 + $0xc] ss:$48 sps:$4 sm:$0xff]  }
 0xbee   : > { %8227 = vmatprep.mubr.bf16.mxu1 %v8070_v43  ;;  %v19886_v8 = vld [vmem:[%s22651_s8 + $0xc0] ss:$48 sps:$4 sm:$0xff]  }
 0xbf0   : > { %13449 = vmatpush3.bf16.msra.mxu0 %v23741_v29  ;;  %13465 = vmatpush3.bf16.msra.mxu1 %v23841_v4  ;;  %v19900_v4 = vld [vmem:[%s22651_s8 + $0x14] ss:$48 sps:$4 sm:$0xff]  }
 0xbf1   : > { %13450 = vmatprep.subr.bf16.mxu0 %v23842_v20  ;;  %13466 = vmatprep.subr.bf16.mxu1 %v23843_v26  ;;  %v23874_v20 = vld [vmem:[#allocation17_spill] sm:$0xff] }
 0xbf2   : > { %v19908_v26 = vld [vmem:[%s22651_s8 + $0x8] ss:$48 sps:$4 sm:$0xff]  }
 0xbf3   : > { %23875 = vst [vmem:[#allocation6_spill] sm:$0xff] %v19908_v26 }
 0xbf4   : > { %13451 = vmatpush3.bf16.msra.mxu0 %v23745_v0  ;;  %13467 = vmatpush3.bf16.msra.mxu1 %v23746_v31  ;;  %v8044_v38 = vpop.f32.mrb[160].mxu1  ;;  %v23846_v0 = vld [vmem:[#allocation94_spill] sm:$0xff]  ;;  %v23847_v31 = vld [vmem:[#allocation95_spill] sm:$0xff] }
 0xbf5   : > { %v19809_v34 = vmul.f32 %v8044_v38, %v23747_v39  ;;  %v8046_v57 = vpop.f32.mrb[161].mxu1  ;;  %13468 = vmatprep.subr.bf16.mxu1 %v23844_v33  ;;  %13480 = vmatprep.subr.bf16.mxu0 %v23845_v27  ;;  %v19914_v38 = vld [vmem:[%s22651_s8 + $0x10] ss:$48 sps:$4 sm:$0xff]   ;;  %v19946_v27 = vld [vmem:[%s22651_s8 + $0xcc] ss:$48 sps:$4 sm:$0xff]  }
 0xbf6   : > { %v8062_v29 = vmul.f32 %v8046_v57, %v18083_v1  ;;  %v8048_v12 = vpop.f32.mrb[162].mxu1  ;;  %23876 = vst [vmem:[#allocation7_spill] sm:$0xff] %v19914_v38  ;;  %v19934_v57 = vld [vmem:[%s22651_s8 + $0x68] ss:$48 sps:$4 sm:$0xff]   ;;  %v19940_v33 = vld [vmem:[%s22651_s8 + $0x70] ss:$48 sps:$4 sm:$0xff]  }
 0xbf7   : > { %8188 = vmatmul.mubr.bf16.vlgmr.msra.gmra.mrb[156].mxu0 %v8067_v16  ;;  %v8049_v5 = vpop.f32.mrb[163].mxu1  ;;  %v8073_v43 = vpack.c.bf16 %v19809_v34, %v19809_v34  ;;  %v19920_v16 = vld [vmem:[%s22651_s8 + $0x6c] ss:$48 sps:$4 sm:$0xff]   ;;  %v19926_v34 = vld [vmem:[%s22651_s8 + $0x74] ss:$48 sps:$4 sm:$0xff]   ;;  %23879 = vst [vmem:[#allocation11_spill] sm:$0xff] %v19934_v57 }
 0xbf8   : > { %13469 = vmatpush3.bf16.msra.mxu1 %v19287_v55  ;;  %13481 = vmatpush3.bf16.msra.mxu0 %v19293_v41  ;;  %v8069_v55 = vpack.c.bf16 %v8057_v19, %v8057_v19  ;;  %v23848_v41 = vld [vmem:[#allocation96_spill] sm:$0xff]  ;;  %23877 = vst [vmem:[#allocation9_spill] sm:$0xff] %v19920_v16  ;;  %23878 = vst [vmem:[#allocation10_spill] sm:$0xff] %v19926_v34  ;;  %v19958_v12 = vld [vmem:[%s22651_s8 + $0xc8] ss:$48 sps:$4 sm:$0xff]  }
 0xbf9   : > { %8267 = vmatprep.mubr.bf16.mxu0 %v8072_v48  ;;  %13470 = vmatprep.subr.bf16.mxu1 %v19299_v17  ;;  %v8074_v17 = vpack.c.bf16 %v8062_v29, %v8062_v29  ;;  %v19857_v19 = vld [vmem:[%s22651_s8] ss:$48 sps:$4 sm:$0xff]   ;;  %23880 = vst [vmem:[#allocation12_spill] sm:$0xff] %v19940_v33  ;;  %23881 = vst [vmem:[#allocation14_spill] sm:$0xff] %v19946_v27  ;;  %v19952_v29 = vld [vmem:[%s22651_s8 + $0xd4] ss:$48 sps:$4 sm:$0xff]  }
 0xbfa   : > { %13482 = vmatprep.subr.bf16.mxu0 %v23749_v22  ;;  %v23849_v22 = vld [vmem:[#allocation97_spill] sm:$0xff]  ;;  %23882 = vst [vmem:[#allocation23_spill] sm:$0xff] %v19952_v29  ;;  %23883 = vst [vmem:[#allocation22_spill] sm:$0xff] %v19958_v12  ;;  %v19964_v48 = vld [vmem:[%s22651_s8 + $0xd0] ss:$48 sps:$4 sm:$0xff]  }
 0xbfb   : > { %23884 = vst [vmem:[#allocation25_spill] sm:$0xff] %v19964_v48  ;;  %v19970_v5 = vld [vmem:[%s22651_s8 + $0x1c] ss:$48 sps:$4 sm:$0xff]  }
 0xbfc   : > { %13471 = vmatpush3.bf16.msra.mxu1 %v23750_v61  ;;  %13483 = vmatpush3.bf16.msra.mxu0 %v23751_v28  ;;  %v23850_v61 = vld [vmem:[#allocation98_spill] sm:$0xff]  ;;  %v23851_v28 = vld [vmem:[#allocation99_spill] sm:$0xff]  ;;  %23885 = vst [vmem:[#allocation24_spill] sm:$0xff] %v19970_v5 }
 0xbfd   : > { %13472 = vmatprep.subr.bf16.mxu1 %v23752_v58  ;;  %13484 = vmatprep.subr.bf16.mxu0 %v23753_v9  ;;  %v23852_v58 = vld [vmem:[#allocation100_spill] sm:$0xff]  ;;  %v23853_v9 = vld [vmem:[#allocation15_spill] sm:$0xff] }
 0xc00   : > { %13473 = vmatpush3.bf16.msra.mxu1 %v23754_v63  ;;  %13485 = vmatpush3.bf16.msra.mxu0 %v23846_v0  ;;  %v23854_v63 = vld [vmem:[#allocation77_spill] sm:$0xff]  ;;  %v19976_v0 = vld [vmem:[%s22651_s8 + $0x24] ss:$48 sps:$4 sm:$0xff]  }
 0xc01   : > { %13486 = vmatprep.subr.bf16.mxu0 %v23847_v31  ;;  %13502 = vmatprep.subr.bf16.mxu1 %v23848_v41  ;;  %23886 = vst [vmem:[#allocation27_spill] sm:$0xff] %v19976_v0  ;;  %v19992_v31 = vld [vmem:[%s22651_s8 + $0x20] ss:$48 sps:$4 sm:$0xff]   ;;  %v19998_v41 = vld [vmem:[%s22651_s8 + $0x7c] ss:$48 sps:$4 sm:$0xff]  }
 0xc02   : > { %23888 = vst [vmem:[#allocation29_spill] sm:$0xff] %v19992_v31  ;;  %23889 = vst [vmem:[#allocation28_spill] sm:$0xff] %v19998_v41 }
 0xc03   : > { %8228 = vmatmul.mubr.bf16.vlgmr.msra.gmra.mrb[168].mxu1 %v8069_v55  ;;  %v19986_v55 = vld [vmem:[%s22651_s8 + $0x18] ss:$48 sps:$4 sm:$0xff]  }
 0xc04   : > { %13487 = vmatpush3.bf16.msra.mxu0 %v23849_v22  ;;  %13503 = vmatpush3.bf16.msra.mxu1 %v23850_v61  ;;  %23887 = vst [vmem:[#allocation26_spill] sm:$0xff] %v19986_v55  ;;  %v20012_v22 = vld [vmem:[%s22651_s8 + $0x78] ss:$48 sps:$4 sm:$0xff]   ;;  %v20018_v61 = vld [vmem:[%s22651_s8 + $0x80] ss:$48 sps:$4 sm:$0xff]  }
 0xc05   : > { %8307 = vmatprep.mubr.bf16.mxu1 %v8074_v17  ;;  %13488 = vmatprep.subr.bf16.mxu0 %v23851_v28  ;;  %v20004_v17 = vld [vmem:[%s22651_s8 + $0x84] ss:$48 sps:$4 sm:$0xff]   ;;  %23891 = vst [vmem:[#allocation30_spill] sm:$0xff] %v20012_v22  ;;  %23892 = vst [vmem:[#allocation33_spill] sm:$0xff] %v20018_v61  ;;  %v20024_v28 = vld [vmem:[%s22651_s8 + $0xdc] ss:$48 sps:$4 sm:$0xff]  }
 0xc06   : > { %13504 = vmatprep.subr.bf16.mxu1 %v23852_v58  ;;  %23890 = vst [vmem:[#allocation31_spill] sm:$0xff] %v20004_v17  ;;  %23893 = vst [vmem:[#allocation32_spill] sm:$0xff] %v20024_v28  ;;  %v20030_v58 = vld [vmem:[%s22651_s8 + $0xe4] ss:$48 sps:$4 sm:$0xff]  }
 0xc07   : > { %23894 = vst [vmem:[#allocation35_spill] sm:$0xff] %v20030_v58 }
 0xc08   : > { %13489 = vmatpush3.bf16.msra.mxu0 %v23853_v9  ;;  %13505 = vmatpush3.bf16.msra.mxu1 %v23854_v63 }
 0xc09   : > { %13490 = vmatprep.subr.bf16.mxu0 %v23855_v56  ;;  %13506 = vmatprep.subr.bf16.mxu1 %v23856_v42 }
 0xc0c   : > { %13491 = vmatpush3.bf16.msra.mxu0 %v23857_v50  ;;  %13507 = vmatpush3.bf16.msra.mxu1 %v23858_v32 }
 0xc0d   : > { %13492 = vmatprep.subr.bf16.mxu0 %v23859_v60  ;;  %13508 = vmatprep.subr.bf16.mxu1 %v23860_v13 }
 0xc10   : > { %13493 = vmatpush3.bf16.msra.mxu0 %v23861_v11  ;;  %13509 = vmatpush3.bf16.msra.mxu1 %v23862_v54 }
 0xc11   : > { %13494 = vmatprep.subr.bf16.mxu0 %v23863_v45  ;;  %13510 = vmatprep.subr.bf16.mxu1 %v23864_v53 }
 0xc14   : > { %13495 = vmatpush3.bf16.msra.mxu0 %v23865_v30  ;;  %13511 = vmatpush3.bf16.msra.mxu1 %v23866_v6 }
 0xc15   : > { %13512 = vmatprep.subr.bf16.mxu1 %v23867_v44  ;;  %8327 = vmatprep.subr.bf16.mxu0 %v19850_v52 }
 0xc17   : > { %8268 = vmatmul.mubr.bf16.vlgmr.msra.gmra.mrb[160].mxu0 %v8071_v2  ;;  %v20036_v2 = vld [vmem:[%s22651_s8 + $0xd8] ss:$48 sps:$4 sm:$0xff]  }
 0xc18   : > { %13513 = vmatpush3.bf16.msra.mxu1 %v23868_v14  ;;  %8328 = vmatpush1.bf16.msra.mxu0 %v19857_v19  ;;  %23895 = vst [vmem:[#allocation34_spill] sm:$0xff] %v20036_v2 }
 0xc19   : > { %13514 = vmatprep.subr.bf16.mxu1 %v23869_v35  ;;  %8329 = vmatprep.subr.bf16.mxu0 %v19864_v47 }
 0xc1a   : > { %8359 = vmatprep.mubr.bf16.mxu0 %v23870_v21 }
 0xc1c   : > { %13515 = vmatpush3.bf16.msra.mxu1 %v23871_v24  ;;  %8330 = vmatpush1.bf16.msra.mxu0 %v19872_v40 }
 0xc1d   : > { %13516 = vmatprep.subr.bf16.mxu1 %v23872_v46  ;;  %8331 = vmatprep.subr.bf16.mxu0 %v19879_v7 }
 0xc20   : > { %13517 = vmatpush3.bf16.msra.mxu1 %v23873_v62  ;;  %8332 = vmatpush1.bf16.msra.mxu0 %v19886_v8 }
 0xc21   : > { %8368 = vmatprep.subr.bf16.mxu1 %v19894_v37  ;;  %8409 = vmatprep.subr.bf16.mxu0 %v19900_v4 }
 0xc23   : > { %8308 = vmatmul.mubr.bf16.vlgmr.msra.gmra.mrb[172].mxu1 %v8073_v43  ;;  %12676 = vmatmul.mubr.msk.bf16.vlgmr.msra.gmra.mrb[164].mxu0 %vm1806_vm6, %v23874_v20  ;;  %v20042_v43 = vld [vmem:[%s22651_s8 + $0xe0] ss:$48 sps:$4 sm:$0xff]  }
 0xc24   : > { %8369 = vmatpush1.bf16.msra.mxu1 %v19908_v26  ;;  %8410 = vmatpush1.bf16.msra.mxu0 %v19914_v38  ;;  %23896 = vst [vmem:[#allocation37_spill] sm:$0xff] %v20042_v43 }
 0xc25   : > { %8370 = vmatprep.subr.bf16.mxu1 %v19920_v16  ;;  %8411 = vmatprep.subr.bf16.mxu0 %v19926_v34 }
 0xc26   : > { %8400 = vmatprep.mubr.bf16.mxu1 %v23870_v21  ;;  %8441 = vmatprep.mubr.bf16.mxu0 %v23870_v21 }
 0xc28   : > { %8371 = vmatpush1.bf16.msra.mxu1 %v19934_v57  ;;  %8412 = vmatpush1.bf16.msra.mxu0 %v19940_v33 }
 0xc29   : > { %8372 = vmatprep.subr.bf16.mxu1 %v19946_v27  ;;  %8413 = vmatprep.subr.bf16.mxu0 %v19952_v29 }
 0xc2c   : > { %8373 = vmatpush1.bf16.msra.mxu1 %v19958_v12  ;;  %8414 = vmatpush1.bf16.msra.mxu0 %v19964_v48 }
 0xc2d   : > { %8450 = vmatprep.subr.bf16.mxu1 %v19970_v5  ;;  %8491 = vmatprep.subr.bf16.mxu0 %v19976_v0 }
 0xc2f   : > { %12677 = vmatmul.mubr.msk.bf16.vlgmr.msra.gmra.mrb[176].mxu1 %vm1806_vm6, %v23874_v20  ;;  %12678 = vmatmul.mubr.msk.bf16.vlgmr.msra.gmra.mrb[168].mxu0 %vm1806_vm6, %v23874_v20 }
 0xc30   : > { %8451 = vmatpush1.bf16.msra.mxu1 %v19986_v55  ;;  %8492 = vmatpush1.bf16.msra.mxu0 %v19992_v31 }
 0xc31   : > { %8452 = vmatprep.subr.bf16.mxu1 %v19998_v41  ;;  %8493 = vmatprep.subr.bf16.mxu0 %v20004_v17 }
 0xc32   : > { %8482 = vmatprep.mubr.bf16.mxu1 %v23870_v21  ;;  %8523 = vmatprep.mubr.bf16.mxu0 %v23870_v21 }
 0xc34   : > { %8453 = vmatpush1.bf16.msra.mxu1 %v20012_v22  ;;  %8494 = vmatpush1.bf16.msra.mxu0 %v20018_v61 }
 0xc35   : > { %8454 = vmatprep.subr.bf16.mxu1 %v20024_v28  ;;  %8495 = vmatprep.subr.bf16.mxu0 %v20030_v58  ;;  %v20048_v28 = vld [vmem:[%s22651_s8 + $0x2c] ss:$48 sps:$4 sm:$0xff]   ;;  %v20054_v58 = vld [vmem:[%s22652_s9 + $0x40] sm:$0xff]  }
 0xc36   : > { %23897 = vst [vmem:[#allocation36_spill] sm:$0xff] %v20048_v28  ;;  %23898 = vst [vmem:[#allocation38_spill] sm:$0xff] %v20054_v58 }
 0xc38   : > { %8455 = vmatpush1.bf16.msra.mxu1 %v20036_v2  ;;  %8496 = vmatpush1.bf16.msra.mxu0 %v20042_v43  ;;  %v20064_v43 = vld [vmem:[%s22651_s8 + $0x28] ss:$48 sps:$4 sm:$0xff]  }
 0xc39   : > { %8532 = vmatprep.subr.bf16.mxu1 %v20048_v28  ;;  %13524 = vmatprep.subr.bf16.mxu0 %v20054_v58  ;;  %23899 = vst [vmem:[#allocation39_spill] sm:$0xff] %v20064_v43  ;;  %v20071_v28 = vld [vmem:[%s22651_s8 + $0x8c] ss:$48 sps:$4 sm:$0xff]   ;;  %v20077_v58 = vld [vmem:[%s22652_s9] sm:$0xff]   ;;  %v20089_v2 = vld [vmem:[%s22651_s8 + $0x88] ss:$48 sps:$4 sm:$0xff]  }
 0xc3a   : > { %23900 = vst [vmem:[#allocation40_spill] sm:$0xff] %v20071_v28  ;;  %23901 = vst [vmem:[#allocation41_spill] sm:$0xff] %v20077_v58 }
 0xc3b   : > { %12679 = vmatmul.mubr.msk.bf16.vlgmr.msra.gmra.mrb[180].mxu1 %vm1806_vm6, %v23874_v20  ;;  %12680 = vmatmul.mubr.msk.bf16.vlgmr.msra.gmra.mrb[172].mxu0 %vm1806_vm6, %v23874_v20  ;;  %23903 = vst [vmem:[#allocation43_spill] sm:$0xff] %v20089_v2 }
 0xc3c   : > { %8533 = vmatpush1.bf16.msra.mxu1 %v20064_v43  ;;  %8564 = vmatprep.mubr.bf16.mxu1 %v23870_v21  ;;  %v20083_v43 = vld [vmem:[%s22652_s9 + $0x48] sm:$0xff]  }
 0xc3d   : > { %8534 = vmatprep.subr.bf16.mxu1 %v20071_v28  ;;  %13525 = vmatpush3.bf16.msra.mxu0 %v20077_v58  ;;  %23902 = vst [vmem:[#allocation42_spill] sm:$0xff] %v20083_v43  ;;  %v20095_v28 = vld [vmem:[%s22651_s8 + $0xec] ss:$48 sps:$4 sm:$0xff]  }
 0xc3e   : > { %13526 = vmatprep.subr.bf16.mxu0 %v20083_v43  ;;  %23904 = vst [vmem:[#allocation44_spill] sm:$0xff] %v20095_v28  ;;  %v20101_v58 = vld [vmem:[%s22652_s9 + $0x8] sm:$0xff]   ;;  %v20107_v43 = vld [vmem:[%s22652_s9 + $0x50] sm:$0xff]  }
 0xc3f   : > { %23905 = vst [vmem:[#allocation45_spill] sm:$0xff] %v20101_v58  ;;  %23906 = vst [vmem:[#allocation3_spill] sm:$0xff] %v20107_v43 }
 0xc40   : > { %8535 = vmatpush1.bf16.msra.mxu1 %v20089_v2  ;;  %v20113_v2 = vld [vmem:[%s22651_s8 + $0xe8] ss:$48 sps:$4 sm:$0xff]  }
 0xc41   : > { %8536 = vmatprep.subr.bf16.mxu1 %v20095_v28  ;;  %13527 = vmatpush3.bf16.msra.mxu0 %v20101_v58  ;;  %23907 = vst [vmem:[#allocation4_spill] sm:$0xff] %v20113_v2  ;;  %v20119_v28 = vld [vmem:[%s22652_s9 + $0x10] sm:$0xff]   ;;  %v20125_v58 = vld [vmem:[%s22652_s9 + $0xc0] sm:$0xff]  }
 0xc42   : > { %13528 = vmatprep.subr.bf16.mxu0 %v20107_v43  ;;  %23908 = vst [vmem:[#allocation50_spill] sm:$0xff] %v20119_v28  ;;  %23909 = vst [vmem:[#allocation51_spill] sm:$0xff] %v20125_v58  ;;  %v20131_v43 = vld [vmem:[%s22652_s9 + $0x58] sm:$0xff]  }
 0xc43   : > { %23910 = vst [vmem:[#allocation52_spill] sm:$0xff] %v20131_v43 }
 0xc44   : > { %8537 = vmatpush1.bf16.msra.mxu1 %v20113_v2  ;;  %v20157_v2 = vld [vmem:[%s22652_s9 + $0x60] sm:$0xff]  }
 0xc45   : > { %13529 = vmatpush3.bf16.msra.mxu0 %v20119_v28  ;;  %13546 = vmatprep.subr.bf16.mxu1 %v20125_v58  ;;  %v20139_v28 = vld [vmem:[%s22652_s9 + $0x80] sm:$0xff]   ;;  %v20145_v58 = vld [vmem:[%s22652_s9 + $0x18] sm:$0xff]   ;;  %23914 = vst [vmem:[#allocation54_spill] sm:$0xff] %v20157_v2 }
 0xc46   : > { %13530 = vmatprep.subr.bf16.mxu0 %v20131_v43  ;;  %23911 = vst [vmem:[#allocation5_spill] sm:$0xff] %v20139_v28  ;;  %23912 = vst [vmem:[#allocation46_spill] sm:$0xff] %v20145_v58  ;;  %v20151_v43 = vld [vmem:[%s22652_s9 + $0xc8] sm:$0xff]  }
 0xc47   : > { %12681 = vmatmul.mubr.msk.bf16.vlgmr.msra.gmra.mrb[184].mxu1 %vm1806_vm6, %v23874_v20  ;;  %23913 = vst [vmem:[#allocation53_spill] sm:$0xff] %v20151_v43 }
 0xc48   : > { %13547 = vmatpush3.bf16.msra.mxu1 %v20139_v28 }
 0xc49   : > { %13531 = vmatpush3.bf16.msra.mxu0 %v20145_v58  ;;  %13548 = vmatprep.subr.bf16.mxu1 %v20151_v43  ;;  %v20165_v58 = vld [vmem:[%s22652_s9 + $0x88] sm:$0xff]   ;;  %v20171_v43 = vld [vmem:[%s22652_s9 + $0x20] sm:$0xff]  }
 0xc4a   : > { %v7796_v20 = vpop.permute.xlu1 %7795  ;;  %13532 = vmatprep.subr.bf16.mxu0 %v20157_v2  ;;  %23915 = vst [vmem:[#allocation55_spill] sm:$0xff] %v20165_v58  ;;  %23916 = vst [vmem:[#allocation56_spill] sm:$0xff] %v20171_v43  ;;  %v20177_v2 = vld [vmem:[%s22652_s9 + $0xd0] sm:$0xff]  }
 0xc4b   : > { %7799 = vst.msk [vmem:[%s18578_s24] sm:$0xf] %vm7798_vm2, %v7796_v20  ;;  %23917 = vst [vmem:[#allocation57_spill] sm:$0xff] %v20177_v2  ;;  %v20183_v20 = vld [vmem:[%s22652_s9 + $0x68] sm:$0xff]  }
 0xc4c   : > { %13549 = vmatpush3.bf16.msra.mxu1 %v20165_v58  ;;  %23918 = vst [vmem:[#allocation58_spill] sm:$0xff] %v20183_v20  ;;  %v20189_v58 = vld [vmem:[%s22652_s9 + $0x90] sm:$0xff]  }
 0xc4d   : > { %13533 = vmatpush3.bf16.msra.mxu0 %v20171_v43  ;;  %13550 = vmatprep.subr.bf16.mxu1 %v20177_v2  ;;  %23919 = vst [vmem:[#allocation59_spill] sm:$0xff] %v20189_v58  ;;  %v20195_v43 = vld [vmem:[%s22652_s9 + $0x28] sm:$0xff]   ;;  %v20201_v2 = vld [vmem:[%s22652_s9 + $0xd8] sm:$0xff]  }
 0xc4e   : > { %13534 = vmatprep.subr.bf16.mxu0 %v20183_v20  ;;  %23920 = vst [vmem:[#allocation60_spill] sm:$0xff] %v20195_v43  ;;  %23921 = vst [vmem:[#allocation61_spill] sm:$0xff] %v20201_v2  ;;  %v20207_v20 = vld [vmem:[%s22652_s9 + $0x70] sm:$0xff]  }
 0xc4f   : > { %23922 = vst [vmem:[#allocation62_spill] sm:$0xff] %v20207_v20 }
 0xc50   : > { %13551 = vmatpush3.bf16.msra.mxu1 %v20189_v58  ;;  %v20213_v58 = vld [vmem:[%s22652_s9 + $0x98] sm:$0xff]  }
 0xc51   : > { %13535 = vmatpush3.bf16.msra.mxu0 %v20195_v43  ;;  %13552 = vmatprep.subr.bf16.mxu1 %v20201_v2  ;;  %23923 = vst [vmem:[#allocation63_spill] sm:$0xff] %v20213_v58  ;;  %v20219_v43 = vld [vmem:[%s22652_s9 + $0x30] sm:$0xff]   ;;  %v20225_v2 = vld [vmem:[%s22652_s9 + $0xe0] sm:$0xff]  }
 0xc52   : > { %13536 = vmatprep.subr.bf16.mxu0 %v20207_v20  ;;  %23924 = vst [vmem:[#allocation64_spill] sm:$0xff] %v20219_v43  ;;  %23925 = vst [vmem:[#allocation65_spill] sm:$0xff] %v20225_v2  ;;  %v20231_v20 = vld [vmem:[%s22652_s9 + $0x78] sm:$0xff]  }
 0xc53   : > { %23926 = vst [vmem:[#allocation66_spill] sm:$0xff] %v20231_v20 }
 0xc54   : > { %13553 = vmatpush3.bf16.msra.mxu1 %v20213_v58  ;;  %v20237_v58 = vld [vmem:[%s22652_s9 + $0xa0] sm:$0xff]  }
 0xc55   : > { %13537 = vmatpush3.bf16.msra.mxu0 %v20219_v43  ;;  %13554 = vmatprep.subr.bf16.mxu1 %v20225_v2  ;;  %23927 = vst [vmem:[#allocation67_spill] sm:$0xff] %v20237_v58  ;;  %v20243_v43 = vld [vmem:[%s22652_s9 + $0x38] sm:$0xff]   ;;  %v20249_v2 = vld [vmem:[%s22652_s9 + $0xe8] sm:$0xff]  }
 0xc56   : > { %13538 = vmatprep.subr.bf16.mxu0 %v20231_v20  ;;  %23928 = vst [vmem:[#allocation68_spill] sm:$0xff] %v20243_v43  ;;  %23929 = vst [vmem:[#allocation69_spill] sm:$0xff] %v20249_v2  ;;  %v20255_v20 = vld [vmem:[%s22652_s9 + $0x140] sm:$0xff]  }
 0xc57   : > { %23930 = vst [vmem:[#allocation70_spill] sm:$0xff] %v20255_v20 }
 0xc58   : > { %13555 = vmatpush3.bf16.msra.mxu1 %v20237_v58  ;;  %v20261_v58 = vld [vmem:[%s22652_s9 + $0xa8] sm:$0xff]  }
 0xc59   : > { %13539 = vmatpush3.bf16.msra.mxu0 %v20243_v43  ;;  %13556 = vmatprep.subr.bf16.mxu1 %v20249_v2  ;;  %23931 = vst [vmem:[#allocation71_spill] sm:$0xff] %v20261_v58  ;;  %v20267_v43 = vld [vmem:[%s22652_s9 + $0xf0] sm:$0xff]  }
 0xc5a   : > { %13568 = vmatprep.subr.bf16.mxu0 %v20255_v20  ;;  %23932 = vst [vmem:[#allocation72_spill] sm:$0xff] %v20267_v43  ;;  %v20273_v2 = vld [vmem:[%s22652_s9 + $0xb0] sm:$0xff]   ;;  %v20279_v20 = vld [vmem:[%s22652_s9 + $0xf8] sm:$0xff]  }
 0xc5b   : > { %23933 = vst [vmem:[#allocation73_spill] sm:$0xff] %v20273_v2  ;;  %23934 = vst [vmem:[#allocation74_spill] sm:$0xff] %v20279_v20 }
 0xc5c   : > { %13557 = vmatpush3.bf16.msra.mxu1 %v20261_v58  ;;  %v20285_v58 = vld [vmem:[%s22652_s9 + $0xb8] sm:$0xff]  }
 0xc5d   : > { %13558 = vmatprep.subr.bf16.mxu1 %v20267_v43  ;;  %23935 = vst [vmem:[#allocation75_spill] sm:$0xff] %v20285_v58  ;;  %v20291_v43 = vld [vmem:[%s22652_s9 + $0x1c0] sm:$0xff]  }
 0xc5e   : > { %23936 = vst [vmem:[#allocation76_spill] sm:$0xff] %v20291_v43 }
 0xc60   : > { %13559 = vmatpush3.bf16.msra.mxu1 %v20273_v2 }
 0xc61   : > { %13560 = vmatprep.subr.bf16.mxu1 %v20279_v20 }
 0xc64   : > { %13561 = vmatpush3.bf16.msra.mxu1 %v20285_v58 }
 0xc65   : > { %13590 = vmatprep.subr.bf16.mxu1 %v20291_v43 }
 0xcaa   : > { %v13408_v2 = vpop.f32.mrb[152].mxu0 }
 0xcab   : > { %v13409_v28 = vpop.f32.mrb[153].mxu0 }
 0xcac   : > { %v13410_v61 = vadd.f32 %v13409_v28, %v13408_v2  ;;  %v13411_v22 = vpop.f32.mrb[154].mxu0 }
 0xcad   : > { %v13412_v17 = vpop.f32.mrb[155].mxu0 }
 0xcb6   : > { %v13430_v20 = vpop.f32.mrb[164].mxu1 }
 0xcb7   : > { %v13431_v41 = vpop.f32.mrb[165].mxu1 }
 0xcb8   : > { %v13432_v31 = vadd.f32 %v13431_v41, %v13430_v20  ;;  %v13433_v55 = vpop.f32.mrb[166].mxu1  ;;  %v20307_v20 = vld [vmem:[%s22652_s9 + $0x148] sm:$0xff]  }
 0xcb9   : > { %v13434_v0 = vpop.f32.mrb[167].mxu1 }
 0xcba   : > { %v8150_v5 = vadd.f32 %v13432_v31, %v13410_v61 }
 0xcca   : > { %v13452_v48 = vpop.f32.mrb[156].mxu0 }
 0xccb   : > { %v13453_v58 = vpop.f32.mrb[157].mxu0 }
 0xccc   : > { %v13454_v12 = vadd.f32 %v13453_v58, %v13452_v48  ;;  %v13455_v29 = vpop.f32.mrb[158].mxu0 }
 0xccd   : > { %v13456_v27 = vpop.f32.mrb[159].mxu0 }
 0xcce   : > { %v8190_v33 = vadd.f32 %v13454_v12, %v8150_v5 }
 0xcd6   : > { %v13474_v57 = vpop.f32.mrb[168].mxu1 }
 0xcd7   : > { %v13475_v34 = vpop.f32.mrb[169].mxu1 }
 0xcd8   : > { %v13476_v43 = vadd.f32 %v13475_v34, %v13474_v57  ;;  %v13477_v16 = vpop.f32.mrb[170].mxu1 }
 0xcd9   : > { %v13478_v38 = vpop.f32.mrb[171].mxu1 }
 0xcda   : > { %v8230_v28 = vadd.f32 %v13476_v43, %v8190_v33  ;;  %v20301_v43 = vld [vmem:[%s22652_s9 + $0x100] sm:$0xff]  }
 0xcea   : > { %v13496_v22 = vpop.f32.mrb[160].mxu0 }
 0xceb   : > { %v13497_v17 = vpop.f32.mrb[161].mxu0 }
 0xcec   : > { %v13498_v2 = vadd.f32 %v13497_v17, %v13496_v22  ;;  %v13499_v26 = vpop.f32.mrb[162].mxu0 }
 0xced   : > { %v13500_v41 = vpop.f32.mrb[163].mxu0 }
 0xcee   : > { %v8270_v55 = vadd.f32 %v13498_v2, %v8230_v28  ;;  %v20313_v28 = vld [vmem:[%s22652_s9 + $0x108] sm:$0xff]  }
 0xcf6   : > { %v13518_v0 = vpop.f32.mrb[172].mxu1  ;;  %v8361_v31 = vpop.f32.mrb[164].mxu0 }
 0xcf7   : > { %v8573_v48 = vmul.f32 %v8361_v31, %v23530_v18  ;;  %v13519_v29 = vpop.f32.mrb[173].mxu1  ;;  %v8363_v27 = vpop.f32.mrb[165].mxu0  ;;  %v20323_v31 = vld [vmem:[%s22652_s9 + $0x150] sm:$0xff]  }
 0xcf8   : > { %v13520_v12 = vadd.f32 %v13519_v29, %v13518_v0  ;;  %v8574_v5 = vmul.f32 %v8363_v27, %v23531_v10  ;;  %v13521_v34 = vpop.f32.mrb[174].mxu1  ;;  %v8365_v16 = vpop.f32.mrb[166].mxu0 }
 0xcf9   : > { %v13522_v38 = vpop.f32.mrb[175].mxu1  ;;  %v8366_v57 = vpop.f32.mrb[167].mxu0  ;;  %v8585_v58 = vpack.c.bf16 %v8573_v48, %v8573_v48 }
 0xcfa   : > { %v8310_v33 = vadd.f32 %v13520_v12, %v8270_v55  ;;  %v8586_v61 = vpack.c.bf16 %v8574_v5, %v8574_v5  ;;  %v20331_v57 = vld [vmem:[%s22652_s9 + $0x110] sm:$0xff]  }
 0xcfc   : > { %v8315_v26 = vpack.c.bf16 %v8310_v33, %v8310_v33  ;;  %8629 = vmatprep.mubr.bf16.mxu0 %v8586_v61  ;;  %v20337_v61 = vld [vmem:[%s22652_s9 + $0x158] sm:$0xff]  }
 0xcfd   : > { %8630 = vmatmul.mubr.bf16.vlgmr.msra.gmra.mrb[176].mxu0 %v8585_v58  ;;  %v20343_v58 = vld [vmem:[%s22652_s9 + $0x118] sm:$0xff]  }
 0xcfe   : > { %8316 = vst.msk [vmem:[%s18578_s24 + $0x4] sm:$0xf] %vm6220_vm15, %v8315_v26  ;;  %13569 = vmatpush3.bf16.msra.mxu0 %v20301_v43  ;;  %v20349_v26 = vld [vmem:[%s22652_s9 + $0x180] sm:$0xff]  }
 0xcff   : > { %13570 = vmatprep.subr.bf16.mxu0 %v20307_v20 }
 0xd02   : > { %13571 = vmatpush3.bf16.msra.mxu0 %v20313_v28  ;;  %v8402_v22 = vpop.f32.mrb[176].mxu1  ;;  %v8443_v17 = vpop.f32.mrb[168].mxu0 }
 0xd03   : > { %v8575_v2 = vmul.f32 %v8402_v22, %v23535_v23  ;;  %v20318_v41 = vmul.f32 %v8443_v17, %v23536_v25  ;;  %v8404_v55 = vpop.f32.mrb[177].mxu1  ;;  %v8445_v0 = vpop.f32.mrb[169].mxu0  ;;  %13572 = vmatprep.subr.bf16.mxu0 %v20323_v31  ;;  %v20355_v22 = vld [vmem:[%s22652_s9 + $0x160] sm:$0xff]   ;;  %v20361_v17 = vld [vmem:[%s22652_s9 + $0x1c8] sm:$0xff]  }
 0xd04   : > { %v8576_v48 = vmul.f32 %v8404_v55, %v17806_v51  ;;  %v8578_v29 = vmul.f32 %v8445_v0, %v18070_v59  ;;  %v8406_v27 = vpop.f32.mrb[178].mxu1  ;;  %v8447_v12 = vpop.f32.mrb[170].mxu0  ;;  %v20373_v55 = vld [vmem:[%s22652_s9 + $0x188] sm:$0xff]  }
 0xd05   : > { %v8407_v5 = vpop.f32.mrb[179].mxu1  ;;  %v8448_v34 = vpop.f32.mrb[171].mxu0  ;;  %v8587_v33 = vpack.c.bf16 %v8575_v2, %v8575_v2  ;;  %v20367_v2 = vld [vmem:[%s22652_s9 + $0x120] sm:$0xff]   ;;  %23937 = vst [vmem:[#allocation81_spill] sm:$0xff] %v20373_v55 }
 0xd06   : > { %v8588_v16 = vpack.c.bf16 %v8576_v48, %v8576_v48  ;;  %v8590_v38 = vpack.c.bf16 %v8578_v29, %v8578_v29  ;;  %13573 = vmatpush3.bf16.msra.mxu0 %v20331_v57  ;;  %v20385_v34 = vld [vmem:[%s22652_s9 + $0x168] sm:$0xff]  }
 0xd07   : > { %13574 = vmatprep.subr.bf16.mxu0 %v20337_v61  ;;  %23938 = vst [vmem:[#allocation83_spill] sm:$0xff] %v20385_v34 }
 0xd08   : > { %8669 = vmatprep.mubr.bf16.mxu1 %v8588_v16  ;;  %8709 = vmatprep.mubr.bf16.mxu0 %v8590_v38  ;;  %v20391_v16 = vld [vmem:[%s22652_s9 + $0x1d0] sm:$0xff]  }
 0xd09   : > { %8670 = vmatmul.mubr.bf16.vlgmr.msra.gmra.mrb[188].mxu1 %v8587_v33  ;;  %23939 = vst [vmem:[#allocation84_spill] sm:$0xff] %v20391_v16 }
 0xd0a   : > { %13575 = vmatpush3.bf16.msra.mxu0 %v20343_v58  ;;  %13591 = vmatpush3.bf16.msra.mxu1 %v20349_v26 }
 0xd0b   : > { %13576 = vmatprep.subr.bf16.mxu0 %v20355_v22  ;;  %13592 = vmatprep.subr.bf16.mxu1 %v20361_v17 }
 0xd0e   : > { %13577 = vmatpush3.bf16.msra.mxu0 %v20367_v2  ;;  %13593 = vmatpush3.bf16.msra.mxu1 %v20373_v55  ;;  %v8484_v0 = vpop.f32.mrb[180].mxu1  ;;  %v8525_v48 = vpop.f32.mrb[172].mxu0 }
 0xd0f   : > { %v20377_v29 = vmul.f32 %v8484_v0, %v23735_v15  ;;  %v20380_v27 = vmul.f32 %v8525_v48, %v23736_v36  ;;  %v8486_v12 = vpop.f32.mrb[181].mxu1  ;;  %v8527_v5 = vpop.f32.mrb[173].mxu0  ;;  %13578 = vmatprep.subr.bf16.mxu0 %v20385_v34  ;;  %13594 = vmatprep.subr.bf16.mxu1 %v20391_v16  ;;  %v20399_v34 = vld [vmem:[%s22652_s9 + $0x128] sm:$0xff]   ;;  %v20405_v16 = vld [vmem:[%s22652_s9 + $0x190] sm:$0xff]  }
 0xd10   : > { %v8580_v38 = vmul.f32 %v8486_v12, %v18074_v49  ;;  %v8582_v33 = vmul.f32 %v8527_v5, %v18078_v3  ;;  %v8488_v0 = vpop.f32.mrb[182].mxu1  ;;  %v8529_v48 = vpop.f32.mrb[174].mxu0  ;;  %v20423_v12 = vld [vmem:[%s22652_s9 + $0x130] sm:$0xff]   ;;  %v20429_v5 = vld [vmem:[%s22652_s9 + $0x198] sm:$0xff]  }
 0xd11   : > { %v8489_v36 = vpop.f32.mrb[183].mxu1  ;;  %v8530_v15 = vpop.f32.mrb[175].mxu0  ;;  %23942 = vst [vmem:[#allocation89_spill] sm:$0xff] %v20423_v12  ;;  %23943 = vst [vmem:[#allocation94_spill] sm:$0xff] %v20429_v5  ;;  %v20447_v0 = vld [vmem:[%s22652_s9 + $0x138] sm:$0xff]   ;;  %v20453_v48 = vld [vmem:[%s22652_s9 + $0x1a0] sm:$0xff]  }
 0xd12   : > { %v8592_v55 = vpack.c.bf16 %v8580_v38, %v8580_v38  ;;  %13579 = vmatpush3.bf16.msra.mxu0 %v20399_v34  ;;  %13595 = vmatpush3.bf16.msra.mxu1 %v20405_v16  ;;  %v20411_v36 = vld [vmem:[%s22652_s9 + $0x170] sm:$0xff]   ;;  %v20417_v15 = vld [vmem:[%s22652_s9 + $0x1d8] sm:$0xff]   ;;  %23946 = vst [vmem:[#allocation97_spill] sm:$0xff] %v20447_v0  ;;  %23947 = vst [vmem:[#allocation98_spill] sm:$0xff] %v20453_v48 }
 0xd13   : > { %23940 = vst [vmem:[#allocation85_spill] sm:$0xff] %v20411_v36  ;;  %13580 = vmatprep.subr.bf16.mxu0 %v20411_v36  ;;  %23941 = vst [vmem:[#allocation88_spill] sm:$0xff] %v20417_v15  ;;  %13596 = vmatprep.subr.bf16.mxu1 %v20417_v15  ;;  %v20435_v38 = vld [vmem:[%s22652_s9 + $0x178] sm:$0xff]   ;;  %v20464_v15 = vld [vmem:[%s22652_s9 + $0x1e8] sm:$0xff]  }
 0xd14   : > { %8749 = vmatprep.mubr.bf16.mxu1 %v8592_v55  ;;  %23944 = vst [vmem:[#allocation95_spill] sm:$0xff] %v20435_v38  ;;  %v20441_v55 = vld [vmem:[%s22652_s9 + $0x1e0] sm:$0xff]   ;;  %23948 = vst [vmem:[#allocation99_spill] sm:$0xff] %v20464_v15  ;;  %v20477_v36 = vld [vmem:[%s22652_s9 + $0x1a8] sm:$0xff]  }
 0xd15   : > { %23945 = vst [vmem:[#allocation96_spill] sm:$0xff] %v20441_v55 }
 0xd16   : > { %13581 = vmatpush3.bf16.msra.mxu0 %v20423_v12  ;;  %13597 = vmatpush3.bf16.msra.mxu1 %v20429_v5  ;;  %v8589_v5 = vpack.c.bf16 %v20318_v41, %v20318_v41 }
 0xd17   : > { %13582 = vmatprep.subr.bf16.mxu0 %v20435_v38  ;;  %13598 = vmatprep.subr.bf16.mxu1 %v20441_v55 }
 0xd1a   : > { %13583 = vmatpush3.bf16.msra.mxu0 %v20447_v0  ;;  %13599 = vmatpush3.bf16.msra.mxu1 %v20453_v48  ;;  %v8566_v38 = vpop.f32.mrb[184].mxu1  ;;  %v20470_v0 = vld [vmem:[%s22652_s9 + $0x240] sm:$0xff]  }
 0xd1b   : > { %v20459_v55 = vmul.f32 %v8566_v38, %v23747_v39  ;;  %v8568_v12 = vpop.f32.mrb[185].mxu1  ;;  %13600 = vmatprep.subr.bf16.mxu1 %v20464_v15  ;;  %23949 = vst [vmem:[#allocation100_spill] sm:$0xff] %v20470_v0  ;;  %13612 = vmatprep.subr.bf16.mxu0 %v20470_v0  ;;  %v8594_v38 = vpack.c.bf16 %v8582_v33, %v8582_v33  ;;  %v20483_v15 = vld [vmem:[%s22652_s9 + $0x200] sm:$0xff]   ;;  %v20489_v33 = vld [vmem:[%s22652_s9 + $0x1f0] sm:$0xff]  }
 0xd1c   : > { %v8584_v41 = vmul.f32 %v8568_v12, %v18083_v1  ;;  %v8570_v48 = vpop.f32.mrb[186].mxu1  ;;  %v20501_v12 = vld [vmem:[%s22652_s9 + $0x1b0] sm:$0xff]  }
 0xd1d   : > { %8710 = vmatmul.mubr.bf16.vlgmr.msra.gmra.mrb[180].mxu0 %v8589_v5  ;;  %v8571_v39 = vpop.f32.mrb[187].mxu1  ;;  %23951 = vst [vmem:[#allocation77_spill] sm:$0xff] %v20501_v12  ;;  %v20507_v5 = vld [vmem:[%s22652_s9 + $0x208] sm:$0xff]   ;;  %v20513_v48 = vld [vmem:[%s22652_s9 + $0x1f8] sm:$0xff]  }
 0xd1e   : > { %13601 = vmatpush3.bf16.msra.mxu1 %v20477_v36  ;;  %13613 = vmatpush3.bf16.msra.mxu0 %v20483_v15  ;;  %v20495_v39 = vld [vmem:[%s22652_s9 + $0x248] sm:$0xff]   ;;  %23952 = vst [vmem:[#allocation78_spill] sm:$0xff] %v20507_v5  ;;  %23953 = vst [vmem:[#allocation79_spill] sm:$0xff] %v20513_v48 }
 0xd1f   : > { %8789 = vmatprep.mubr.bf16.mxu0 %v8594_v38  ;;  %13602 = vmatprep.subr.bf16.mxu1 %v20489_v33  ;;  %23950 = vst [vmem:[#allocation15_spill] sm:$0xff] %v20495_v39  ;;  %v20519_v38 = vld [vmem:[%s22652_s9 + $0x250] sm:$0xff]  }
 0xd20   : > { %13614 = vmatprep.subr.bf16.mxu0 %v20495_v39  ;;  %23954 = vst [vmem:[#allocation80_spill] sm:$0xff] %v20519_v38  ;;  %v8596_v39 = vpack.c.bf16 %v8584_v41, %v8584_v41  ;;  %v20563_v41 = vld [vmem:[%s22652_s9 + $0x260] sm:$0xff]  }
 0xd21   : > { %23961 = vst [vmem:[#allocation93_spill] sm:$0xff] %v20563_v41 }
 0xd22   : > { %13603 = vmatpush3.bf16.msra.mxu1 %v20501_v12  ;;  %13615 = vmatpush3.bf16.msra.mxu0 %v20507_v5  ;;  %v20525_v12 = vld [vmem:[%s22652_s9 + $0x1b8] sm:$0xff]   ;;  %v20531_v5 = vld [vmem:[%s22652_s9 + $0x210] sm:$0xff]  }
 0xd23   : > { %13604 = vmatprep.subr.bf16.mxu1 %v20513_v48  ;;  %13616 = vmatprep.subr.bf16.mxu0 %v20519_v38  ;;  %23955 = vst [vmem:[#allocation82_spill] sm:$0xff] %v20525_v12  ;;  %23956 = vst [vmem:[#allocation86_spill] sm:$0xff] %v20531_v5  ;;  %v8591_v48 = vpack.c.bf16 %v20377_v29, %v20377_v29  ;;  %v20539_v38 = vld [vmem:[%s22652_s9 + $0x258] sm:$0xff]  }
 0xd24   : > { %23957 = vst [vmem:[#allocation87_spill] sm:$0xff] %v20539_v38  ;;  %v20551_v29 = vld [vmem:[%s22652_s9 + $0x218] sm:$0xff]  }
 0xd25   : > { %23959 = vst [vmem:[#allocation91_spill] sm:$0xff] %v20551_v29 }
 0xd26   : > { %13605 = vmatpush3.bf16.msra.mxu1 %v20525_v12  ;;  %13617 = vmatpush3.bf16.msra.mxu0 %v20531_v5  ;;  %v20545_v12 = vld [vmem:[%s22652_s9 + $0x2c0] sm:$0xff]  }
 0xd27   : > { %13618 = vmatprep.subr.bf16.mxu0 %v20539_v38  ;;  %23958 = vst [vmem:[#allocation90_spill] sm:$0xff] %v20545_v12  ;;  %13634 = vmatprep.subr.bf16.mxu1 %v20545_v12  ;;  %v20557_v38 = vld [vmem:[%s22652_s9 + $0x280] sm:$0xff]  }
 0xd28   : > { %23960 = vst [vmem:[#allocation92_spill] sm:$0xff] %v20557_v38 }
 0xd29   : > { %8750 = vmatmul.mubr.bf16.vlgmr.msra.gmra.mrb[192].mxu1 %v8591_v48  ;;  %v20569_v48 = vld [vmem:[%s22652_s9 + $0x2c8] sm:$0xff]  }
 0xd2a   : > { %13619 = vmatpush3.bf16.msra.mxu0 %v20551_v29  ;;  %13635 = vmatpush3.bf16.msra.mxu1 %v20557_v38  ;;  %23962 = vst [vmem:[#allocation13_spill] sm:$0xff] %v20569_v48 }
 0xd2b   : > { %8829 = vmatprep.mubr.bf16.mxu1 %v8596_v39  ;;  %13620 = vmatprep.subr.bf16.mxu0 %v20563_v41  ;;  %v23983_v39 = vld [vmem:[#allocation35_spill] sm:$0xff] }
 0xd2c   : > { %13636 = vmatprep.subr.bf16.mxu1 %v20569_v48 }
 0xd2e   : > { %13621 = vmatpush3.bf16.msra.mxu0 %v23853_v9  ;;  %13637 = vmatpush3.bf16.msra.mxu1 %v23854_v63  ;;  %v8593_v9 = vpack.c.bf16 %v20380_v27, %v20380_v27  ;;  %v8595_v63 = vpack.c.bf16 %v20459_v55, %v20459_v55  ;;  %v23981_v27 = vld [vmem:[#allocation33_spill] sm:$0xff]  ;;  %v23982_v55 = vld [vmem:[#allocation32_spill] sm:$0xff] }
 0xd2f   : > { %13622 = vmatprep.subr.bf16.mxu0 %v23855_v56  ;;  %13638 = vmatprep.subr.bf16.mxu1 %v23856_v42  ;;  %v23963_v56 = vld [vmem:[#allocation18_spill] sm:$0xff] }
 0xd30   : > { %v23964_v42 = vld [vmem:[#allocation6_spill] sm:$0xff] }
 0xd32   : > { %13623 = vmatpush3.bf16.msra.mxu0 %v23857_v50  ;;  %13639 = vmatpush3.bf16.msra.mxu1 %v23858_v32  ;;  %v23965_v50 = vld [vmem:[#allocation7_spill] sm:$0xff]  ;;  %v23966_v32 = vld [vmem:[#allocation9_spill] sm:$0xff] }
 0xd33   : > { %13624 = vmatprep.subr.bf16.mxu0 %v23859_v60  ;;  %13640 = vmatprep.subr.bf16.mxu1 %v23860_v13  ;;  %v23967_v60 = vld [vmem:[#allocation10_spill] sm:$0xff]  ;;  %v23968_v13 = vld [vmem:[#allocation11_spill] sm:$0xff] }
 0xd36   : > { %13625 = vmatpush3.bf16.msra.mxu0 %v23861_v11  ;;  %13641 = vmatpush3.bf16.msra.mxu1 %v23862_v54  ;;  %v23969_v11 = vld [vmem:[#allocation12_spill] sm:$0xff]  ;;  %v23970_v54 = vld [vmem:[#allocation14_spill] sm:$0xff] }
 0xd37   : > { %13626 = vmatprep.subr.bf16.mxu0 %v23863_v45  ;;  %13642 = vmatprep.subr.bf16.mxu1 %v23864_v53  ;;  %v23971_v45 = vld [vmem:[#allocation23_spill] sm:$0xff]  ;;  %v23972_v53 = vld [vmem:[#allocation22_spill] sm:$0xff] }
 0xd3a   : > { %13627 = vmatpush3.bf16.msra.mxu0 %v23865_v30  ;;  %13643 = vmatpush3.bf16.msra.mxu1 %v23866_v6  ;;  %v23973_v30 = vld [vmem:[#allocation25_spill] sm:$0xff]  ;;  %v23974_v6 = vld [vmem:[#allocation24_spill] sm:$0xff] }
 0xd3b   : > { %13644 = vmatprep.subr.bf16.mxu1 %v23867_v44  ;;  %8850 = vmatprep.subr.bf16.mxu0 %v19850_v52  ;;  %v23975_v44 = vld [vmem:[#allocation27_spill] sm:$0xff] }
 0xd3d   : > { %8790 = vmatmul.mubr.bf16.vlgmr.msra.gmra.mrb[184].mxu0 %v8593_v9  ;;  %v23984_v9 = vld [vmem:[#allocation34_spill] sm:$0xff] }
 0xd3e   : > { %13645 = vmatpush3.bf16.msra.mxu1 %v23868_v14  ;;  %8851 = vmatpush1.bf16.msra.mxu0 %v19857_v19  ;;  %v23976_v14 = vld [vmem:[#allocation26_spill] sm:$0xff] }
 0xd3f   : > { %13646 = vmatprep.subr.bf16.mxu1 %v23869_v35  ;;  %8852 = vmatprep.subr.bf16.mxu0 %v19864_v47  ;;  %v23977_v35 = vld [vmem:[#allocation29_spill] sm:$0xff] }
 0xd40   : > { %8882 = vmatprep.mubr.bf16.mxu0 %v23870_v21 }
 0xd42   : > { %13647 = vmatpush3.bf16.msra.mxu1 %v23871_v24  ;;  %8853 = vmatpush1.bf16.msra.mxu0 %v19872_v40  ;;  %v23978_v24 = vld [vmem:[#allocation28_spill] sm:$0xff] }
 0xd43   : > { %13648 = vmatprep.subr.bf16.mxu1 %v23872_v46  ;;  %8854 = vmatprep.subr.bf16.mxu0 %v19879_v7  ;;  %v23979_v46 = vld [vmem:[#allocation31_spill] sm:$0xff] }
 0xd46   : > { %13649 = vmatpush3.bf16.msra.mxu1 %v23873_v62  ;;  %8855 = vmatpush1.bf16.msra.mxu0 %v19886_v8  ;;  %v23980_v62 = vld [vmem:[#allocation30_spill] sm:$0xff] }
 0xd47   : > { %8891 = vmatprep.subr.bf16.mxu1 %v19894_v37  ;;  %8932 = vmatprep.subr.bf16.mxu0 %v19900_v4 }
 0xd49   : > { %8830 = vmatmul.mubr.bf16.vlgmr.msra.gmra.mrb[196].mxu1 %v8595_v63  ;;  %12683 = vmatmul.mubr.msk.bf16.vlgmr.msra.gmra.mrb[188].mxu0 %vm1806_vm6, %v23963_v56  ;;  %v23985_v63 = vld [vmem:[#allocation37_spill] sm:$0xff] }
 0xd4a   : > { %8892 = vmatpush1.bf16.msra.mxu1 %v23964_v42  ;;  %8933 = vmatpush1.bf16.msra.mxu0 %v23965_v50 }
 0xd4b   : > { %8893 = vmatprep.subr.bf16.mxu1 %v23966_v32  ;;  %8934 = vmatprep.subr.bf16.mxu0 %v23967_v60 }
 0xd4c   : > { %8923 = vmatprep.mubr.bf16.mxu1 %v23870_v21  ;;  %8964 = vmatprep.mubr.bf16.mxu0 %v23870_v21 }
 0xd4e   : > { %8894 = vmatpush1.bf16.msra.mxu1 %v23968_v13  ;;  %8935 = vmatpush1.bf16.msra.mxu0 %v23969_v11 }
 0xd4f   : > { %8895 = vmatprep.subr.bf16.mxu1 %v23970_v54  ;;  %8936 = vmatprep.subr.bf16.mxu0 %v23971_v45 }
 0xd52   : > { %8896 = vmatpush1.bf16.msra.mxu1 %v23972_v53  ;;  %8937 = vmatpush1.bf16.msra.mxu0 %v23973_v30 }
 0xd53   : > { %8973 = vmatprep.subr.bf16.mxu1 %v23974_v6  ;;  %9014 = vmatprep.subr.bf16.mxu0 %v23975_v44  ;;  %v23999_v44 = vld [vmem:[#allocation52_spill] sm:$0xff] }
 0xd55   : > { %12684 = vmatmul.mubr.msk.bf16.vlgmr.msra.gmra.mrb[200].mxu1 %vm1806_vm6, %v23963_v56  ;;  %12685 = vmatmul.mubr.msk.bf16.vlgmr.msra.gmra.mrb[192].mxu0 %vm1806_vm6, %v23963_v56 }
 0xd56   : > { %8974 = vmatpush1.bf16.msra.mxu1 %v23976_v14  ;;  %9015 = vmatpush1.bf16.msra.mxu0 %v23977_v35  ;;  %v23986_v35 = vld [vmem:[#allocation36_spill] sm:$0xff]  ;;  %v23997_v14 = vld [vmem:[#allocation50_spill] sm:$0xff] }
 0xd57   : > { %8975 = vmatprep.subr.bf16.mxu1 %v23978_v24  ;;  %9016 = vmatprep.subr.bf16.mxu0 %v23979_v46  ;;  %v23987_v24 = vld [vmem:[#allocation38_spill] sm:$0xff]  ;;  %v23996_v46 = vld [vmem:[#allocation4_spill] sm:$0xff] }
 0xd58   : > { %9005 = vmatprep.mubr.bf16.mxu1 %v23870_v21  ;;  %9046 = vmatprep.mubr.bf16.mxu0 %v23870_v21 }
 0xd5a   : > { %8976 = vmatpush1.bf16.msra.mxu1 %v23980_v62  ;;  %9017 = vmatpush1.bf16.msra.mxu0 %v23981_v27  ;;  %v23988_v62 = vld [vmem:[#allocation39_spill] sm:$0xff] }
 0xd5b   : > { %8977 = vmatprep.subr.bf16.mxu1 %v23982_v55  ;;  %9018 = vmatprep.subr.bf16.mxu0 %v23983_v39  ;;  %v23989_v55 = vld [vmem:[#allocation40_spill] sm:$0xff]  ;;  %v23990_v39 = vld [vmem:[#allocation41_spill] sm:$0xff]  ;;  %v23995_v27 = vld [vmem:[#allocation3_spill] sm:$0xff] }
 0xd5e   : > { %8978 = vmatpush1.bf16.msra.mxu1 %v23984_v9  ;;  %9019 = vmatpush1.bf16.msra.mxu0 %v23985_v63  ;;  %v23991_v9 = vld [vmem:[#allocation42_spill] sm:$0xff]  ;;  %v23992_v63 = vld [vmem:[#allocation43_spill] sm:$0xff] }
 0xd5f   : > { %9055 = vmatprep.subr.bf16.mxu1 %v23986_v35  ;;  %13656 = vmatprep.subr.bf16.mxu0 %v23987_v24  ;;  %v23993_v35 = vld [vmem:[#allocation44_spill] sm:$0xff]  ;;  %v23994_v24 = vld [vmem:[#allocation45_spill] sm:$0xff] }
 0xd61   : > { %12686 = vmatmul.mubr.msk.bf16.vlgmr.msra.gmra.mrb[204].mxu1 %vm1806_vm6, %v23963_v56  ;;  %12687 = vmatmul.mubr.msk.bf16.vlgmr.msra.gmra.mrb[196].mxu0 %vm1806_vm6, %v23963_v56 }
 0xd62   : > { %9056 = vmatpush1.bf16.msra.mxu1 %v23988_v62  ;;  %9087 = vmatprep.mubr.bf16.mxu1 %v23870_v21  ;;  %v23998_v62 = vld [vmem:[#allocation51_spill] sm:$0xff] }
 0xd63   : > { %9057 = vmatprep.subr.bf16.mxu1 %v23989_v55  ;;  %13657 = vmatpush3.bf16.msra.mxu0 %v23990_v39  ;;  %v24009_v39 = vld [vmem:[#allocation60_spill] sm:$0xff] }
 0xd64   : > { %13658 = vmatprep.subr.bf16.mxu0 %v23991_v9  ;;  %v24000_v9 = vld [vmem:[#allocation5_spill] sm:$0xff] }
 0xd66   : > { %9058 = vmatpush1.bf16.msra.mxu1 %v23992_v63  ;;  %v24001_v63 = vld [vmem:[#allocation46_spill] sm:$0xff] }
 0xd67   : > { %9059 = vmatprep.subr.bf16.mxu1 %v23993_v35  ;;  %13659 = vmatpush3.bf16.msra.mxu0 %v23994_v24  ;;  %v24002_v35 = vld [vmem:[#allocation53_spill] sm:$0xff]  ;;  %v24003_v24 = vld [vmem:[#allocation54_spill] sm:$0xff] }
 0xd68   : > { %13660 = vmatprep.subr.bf16.mxu0 %v23995_v27  ;;  %v24004_v27 = vld [vmem:[#allocation55_spill] sm:$0xff] }
 0xd6a   : > { %9060 = vmatpush1.bf16.msra.mxu1 %v23996_v46  ;;  %v24005_v46 = vld [vmem:[#allocation56_spill] sm:$0xff] }
 0xd6b   : > { %13661 = vmatpush3.bf16.msra.mxu0 %v23997_v14  ;;  %13678 = vmatprep.subr.bf16.mxu1 %v23998_v62  ;;  %v24006_v14 = vld [vmem:[#allocation57_spill] sm:$0xff]  ;;  %v24007_v62 = vld [vmem:[#allocation58_spill] sm:$0xff] }
 0xd6c   : > { %13662 = vmatprep.subr.bf16.mxu0 %v23999_v44  ;;  %v24008_v44 = vld [vmem:[#allocation59_spill] sm:$0xff] }
 0xd6d   : > { %12688 = vmatmul.mubr.msk.bf16.vlgmr.msra.gmra.mrb[208].mxu1 %vm1806_vm6, %v23963_v56  ;;  %v24010_v56 = vld [vmem:[#allocation61_spill] sm:$0xff] }
 0xd6e   : > { %13679 = vmatpush3.bf16.msra.mxu1 %v24000_v9  ;;  %v24011_v9 = vld [vmem:[#allocation62_spill] sm:$0xff] }
 0xd6f   : > { %13663 = vmatpush3.bf16.msra.mxu0 %v24001_v63  ;;  %13680 = vmatprep.subr.bf16.mxu1 %v24002_v35  ;;  %v24012_v63 = vld [vmem:[#allocation63_spill] sm:$0xff]  ;;  %v24013_v35 = vld [vmem:[#allocation64_spill] sm:$0xff] }
 0xd70   : > { %13664 = vmatprep.subr.bf16.mxu0 %v24003_v24  ;;  %v24014_v24 = vld [vmem:[#allocation65_spill] sm:$0xff] }
 0xd72   : > { %13681 = vmatpush3.bf16.msra.mxu1 %v24004_v27  ;;  %v24015_v27 = vld [vmem:[#allocation66_spill] sm:$0xff] }
 0xd73   : > { %13665 = vmatpush3.bf16.msra.mxu0 %v24005_v46  ;;  %13682 = vmatprep.subr.bf16.mxu1 %v24006_v14  ;;  %v24016_v46 = vld [vmem:[#allocation67_spill] sm:$0xff]  ;;  %v24017_v14 = vld [vmem:[#allocation68_spill] sm:$0xff] }
 0xd74   : > { %13666 = vmatprep.subr.bf16.mxu0 %v24007_v62  ;;  %v24018_v62 = vld [vmem:[#allocation69_spill] sm:$0xff] }
 0xd76   : > { %13683 = vmatpush3.bf16.msra.mxu1 %v24008_v44  ;;  %v24019_v44 = vld [vmem:[#allocation70_spill] sm:$0xff] }
 0xd77   : > { %13667 = vmatpush3.bf16.msra.mxu0 %v24009_v39  ;;  %13684 = vmatprep.subr.bf16.mxu1 %v24010_v56  ;;  %v24020_v39 = vld [vmem:[#allocation71_spill] sm:$0xff]  ;;  %v24021_v56 = vld [vmem:[#allocation72_spill] sm:$0xff] }
 0xd78   : > { %13668 = vmatprep.subr.bf16.mxu0 %v24011_v9  ;;  %v24022_v9 = vld [vmem:[#allocation73_spill] sm:$0xff] }
 0xd7a   : > { %13685 = vmatpush3.bf16.msra.mxu1 %v24012_v63  ;;  %v24023_v63 = vld [vmem:[#allocation74_spill] sm:$0xff] }
 0xd7b   : > { %13669 = vmatpush3.bf16.msra.mxu0 %v24013_v35  ;;  %13686 = vmatprep.subr.bf16.mxu1 %v24014_v24  ;;  %v24024_v35 = vld [vmem:[#allocation75_spill] sm:$0xff]  ;;  %v24025_v24 = vld [vmem:[#allocation76_spill] sm:$0xff] }
 0xd7c   : > { %13670 = vmatprep.subr.bf16.mxu0 %v24015_v27 }
 0xd7e   : > { %13687 = vmatpush3.bf16.msra.mxu1 %v24016_v46 }
 0xd7f   : > { %13671 = vmatpush3.bf16.msra.mxu0 %v24017_v14  ;;  %13688 = vmatprep.subr.bf16.mxu1 %v24018_v62 }
 0xd80   : > { %13700 = vmatprep.subr.bf16.mxu0 %v24019_v44 }
 0xd82   : > { %13689 = vmatpush3.bf16.msra.mxu1 %v24020_v39 }
 0xd83   : > { %13690 = vmatprep.subr.bf16.mxu1 %v24021_v56 }
 0xd86   : > { %13691 = vmatpush3.bf16.msra.mxu1 %v24022_v9 }
 0xd87   : > { %13692 = vmatprep.subr.bf16.mxu1 %v24023_v63 }
 0xd8a   : > { %13693 = vmatpush3.bf16.msra.mxu1 %v24024_v35 }
 0xd8b   : > { %13722 = vmatprep.subr.bf16.mxu1 %v24025_v24 }
 0xdd0   : > { %v13540_v27 = vpop.f32.mrb[176].mxu0 }
 0xdd1   : > { %v13541_v46 = vpop.f32.mrb[177].mxu0 }
 0xdd2   : > { %v13542_v55 = vadd.f32 %v13541_v46, %v13540_v27  ;;  %v13543_v14 = vpop.f32.mrb[178].mxu0 }
 0xdd3   : > { %v13544_v6 = vpop.f32.mrb[179].mxu0 }
 0xddc   : > { %v13562_v62 = vpop.f32.mrb[188].mxu1 }
 0xddd   : > { %v13563_v30 = vpop.f32.mrb[189].mxu1 }
 0xdde   : > { %v13564_v44 = vadd.f32 %v13563_v30, %v13562_v62  ;;  %v13565_v53 = vpop.f32.mrb[190].mxu1 }
 0xddf   : > { %v13566_v39 = vpop.f32.mrb[191].mxu1 }
 0xde0   : > { %v8672_v45 = vadd.f32 %v13564_v44, %v13542_v55 }
 0xdf0   : > { %v13584_v56 = vpop.f32.mrb[180].mxu0 }
 0xdf1   : > { %v13585_v54 = vpop.f32.mrb[181].mxu0 }
 0xdf2   : > { %v13586_v9 = vadd.f32 %v13585_v54, %v13584_v56  ;;  %v13587_v11 = vpop.f32.mrb[182].mxu0 }
 0xdf3   : > { %v13588_v63 = vpop.f32.mrb[183].mxu0 }
 0xdf4   : > { %v8712_v13 = vadd.f32 %v13586_v9, %v8672_v45 }
 0xdfc   : > { %v13606_v35 = vpop.f32.mrb[192].mxu1 }
 0xdfd   : > { %v13607_v60 = vpop.f32.mrb[193].mxu1 }
 0xdfe   : > { %v13608_v24 = vadd.f32 %v13607_v60, %v13606_v35  ;;  %v13609_v32 = vpop.f32.mrb[194].mxu1 }
 0xdff   : > { %v13610_v50 = vpop.f32.mrb[195].mxu1 }
 0xe00   : > { %v8752_v46 = vadd.f32 %v13608_v24, %v8712_v13 }
 0xe10   : > { %v13628_v14 = vpop.f32.mrb[184].mxu0 }
 0xe11   : > { %v13629_v6 = vpop.f32.mrb[185].mxu0 }
 0xe12   : > { %v13630_v27 = vadd.f32 %v13629_v6, %v13628_v14  ;;  %v13631_v42 = vpop.f32.mrb[186].mxu0 }
 0xe13   : > { %v13632_v30 = vpop.f32.mrb[187].mxu0 }
 0xe14   : > { %v8792_v53 = vadd.f32 %v13630_v27, %v8752_v46 }
 0xe1c   : > { %v13650_v62 = vpop.f32.mrb[196].mxu1  ;;  %v8884_v44 = vpop.f32.mrb[188].mxu0 }
 0xe1d   : > { %v9096_v55 = vmul.f32 %v8884_v44, %v23530_v18  ;;  %v13651_v54 = vpop.f32.mrb[197].mxu1  ;;  %v8886_v11 = vpop.f32.mrb[189].mxu0 }
 0xe1e   : > { %v13652_v39 = vadd.f32 %v13651_v54, %v13650_v62  ;;  %v9097_v45 = vmul.f32 %v8886_v11, %v23531_v10  ;;  %v13653_v9 = vpop.f32.mrb[198].mxu1  ;;  %v8888_v60 = vpop.f32.mrb[190].mxu0 }
 0xe1f   : > { %v13654_v32 = vpop.f32.mrb[199].mxu1  ;;  %v8889_v50 = vpop.f32.mrb[191].mxu0  ;;  %v9108_v24 = vpack.c.bf16 %v9096_v55, %v9096_v55  ;;  %v24026_v9 = vld [vmem:[#allocation81_spill] sm:$0xff] }
 0xe20   : > { %v8832_v13 = vadd.f32 %v13652_v39, %v8792_v53  ;;  %v9109_v35 = vpack.c.bf16 %v9097_v45, %v9097_v45  ;;  %v24027_v50 = vld [vmem:[#allocation47_spill] sm:$0xff] }
 0xe22   : > { %v12729_v63 = vpack.c.bf16 %v8832_v13, %v8832_v13  ;;  %9152 = vmatprep.mubr.bf16.mxu0 %v9109_v35  ;;  %v24028_v35 = vld [vmem:[#allocation48_spill] sm:$0xff] }
 0xe23   : > { %9153 = vmatmul.mubr.bf16.vlgmr.msra.gmra.mrb[200].mxu0 %v9108_v24 }
 0xe24   : > { %13701 = vmatpush3.bf16.msra.mxu0 %v20301_v43  ;;  %8841 = vrot.lane.b32.xlu0 %v12729_v63, %s15911_s11 }
 0xe25   : > { %13702 = vmatprep.subr.bf16.mxu0 %v20307_v20 }
 0xe28   : > { %13703 = vmatpush3.bf16.msra.mxu0 %v20313_v28  ;;  %v8925_v42 = vpop.f32.mrb[200].mxu1  ;;  %v8966_v56 = vpop.f32.mrb[192].mxu0 }
 0xe29   : > { %v9098_v46 = vmul.f32 %v8925_v42, %v23535_v23  ;;  %v9100_v14 = vmul.f32 %v8966_v56, %v23536_v25  ;;  %v8927_v6 = vpop.f32.mrb[201].mxu1  ;;  %v8968_v27 = vpop.f32.mrb[193].mxu0  ;;  %13704 = vmatprep.subr.bf16.mxu0 %v20323_v31  ;;  %v24029_v56 = vld [vmem:[#allocation83_spill] sm:$0xff] }
 0xe2a   : > { %v9099_v30 = vmul.f32 %v8927_v6, %v17806_v51  ;;  %v9101_v53 = vmul.f32 %v8968_v27, %v18070_v59  ;;  %v8929_v62 = vpop.f32.mrb[202].mxu1  ;;  %v8970_v44 = vpop.f32.mrb[194].mxu0 }
 0xe2b   : > { %v8930_v55 = vpop.f32.mrb[203].mxu1  ;;  %v8971_v54 = vpop.f32.mrb[195].mxu0  ;;  %v9110_v45 = vpack.c.bf16 %v9098_v46, %v9098_v46  ;;  %v24030_v46 = vld [vmem:[#allocation84_spill] sm:$0xff] }
 0xe2c   : > { %v9111_v11 = vpack.c.bf16 %v9099_v30, %v9099_v30  ;;  %v9113_v39 = vpack.c.bf16 %v9101_v53, %v9101_v53  ;;  %13705 = vmatpush3.bf16.msra.mxu0 %v20331_v57  ;;  %v24031_v54 = vld [vmem:[#allocation85_spill] sm:$0xff] }
 0xe2d   : > { %13706 = vmatprep.subr.bf16.mxu0 %v20337_v61 }
 0xe2e   : > { %9192 = vmatprep.mubr.bf16.mxu1 %v9111_v11  ;;  %9232 = vmatprep.mubr.bf16.mxu0 %v9113_v39  ;;  %v24032_v11 = vld [vmem:[#allocation88_spill] sm:$0xff]  ;;  %v24033_v39 = vld [vmem:[#allocation89_spill] sm:$0xff] }
 0xe2f   : > { %9193 = vmatmul.mubr.bf16.vlgmr.msra.gmra.mrb[212].mxu1 %v9110_v45  ;;  %v24034_v45 = vld [vmem:[#allocation94_spill] sm:$0xff] }
 0xe30   : > { %13707 = vmatpush3.bf16.msra.mxu0 %v20343_v58  ;;  %13723 = vmatpush3.bf16.msra.mxu1 %v20349_v26 }
 0xe31   : > { %13708 = vmatprep.subr.bf16.mxu0 %v20355_v22  ;;  %13724 = vmatprep.subr.bf16.mxu1 %v20361_v17 }
 0xe34   : > { %13709 = vmatpush3.bf16.msra.mxu0 %v20367_v2  ;;  %13725 = vmatpush3.bf16.msra.mxu1 %v24026_v9  ;;  %v9007_v60 = vpop.f32.mrb[204].mxu1  ;;  %v9048_v32 = vpop.f32.mrb[196].mxu0 }
 0xe35   : > { %v9102_v13 = vmul.f32 %v9007_v60, %v24027_v50  ;;  %v20705_v24 = vmul.f32 %v9048_v32, %v24028_v35  ;;  %v9009_v63 = vpop.f32.mrb[205].mxu1  ;;  %v9050_v42 = vpop.f32.mrb[197].mxu0  ;;  %13710 = vmatprep.subr.bf16.mxu0 %v24029_v56  ;;  %13726 = vmatprep.subr.bf16.mxu1 %v24030_v46  ;;  %v24035_v60 = vld [vmem:[#allocation95_spill] sm:$0xff]  ;;  %v24036_v32 = vld [vmem:[#allocation96_spill] sm:$0xff] }
 0xe36   : > { %v9103_v6 = vmul.f32 %v9009_v63, %v18074_v49  ;;  %v9105_v27 = vmul.f32 %v9050_v42, %v18078_v3  ;;  %v9011_v30 = vpop.f32.mrb[206].mxu1  ;;  %v9052_v53 = vpop.f32.mrb[198].mxu0  ;;  %v24037_v63 = vld [vmem:[#allocation97_spill] sm:$0xff]  ;;  %v24038_v42 = vld [vmem:[#allocation98_spill] sm:$0xff] }
 0xe37   : > { %v9012_v62 = vpop.f32.mrb[207].mxu1  ;;  %v9053_v44 = vpop.f32.mrb[199].mxu0  ;;  %v9112_v30 = vpack.c.bf16 %v9100_v14, %v9100_v14  ;;  %v24039_v53 = vld [vmem:[#allocation49_spill] sm:$0xff]  ;;  %v24041_v14 = vld [vmem:[#allocation15_spill] sm:$0xff] }
 0xe38   : > { %v9115_v55 = vpack.c.bf16 %v9103_v6, %v9103_v6  ;;  %13711 = vmatpush3.bf16.msra.mxu0 %v20399_v34  ;;  %13727 = vmatpush3.bf16.msra.mxu1 %v20405_v16 }
 0xe39   : > { %13712 = vmatprep.subr.bf16.mxu0 %v24031_v54  ;;  %13728 = vmatprep.subr.bf16.mxu1 %v24032_v11  ;;  %v24040_v11 = vld [vmem:[#allocation99_spill] sm:$0xff] }
 0xe3a   : > { %9272 = vmatprep.mubr.bf16.mxu1 %v9115_v55 }
 0xe3c   : > { %13713 = vmatpush3.bf16.msra.mxu0 %v24033_v39  ;;  %13729 = vmatpush3.bf16.msra.mxu1 %v24034_v45 }
 0xe3d   : > { %13714 = vmatprep.subr.bf16.mxu0 %v24035_v60  ;;  %13730 = vmatprep.subr.bf16.mxu1 %v24036_v32  ;;  %v9117_v60 = vpack.c.bf16 %v9105_v27, %v9105_v27  ;;  %v24046_v27 = vld [vmem:[#allocation82_spill] sm:$0xff] }
 0xe40   : > { %13715 = vmatpush3.bf16.msra.mxu0 %v24037_v63  ;;  %13731 = vmatpush3.bf16.msra.mxu1 %v24038_v42  ;;  %v9089_v6 = vpop.f32.mrb[208].mxu1 }
 0xe41   : > { %v20722_v62 = vmul.f32 %v9089_v6, %v24039_v53  ;;  %v9091_v44 = vpop.f32.mrb[209].mxu1  ;;  %13732 = vmatprep.subr.bf16.mxu1 %v24040_v11  ;;  %13744 = vmatprep.subr.bf16.mxu0 %v20470_v0  ;;  %v24042_v6 = vld [vmem:[#allocation77_spill] sm:$0xff]  ;;  %v24043_v11 = vld [vmem:[#allocation78_spill] sm:$0xff]  ;;  %v24044_v0 = vld [vmem:[#allocation79_spill] sm:$0xff] }
 0xe42   : > { %v9107_v55 = vmul.f32 %v9091_v44, %v18083_v1  ;;  %v9093_v45 = vpop.f32.mrb[210].mxu1  ;;  %v24045_v44 = vld [vmem:[#allocation80_spill] sm:$0xff] }
 0xe43   : > { %9233 = vmatmul.mubr.bf16.vlgmr.msra.gmra.mrb[204].mxu0 %v9112_v30  ;;  %v9094_v32 = vpop.f32.mrb[211].mxu1  ;;  %v9114_v45 = vpack.c.bf16 %v9102_v13, %v9102_v13  ;;  %v20746_v30 = vld [vmem:[%s22652_s9 + $0x220] sm:$0xff]   ;;  %v20752_v13 = vld [vmem:[%s22652_s9 + $0x288] sm:$0xff]  }
 0xe44   : > { %13733 = vmatpush3.bf16.msra.mxu1 %v20477_v36  ;;  %13745 = vmatpush3.bf16.msra.mxu0 %v20483_v15  ;;  %v24047_v32 = vld [vmem:[#allocation87_spill] sm:$0xff]  ;;  %24048 = vst [vmem:[#allocation8_spill] sm:$0xff] %v20746_v30  ;;  %24049 = vst [vmem:[#allocation101_spill] sm:$0xff] %v20752_v13 }
 0xe45   : > { %9312 = vmatprep.mubr.bf16.mxu0 %v9117_v60  ;;  %13734 = vmatprep.subr.bf16.mxu1 %v20489_v33  ;;  %v9119_v60 = vpack.c.bf16 %v9107_v55, %v9107_v55  ;;  %v20758_v55 = vld [vmem:[%s22652_s9 + $0x268] sm:$0xff]  }
 0xe46   : > { %13746 = vmatprep.subr.bf16.mxu0 %v24041_v14  ;;  %24050 = vst [vmem:[#allocation102_spill] sm:$0xff] %v20758_v55 }
 0xe48   : > { %13735 = vmatpush3.bf16.msra.mxu1 %v24042_v6  ;;  %13747 = vmatpush3.bf16.msra.mxu0 %v24043_v11 }
 0xe49   : > { %13736 = vmatprep.subr.bf16.mxu1 %v24044_v0  ;;  %13748 = vmatprep.subr.bf16.mxu0 %v24045_v44 }
 0xe4c   : > { %13737 = vmatpush3.bf16.msra.mxu1 %v24046_v27  ;;  %13749 = vmatpush3.bf16.msra.mxu0 %v20531_v5 }
 0xe4d   : > { %13750 = vmatprep.subr.bf16.mxu0 %v24047_v32  ;;  %13766 = vmatprep.subr.bf16.mxu1 %v20545_v12 }
 0xe4f   : > { %9273 = vmatmul.mubr.bf16.vlgmr.msra.gmra.mrb[216].mxu1 %v9114_v45  ;;  %v20764_v45 = vld [vmem:[%s22652_s9 + $0x2d0] sm:$0xff]  }
 0xe50   : > { %13751 = vmatpush3.bf16.msra.mxu0 %v20551_v29  ;;  %13767 = vmatpush3.bf16.msra.mxu1 %v20557_v38  ;;  %24051 = vst [vmem:[#allocation103_spill] sm:$0xff] %v20764_v45 }
 0xe51   : > { %9352 = vmatprep.mubr.bf16.mxu1 %v9119_v60  ;;  %13752 = vmatprep.subr.bf16.mxu0 %v20563_v41  ;;  %v20770_v60 = vld [vmem:[%s22652_s9 + $0x228] sm:$0xff]  }
 0xe52   : > { %13768 = vmatprep.subr.bf16.mxu1 %v20569_v48  ;;  %24052 = vst [vmem:[#allocation104_spill] sm:$0xff] %v20770_v60 }
 0xe54   : > { %13753 = vmatpush3.bf16.msra.mxu0 %v20746_v30  ;;  %13769 = vmatpush3.bf16.msra.mxu1 %v20752_v13  ;;  %v20776_v13 = vld [vmem:[%s22652_s9 + $0x290] sm:$0xff]  }
 0xe55   : > { %13754 = vmatprep.subr.bf16.mxu0 %v20758_v55  ;;  %13770 = vmatprep.subr.bf16.mxu1 %v20764_v45  ;;  %24053 = vst [vmem:[#allocation105_spill] sm:$0xff] %v20776_v13  ;;  %v20782_v55 = vld [vmem:[%s22652_s9 + $0x270] sm:$0xff]   ;;  %v20788_v45 = vld [vmem:[%s22652_s9 + $0x2d8] sm:$0xff]  }
 0xe56   : > { %24054 = vst [vmem:[#allocation106_spill] sm:$0xff] %v20782_v55  ;;  %24055 = vst [vmem:[#allocation17_spill] sm:$0xff] %v20788_v45 }
 0xe58   : > { %13755 = vmatpush3.bf16.msra.mxu0 %v20770_v60  ;;  %13771 = vmatpush3.bf16.msra.mxu1 %v20776_v13  ;;  %v20794_v60 = vld [vmem:[%s22652_s9 + $0x230] sm:$0xff]   ;;  %v20800_v13 = vld [vmem:[%s22652_s9 + $0x298] sm:$0xff]  }
 0xe59   : > { %13756 = vmatprep.subr.bf16.mxu0 %v20782_v55  ;;  %13772 = vmatprep.subr.bf16.mxu1 %v20788_v45  ;;  %24056 = vst [vmem:[#allocation18_spill] sm:$0xff] %v20794_v60  ;;  %24057 = vst [vmem:[#allocation81_spill] sm:$0xff] %v20800_v13  ;;  %v20806_v55 = vld [vmem:[%s22652_s9 + $0x278] sm:$0xff]   ;;  %v20812_v45 = vld [vmem:[%s22652_s9 + $0x2e0] sm:$0xff]  }
 0xe5a   : > { %24058 = vst [vmem:[#allocation83_spill] sm:$0xff] %v20806_v55  ;;  %24059 = vst [vmem:[#allocation84_spill] sm:$0xff] %v20812_v45 }
 0xe5c   : > { %13757 = vmatpush3.bf16.msra.mxu0 %v20794_v60  ;;  %13773 = vmatpush3.bf16.msra.mxu1 %v20800_v13  ;;  %v20818_v60 = vld [vmem:[%s22652_s9 + $0x238] sm:$0xff]   ;;  %v20824_v13 = vld [vmem:[%s22652_s9 + $0x2a0] sm:$0xff]  }
 0xe5d   : > { %13758 = vmatprep.subr.bf16.mxu0 %v20806_v55  ;;  %13774 = vmatprep.subr.bf16.mxu1 %v20812_v45  ;;  %24060 = vst [vmem:[#allocation85_spill] sm:$0xff] %v20818_v60  ;;  %24061 = vst [vmem:[#allocation89_spill] sm:$0xff] %v20824_v13  ;;  %v9116_v55 = vpack.c.bf16 %v20705_v24, %v20705_v24  ;;  %v20832_v45 = vld [vmem:[%s22652_s9 + $0x2e8] sm:$0xff]   ;;  %v20846_v24 = vld [vmem:[%s22652_s9 + $0x2f0] sm:$0xff]  }
 0xe5e   : > { %24062 = vst [vmem:[#allocation97_spill] sm:$0xff] %v20832_v45  ;;  %24064 = vst [vmem:[#allocation15_spill] sm:$0xff] %v20846_v24 }
 0xe60   : > { %13759 = vmatpush3.bf16.msra.mxu0 %v20818_v60  ;;  %13775 = vmatpush3.bf16.msra.mxu1 %v20824_v13  ;;  %v20839_v60 = vld [vmem:[%s22652_s9 + $0x2a8] sm:$0xff]  }
 0xe61   : > { %13776 = vmatprep.subr.bf16.mxu1 %v20832_v45  ;;  %9373 = vmatprep.subr.bf16.mxu0 %v19850_v52  ;;  %24063 = vst [vmem:[#allocation98_spill] sm:$0xff] %v20839_v60  ;;  %v20854_v52 = vld [vmem:[%s22652_s9 + $0x2b0] sm:$0xff]  }
 0xe62   : > { %24065 = vst [vmem:[#allocation77_spill] sm:$0xff] %v20854_v52 }
 0xe63   : > { %9313 = vmatmul.mubr.bf16.vlgmr.msra.gmra.mrb[208].mxu0 %v9116_v55  ;;  %v24068_v55 = vld [vmem:[#allocation19_spill] sm:$0xff] }
 0xe64   : > { %13777 = vmatpush3.bf16.msra.mxu1 %v20839_v60  ;;  %9374 = vmatpush1.bf16.msra.mxu0 %v19857_v19  ;;  %v20861_v19 = vld [vmem:[%s22652_s9 + $0x2f8] sm:$0xff]  }
 0xe65   : > { %13778 = vmatprep.subr.bf16.mxu1 %v20846_v24  ;;  %9375 = vmatprep.subr.bf16.mxu0 %v19864_v47  ;;  %24066 = vst [vmem:[#allocation78_spill] sm:$0xff] %v20861_v19  ;;  %v20868_v47 = vld [vmem:[%s22652_s9 + $0x2b8] sm:$0xff]  }
 0xe66   : > { %9405 = vmatprep.mubr.bf16.mxu0 %v23870_v21  ;;  %24067 = vst [vmem:[#allocation79_spill] sm:$0xff] %v20868_v47 }
 0xe68   : > { %13779 = vmatpush3.bf16.msra.mxu1 %v20854_v52  ;;  %9376 = vmatpush1.bf16.msra.mxu0 %v19872_v40  ;;  %v9118_v40 = vpack.c.bf16 %v20722_v62, %v20722_v62  ;;  %v24071_v52 = vld [vmem:[#allocation9_spill] sm:$0xff]  ;;  %v24076_v62 = vld [vmem:[#allocation23_spill] sm:$0xff] }
 0xe69   : > { %13780 = vmatprep.subr.bf16.mxu1 %v20861_v19  ;;  %9377 = vmatprep.subr.bf16.mxu0 %v19879_v7  ;;  %v24069_v7 = vld [vmem:[#allocation6_spill] sm:$0xff]  ;;  %v24070_v19 = vld [vmem:[#allocation7_spill] sm:$0xff] }
 0xe6c   : > { %13781 = vmatpush3.bf16.msra.mxu1 %v20868_v47  ;;  %9378 = vmatpush1.bf16.msra.mxu0 %v19886_v8  ;;  %v24072_v47 = vld [vmem:[#allocation10_spill] sm:$0xff]  ;;  %v24073_v8 = vld [vmem:[#allocation11_spill] sm:$0xff] }
 0xe6d   : > { %9414 = vmatprep.subr.bf16.mxu1 %v19894_v37  ;;  %9455 = vmatprep.subr.bf16.mxu0 %v19900_v4  ;;  %v24074_v37 = vld [vmem:[#allocation12_spill] sm:$0xff]  ;;  %v24075_v4 = vld [vmem:[#allocation14_spill] sm:$0xff] }
 0xe6f   : > { %9353 = vmatmul.mubr.bf16.vlgmr.msra.gmra.mrb[220].mxu1 %v9118_v40  ;;  %12690 = vmatmul.mubr.msk.bf16.vlgmr.msra.gmra.mrb[212].mxu0 %vm1806_vm6, %v24068_v55  ;;  %v24077_v40 = vld [vmem:[#allocation22_spill] sm:$0xff] }
 0xe70   : > { %9415 = vmatpush1.bf16.msra.mxu1 %v24069_v7  ;;  %9456 = vmatpush1.bf16.msra.mxu0 %v24070_v19  ;;  %v24078_v7 = vld [vmem:[#allocation25_spill] sm:$0xff]  ;;  %v24079_v19 = vld [vmem:[#allocation24_spill] sm:$0xff] }
 0xe71   : > { %9416 = vmatprep.subr.bf16.mxu1 %v24071_v52  ;;  %9457 = vmatprep.subr.bf16.mxu0 %v24072_v47  ;;  %v24080_v52 = vld [vmem:[#allocation27_spill] sm:$0xff]  ;;  %v24081_v47 = vld [vmem:[#allocation26_spill] sm:$0xff] }
 0xe72   : > { %9446 = vmatprep.mubr.bf16.mxu1 %v23870_v21  ;;  %9487 = vmatprep.mubr.bf16.mxu0 %v23870_v21 }
 0xe74   : > { %9417 = vmatpush1.bf16.msra.mxu1 %v24073_v8  ;;  %9458 = vmatpush1.bf16.msra.mxu0 %v24074_v37  ;;  %v24082_v8 = vld [vmem:[#allocation29_spill] sm:$0xff]  ;;  %v24083_v37 = vld [vmem:[#allocation28_spill] sm:$0xff] }
 0xe75   : > { %9418 = vmatprep.subr.bf16.mxu1 %v24075_v4  ;;  %9459 = vmatprep.subr.bf16.mxu0 %v24076_v62  ;;  %v24084_v4 = vld [vmem:[#allocation31_spill] sm:$0xff]  ;;  %v24085_v62 = vld [vmem:[#allocation30_spill] sm:$0xff] }
 0xe78   : > { %9419 = vmatpush1.bf16.msra.mxu1 %v24077_v40  ;;  %9460 = vmatpush1.bf16.msra.mxu0 %v24078_v7  ;;  %v24086_v40 = vld [vmem:[#allocation33_spill] sm:$0xff]  ;;  %v24087_v7 = vld [vmem:[#allocation32_spill] sm:$0xff] }
 0xe79   : > { %9496 = vmatprep.subr.bf16.mxu1 %v24079_v19  ;;  %9537 = vmatprep.subr.bf16.mxu0 %v24080_v52  ;;  %v24088_v19 = vld [vmem:[#allocation35_spill] sm:$0xff]  ;;  %v24089_v52 = vld [vmem:[#allocation34_spill] sm:$0xff] }
 0xe7b   : > { %12691 = vmatmul.mubr.msk.bf16.vlgmr.msra.gmra.mrb[224].mxu1 %vm1806_vm6, %v24068_v55  ;;  %12692 = vmatmul.mubr.msk.bf16.vlgmr.msra.gmra.mrb[216].mxu0 %vm1806_vm6, %v24068_v55 }
 0xe7c   : > { %9497 = vmatpush1.bf16.msra.mxu1 %v24081_v47  ;;  %9538 = vmatpush1.bf16.msra.mxu0 %v24082_v8  ;;  %v24090_v47 = vld [vmem:[#allocation37_spill] sm:$0xff]  ;;  %v24091_v8 = vld [vmem:[#allocation36_spill] sm:$0xff] }
 0xe7d   : > { %9498 = vmatprep.subr.bf16.mxu1 %v24083_v37  ;;  %9539 = vmatprep.subr.bf16.mxu0 %v24084_v4  ;;  %v24092_v37 = vld [vmem:[#allocation38_spill] sm:$0xff]  ;;  %v24093_v4 = vld [vmem:[#allocation39_spill] sm:$0xff] }
 0xe7e   : > { %9528 = vmatprep.mubr.bf16.mxu1 %v23870_v21  ;;  %9569 = vmatprep.mubr.bf16.mxu0 %v23870_v21 }
 0xe80   : > { %9499 = vmatpush1.bf16.msra.mxu1 %v24085_v62  ;;  %9540 = vmatpush1.bf16.msra.mxu0 %v24086_v40  ;;  %v24094_v62 = vld [vmem:[#allocation40_spill] sm:$0xff]  ;;  %v24095_v40 = vld [vmem:[#allocation41_spill] sm:$0xff] }
 0xe81   : > { %9500 = vmatprep.subr.bf16.mxu1 %v24087_v7  ;;  %9541 = vmatprep.subr.bf16.mxu0 %v24088_v19  ;;  %v24096_v7 = vld [vmem:[#allocation42_spill] sm:$0xff]  ;;  %v24097_v19 = vld [vmem:[#allocation43_spill] sm:$0xff] }
 0xe84   : > { %9501 = vmatpush1.bf16.msra.mxu1 %v24089_v52  ;;  %9542 = vmatpush1.bf16.msra.mxu0 %v24090_v47  ;;  %v24098_v52 = vld [vmem:[#allocation44_spill] sm:$0xff]  ;;  %v24099_v47 = vld [vmem:[#allocation45_spill] sm:$0xff] }
 0xe85   : > { %9578 = vmatprep.subr.bf16.mxu1 %v24091_v8  ;;  %13788 = vmatprep.subr.bf16.mxu0 %v24092_v37  ;;  %v24100_v8 = vld [vmem:[#allocation3_spill] sm:$0xff]  ;;  %v24101_v37 = vld [vmem:[#allocation4_spill] sm:$0xff] }
 0xe87   : > { %12693 = vmatmul.mubr.msk.bf16.vlgmr.msra.gmra.mrb[228].mxu1 %vm1806_vm6, %v24068_v55  ;;  %12694 = vmatmul.mubr.msk.bf16.vlgmr.msra.gmra.mrb[220].mxu0 %vm1806_vm6, %v24068_v55 }
 0xe88   : > { %9579 = vmatpush1.bf16.msra.mxu1 %v24093_v4  ;;  %9610 = vmatprep.mubr.bf16.mxu1 %v23870_v21  ;;  %v24102_v4 = vld [vmem:[#allocation50_spill] sm:$0xff]  ;;  %v24103_v21 = vld [vmem:[#allocation51_spill] sm:$0xff] }
 0xe89   : > { %9580 = vmatprep.subr.bf16.mxu1 %v24094_v62  ;;  %13789 = vmatpush3.bf16.msra.mxu0 %v24095_v40  ;;  %v24104_v62 = vld [vmem:[#allocation52_spill] sm:$0xff]  ;;  %v24105_v40 = vld [vmem:[#allocation5_spill] sm:$0xff] }
 0xe8a   : > { %13790 = vmatprep.subr.bf16.mxu0 %v24096_v7  ;;  %v24106_v7 = vld [vmem:[#allocation46_spill] sm:$0xff] }
 0xe8c   : > { %9581 = vmatpush1.bf16.msra.mxu1 %v24097_v19  ;;  %v24107_v19 = vld [vmem:[#allocation53_spill] sm:$0xff] }
 0xe8d   : > { %9582 = vmatprep.subr.bf16.mxu1 %v24098_v52  ;;  %13791 = vmatpush3.bf16.msra.mxu0 %v24099_v47  ;;  %v24108_v47 = vld [vmem:[#allocation54_spill] sm:$0xff] }
 0xe8e   : > { %13792 = vmatprep.subr.bf16.mxu0 %v24100_v8  ;;  %v24109_v8 = vld [vmem:[#allocation55_spill] sm:$0xff] }
 0xe90   : > { %9583 = vmatpush1.bf16.msra.mxu1 %v24101_v37  ;;  %v24110_v37 = vld [vmem:[#allocation56_spill] sm:$0xff] }
 0xe91   : > { %13793 = vmatpush3.bf16.msra.mxu0 %v24102_v4  ;;  %13810 = vmatprep.subr.bf16.mxu1 %v24103_v21  ;;  %v24111_v21 = vld [vmem:[#allocation57_spill] sm:$0xff]  ;;  %v24112_v4 = vld [vmem:[#allocation58_spill] sm:$0xff] }
 0xe92   : > { %13794 = vmatprep.subr.bf16.mxu0 %v24104_v62  ;;  %v24114_v62 = vld [vmem:[#allocation60_spill] sm:$0xff] }
 0xe93   : > { %12695 = vmatmul.mubr.msk.bf16.vlgmr.msra.gmra.mrb[232].mxu1 %vm1806_vm6, %v24068_v55  ;;  %v24113_v55 = vld [vmem:[#allocation59_spill] sm:$0xff] }
 0xe94   : > { %13811 = vmatpush3.bf16.msra.mxu1 %v24105_v40  ;;  %v24115_v40 = vld [vmem:[#allocation61_spill] sm:$0xff] }
 0xe95   : > { %13795 = vmatpush3.bf16.msra.mxu0 %v24106_v7  ;;  %13812 = vmatprep.subr.bf16.mxu1 %v24107_v19  ;;  %v24116_v7 = vld [vmem:[#allocation62_spill] sm:$0xff]  ;;  %v24117_v19 = vld [vmem:[#allocation63_spill] sm:$0xff] }
 0xe96   : > { %v8842_v52 = vpop.permute.xlu0 %8841  ;;  %13796 = vmatprep.subr.bf16.mxu0 %v24108_v47  ;;  %v24118_v47 = vld [vmem:[#allocation64_spill] sm:$0xff] }
 0xe97   : > { %8844 = vst.msk [vmem:[%s18578_s24 + $0x4] sm:$0xf] %vm6745_vm0, %v8842_v52  ;;  %v24119_v52 = vld [vmem:[#allocation65_spill] sm:$0xff] }
 0xe98   : > { %13813 = vmatpush3.bf16.msra.mxu1 %v24109_v8  ;;  %v24120_v8 = vld [vmem:[#allocation66_spill] sm:$0xff] }
 0xe99   : > { %13797 = vmatpush3.bf16.msra.mxu0 %v24110_v37  ;;  %13814 = vmatprep.subr.bf16.mxu1 %v24111_v21  ;;  %v24121_v37 = vld [vmem:[#allocation67_spill] sm:$0xff]  ;;  %v24122_v21 = vld [vmem:[#allocation68_spill] sm:$0xff] }
 0xe9a   : > { %13798 = vmatprep.subr.bf16.mxu0 %v24112_v4  ;;  %v24123_v4 = vld [vmem:[#allocation69_spill] sm:$0xff] }
 0xe9c   : > { %13815 = vmatpush3.bf16.msra.mxu1 %v24113_v55  ;;  %v24124_v55 = vld [vmem:[#allocation70_spill] sm:$0xff] }
 0xe9d   : > { %13799 = vmatpush3.bf16.msra.mxu0 %v24114_v62  ;;  %13816 = vmatprep.subr.bf16.mxu1 %v24115_v40  ;;  %v24125_v62 = vld [vmem:[#allocation71_spill] sm:$0xff]  ;;  %v24126_v40 = vld [vmem:[#allocation72_spill] sm:$0xff] }
 0xe9e   : > { %13800 = vmatprep.subr.bf16.mxu0 %v24116_v7  ;;  %v24127_v7 = vld [vmem:[#allocation73_spill] sm:$0xff] }
 0xea0   : > { %13817 = vmatpush3.bf16.msra.mxu1 %v24117_v19  ;;  %v24128_v19 = vld [vmem:[#allocation74_spill] sm:$0xff] }
 0xea1   : > { %13801 = vmatpush3.bf16.msra.mxu0 %v24118_v47  ;;  %13818 = vmatprep.subr.bf16.mxu1 %v24119_v52  ;;  %v24129_v47 = vld [vmem:[#allocation75_spill] sm:$0xff]  ;;  %v24130_v52 = vld [vmem:[#allocation76_spill] sm:$0xff] }
 0xea2   : > { %13802 = vmatprep.subr.bf16.mxu0 %v24120_v8 }
 0xea4   : > { %13819 = vmatpush3.bf16.msra.mxu1 %v24121_v37 }
 0xea5   : > { %13803 = vmatpush3.bf16.msra.mxu0 %v24122_v21  ;;  %13820 = vmatprep.subr.bf16.mxu1 %v24123_v4 }
 0xea6   : > { %13832 = vmatprep.subr.bf16.mxu0 %v24124_v55 }
 0xea8   : > { %13821 = vmatpush3.bf16.msra.mxu1 %v24125_v62 }
 0xea9   : > { %13822 = vmatprep.subr.bf16.mxu1 %v24126_v40 }
 0xeac   : > { %13823 = vmatpush3.bf16.msra.mxu1 %v24127_v7 }
 0xead   : > { %13824 = vmatprep.subr.bf16.mxu1 %v24128_v19 }
 0xeb0   : > { %13825 = vmatpush3.bf16.msra.mxu1 %v24129_v47 }
 0xeb1   : > { %13854 = vmatprep.subr.bf16.mxu1 %v24130_v52 }
 0xef6   : > { %v13672_v8 = vpop.f32.mrb[200].mxu0 }
 0xef7   : > { %v13673_v37 = vpop.f32.mrb[201].mxu0 }
 0xef8   : > { %v13674_v24 = vadd.f32 %v13673_v37, %v13672_v8  ;;  %v13675_v21 = vpop.f32.mrb[202].mxu0 }
 0xef9   : > { %v13676_v60 = vpop.f32.mrb[203].mxu0 }
 0xf02   : > { %v13694_v4 = vpop.f32.mrb[212].mxu1 }
 0xf03   : > { %v13695_v45 = vpop.f32.mrb[213].mxu1 }
 0xf04   : > { %v13696_v55 = vadd.f32 %v13695_v45, %v13694_v4  ;;  %v13697_v13 = vpop.f32.mrb[214].mxu1 }
 0xf05   : > { %v13698_v62 = vpop.f32.mrb[215].mxu1 }
 0xf06   : > { %v9195_v30 = vadd.f32 %v13696_v55, %v13674_v24 }
 0xf16   : > { %v13716_v40 = vpop.f32.mrb[204].mxu0 }
 0xf17   : > { %v13717_v48 = vpop.f32.mrb[205].mxu0 }
 0xf18   : > { %v13718_v7 = vadd.f32 %v13717_v48, %v13716_v40  ;;  %v13719_v41 = vpop.f32.mrb[206].mxu0 }
 0xf19   : > { %v13720_v19 = vpop.f32.mrb[207].mxu0 }
 0xf1a   : > { %v9235_v38 = vadd.f32 %v13718_v7, %v9195_v30 }
 0xf22   : > { %v13738_v47 = vpop.f32.mrb[216].mxu1 }
 0xf23   : > { %v13739_v29 = vpop.f32.mrb[217].mxu1 }
 0xf24   : > { %v13740_v52 = vadd.f32 %v13739_v29, %v13738_v47  ;;  %v13741_v12 = vpop.f32.mrb[218].mxu1 }
 0xf25   : > { %v13742_v32 = vpop.f32.mrb[219].mxu1 }
 0xf26   : > { %v9275_v8 = vadd.f32 %v13740_v52, %v9235_v38 }
 0xf36   : > { %v13760_v37 = vpop.f32.mrb[208].mxu0 }
 0xf37   : > { %v13761_v60 = vpop.f32.mrb[209].mxu0 }
 0xf38   : > { %v13762_v21 = vadd.f32 %v13761_v60, %v13760_v37  ;;  %v13763_v5 = vpop.f32.mrb[210].mxu0 }
 0xf39   : > { %v13764_v45 = vpop.f32.mrb[211].mxu0 }
 0xf3a   : > { %v9315_v13 = vadd.f32 %v13762_v21, %v9275_v8 }
 0xf42   : > { %v13782_v4 = vpop.f32.mrb[220].mxu1  ;;  %v9407_v24 = vpop.f32.mrb[212].mxu0 }
 0xf43   : > { %v9619_v55 = vmul.f32 %v9407_v24, %v23530_v18  ;;  %v13783_v48 = vpop.f32.mrb[221].mxu1  ;;  %v9409_v41 = vpop.f32.mrb[213].mxu0 }
 0xf44   : > { %v13784_v62 = vadd.f32 %v13783_v48, %v13782_v4  ;;  %v9620_v30 = vmul.f32 %v9409_v41, %v23531_v10  ;;  %v13785_v40 = vpop.f32.mrb[222].mxu1  ;;  %v9411_v29 = vpop.f32.mrb[214].mxu0 }
 0xf45   : > { %v13786_v12 = vpop.f32.mrb[223].mxu1  ;;  %v9412_v32 = vpop.f32.mrb[215].mxu0  ;;  %v9631_v19 = vpack.c.bf16 %v9619_v55, %v9619_v55  ;;  %v24131_v29 = vld [vmem:[#allocation88_spill] sm:$0xff] }
 0xf46   : > { %v9355_v38 = vadd.f32 %v13784_v62, %v9315_v13  ;;  %v9632_v7 = vpack.c.bf16 %v9620_v30, %v9620_v30  ;;  %v24134_v12 = vld [vmem:[#allocation96_spill] sm:$0xff] }
 0xf48   : > { %v12730_v47 = vpack.c.bf16 %v9355_v38, %v9355_v38  ;;  %9675 = vmatprep.mubr.bf16.mxu0 %v9632_v7  ;;  %v24135_v38 = vld [vmem:[#allocation99_spill] sm:$0xff]  ;;  %v24136_v7 = vld [vmem:[#allocation100_spill] sm:$0xff] }
 0xf49   : > { %9676 = vmatmul.mubr.bf16.vlgmr.msra.gmra.mrb[224].mxu0 %v9631_v19 }
 0xf4a   : > { %13833 = vmatpush3.bf16.msra.mxu0 %v20301_v43  ;;  %9364 = vrot.lane.b32.xlu1 %v12730_v47, %s15915_s25 }
 0xf4b   : > { %13834 = vmatprep.subr.bf16.mxu0 %v20307_v20 }
 0xf4e   : > { %13835 = vmatpush3.bf16.msra.mxu0 %v20313_v28  ;;  %v9448_v5 = vpop.f32.mrb[224].mxu1  ;;  %v9489_v52 = vpop.f32.mrb[216].mxu0 }
 0xf4f   : > { %v9621_v8 = vmul.f32 %v9448_v5, %v23535_v23  ;;  %v9623_v37 = vmul.f32 %v9489_v52, %v23536_v25  ;;  %v9450_v60 = vpop.f32.mrb[225].mxu1  ;;  %v9491_v21 = vpop.f32.mrb[217].mxu0  ;;  %13836 = vmatprep.subr.bf16.mxu0 %v20323_v31  ;;  %v24146_v52 = vld [vmem:[#allocation102_spill] sm:$0xff] }
 0xf50   : > { %v9622_v45 = vmul.f32 %v9450_v60, %v17806_v51  ;;  %v9624_v43 = vmul.f32 %v9491_v21, %v18070_v59  ;;  %v9452_v13 = vpop.f32.mrb[226].mxu1  ;;  %v9493_v4 = vpop.f32.mrb[218].mxu0  ;;  %v24149_v60 = vld [vmem:[#allocation105_spill] sm:$0xff]  ;;  %v24150_v21 = vld [vmem:[#allocation106_spill] sm:$0xff] }
 0xf51   : > { %v9453_v24 = vpop.f32.mrb[227].mxu1  ;;  %v9494_v20 = vpop.f32.mrb[219].mxu0  ;;  %v9633_v48 = vpack.c.bf16 %v9621_v8, %v9621_v8  ;;  %v9635_v32 = vpack.c.bf16 %v9623_v37, %v9623_v37  ;;  %v24147_v8 = vld [vmem:[#allocation103_spill] sm:$0xff]  ;;  %v24148_v37 = vld [vmem:[#allocation104_spill] sm:$0xff]  ;;  %v24153_v13 = vld [vmem:[#allocation81_spill] sm:$0xff] }
 0xf52   : > { %v9634_v55 = vpack.c.bf16 %v9622_v45, %v9622_v45  ;;  %v9636_v28 = vpack.c.bf16 %v9624_v43, %v9624_v43  ;;  %13837 = vmatpush3.bf16.msra.mxu0 %v20331_v57  ;;  %v24151_v45 = vld [vmem:[#allocation17_spill] sm:$0xff]  ;;  %v24152_v43 = vld [vmem:[#allocation18_spill] sm:$0xff]  ;;  %v24154_v4 = vld [vmem:[#allocation83_spill] sm:$0xff] }
 0xf53   : > { %13838 = vmatprep.subr.bf16.mxu0 %v20337_v61  ;;  %v24155_v24 = vld [vmem:[#allocation84_spill] sm:$0xff]  ;;  %v24156_v20 = vld [vmem:[#allocation85_spill] sm:$0xff] }
 0xf54   : > { %9715 = vmatprep.mubr.bf16.mxu1 %v9634_v55  ;;  %9755 = vmatprep.mubr.bf16.mxu0 %v9636_v28  ;;  %v24157_v55 = vld [vmem:[#allocation89_spill] sm:$0xff] }
 0xf55   : > { %9716 = vmatmul.mubr.bf16.vlgmr.msra.gmra.mrb[236].mxu1 %v9633_v48  ;;  %v24158_v48 = vld [vmem:[#allocation97_spill] sm:$0xff] }
 0xf56   : > { %13839 = vmatpush3.bf16.msra.mxu0 %v20343_v58  ;;  %13855 = vmatpush3.bf16.msra.mxu1 %v20349_v26 }
 0xf57   : > { %13840 = vmatprep.subr.bf16.mxu0 %v20355_v22  ;;  %13856 = vmatprep.subr.bf16.mxu1 %v20361_v17 }
 0xf5a   : > { %13841 = vmatpush3.bf16.msra.mxu0 %v20367_v2  ;;  %13857 = vmatpush3.bf16.msra.mxu1 %v24026_v9  ;;  %v9530_v31 = vpop.f32.mrb[228].mxu1  ;;  %v9571_v57 = vpop.f32.mrb[220].mxu0 }
 0xf5b   : > { %v9625_v41 = vmul.f32 %v9530_v31, %v24027_v50  ;;  %v20978_v61 = vmul.f32 %v9571_v57, %v24028_v35  ;;  %v9532_v62 = vpop.f32.mrb[229].mxu1  ;;  %v9573_v30 = vpop.f32.mrb[221].mxu0  ;;  %13842 = vmatprep.subr.bf16.mxu0 %v24029_v56  ;;  %13858 = vmatprep.subr.bf16.mxu1 %v24030_v46  ;;  %v24132_v56 = vld [vmem:[#allocation94_spill] sm:$0xff]  ;;  %v24133_v46 = vld [vmem:[#allocation95_spill] sm:$0xff] }
 0xf5c   : > { %v9626_v58 = vmul.f32 %v9532_v62, %v18074_v49  ;;  %v9628_v26 = vmul.f32 %v9573_v30, %v18078_v3  ;;  %v9534_v22 = vpop.f32.mrb[230].mxu1  ;;  %v9575_v17 = vpop.f32.mrb[222].mxu0  ;;  %v21036_v31 = vld [vmem:[%s22651_s8 + $0x4] ss:$48 sps:$4 sm:$0xff]   ;;  %v24161_v30 = vmov 0  }
 0xf5d   : > { %v9535_v2 = vpop.f32.mrb[231].mxu1  ;;  %v9576_v9 = vpop.f32.mrb[223].mxu0  ;;  %v9639_v28 = vpack.c.bf16 %v20978_v61, %v20978_v61  ;;  %v24159_v57 = vld [vmem:[#allocation98_spill] sm:$0xff]  ;;  %v24160_v61 = vld [vmem:[#allocation15_spill] sm:$0xff] }
 0xf5e   : > { %v9638_v40 = vpack.c.bf16 %v9626_v58, %v9626_v58  ;;  %13843 = vmatpush3.bf16.msra.mxu0 %v20399_v34  ;;  %13859 = vmatpush3.bf16.msra.mxu1 %v20405_v16  ;;  %v9640_v47 = vpack.c.bf16 %v9628_v26, %v9628_v26  ;;  %v21050_v62 = vld [vmem:[%s22651_s8 + $0x64] ss:$48 sps:$4 sm:$0xff]   ;;  %v24162_v58 = vld [vmem:[#allocation77_spill] sm:$0xff]  ;;  %v21058_v26 = vld [vmem:[%s22651_s8 + $0x60] ss:$48 sps:$4 sm:$0xff]  }
 0xf5f   : > { %13844 = vmatprep.subr.bf16.mxu0 %v24031_v54  ;;  %13860 = vmatprep.subr.bf16.mxu1 %v24131_v29  ;;  %v24163_v22 = vld [vmem:[#allocation78_spill] sm:$0xff]  ;;  %v24164_v2 = vld [vmem:[#allocation79_spill] sm:$0xff] }
 0xf60   : > { %9795 = vmatprep.mubr.bf16.mxu1 %v9638_v40  ;;  %v21065_v17 = vld [vmem:[%s22651_s8 + $0xc4] ss:$48 sps:$4 sm:$0xff]   ;;  %v21072_v9 = vld [vmem:[%s22651_s8 + $0xc0] ss:$48 sps:$4 sm:$0xff]   ;;  %v21080_v29 = vld [vmem:[%s22651_s8 + $0xc] ss:$48 sps:$4 sm:$0xff]  }
 0xf62   : > { %13845 = vmatpush3.bf16.msra.mxu0 %v24033_v39  ;;  %13861 = vmatpush3.bf16.msra.mxu1 %v24132_v56  ;;  %v21086_v56 = vld [vmem:[%s22651_s8 + $0x14] ss:$48 sps:$4 sm:$0xff]  }
 0xf63   : > { %13846 = vmatprep.subr.bf16.mxu0 %v24133_v46  ;;  %13862 = vmatprep.subr.bf16.mxu1 %v24134_v12  ;;  %v24165_v46 = vld [vmem:[#allocation2_spill] sm:$0xff]  ;;  %v21094_v12 = vld [vmem:[%s22651_s8 + $0x8] ss:$48 sps:$4 sm:$0xff]  }
 0xf64   : > { %24166 = vst [vmem:[#allocation80_spill] sm:$0xff] %v21094_v12 }
 0xf66   : > { %13847 = vmatpush3.bf16.msra.mxu0 %v24037_v63  ;;  %13863 = vmatpush3.bf16.msra.mxu1 %v24038_v42  ;;  %v9612_v34 = vpop.f32.mrb[232].mxu1  ;;  %v24137_v63 = vld [vmem:[#allocation86_spill] sm:$0xff]  ;;  %v24138_v42 = vld [vmem:[#allocation87_spill] sm:$0xff] }
 0xf67   : > { %v20995_v16 = vmul.f32 %v9612_v34, %v24039_v53  ;;  %v9614_v54 = vpop.f32.mrb[233].mxu1  ;;  %13864 = vmatprep.subr.bf16.mxu1 %v24135_v38  ;;  %13876 = vmatprep.subr.bf16.mxu0 %v24136_v7  ;;  %v21100_v34 = vld [vmem:[%s22651_s8 + $0x10] ss:$48 sps:$4 sm:$0xff]   ;;  %v21132_v7 = vld [vmem:[%s22651_s8 + $0xcc] ss:$48 sps:$4 sm:$0xff]  }
 0xf68   : > { %v9630_v39 = vmul.f32 %v9614_v54, %v18083_v1  ;;  %v9616_v19 = vpop.f32.mrb[234].mxu1  ;;  %24167 = vst [vmem:[#allocation82_spill] sm:$0xff] %v21100_v34  ;;  %v21120_v54 = vld [vmem:[%s22651_s8 + $0x68] ss:$48 sps:$4 sm:$0xff]   ;;  %v21126_v38 = vld [vmem:[%s22651_s8 + $0x70] ss:$48 sps:$4 sm:$0xff]  }
 0xf69   : > { %9756 = vmatmul.mubr.bf16.vlgmr.msra.gmra.mrb[228].mxu0 %v9635_v32  ;;  %v9617_v5 = vpop.f32.mrb[235].mxu1  ;;  %v9641_v40 = vpack.c.bf16 %v20995_v16, %v20995_v16  ;;  %v21106_v32 = vld [vmem:[%s22651_s8 + $0x6c] ss:$48 sps:$4 sm:$0xff]   ;;  %v21112_v16 = vld [vmem:[%s22651_s8 + $0x74] ss:$48 sps:$4 sm:$0xff]   ;;  %24170 = vst [vmem:[#allocation7_spill] sm:$0xff] %v21120_v54 }
 0xf6a   : > { %13865 = vmatpush3.bf16.msra.mxu1 %v20477_v36  ;;  %13877 = vmatpush3.bf16.msra.mxu0 %v20483_v15  ;;  %v9637_v36 = vpack.c.bf16 %v9625_v41, %v9625_v41  ;;  %v24139_v15 = vld [vmem:[#allocation90_spill] sm:$0xff]  ;;  %24168 = vst [vmem:[#allocation19_spill] sm:$0xff] %v21106_v32  ;;  %24169 = vst [vmem:[#allocation6_spill] sm:$0xff] %v21112_v16  ;;  %v21144_v19 = vld [vmem:[%s22651_s8 + $0xc8] ss:$48 sps:$4 sm:$0xff]  }
 0xf6b   : > { %9835 = vmatprep.mubr.bf16.mxu0 %v9640_v47  ;;  %13866 = vmatprep.subr.bf16.mxu1 %v20489_v33  ;;  %v9642_v33 = vpack.c.bf16 %v9630_v39, %v9630_v39  ;;  %v21043_v41 = vld [vmem:[%s22651_s8] ss:$48 sps:$4 sm:$0xff]   ;;  %24171 = vst [vmem:[#allocation9_spill] sm:$0xff] %v21126_v38  ;;  %24172 = vst [vmem:[#allocation10_spill] sm:$0xff] %v21132_v7  ;;  %v21138_v39 = vld [vmem:[%s22651_s8 + $0xd4] ss:$48 sps:$4 sm:$0xff]  }
 0xf6c   : > { %13878 = vmatprep.subr.bf16.mxu0 %v24041_v14  ;;  %v24140_v14 = vld [vmem:[#allocation91_spill] sm:$0xff]  ;;  %24173 = vst [vmem:[#allocation11_spill] sm:$0xff] %v21138_v39  ;;  %24174 = vst [vmem:[#allocation12_spill] sm:$0xff] %v21144_v19  ;;  %v21150_v47 = vld [vmem:[%s22651_s8 + $0xd0] ss:$48 sps:$4 sm:$0xff]  }
 0xf6d   : > { %24175 = vst [vmem:[#allocation14_spill] sm:$0xff] %v21150_v47  ;;  %v21156_v5 = vld [vmem:[%s22651_s8 + $0x1c] ss:$48 sps:$4 sm:$0xff]  }
 0xf6e   : > { %13867 = vmatpush3.bf16.msra.mxu1 %v24042_v6  ;;  %13879 = vmatpush3.bf16.msra.mxu0 %v24043_v11  ;;  %v24141_v6 = vld [vmem:[#allocation92_spill] sm:$0xff]  ;;  %v24142_v11 = vld [vmem:[#allocation93_spill] sm:$0xff]  ;;  %24176 = vst [vmem:[#allocation23_spill] sm:$0xff] %v21156_v5 }
 0xf6f   : > { %13868 = vmatprep.subr.bf16.mxu1 %v24044_v0  ;;  %13880 = vmatprep.subr.bf16.mxu0 %v24045_v44  ;;  %v24143_v0 = vld [vmem:[#allocation13_spill] sm:$0xff]  ;;  %v24144_v44 = vld [vmem:[#allocation8_spill] sm:$0xff] }
 0xf72   : > { %13869 = vmatpush3.bf16.msra.mxu1 %v24046_v27  ;;  %13881 = vmatpush3.bf16.msra.mxu0 %v24137_v63  ;;  %v24145_v27 = vld [vmem:[#allocation101_spill] sm:$0xff]  ;;  %v21162_v63 = vld [vmem:[%s22651_s8 + $0x24] ss:$48 sps:$4 sm:$0xff]  }
 0xf73   : > { %13882 = vmatprep.subr.bf16.mxu0 %v24138_v42  ;;  %13898 = vmatprep.subr.bf16.mxu1 %v24139_v15  ;;  %24177 = vst [vmem:[#allocation22_spill] sm:$0xff] %v21162_v63  ;;  %v21178_v42 = vld [vmem:[%s22651_s8 + $0x20] ss:$48 sps:$4 sm:$0xff]   ;;  %v21184_v15 = vld [vmem:[%s22651_s8 + $0x7c] ss:$48 sps:$4 sm:$0xff]  }
 0xf74   : > { %24179 = vst [vmem:[#allocation24_spill] sm:$0xff] %v21178_v42  ;;  %24180 = vst [vmem:[#allocation27_spill] sm:$0xff] %v21184_v15 }
 0xf75   : > { %9796 = vmatmul.mubr.bf16.vlgmr.msra.gmra.mrb[240].mxu1 %v9637_v36  ;;  %v21172_v36 = vld [vmem:[%s22651_s8 + $0x18] ss:$48 sps:$4 sm:$0xff]  }
 0xf76   : > { %13883 = vmatpush3.bf16.msra.mxu0 %v24140_v14  ;;  %13899 = vmatpush3.bf16.msra.mxu1 %v24141_v6  ;;  %24178 = vst [vmem:[#allocation25_spill] sm:$0xff] %v21172_v36  ;;  %v21198_v14 = vld [vmem:[%s22651_s8 + $0x78] ss:$48 sps:$4 sm:$0xff]   ;;  %v21204_v6 = vld [vmem:[%s22651_s8 + $0x80] ss:$48 sps:$4 sm:$0xff]  }
 0xf77   : > { %9875 = vmatprep.mubr.bf16.mxu1 %v9642_v33  ;;  %13884 = vmatprep.subr.bf16.mxu0 %v24142_v11  ;;  %v21190_v33 = vld [vmem:[%s22651_s8 + $0x84] ss:$48 sps:$4 sm:$0xff]   ;;  %24182 = vst [vmem:[#allocation29_spill] sm:$0xff] %v21198_v14  ;;  %24183 = vst [vmem:[#allocation28_spill] sm:$0xff] %v21204_v6  ;;  %v21210_v11 = vld [vmem:[%s22651_s8 + $0xdc] ss:$48 sps:$4 sm:$0xff]  }
 0xf78   : > { %13900 = vmatprep.subr.bf16.mxu1 %v24143_v0  ;;  %24181 = vst [vmem:[#allocation26_spill] sm:$0xff] %v21190_v33  ;;  %24184 = vst [vmem:[#allocation31_spill] sm:$0xff] %v21210_v11  ;;  %v21216_v0 = vld [vmem:[%s22651_s8 + $0xe4] ss:$48 sps:$4 sm:$0xff]  }
 0xf79   : > { %24185 = vst [vmem:[#allocation30_spill] sm:$0xff] %v21216_v0 }
 0xf7a   : > { %13885 = vmatpush3.bf16.msra.mxu0 %v24144_v44  ;;  %13901 = vmatpush3.bf16.msra.mxu1 %v24145_v27 }
 0xf7b   : > { %13886 = vmatprep.subr.bf16.mxu0 %v24146_v52  ;;  %13902 = vmatprep.subr.bf16.mxu1 %v24147_v8 }
 0xf7e   : > { %13887 = vmatpush3.bf16.msra.mxu0 %v24148_v37  ;;  %13903 = vmatpush3.bf16.msra.mxu1 %v24149_v60 }
 0xf7f   : > { %13888 = vmatprep.subr.bf16.mxu0 %v24150_v21  ;;  %13904 = vmatprep.subr.bf16.mxu1 %v24151_v45 }
 0xf82   : > { %13889 = vmatpush3.bf16.msra.mxu0 %v24152_v43  ;;  %13905 = vmatpush3.bf16.msra.mxu1 %v24153_v13 }
 0xf83   : > { %13890 = vmatprep.subr.bf16.mxu0 %v24154_v4  ;;  %13906 = vmatprep.subr.bf16.mxu1 %v24155_v24 }
 0xf86   : > { %13891 = vmatpush3.bf16.msra.mxu0 %v24156_v20  ;;  %13907 = vmatpush3.bf16.msra.mxu1 %v24157_v55 }
 0xf87   : > { %13908 = vmatprep.subr.bf16.mxu1 %v24158_v48  ;;  %9894 = vmatprep.subr.bf16.mxu0 %v21036_v31 }
 0xf89   : > { %9836 = vmatmul.mubr.bf16.vlgmr.msra.gmra.mrb[232].mxu0 %v9639_v28  ;;  %v21222_v28 = vld [vmem:[%s22651_s8 + $0xd8] ss:$48 sps:$4 sm:$0xff]  }
 0xf8a   : > { %13909 = vmatpush3.bf16.msra.mxu1 %v24159_v57  ;;  %9895 = vmatpush1.bf16.msra.mxu0 %v21043_v41  ;;  %24186 = vst [vmem:[#allocation33_spill] sm:$0xff] %v21222_v28 }
 0xf8b   : > { %13910 = vmatprep.subr.bf16.mxu1 %v24160_v61  ;;  %9896 = vmatprep.subr.bf16.mxu0 %v21050_v62 }
 0xf8c   : > { %9926 = vmatprep.mubr.bf16.mxu0 %v24161_v30 }
 0xf8e   : > { %13911 = vmatpush3.bf16.msra.mxu1 %v24162_v58  ;;  %9897 = vmatpush1.bf16.msra.mxu0 %v21058_v26 }
 0xf8f   : > { %13912 = vmatprep.subr.bf16.mxu1 %v24163_v22  ;;  %9898 = vmatprep.subr.bf16.mxu0 %v21065_v17 }
 0xf92   : > { %13913 = vmatpush3.bf16.msra.mxu1 %v24164_v2  ;;  %9899 = vmatpush1.bf16.msra.mxu0 %v21072_v9 }
 0xf93   : > { %9935 = vmatprep.subr.bf16.mxu1 %v21080_v29  ;;  %9976 = vmatprep.subr.bf16.mxu0 %v21086_v56 }
 0xf95   : > { %9876 = vmatmul.mubr.bf16.vlgmr.msra.gmra.mrb[244].mxu1 %v9641_v40  ;;  %12697 = vmatmul.mubr.msk.bf16.vlgmr.msra.gmra.mrb[236].mxu0 %vm1806_vm6, %v24165_v46  ;;  %v21228_v40 = vld [vmem:[%s22651_s8 + $0xe0] ss:$48 sps:$4 sm:$0xff]  }
 0xf96   : > { %9936 = vmatpush1.bf16.msra.mxu1 %v21094_v12  ;;  %9977 = vmatpush1.bf16.msra.mxu0 %v21100_v34  ;;  %24187 = vst [vmem:[#allocation32_spill] sm:$0xff] %v21228_v40 }
 0xf97   : > { %9937 = vmatprep.subr.bf16.mxu1 %v21106_v32  ;;  %9978 = vmatprep.subr.bf16.mxu0 %v21112_v16 }
 0xf98   : > { %9967 = vmatprep.mubr.bf16.mxu1 %v24161_v30  ;;  %10008 = vmatprep.mubr.bf16.mxu0 %v24161_v30 }
 0xf9a   : > { %9938 = vmatpush1.bf16.msra.mxu1 %v21120_v54  ;;  %9979 = vmatpush1.bf16.msra.mxu0 %v21126_v38 }
 0xf9b   : > { %9939 = vmatprep.subr.bf16.mxu1 %v21132_v7  ;;  %9980 = vmatprep.subr.bf16.mxu0 %v21138_v39 }
 0xf9e   : > { %9940 = vmatpush1.bf16.msra.mxu1 %v21144_v19  ;;  %9981 = vmatpush1.bf16.msra.mxu0 %v21150_v47 }
 0xf9f   : > { %10017 = vmatprep.subr.bf16.mxu1 %v21156_v5  ;;  %10058 = vmatprep.subr.bf16.mxu0 %v21162_v63 }
 0xfa1   : > { %12698 = vmatmul.mubr.msk.bf16.vlgmr.msra.gmra.mrb[248].mxu1 %vm1806_vm6, %v24165_v46  ;;  %12699 = vmatmul.mubr.msk.bf16.vlgmr.msra.gmra.mrb[240].mxu0 %vm1806_vm6, %v24165_v46 }
 0xfa2   : > { %10018 = vmatpush1.bf16.msra.mxu1 %v21172_v36  ;;  %10059 = vmatpush1.bf16.msra.mxu0 %v21178_v42 }
 0xfa3   : > { %10019 = vmatprep.subr.bf16.mxu1 %v21184_v15  ;;  %10060 = vmatprep.subr.bf16.mxu0 %v21190_v33 }
 0xfa4   : > { %10049 = vmatprep.mubr.bf16.mxu1 %v24161_v30  ;;  %10090 = vmatprep.mubr.bf16.mxu0 %v24161_v30 }
 0xfa6   : > { %10020 = vmatpush1.bf16.msra.mxu1 %v21198_v14  ;;  %10061 = vmatpush1.bf16.msra.mxu0 %v21204_v6 }
 0xfa7   : > { %10021 = vmatprep.subr.bf16.mxu1 %v21210_v11  ;;  %10062 = vmatprep.subr.bf16.mxu0 %v21216_v0  ;;  %v21234_v11 = vld [vmem:[%s22651_s8 + $0x2c] ss:$48 sps:$4 sm:$0xff]   ;;  %v21240_v0 = vld [vmem:[%s22652_s9 + $0x40] sm:$0xff]  }
 0xfa8   : > { %24188 = vst [vmem:[#allocation35_spill] sm:$0xff] %v21234_v11  ;;  %24189 = vst [vmem:[#allocation34_spill] sm:$0xff] %v21240_v0 }
 0xfaa   : > { %10022 = vmatpush1.bf16.msra.mxu1 %v21222_v28  ;;  %10063 = vmatpush1.bf16.msra.mxu0 %v21228_v40  ;;  %v21250_v40 = vld [vmem:[%s22651_s8 + $0x28] ss:$48 sps:$4 sm:$0xff]  }
 0xfab   : > { %10099 = vmatprep.subr.bf16.mxu1 %v21234_v11  ;;  %13920 = vmatprep.subr.bf16.mxu0 %v21240_v0  ;;  %24190 = vst [vmem:[#allocation37_spill] sm:$0xff] %v21250_v40  ;;  %v21257_v11 = vld [vmem:[%s22651_s8 + $0x8c] ss:$48 sps:$4 sm:$0xff]   ;;  %v21263_v0 = vld [vmem:[%s22652_s9] sm:$0xff]   ;;  %v21275_v28 = vld [vmem:[%s22651_s8 + $0x88] ss:$48 sps:$4 sm:$0xff]  }
 0xfac   : > { %24191 = vst [vmem:[#allocation36_spill] sm:$0xff] %v21257_v11  ;;  %24192 = vst [vmem:[#allocation38_spill] sm:$0xff] %v21263_v0 }
 0xfad   : > { %12700 = vmatmul.mubr.msk.bf16.vlgmr.msra.gmra.mrb[252].mxu1 %vm1806_vm6, %v24165_v46  ;;  %12701 = vmatmul.mubr.msk.bf16.vlgmr.msra.gmra.mrb[244].mxu0 %vm1806_vm6, %v24165_v46  ;;  %24194 = vst [vmem:[#allocation40_spill] sm:$0xff] %v21275_v28 }
 0xfae   : > { %10100 = vmatpush1.bf16.msra.mxu1 %v21250_v40  ;;  %10131 = vmatprep.mubr.bf16.mxu1 %v24161_v30  ;;  %v21269_v40 = vld [vmem:[%s22652_s9 + $0x48] sm:$0xff]  }
 0xfaf   : > { %10101 = vmatprep.subr.bf16.mxu1 %v21257_v11  ;;  %13921 = vmatpush3.bf16.msra.mxu0 %v21263_v0  ;;  %24193 = vst [vmem:[#allocation39_spill] sm:$0xff] %v21269_v40  ;;  %v21281_v11 = vld [vmem:[%s22651_s8 + $0xec] ss:$48 sps:$4 sm:$0xff]  }
 0xfb0   : > { %13922 = vmatprep.subr.bf16.mxu0 %v21269_v40  ;;  %24195 = vst [vmem:[#allocation41_spill] sm:$0xff] %v21281_v11  ;;  %v21287_v0 = vld [vmem:[%s22652_s9 + $0x8] sm:$0xff]   ;;  %v21293_v40 = vld [vmem:[%s22652_s9 + $0x50] sm:$0xff]  }
 0xfb1   : > { %24196 = vst [vmem:[#allocation42_spill] sm:$0xff] %v21287_v0  ;;  %24197 = vst [vmem:[#allocation43_spill] sm:$0xff] %v21293_v40 }
 0xfb2   : > { %10102 = vmatpush1.bf16.msra.mxu1 %v21275_v28  ;;  %v21299_v28 = vld [vmem:[%s22651_s8 + $0xe8] ss:$48 sps:$4 sm:$0xff]  }
 0xfb3   : > { %10103 = vmatprep.subr.bf16.mxu1 %v21281_v11  ;;  %13923 = vmatpush3.bf16.msra.mxu0 %v21287_v0  ;;  %24198 = vst [vmem:[#allocation44_spill] sm:$0xff] %v21299_v28  ;;  %v21305_v11 = vld [vmem:[%s22652_s9 + $0x10] sm:$0xff]   ;;  %v21311_v0 = vld [vmem:[%s22652_s9 + $0xc0] sm:$0xff]  }
 0xfb4   : > { %13924 = vmatprep.subr.bf16.mxu0 %v21293_v40  ;;  %24199 = vst [vmem:[#allocation45_spill] sm:$0xff] %v21305_v11  ;;  %24200 = vst [vmem:[#allocation3_spill] sm:$0xff] %v21311_v0  ;;  %v21317_v40 = vld [vmem:[%s22652_s9 + $0x58] sm:$0xff]  }
 0xfb5   : > { %24201 = vst [vmem:[#allocation4_spill] sm:$0xff] %v21317_v40 }
 0xfb6   : > { %10104 = vmatpush1.bf16.msra.mxu1 %v21299_v28  ;;  %v21343_v28 = vld [vmem:[%s22652_s9 + $0x60] sm:$0xff]  }
 0xfb7   : > { %13925 = vmatpush3.bf16.msra.mxu0 %v21305_v11  ;;  %13942 = vmatprep.subr.bf16.mxu1 %v21311_v0  ;;  %v21325_v11 = vld [vmem:[%s22652_s9 + $0x80] sm:$0xff]   ;;  %v21331_v0 = vld [vmem:[%s22652_s9 + $0x18] sm:$0xff]   ;;  %24205 = vst [vmem:[#allocation5_spill] sm:$0xff] %v21343_v28 }
 0xfb8   : > { %13926 = vmatprep.subr.bf16.mxu0 %v21317_v40  ;;  %24202 = vst [vmem:[#allocation50_spill] sm:$0xff] %v21325_v11  ;;  %24203 = vst [vmem:[#allocation51_spill] sm:$0xff] %v21331_v0  ;;  %v21337_v40 = vld [vmem:[%s22652_s9 + $0xc8] sm:$0xff]  }
 0xfb9   : > { %12702 = vmatmul.mubr.msk.bf16.vlgmr.msra.gmra.mrb[0].mxu1 %vm1806_vm6, %v24165_v46  ;;  %24204 = vst [vmem:[#allocation52_spill] sm:$0xff] %v21337_v40 }
 0xfba   : > { %13943 = vmatpush3.bf16.msra.mxu1 %v21325_v11 }
 0xfbb   : > { %13927 = vmatpush3.bf16.msra.mxu0 %v21331_v0  ;;  %13944 = vmatprep.subr.bf16.mxu1 %v21337_v40  ;;  %v21351_v0 = vld [vmem:[%s22652_s9 + $0x88] sm:$0xff]   ;;  %v21357_v40 = vld [vmem:[%s22652_s9 + $0x20] sm:$0xff]  }
 0xfbc   : > { %v9365_v46 = vpop.permute.xlu1 %9364  ;;  %13928 = vmatprep.subr.bf16.mxu0 %v21343_v28  ;;  %24206 = vst [vmem:[#allocation46_spill] sm:$0xff] %v21351_v0  ;;  %24207 = vst [vmem:[#allocation53_spill] sm:$0xff] %v21357_v40  ;;  %v21363_v28 = vld [vmem:[%s22652_s9 + $0xd0] sm:$0xff]  }
 0xfbd   : > { %9367 = vst.msk [vmem:[%s18578_s24 + $0x4] sm:$0xf] %vm7274_vm1, %v9365_v46  ;;  %24208 = vst [vmem:[#allocation54_spill] sm:$0xff] %v21363_v28  ;;  %v21369_v46 = vld [vmem:[%s22652_s9 + $0x68] sm:$0xff]  }
 0xfbe   : > { %13945 = vmatpush3.bf16.msra.mxu1 %v21351_v0  ;;  %24209 = vst [vmem:[#allocation55_spill] sm:$0xff] %v21369_v46  ;;  %v21375_v0 = vld [vmem:[%s22652_s9 + $0x90] sm:$0xff]  }
 0xfbf   : > { %13929 = vmatpush3.bf16.msra.mxu0 %v21357_v40  ;;  %13946 = vmatprep.subr.bf16.mxu1 %v21363_v28  ;;  %24210 = vst [vmem:[#allocation56_spill] sm:$0xff] %v21375_v0  ;;  %v21381_v40 = vld [vmem:[%s22652_s9 + $0x28] sm:$0xff]   ;;  %v21387_v28 = vld [vmem:[%s22652_s9 + $0xd8] sm:$0xff]  }
 0xfc0   : > { %13930 = vmatprep.subr.bf16.mxu0 %v21369_v46  ;;  %24211 = vst [vmem:[#allocation57_spill] sm:$0xff] %v21381_v40  ;;  %24212 = vst [vmem:[#allocation58_spill] sm:$0xff] %v21387_v28  ;;  %v21393_v46 = vld [vmem:[%s22652_s9 + $0x70] sm:$0xff]  }
 0xfc1   : > { %24213 = vst [vmem:[#allocation59_spill] sm:$0xff] %v21393_v46 }
 0xfc2   : > { %13947 = vmatpush3.bf16.msra.mxu1 %v21375_v0  ;;  %v21399_v0 = vld [vmem:[%s22652_s9 + $0x98] sm:$0xff]  }
 0xfc3   : > { %13931 = vmatpush3.bf16.msra.mxu0 %v21381_v40  ;;  %13948 = vmatprep.subr.bf16.mxu1 %v21387_v28  ;;  %24214 = vst [vmem:[#allocation60_spill] sm:$0xff] %v21399_v0  ;;  %v21405_v40 = vld [vmem:[%s22652_s9 + $0x30] sm:$0xff]   ;;  %v21411_v28 = vld [vmem:[%s22652_s9 + $0xe0] sm:$0xff]  }
 0xfc4   : > { %13932 = vmatprep.subr.bf16.mxu0 %v21393_v46  ;;  %24215 = vst [vmem:[#allocation61_spill] sm:$0xff] %v21405_v40  ;;  %24216 = vst [vmem:[#allocation62_spill] sm:$0xff] %v21411_v28  ;;  %v21417_v46 = vld [vmem:[%s22652_s9 + $0x78] sm:$0xff]  }
 0xfc5   : > { %24217 = vst [vmem:[#allocation63_spill] sm:$0xff] %v21417_v46 }
 0xfc6   : > { %13949 = vmatpush3.bf16.msra.mxu1 %v21399_v0  ;;  %v21423_v0 = vld [vmem:[%s22652_s9 + $0xa0] sm:$0xff]  }
 0xfc7   : > { %13933 = vmatpush3.bf16.msra.mxu0 %v21405_v40  ;;  %13950 = vmatprep.subr.bf16.mxu1 %v21411_v28  ;;  %24218 = vst [vmem:[#allocation64_spill] sm:$0xff] %v21423_v0  ;;  %v21429_v40 = vld [vmem:[%s22652_s9 + $0x38] sm:$0xff]   ;;  %v21435_v28 = vld [vmem:[%s22652_s9 + $0xe8] sm:$0xff]  }
 0xfc8   : > { %13934 = vmatprep.subr.bf16.mxu0 %v21417_v46  ;;  %24219 = vst [vmem:[#allocation65_spill] sm:$0xff] %v21429_v40  ;;  %24220 = vst [vmem:[#allocation66_spill] sm:$0xff] %v21435_v28  ;;  %v21441_v46 = vld [vmem:[%s22652_s9 + $0x140] sm:$0xff]  }
 0xfc9   : > { %24221 = vst [vmem:[#allocation67_spill] sm:$0xff] %v21441_v46 }
 0xfca   : > { %13951 = vmatpush3.bf16.msra.mxu1 %v21423_v0  ;;  %v21447_v0 = vld [vmem:[%s22652_s9 + $0xa8] sm:$0xff]  }
 0xfcb   : > { %13935 = vmatpush3.bf16.msra.mxu0 %v21429_v40  ;;  %13952 = vmatprep.subr.bf16.mxu1 %v21435_v28  ;;  %24222 = vst [vmem:[#allocation68_spill] sm:$0xff] %v21447_v0  ;;  %v21453_v40 = vld [vmem:[%s22652_s9 + $0xf0] sm:$0xff]  }
 0xfcc   : > { %13964 = vmatprep.subr.bf16.mxu0 %v21441_v46  ;;  %24223 = vst [vmem:[#allocation69_spill] sm:$0xff] %v21453_v40  ;;  %v21459_v28 = vld [vmem:[%s22652_s9 + $0xb0] sm:$0xff]   ;;  %v21465_v46 = vld [vmem:[%s22652_s9 + $0xf8] sm:$0xff]  }
 0xfcd   : > { %24224 = vst [vmem:[#allocation70_spill] sm:$0xff] %v21459_v28  ;;  %24225 = vst [vmem:[#allocation71_spill] sm:$0xff] %v21465_v46 }
 0xfce   : > { %13953 = vmatpush3.bf16.msra.mxu1 %v21447_v0  ;;  %v21471_v0 = vld [vmem:[%s22652_s9 + $0xb8] sm:$0xff]  }
 0xfcf   : > { %13954 = vmatprep.subr.bf16.mxu1 %v21453_v40  ;;  %24226 = vst [vmem:[#allocation72_spill] sm:$0xff] %v21471_v0  ;;  %v21477_v40 = vld [vmem:[%s22652_s9 + $0x1c0] sm:$0xff]  }
 0xfd0   : > { %24227 = vst [vmem:[#allocation73_spill] sm:$0xff] %v21477_v40 }
 0xfd2   : > { %13955 = vmatpush3.bf16.msra.mxu1 %v21459_v28 }
 0xfd3   : > { %13956 = vmatprep.subr.bf16.mxu1 %v21465_v46 }
 0xfd6   : > { %13957 = vmatpush3.bf16.msra.mxu1 %v21471_v0 }
 0xfd7   : > { %13986 = vmatprep.subr.bf16.mxu1 %v21477_v40 }
0x101c   : > { %v13804_v28 = vpop.f32.mrb[224].mxu0 }
0x101d   : > { %v13805_v11 = vpop.f32.mrb[225].mxu0 }
0x101e   : > { %v13806_v6 = vadd.f32 %v13805_v11, %v13804_v28  ;;  %v13807_v14 = vpop.f32.mrb[226].mxu0 }
0x101f   : > { %v13808_v33 = vpop.f32.mrb[227].mxu0 }
0x1028   : > { %v13826_v46 = vpop.f32.mrb[236].mxu1 }
0x1029   : > { %v13827_v15 = vpop.f32.mrb[237].mxu1 }
0x102a   : > { %v13828_v42 = vadd.f32 %v13827_v15, %v13826_v46  ;;  %v13829_v36 = vpop.f32.mrb[238].mxu1  ;;  %v21499_v46 = vld [vmem:[%s22652_s9 + $0x108] sm:$0xff]  }
0x102b   : > { %v13830_v63 = vpop.f32.mrb[239].mxu1 }
0x102c   : > { %v9718_v5 = vadd.f32 %v13828_v42, %v13806_v6 }
0x103c   : > { %v13848_v47 = vpop.f32.mrb[228].mxu0 }
0x103d   : > { %v13849_v0 = vpop.f32.mrb[229].mxu0 }
0x103e   : > { %v13850_v19 = vadd.f32 %v13849_v0, %v13848_v47  ;;  %v13851_v39 = vpop.f32.mrb[230].mxu0 }
0x103f   : > { %v13852_v7 = vpop.f32.mrb[231].mxu0 }
0x1040   : > { %v9758_v38 = vadd.f32 %v13850_v19, %v9718_v5 }
0x1048   : > { %v13870_v54 = vpop.f32.mrb[240].mxu1 }
0x1049   : > { %v13871_v16 = vpop.f32.mrb[241].mxu1 }
0x104a   : > { %v13872_v40 = vadd.f32 %v13871_v16, %v13870_v54  ;;  %v13873_v32 = vpop.f32.mrb[242].mxu1 }
0x104b   : > { %v13874_v34 = vpop.f32.mrb[243].mxu1 }
0x104c   : > { %v9798_v11 = vadd.f32 %v13872_v40, %v9758_v38  ;;  %v21493_v40 = vld [vmem:[%s22652_s9 + $0x148] sm:$0xff]  }
0x105c   : > { %v13892_v14 = vpop.f32.mrb[232].mxu0 }
0x105d   : > { %v13893_v33 = vpop.f32.mrb[233].mxu0 }
0x105e   : > { %v13894_v28 = vadd.f32 %v13893_v33, %v13892_v14  ;;  %v13895_v12 = vpop.f32.mrb[234].mxu0 }
0x105f   : > { %v13896_v15 = vpop.f32.mrb[235].mxu0  ;;  %v21487_v12 = vld [vmem:[%s22652_s9 + $0x100] sm:$0xff]  }
0x1060   : > { %v9838_v36 = vadd.f32 %v13894_v28, %v9798_v11 }
0x1068   : > { %v13914_v63 = vpop.f32.mrb[244].mxu1  ;;  %v9928_v42 = vpop.f32.mrb[236].mxu0 }
0x1069   : > { %v10140_v6 = vmul.f32 %v9928_v42, %v23530_v18  ;;  %v13915_v47 = vpop.f32.mrb[245].mxu1  ;;  %v9930_v39 = vpop.f32.mrb[237].mxu0 }
0x106a   : > { %v13916_v7 = vadd.f32 %v13915_v47, %v13914_v63  ;;  %v10141_v19 = vmul.f32 %v9930_v39, %v23531_v10  ;;  %v13917_v5 = vpop.f32.mrb[246].mxu1  ;;  %v9932_v16 = vpop.f32.mrb[238].mxu0  ;;  %v21509_v63 = vld [vmem:[%s22652_s9 + $0x150] sm:$0xff]  }
0x106b   : > { %v13918_v32 = vpop.f32.mrb[247].mxu1  ;;  %v9933_v34 = vpop.f32.mrb[239].mxu0  ;;  %v10152_v0 = vpack.c.bf16 %v10140_v6, %v10140_v6 }
0x106c   : > { %v21482_v54 = vadd.f32 %v13916_v7, %v9838_v36  ;;  %v10153_v38 = vpack.c.bf16 %v10141_v19, %v10141_v19  ;;  %v21517_v32 = vld [vmem:[%s22652_s9 + $0x110] sm:$0xff]  }
0x106e   : > { %24228 = vst [vmem:[#allocation74_spill] sm:$0xff] %v21482_v54  ;;  %10196 = vmatprep.mubr.bf16.mxu0 %v10153_v38  ;;  %v21523_v38 = vld [vmem:[%s22652_s9 + $0x158] sm:$0xff]  }
0x106f   : > { %10197 = vmatmul.mubr.bf16.vlgmr.msra.gmra.mrb[248].mxu0 %v10152_v0  ;;  %v21529_v0 = vld [vmem:[%s22652_s9 + $0x118] sm:$0xff]  }
0x1070   : > { %13965 = vmatpush3.bf16.msra.mxu0 %v21487_v12 }
0x1071   : > { %13966 = vmatprep.subr.bf16.mxu0 %v21493_v40 }
0x1074   : > { %13967 = vmatpush3.bf16.msra.mxu0 %v21499_v46  ;;  %v9969_v11 = vpop.f32.mrb[248].mxu1  ;;  %v10010_v14 = vpop.f32.mrb[240].mxu0 }
0x1075   : > { %v10142_v33 = vmul.f32 %v9969_v11, %v23535_v23  ;;  %v21504_v28 = vmul.f32 %v10010_v14, %v23536_v25  ;;  %v9971_v15 = vpop.f32.mrb[249].mxu1  ;;  %v10012_v36 = vpop.f32.mrb[241].mxu0  ;;  %13968 = vmatprep.subr.bf16.mxu0 %v21509_v63  ;;  %v21535_v11 = vld [vmem:[%s22652_s9 + $0x180] sm:$0xff]  }
0x1076   : > { %v10143_v42 = vmul.f32 %v9971_v15, %v17806_v51  ;;  %v10145_v6 = vmul.f32 %v10012_v36, %v18070_v59  ;;  %v9973_v47 = vpop.f32.mrb[250].mxu1  ;;  %v10014_v39 = vpop.f32.mrb[242].mxu0  ;;  %v21541_v14 = vld [vmem:[%s22652_s9 + $0x160] sm:$0xff]   ;;  %v21559_v36 = vld [vmem:[%s22652_s9 + $0x188] sm:$0xff]  }
0x1077   : > { %v9974_v7 = vpop.f32.mrb[251].mxu1  ;;  %v10015_v19 = vpop.f32.mrb[243].mxu0  ;;  %v10154_v34 = vpack.c.bf16 %v10142_v33, %v10142_v33  ;;  %v21547_v33 = vld [vmem:[%s22652_s9 + $0x1c8] sm:$0xff]   ;;  %v21553_v15 = vld [vmem:[%s22652_s9 + $0x120] sm:$0xff]   ;;  %24229 = vst [vmem:[#allocation75_spill] sm:$0xff] %v21559_v36 }
0x1078   : > { %v10155_v5 = vpack.c.bf16 %v10143_v42, %v10143_v42  ;;  %v10157_v16 = vpack.c.bf16 %v10145_v6, %v10145_v6  ;;  %13969 = vmatpush3.bf16.msra.mxu0 %v21517_v32 }
0x1079   : > { %13970 = vmatprep.subr.bf16.mxu0 %v21523_v38 }
0x107a   : > { %10236 = vmatprep.mubr.bf16.mxu1 %v10155_v5  ;;  %10276 = vmatprep.mubr.bf16.mxu0 %v10157_v16  ;;  %v21571_v5 = vld [vmem:[%s22652_s9 + $0x168] sm:$0xff]   ;;  %v21577_v16 = vld [vmem:[%s22652_s9 + $0x1d0] sm:$0xff]  }
0x107b   : > { %10237 = vmatmul.mubr.bf16.vlgmr.msra.gmra.mrb[4].mxu1 %v10154_v34  ;;  %24230 = vst [vmem:[#allocation76_spill] sm:$0xff] %v21571_v5  ;;  %24231 = vst [vmem:[#allocation88_spill] sm:$0xff] %v21577_v16 }
0x107c   : > { %13971 = vmatpush3.bf16.msra.mxu0 %v21529_v0  ;;  %13987 = vmatpush3.bf16.msra.mxu1 %v21535_v11 }
0x107d   : > { %13972 = vmatprep.subr.bf16.mxu0 %v21541_v14  ;;  %13988 = vmatprep.subr.bf16.mxu1 %v21547_v33 }
0x1080   : > { %13973 = vmatpush3.bf16.msra.mxu0 %v21553_v15  ;;  %13989 = vmatpush3.bf16.msra.mxu1 %v21559_v36  ;;  %v10051_v42 = vpop.f32.mrb[252].mxu1  ;;  %v10092_v6 = vpop.f32.mrb[244].mxu0 }
0x1081   : > { %v21563_v47 = vmul.f32 %v10051_v42, %v24027_v50  ;;  %v21566_v39 = vmul.f32 %v10092_v6, %v24028_v35  ;;  %v10053_v7 = vpop.f32.mrb[253].mxu1  ;;  %v10094_v19 = vpop.f32.mrb[245].mxu0  ;;  %13974 = vmatprep.subr.bf16.mxu0 %v21571_v5  ;;  %13990 = vmatprep.subr.bf16.mxu1 %v21577_v16  ;;  %v21585_v5 = vld [vmem:[%s22652_s9 + $0x128] sm:$0xff]   ;;  %v21591_v16 = vld [vmem:[%s22652_s9 + $0x190] sm:$0xff]  }
0x1082   : > { %v10147_v34 = vmul.f32 %v10053_v7, %v18074_v49  ;;  %v10149_v42 = vmul.f32 %v10094_v19, %v18078_v3  ;;  %v10055_v6 = vpop.f32.mrb[254].mxu1  ;;  %v10096_v54 = vpop.f32.mrb[246].mxu0  ;;  %v21615_v7 = vld [vmem:[%s22652_s9 + $0x198] sm:$0xff]  }
0x1083   : > { %v10056_v35 = vpop.f32.mrb[255].mxu1  ;;  %v10097_v50 = vpop.f32.mrb[247].mxu0  ;;  %v21609_v54 = vld [vmem:[%s22652_s9 + $0x130] sm:$0xff]   ;;  %24235 = vst [vmem:[#allocation99_spill] sm:$0xff] %v21615_v7  ;;  %v21621_v19 = vld [vmem:[%s22652_s9 + $0x178] sm:$0xff]   ;;  %v21639_v6 = vld [vmem:[%s22652_s9 + $0x1a0] sm:$0xff]  }
0x1084   : > { %v10159_v36 = vpack.c.bf16 %v10147_v34, %v10147_v34  ;;  %13975 = vmatpush3.bf16.msra.mxu0 %v21585_v5  ;;  %13991 = vmatpush3.bf16.msra.mxu1 %v21591_v16  ;;  %v21597_v35 = vld [vmem:[%s22652_s9 + $0x170] sm:$0xff]   ;;  %v21603_v50 = vld [vmem:[%s22652_s9 + $0x1d8] sm:$0xff]   ;;  %24234 = vst [vmem:[#allocation96_spill] sm:$0xff] %v21609_v54  ;;  %24236 = vst [vmem:[#allocation100_spill] sm:$0xff] %v21621_v19 }
0x1085   : > { %24232 = vst [vmem:[#allocation94_spill] sm:$0xff] %v21597_v35  ;;  %13976 = vmatprep.subr.bf16.mxu0 %v21597_v35  ;;  %24233 = vst [vmem:[#allocation95_spill] sm:$0xff] %v21603_v50  ;;  %13992 = vmatprep.subr.bf16.mxu1 %v21603_v50  ;;  %v21633_v34 = vld [vmem:[%s22652_s9 + $0x138] sm:$0xff]   ;;  %v21650_v50 = vld [vmem:[%s22652_s9 + $0x1e8] sm:$0xff]  }
0x1086   : > { %10316 = vmatprep.mubr.bf16.mxu1 %v10159_v36  ;;  %v21627_v36 = vld [vmem:[%s22652_s9 + $0x1e0] sm:$0xff]   ;;  %24238 = vst [vmem:[#allocation87_spill] sm:$0xff] %v21633_v34  ;;  %24239 = vst [vmem:[#allocation90_spill] sm:$0xff] %v21639_v6  ;;  %v21663_v35 = vld [vmem:[%s22652_s9 + $0x1a8] sm:$0xff]  }
0x1087   : > { %24237 = vst [vmem:[#allocation86_spill] sm:$0xff] %v21627_v36  ;;  %24240 = vst [vmem:[#allocation91_spill] sm:$0xff] %v21650_v50 }
0x1088   : > { %13977 = vmatpush3.bf16.msra.mxu0 %v21609_v54  ;;  %13993 = vmatpush3.bf16.msra.mxu1 %v21615_v7  ;;  %v10156_v7 = vpack.c.bf16 %v21504_v28, %v21504_v28 }
0x1089   : > { %13978 = vmatprep.subr.bf16.mxu0 %v21621_v19  ;;  %13994 = vmatprep.subr.bf16.mxu1 %v21627_v36 }
0x108c   : > { %13979 = vmatpush3.bf16.msra.mxu0 %v21633_v34  ;;  %13995 = vmatpush3.bf16.msra.mxu1 %v21639_v6  ;;  %v10133_v19 = vpop.f32.mrb[0].mxu1  ;;  %v21656_v34 = vld [vmem:[%s22652_s9 + $0x240] sm:$0xff]  }
0x108d   : > { %v21645_v36 = vmul.f32 %v10133_v19, %v24039_v53  ;;  %v10135_v54 = vpop.f32.mrb[1].mxu1  ;;  %13996 = vmatprep.subr.bf16.mxu1 %v21650_v50  ;;  %24241 = vst [vmem:[#allocation92_spill] sm:$0xff] %v21656_v34  ;;  %14008 = vmatprep.subr.bf16.mxu0 %v21656_v34  ;;  %v10161_v19 = vpack.c.bf16 %v10149_v42, %v10149_v42  ;;  %v21669_v50 = vld [vmem:[%s22652_s9 + $0x200] sm:$0xff]   ;;  %v21675_v42 = vld [vmem:[%s22652_s9 + $0x1f0] sm:$0xff]  }
0x108e   : > { %v10151_v28 = vmul.f32 %v10135_v54, %v18083_v1  ;;  %v10137_v6 = vpop.f32.mrb[2].mxu1  ;;  %v21687_v54 = vld [vmem:[%s22652_s9 + $0x1b0] sm:$0xff]  }
0x108f   : > { %10277 = vmatmul.mubr.bf16.vlgmr.msra.gmra.mrb[252].mxu0 %v10156_v7  ;;  %v10138_v53 = vpop.f32.mrb[3].mxu1  ;;  %24243 = vst [vmem:[#allocation13_spill] sm:$0xff] %v21687_v54  ;;  %v21693_v7 = vld [vmem:[%s22652_s9 + $0x208] sm:$0xff]   ;;  %v21699_v6 = vld [vmem:[%s22652_s9 + $0x1f8] sm:$0xff]  }
0x1090   : > { %13997 = vmatpush3.bf16.msra.mxu1 %v21663_v35  ;;  %14009 = vmatpush3.bf16.msra.mxu0 %v21669_v50  ;;  %v21681_v53 = vld [vmem:[%s22652_s9 + $0x248] sm:$0xff]   ;;  %24244 = vst [vmem:[#allocation8_spill] sm:$0xff] %v21693_v7  ;;  %24245 = vst [vmem:[#allocation101_spill] sm:$0xff] %v21699_v6 }
0x1091   : > { %10356 = vmatprep.mubr.bf16.mxu0 %v10161_v19  ;;  %13998 = vmatprep.subr.bf16.mxu1 %v21675_v42  ;;  %24242 = vst [vmem:[#allocation93_spill] sm:$0xff] %v21681_v53  ;;  %v21705_v19 = vld [vmem:[%s22652_s9 + $0x250] sm:$0xff]  }
0x1092   : > { %14010 = vmatprep.subr.bf16.mxu0 %v21681_v53  ;;  %24246 = vst [vmem:[#allocation102_spill] sm:$0xff] %v21705_v19  ;;  %v10163_v53 = vpack.c.bf16 %v10151_v28, %v10151_v28  ;;  %v21749_v28 = vld [vmem:[%s22652_s9 + $0x260] sm:$0xff]  }
0x1093   : > { %24253 = vst [vmem:[#allocation81_spill] sm:$0xff] %v21749_v28 }
0x1094   : > { %13999 = vmatpush3.bf16.msra.mxu1 %v21687_v54  ;;  %14011 = vmatpush3.bf16.msra.mxu0 %v21693_v7  ;;  %v21711_v54 = vld [vmem:[%s22652_s9 + $0x1b8] sm:$0xff]   ;;  %v21717_v7 = vld [vmem:[%s22652_s9 + $0x210] sm:$0xff]  }
0x1095   : > { %14000 = vmatprep.subr.bf16.mxu1 %v21699_v6  ;;  %14012 = vmatprep.subr.bf16.mxu0 %v21705_v19  ;;  %24247 = vst [vmem:[#allocation103_spill] sm:$0xff] %v21711_v54  ;;  %24248 = vst [vmem:[#allocation104_spill] sm:$0xff] %v21717_v7  ;;  %v10158_v6 = vpack.c.bf16 %v21563_v47, %v21563_v47  ;;  %v21725_v19 = vld [vmem:[%s22652_s9 + $0x258] sm:$0xff]  }
0x1096   : > { %24249 = vst [vmem:[#allocation105_spill] sm:$0xff] %v21725_v19  ;;  %v21737_v47 = vld [vmem:[%s22652_s9 + $0x218] sm:$0xff]  }
0x1097   : > { %24251 = vst [vmem:[#allocation17_spill] sm:$0xff] %v21737_v47 }
0x1098   : > { %14001 = vmatpush3.bf16.msra.mxu1 %v21711_v54  ;;  %14013 = vmatpush3.bf16.msra.mxu0 %v21717_v7  ;;  %v21731_v54 = vld [vmem:[%s22652_s9 + $0x2c0] sm:$0xff]  }
0x1099   : > { %14014 = vmatprep.subr.bf16.mxu0 %v21725_v19  ;;  %24250 = vst [vmem:[#allocation106_spill] sm:$0xff] %v21731_v54  ;;  %14030 = vmatprep.subr.bf16.mxu1 %v21731_v54  ;;  %v21743_v19 = vld [vmem:[%s22652_s9 + $0x280] sm:$0xff]  }
0x109a   : > { %24252 = vst [vmem:[#allocation18_spill] sm:$0xff] %v21743_v19 }
0x109b   : > { %10317 = vmatmul.mubr.bf16.vlgmr.msra.gmra.mrb[8].mxu1 %v10158_v6  ;;  %v21755_v6 = vld [vmem:[%s22652_s9 + $0x2c8] sm:$0xff]  }
0x109c   : > { %14015 = vmatpush3.bf16.msra.mxu0 %v21737_v47  ;;  %14031 = vmatpush3.bf16.msra.mxu1 %v21743_v19  ;;  %24254 = vst [vmem:[#allocation83_spill] sm:$0xff] %v21755_v6 }
0x109d   : > { %10396 = vmatprep.mubr.bf16.mxu1 %v10163_v53  ;;  %14016 = vmatprep.subr.bf16.mxu0 %v21749_v28  ;;  %v24275_v53 = vld [vmem:[#allocation30_spill] sm:$0xff] }
0x109e   : > { %14032 = vmatprep.subr.bf16.mxu1 %v21755_v6 }
0x10a0   : > { %14017 = vmatpush3.bf16.msra.mxu0 %v24144_v44  ;;  %14033 = vmatpush3.bf16.msra.mxu1 %v24145_v27  ;;  %v10160_v44 = vpack.c.bf16 %v21566_v39, %v21566_v39  ;;  %v10162_v27 = vpack.c.bf16 %v21645_v36, %v21645_v36  ;;  %v24273_v39 = vld [vmem:[#allocation28_spill] sm:$0xff]  ;;  %v24274_v36 = vld [vmem:[#allocation31_spill] sm:$0xff] }
0x10a1   : > { %14018 = vmatprep.subr.bf16.mxu0 %v24146_v52  ;;  %14034 = vmatprep.subr.bf16.mxu1 %v24147_v8  ;;  %v24255_v52 = vld [vmem:[#allocation20_spill] sm:$0xff] }
0x10a2   : > { %v24256_v8 = vld [vmem:[#allocation80_spill] sm:$0xff] }
0x10a4   : > { %14019 = vmatpush3.bf16.msra.mxu0 %v24148_v37  ;;  %14035 = vmatpush3.bf16.msra.mxu1 %v24149_v60  ;;  %v24257_v37 = vld [vmem:[#allocation82_spill] sm:$0xff]  ;;  %v24258_v60 = vld [vmem:[#allocation19_spill] sm:$0xff] }
0x10a5   : > { %14020 = vmatprep.subr.bf16.mxu0 %v24150_v21  ;;  %14036 = vmatprep.subr.bf16.mxu1 %v24151_v45  ;;  %v24259_v21 = vld [vmem:[#allocation6_spill] sm:$0xff]  ;;  %v24260_v45 = vld [vmem:[#allocation7_spill] sm:$0xff] }
0x10a8   : > { %14021 = vmatpush3.bf16.msra.mxu0 %v24152_v43  ;;  %14037 = vmatpush3.bf16.msra.mxu1 %v24153_v13  ;;  %v24261_v43 = vld [vmem:[#allocation9_spill] sm:$0xff]  ;;  %v24262_v13 = vld [vmem:[#allocation10_spill] sm:$0xff] }
0x10a9   : > { %14022 = vmatprep.subr.bf16.mxu0 %v24154_v4  ;;  %14038 = vmatprep.subr.bf16.mxu1 %v24155_v24  ;;  %v24263_v4 = vld [vmem:[#allocation11_spill] sm:$0xff]  ;;  %v24264_v24 = vld [vmem:[#allocation12_spill] sm:$0xff] }
0x10ac   : > { %14023 = vmatpush3.bf16.msra.mxu0 %v24156_v20  ;;  %14039 = vmatpush3.bf16.msra.mxu1 %v24157_v55  ;;  %v24265_v20 = vld [vmem:[#allocation14_spill] sm:$0xff]  ;;  %v24266_v55 = vld [vmem:[#allocation23_spill] sm:$0xff] }
0x10ad   : > { %14040 = vmatprep.subr.bf16.mxu1 %v24158_v48  ;;  %10412 = vmatprep.subr.bf16.mxu0 %v21036_v31  ;;  %v24267_v48 = vld [vmem:[#allocation22_spill] sm:$0xff] }
0x10af   : > { %10357 = vmatmul.mubr.bf16.vlgmr.msra.gmra.mrb[0].mxu0 %v10160_v44  ;;  %v24276_v44 = vld [vmem:[#allocation33_spill] sm:$0xff] }
0x10b0   : > { %14041 = vmatpush3.bf16.msra.mxu1 %v24159_v57  ;;  %10413 = vmatpush1.bf16.msra.mxu0 %v21043_v41  ;;  %v24268_v57 = vld [vmem:[#allocation25_spill] sm:$0xff] }
0x10b1   : > { %14042 = vmatprep.subr.bf16.mxu1 %v24160_v61  ;;  %10414 = vmatprep.subr.bf16.mxu0 %v21050_v62  ;;  %v24269_v61 = vld [vmem:[#allocation24_spill] sm:$0xff] }
0x10b2   : > { %10444 = vmatprep.mubr.bf16.mxu0 %v24161_v30 }
0x10b4   : > { %14043 = vmatpush3.bf16.msra.mxu1 %v24162_v58  ;;  %10415 = vmatpush1.bf16.msra.mxu0 %v21058_v26  ;;  %v24270_v58 = vld [vmem:[#allocation27_spill] sm:$0xff] }
0x10b5   : > { %14044 = vmatprep.subr.bf16.mxu1 %v24163_v22  ;;  %10416 = vmatprep.subr.bf16.mxu0 %v21065_v17  ;;  %v24271_v22 = vld [vmem:[#allocation26_spill] sm:$0xff] }
0x10b8   : > { %14045 = vmatpush3.bf16.msra.mxu1 %v24164_v2  ;;  %10417 = vmatpush1.bf16.msra.mxu0 %v21072_v9  ;;  %v24272_v2 = vld [vmem:[#allocation29_spill] sm:$0xff] }
0x10b9   : > { %10453 = vmatprep.subr.bf16.mxu1 %v21080_v29  ;;  %10494 = vmatprep.subr.bf16.mxu0 %v21086_v56 }
0x10bb   : > { %10397 = vmatmul.mubr.bf16.vlgmr.msra.gmra.mrb[12].mxu1 %v10162_v27  ;;  %12703 = vmatmul.mubr.msk.bf16.vlgmr.msra.gmra.mrb[4].mxu0 %vm1806_vm6, %v24255_v52  ;;  %v24277_v27 = vld [vmem:[#allocation32_spill] sm:$0xff] }
0x10bc   : > { %10454 = vmatpush1.bf16.msra.mxu1 %v24256_v8  ;;  %10495 = vmatpush1.bf16.msra.mxu0 %v24257_v37 }
0x10bd   : > { %10455 = vmatprep.subr.bf16.mxu1 %v24258_v60  ;;  %10496 = vmatprep.subr.bf16.mxu0 %v24259_v21 }
0x10be   : > { %10485 = vmatprep.mubr.bf16.mxu1 %v24161_v30  ;;  %10526 = vmatprep.mubr.bf16.mxu0 %v24161_v30 }
0x10c0   : > { %10456 = vmatpush1.bf16.msra.mxu1 %v24260_v45  ;;  %10497 = vmatpush1.bf16.msra.mxu0 %v24261_v43 }
0x10c1   : > { %10457 = vmatprep.subr.bf16.mxu1 %v24262_v13  ;;  %10498 = vmatprep.subr.bf16.mxu0 %v24263_v4 }
0x10c4   : > { %10458 = vmatpush1.bf16.msra.mxu1 %v24264_v24  ;;  %10499 = vmatpush1.bf16.msra.mxu0 %v24265_v20 }
0x10c5   : > { %10535 = vmatprep.subr.bf16.mxu1 %v24266_v55  ;;  %10576 = vmatprep.subr.bf16.mxu0 %v24267_v48  ;;  %v24291_v48 = vld [vmem:[#allocation4_spill] sm:$0xff] }
0x10c7   : > { %12704 = vmatmul.mubr.msk.bf16.vlgmr.msra.gmra.mrb[16].mxu1 %vm1806_vm6, %v24255_v52  ;;  %12705 = vmatmul.mubr.msk.bf16.vlgmr.msra.gmra.mrb[8].mxu0 %vm1806_vm6, %v24255_v52 }
0x10c8   : > { %10536 = vmatpush1.bf16.msra.mxu1 %v24268_v57  ;;  %10577 = vmatpush1.bf16.msra.mxu0 %v24269_v61  ;;  %v24278_v61 = vld [vmem:[#allocation35_spill] sm:$0xff]  ;;  %v24289_v57 = vld [vmem:[#allocation45_spill] sm:$0xff] }
0x10c9   : > { %10537 = vmatprep.subr.bf16.mxu1 %v24270_v58  ;;  %10578 = vmatprep.subr.bf16.mxu0 %v24271_v22  ;;  %v24279_v58 = vld [vmem:[#allocation34_spill] sm:$0xff]  ;;  %v24288_v22 = vld [vmem:[#allocation44_spill] sm:$0xff] }
0x10ca   : > { %10567 = vmatprep.mubr.bf16.mxu1 %v24161_v30  ;;  %10608 = vmatprep.mubr.bf16.mxu0 %v24161_v30 }
0x10cc   : > { %10538 = vmatpush1.bf16.msra.mxu1 %v24272_v2  ;;  %10579 = vmatpush1.bf16.msra.mxu0 %v24273_v39  ;;  %v24280_v2 = vld [vmem:[#allocation37_spill] sm:$0xff]  ;;  %v24287_v39 = vld [vmem:[#allocation43_spill] sm:$0xff] }
0x10cd   : > { %10539 = vmatprep.subr.bf16.mxu1 %v24274_v36  ;;  %10580 = vmatprep.subr.bf16.mxu0 %v24275_v53  ;;  %v24281_v36 = vld [vmem:[#allocation36_spill] sm:$0xff]  ;;  %v24282_v53 = vld [vmem:[#allocation38_spill] sm:$0xff] }
0x10d0   : > { %10540 = vmatpush1.bf16.msra.mxu1 %v24276_v44  ;;  %10581 = vmatpush1.bf16.msra.mxu0 %v24277_v27  ;;  %v24283_v44 = vld [vmem:[#allocation39_spill] sm:$0xff]  ;;  %v24284_v27 = vld [vmem:[#allocation40_spill] sm:$0xff] }
0x10d1   : > { %10617 = vmatprep.subr.bf16.mxu1 %v24278_v61  ;;  %14052 = vmatprep.subr.bf16.mxu0 %v24279_v58  ;;  %v24285_v61 = vld [vmem:[#allocation41_spill] sm:$0xff]  ;;  %v24286_v58 = vld [vmem:[#allocation42_spill] sm:$0xff] }
0x10d3   : > { %12706 = vmatmul.mubr.msk.bf16.vlgmr.msra.gmra.mrb[20].mxu1 %vm1806_vm6, %v24255_v52  ;;  %12707 = vmatmul.mubr.msk.bf16.vlgmr.msra.gmra.mrb[12].mxu0 %vm1806_vm6, %v24255_v52 }
0x10d4   : > { %10618 = vmatpush1.bf16.msra.mxu1 %v24280_v2  ;;  %10649 = vmatprep.mubr.bf16.mxu1 %v24161_v30  ;;  %v24290_v2 = vld [vmem:[#allocation3_spill] sm:$0xff] }
0x10d5   : > { %10619 = vmatprep.subr.bf16.mxu1 %v24281_v36  ;;  %14053 = vmatpush3.bf16.msra.mxu0 %v24282_v53  ;;  %v24301_v53 = vld [vmem:[#allocation57_spill] sm:$0xff] }
0x10d6   : > { %14054 = vmatprep.subr.bf16.mxu0 %v24283_v44  ;;  %v24292_v44 = vld [vmem:[#allocation50_spill] sm:$0xff] }
0x10d8   : > { %10620 = vmatpush1.bf16.msra.mxu1 %v24284_v27  ;;  %v24293_v27 = vld [vmem:[#allocation51_spill] sm:$0xff] }
0x10d9   : > { %10621 = vmatprep.subr.bf16.mxu1 %v24285_v61  ;;  %14055 = vmatpush3.bf16.msra.mxu0 %v24286_v58  ;;  %v24294_v61 = vld [vmem:[#allocation52_spill] sm:$0xff]  ;;  %v24295_v58 = vld [vmem:[#allocation5_spill] sm:$0xff] }
0x10da   : > { %14056 = vmatprep.subr.bf16.mxu0 %v24287_v39  ;;  %v24296_v39 = vld [vmem:[#allocation46_spill] sm:$0xff] }
0x10dc   : > { %10622 = vmatpush1.bf16.msra.mxu1 %v24288_v22  ;;  %v24297_v22 = vld [vmem:[#allocation53_spill] sm:$0xff] }
0x10dd   : > { %14057 = vmatpush3.bf16.msra.mxu0 %v24289_v57  ;;  %14074 = vmatprep.subr.bf16.mxu1 %v24290_v2  ;;  %v24298_v57 = vld [vmem:[#allocation54_spill] sm:$0xff]  ;;  %v24299_v2 = vld [vmem:[#allocation55_spill] sm:$0xff] }
0x10de   : > { %14058 = vmatprep.subr.bf16.mxu0 %v24291_v48  ;;  %v24300_v48 = vld [vmem:[#allocation56_spill] sm:$0xff] }
0x10df   : > { %12708 = vmatmul.mubr.msk.bf16.vlgmr.msra.gmra.mrb[24].mxu1 %vm1806_vm6, %v24255_v52  ;;  %v24302_v52 = vld [vmem:[#allocation58_spill] sm:$0xff] }
0x10e0   : > { %14075 = vmatpush3.bf16.msra.mxu1 %v24292_v44  ;;  %v24303_v44 = vld [vmem:[#allocation59_spill] sm:$0xff] }
0x10e1   : > { %14059 = vmatpush3.bf16.msra.mxu0 %v24293_v27  ;;  %14076 = vmatprep.subr.bf16.mxu1 %v24294_v61  ;;  %v24304_v27 = vld [vmem:[#allocation60_spill] sm:$0xff]  ;;  %v24305_v61 = vld [vmem:[#allocation61_spill] sm:$0xff] }
0x10e2   : > { %14060 = vmatprep.subr.bf16.mxu0 %v24295_v58  ;;  %v24306_v58 = vld [vmem:[#allocation62_spill] sm:$0xff] }
0x10e4   : > { %14077 = vmatpush3.bf16.msra.mxu1 %v24296_v39  ;;  %v24307_v39 = vld [vmem:[#allocation63_spill] sm:$0xff] }
0x10e5   : > { %14061 = vmatpush3.bf16.msra.mxu0 %v24297_v22  ;;  %14078 = vmatprep.subr.bf16.mxu1 %v24298_v57  ;;  %v24308_v22 = vld [vmem:[#allocation64_spill] sm:$0xff]  ;;  %v24309_v57 = vld [vmem:[#allocation65_spill] sm:$0xff] }
0x10e6   : > { %14062 = vmatprep.subr.bf16.mxu0 %v24299_v2  ;;  %v24310_v2 = vld [vmem:[#allocation66_spill] sm:$0xff] }
0x10e8   : > { %14079 = vmatpush3.bf16.msra.mxu1 %v24300_v48  ;;  %v24311_v48 = vld [vmem:[#allocation67_spill] sm:$0xff] }
0x10e9   : > { %14063 = vmatpush3.bf16.msra.mxu0 %v24301_v53  ;;  %14080 = vmatprep.subr.bf16.mxu1 %v24302_v52  ;;  %v24312_v53 = vld [vmem:[#allocation68_spill] sm:$0xff]  ;;  %v24313_v52 = vld [vmem:[#allocation69_spill] sm:$0xff] }
0x10ea   : > { %14064 = vmatprep.subr.bf16.mxu0 %v24303_v44  ;;  %v24314_v44 = vld [vmem:[#allocation70_spill] sm:$0xff] }
0x10ec   : > { %14081 = vmatpush3.bf16.msra.mxu1 %v24304_v27  ;;  %v24315_v27 = vld [vmem:[#allocation71_spill] sm:$0xff] }
0x10ed   : > { %14065 = vmatpush3.bf16.msra.mxu0 %v24305_v61  ;;  %14082 = vmatprep.subr.bf16.mxu1 %v24306_v58  ;;  %v24316_v61 = vld [vmem:[#allocation72_spill] sm:$0xff]  ;;  %v24317_v58 = vld [vmem:[#allocation73_spill] sm:$0xff] }
0x10ee   : > { %14066 = vmatprep.subr.bf16.mxu0 %v24307_v39 }
0x10f0   : > { %14083 = vmatpush3.bf16.msra.mxu1 %v24308_v22 }
0x10f1   : > { %14067 = vmatpush3.bf16.msra.mxu0 %v24309_v57  ;;  %14084 = vmatprep.subr.bf16.mxu1 %v24310_v2 }
0x10f2   : > { %14096 = vmatprep.subr.bf16.mxu0 %v24311_v48 }
0x10f4   : > { %14085 = vmatpush3.bf16.msra.mxu1 %v24312_v53 }
0x10f5   : > { %14086 = vmatprep.subr.bf16.mxu1 %v24313_v52 }
0x10f8   : > { %14087 = vmatpush3.bf16.msra.mxu1 %v24314_v44 }
0x10f9   : > { %14088 = vmatprep.subr.bf16.mxu1 %v24315_v27 }
0x10fc   : > { %14089 = vmatpush3.bf16.msra.mxu1 %v24316_v61 }
0x10fd   : > { %14118 = vmatprep.subr.bf16.mxu1 %v24317_v58 }
0x1142   : > { %v13936_v39 = vpop.f32.mrb[248].mxu0 }
0x1143   : > { %v13937_v22 = vpop.f32.mrb[249].mxu0 }
0x1144   : > { %v13938_v36 = vadd.f32 %v13937_v22, %v13936_v39  ;;  %v13939_v57 = vpop.f32.mrb[250].mxu0 }
0x1145   : > { %v13940_v55 = vpop.f32.mrb[251].mxu0 }
0x114e   : > { %v13958_v2 = vpop.f32.mrb[4].mxu1 }
0x114f   : > { %v13959_v20 = vpop.f32.mrb[5].mxu1 }
0x1150   : > { %v13960_v48 = vadd.f32 %v13959_v20, %v13958_v2  ;;  %v13961_v24 = vpop.f32.mrb[6].mxu1 }
0x1151   : > { %v13962_v53 = vpop.f32.mrb[7].mxu1 }
0x1152   : > { %v10239_v4 = vadd.f32 %v13960_v48, %v13938_v36 }
0x1162   : > { %v13980_v52 = vpop.f32.mrb[252].mxu0 }
0x1163   : > { %v13981_v13 = vpop.f32.mrb[253].mxu0 }
0x1164   : > { %v13982_v44 = vadd.f32 %v13981_v13, %v13980_v52  ;;  %v13983_v43 = vpop.f32.mrb[254].mxu0 }
0x1165   : > { %v13984_v27 = vpop.f32.mrb[255].mxu0 }
0x1166   : > { %v10279_v45 = vadd.f32 %v13982_v44, %v10239_v4 }
0x116e   : > { %v14002_v61 = vpop.f32.mrb[8].mxu1 }
0x116f   : > { %v14003_v21 = vpop.f32.mrb[9].mxu1 }
0x1170   : > { %v14004_v58 = vadd.f32 %v14003_v21, %v14002_v61  ;;  %v14005_v60 = vpop.f32.mrb[10].mxu1 }
0x1171   : > { %v14006_v37 = vpop.f32.mrb[11].mxu1 }
0x1172   : > { %v10319_v22 = vadd.f32 %v14004_v58, %v10279_v45 }
0x1182   : > { %v14024_v57 = vpop.f32.mrb[0].mxu0 }
0x1183   : > { %v14025_v55 = vpop.f32.mrb[1].mxu0 }
0x1184   : > { %v14026_v39 = vadd.f32 %v14025_v55, %v14024_v57  ;;  %v14027_v8 = vpop.f32.mrb[2].mxu0 }
0x1185   : > { %v14028_v20 = vpop.f32.mrb[3].mxu0 }
0x1186   : > { %v10359_v24 = vadd.f32 %v14026_v39, %v10319_v22 }
0x118e   : > { %v14046_v2 = vpop.f32.mrb[12].mxu1  ;;  %v10446_v48 = vpop.f32.mrb[4].mxu0 }
0x118f   : > { %v10658_v13 = vmul.f32 %v10446_v48, %v23530_v18  ;;  %v14047_v43 = vpop.f32.mrb[13].mxu1  ;;  %v10448_v36 = vpop.f32.mrb[5].mxu0 }
0x1190   : > { %v14048_v4 = vadd.f32 %v14047_v43, %v14046_v2  ;;  %v10659_v53 = vmul.f32 %v10448_v36, %v23531_v10  ;;  %v14049_v21 = vpop.f32.mrb[14].mxu1  ;;  %v10450_v60 = vpop.f32.mrb[6].mxu0 }
0x1191   : > { %v14050_v37 = vpop.f32.mrb[15].mxu1  ;;  %v10451_v45 = vpop.f32.mrb[7].mxu0  ;;  %v10670_v44 = vpack.c.bf16 %v10658_v13, %v10658_v13  ;;  %v24318_v21 = vld [vmem:[#allocation75_spill] sm:$0xff] }
0x1192   : > { %v10399_v61 = vadd.f32 %v14048_v4, %v10359_v24  ;;  %v10671_v58 = vpack.c.bf16 %v10659_v53, %v10659_v53  ;;  %v24319_v45 = vld [vmem:[#allocation47_spill] sm:$0xff] }
0x1194   : > { %v10404_v8 = vpack.c.bf16 %v10399_v61, %v10399_v61  ;;  %10714 = vmatprep.mubr.bf16.mxu0 %v10671_v58  ;;  %v24320_v58 = vld [vmem:[#allocation48_spill] sm:$0xff] }
0x1195   : > { %10715 = vmatmul.mubr.bf16.vlgmr.msra.gmra.mrb[16].mxu0 %v10670_v44 }
0x1196   : > { %10405 = vst.msk [vmem:[%s18578_s24 + $0x8] sm:$0xf] %vm6220_vm15, %v10404_v8  ;;  %14097 = vmatpush3.bf16.msra.mxu0 %v21487_v12 }
0x1197   : > { %14098 = vmatprep.subr.bf16.mxu0 %v21493_v40 }
0x119a   : > { %14099 = vmatpush3.bf16.msra.mxu0 %v21499_v46  ;;  %v10487_v27 = vpop.f32.mrb[16].mxu1  ;;  %v10528_v52 = vpop.f32.mrb[8].mxu0 }
0x119b   : > { %v10660_v22 = vmul.f32 %v10487_v27, %v23535_v23  ;;  %v10662_v57 = vmul.f32 %v10528_v52, %v23536_v25  ;;  %v10489_v55 = vpop.f32.mrb[17].mxu1  ;;  %v10530_v39 = vpop.f32.mrb[9].mxu0  ;;  %14100 = vmatprep.subr.bf16.mxu0 %v21509_v63  ;;  %v24321_v52 = vld [vmem:[#allocation76_spill] sm:$0xff] }
0x119c   : > { %v10661_v20 = vmul.f32 %v10489_v55, %v17806_v51  ;;  %v10663_v24 = vmul.f32 %v10530_v39, %v18070_v59  ;;  %v10491_v2 = vpop.f32.mrb[18].mxu1  ;;  %v10532_v48 = vpop.f32.mrb[10].mxu0 }
0x119d   : > { %v10492_v13 = vpop.f32.mrb[19].mxu1  ;;  %v10533_v43 = vpop.f32.mrb[11].mxu0  ;;  %v10672_v53 = vpack.c.bf16 %v10660_v22, %v10660_v22  ;;  %v24322_v22 = vld [vmem:[#allocation88_spill] sm:$0xff] }
0x119e   : > { %v10673_v36 = vpack.c.bf16 %v10661_v20, %v10661_v20  ;;  %v10675_v4 = vpack.c.bf16 %v10663_v24, %v10663_v24  ;;  %14101 = vmatpush3.bf16.msra.mxu0 %v21517_v32  ;;  %v24323_v43 = vld [vmem:[#allocation94_spill] sm:$0xff] }
0x119f   : > { %14102 = vmatprep.subr.bf16.mxu0 %v21523_v38 }
0x11a0   : > { %10754 = vmatprep.mubr.bf16.mxu1 %v10673_v36  ;;  %10794 = vmatprep.mubr.bf16.mxu0 %v10675_v4  ;;  %v24324_v36 = vld [vmem:[#allocation95_spill] sm:$0xff]  ;;  %v24325_v4 = vld [vmem:[#allocation96_spill] sm:$0xff] }
0x11a1   : > { %10755 = vmatmul.mubr.bf16.vlgmr.msra.gmra.mrb[28].mxu1 %v10672_v53  ;;  %v24326_v53 = vld [vmem:[#allocation99_spill] sm:$0xff] }
0x11a2   : > { %14103 = vmatpush3.bf16.msra.mxu0 %v21529_v0  ;;  %14119 = vmatpush3.bf16.msra.mxu1 %v21535_v11 }
0x11a3   : > { %14104 = vmatprep.subr.bf16.mxu0 %v21541_v14  ;;  %14120 = vmatprep.subr.bf16.mxu1 %v21547_v33 }
0x11a6   : > { %14105 = vmatpush3.bf16.msra.mxu0 %v21553_v15  ;;  %14121 = vmatpush3.bf16.msra.mxu1 %v24318_v21  ;;  %v10569_v60 = vpop.f32.mrb[20].mxu1  ;;  %v10610_v37 = vpop.f32.mrb[12].mxu0 }
0x11a7   : > { %v10664_v61 = vmul.f32 %v10569_v60, %v24319_v45  ;;  %v21892_v44 = vmul.f32 %v10610_v37, %v24320_v58  ;;  %v10571_v8 = vpop.f32.mrb[21].mxu1  ;;  %v10612_v27 = vpop.f32.mrb[13].mxu0  ;;  %14106 = vmatprep.subr.bf16.mxu0 %v24321_v52  ;;  %14122 = vmatprep.subr.bf16.mxu1 %v24322_v22  ;;  %v24327_v60 = vld [vmem:[#allocation100_spill] sm:$0xff]  ;;  %v24328_v37 = vld [vmem:[#allocation86_spill] sm:$0xff] }
0x11a8   : > { %v10665_v55 = vmul.f32 %v10571_v8, %v18074_v49  ;;  %v10667_v39 = vmul.f32 %v10612_v27, %v18078_v3  ;;  %v10573_v20 = vpop.f32.mrb[22].mxu1  ;;  %v10614_v24 = vpop.f32.mrb[14].mxu0  ;;  %v24329_v8 = vld [vmem:[#allocation87_spill] sm:$0xff]  ;;  %v24330_v27 = vld [vmem:[#allocation90_spill] sm:$0xff] }
0x11a9   : > { %v10574_v2 = vpop.f32.mrb[23].mxu1  ;;  %v10615_v48 = vpop.f32.mrb[15].mxu0  ;;  %v10674_v20 = vpack.c.bf16 %v10662_v57, %v10662_v57  ;;  %v24331_v24 = vld [vmem:[#allocation49_spill] sm:$0xff] }
0x11aa   : > { %v10677_v13 = vpack.c.bf16 %v10665_v55, %v10665_v55  ;;  %14107 = vmatpush3.bf16.msra.mxu0 %v21585_v5  ;;  %14123 = vmatpush3.bf16.msra.mxu1 %v21591_v16  ;;  %v24333_v57 = vld [vmem:[#allocation93_spill] sm:$0xff] }
0x11ab   : > { %14108 = vmatprep.subr.bf16.mxu0 %v24323_v43  ;;  %14124 = vmatprep.subr.bf16.mxu1 %v24324_v36  ;;  %v24332_v36 = vld [vmem:[#allocation91_spill] sm:$0xff] }
0x11ac   : > { %10834 = vmatprep.mubr.bf16.mxu1 %v10677_v13 }
0x11ae   : > { %14109 = vmatpush3.bf16.msra.mxu0 %v24325_v4  ;;  %14125 = vmatpush3.bf16.msra.mxu1 %v24326_v53 }
0x11af   : > { %14110 = vmatprep.subr.bf16.mxu0 %v24327_v60  ;;  %14126 = vmatprep.subr.bf16.mxu1 %v24328_v37  ;;  %v10679_v60 = vpack.c.bf16 %v10667_v39, %v10667_v39  ;;  %v24338_v39 = vld [vmem:[#allocation103_spill] sm:$0xff] }
0x11b2   : > { %14111 = vmatpush3.bf16.msra.mxu0 %v24329_v8  ;;  %14127 = vmatpush3.bf16.msra.mxu1 %v24330_v27  ;;  %v10651_v55 = vpop.f32.mrb[24].mxu1 }
0x11b3   : > { %v21909_v2 = vmul.f32 %v10651_v55, %v24331_v24  ;;  %v10653_v48 = vpop.f32.mrb[25].mxu1  ;;  %14128 = vmatprep.subr.bf16.mxu1 %v24332_v36  ;;  %14140 = vmatprep.subr.bf16.mxu0 %v21656_v34  ;;  %v24334_v55 = vld [vmem:[#allocation13_spill] sm:$0xff]  ;;  %v24335_v36 = vld [vmem:[#allocation8_spill] sm:$0xff] }
0x11b4   : > { %v10669_v13 = vmul.f32 %v10653_v48, %v18083_v1  ;;  %v10655_v53 = vpop.f32.mrb[26].mxu1  ;;  %v24336_v34 = vld [vmem:[#allocation101_spill] sm:$0xff]  ;;  %v24337_v48 = vld [vmem:[#allocation102_spill] sm:$0xff] }
0x11b5   : > { %10795 = vmatmul.mubr.bf16.vlgmr.msra.gmra.mrb[20].mxu0 %v10674_v20  ;;  %v10656_v37 = vpop.f32.mrb[27].mxu1  ;;  %v10676_v53 = vpack.c.bf16 %v10664_v61, %v10664_v61  ;;  %v21933_v20 = vld [vmem:[%s22652_s9 + $0x220] sm:$0xff]   ;;  %v21939_v61 = vld [vmem:[%s22652_s9 + $0x288] sm:$0xff]  }
0x11b6   : > { %14129 = vmatpush3.bf16.msra.mxu1 %v21663_v35  ;;  %14141 = vmatpush3.bf16.msra.mxu0 %v21669_v50  ;;  %v24339_v37 = vld [vmem:[#allocation105_spill] sm:$0xff]  ;;  %24340 = vst [vmem:[#allocation84_spill] sm:$0xff] %v21933_v20  ;;  %24341 = vst [vmem:[#allocation85_spill] sm:$0xff] %v21939_v61 }
0x11b7   : > { %10874 = vmatprep.mubr.bf16.mxu0 %v10679_v60  ;;  %14130 = vmatprep.subr.bf16.mxu1 %v21675_v42  ;;  %v10681_v60 = vpack.c.bf16 %v10669_v13, %v10669_v13  ;;  %v21945_v13 = vld [vmem:[%s22652_s9 + $0x268] sm:$0xff]  }
0x11b8   : > { %14142 = vmatprep.subr.bf16.mxu0 %v24333_v57  ;;  %24342 = vst [vmem:[#allocation89_spill] sm:$0xff] %v21945_v13 }
0x11ba   : > { %14131 = vmatpush3.bf16.msra.mxu1 %v24334_v55  ;;  %14143 = vmatpush3.bf16.msra.mxu0 %v24335_v36 }
0x11bb   : > { %14132 = vmatprep.subr.bf16.mxu1 %v24336_v34  ;;  %14144 = vmatprep.subr.bf16.mxu0 %v24337_v48 }
0x11be   : > { %14133 = vmatpush3.bf16.msra.mxu1 %v24338_v39  ;;  %14145 = vmatpush3.bf16.msra.mxu0 %v21717_v7 }
0x11bf   : > { %14146 = vmatprep.subr.bf16.mxu0 %v24339_v37  ;;  %14162 = vmatprep.subr.bf16.mxu1 %v21731_v54 }
0x11c1   : > { %10835 = vmatmul.mubr.bf16.vlgmr.msra.gmra.mrb[32].mxu1 %v10676_v53  ;;  %v21951_v53 = vld [vmem:[%s22652_s9 + $0x2d0] sm:$0xff]  }
0x11c2   : > { %14147 = vmatpush3.bf16.msra.mxu0 %v21737_v47  ;;  %14163 = vmatpush3.bf16.msra.mxu1 %v21743_v19  ;;  %24343 = vst [vmem:[#allocation97_spill] sm:$0xff] %v21951_v53 }
0x11c3   : > { %10914 = vmatprep.mubr.bf16.mxu1 %v10681_v60  ;;  %14148 = vmatprep.subr.bf16.mxu0 %v21749_v28  ;;  %v21957_v60 = vld [vmem:[%s22652_s9 + $0x228] sm:$0xff]  }
0x11c4   : > { %14164 = vmatprep.subr.bf16.mxu1 %v21755_v6  ;;  %24344 = vst [vmem:[#allocation98_spill] sm:$0xff] %v21957_v60 }
0x11c6   : > { %14149 = vmatpush3.bf16.msra.mxu0 %v21933_v20  ;;  %14165 = vmatpush3.bf16.msra.mxu1 %v21939_v61  ;;  %v21963_v61 = vld [vmem:[%s22652_s9 + $0x290] sm:$0xff]  }
0x11c7   : > { %14150 = vmatprep.subr.bf16.mxu0 %v21945_v13  ;;  %14166 = vmatprep.subr.bf16.mxu1 %v21951_v53  ;;  %24345 = vst [vmem:[#allocation15_spill] sm:$0xff] %v21963_v61  ;;  %v21969_v13 = vld [vmem:[%s22652_s9 + $0x270] sm:$0xff]   ;;  %v21975_v53 = vld [vmem:[%s22652_s9 + $0x2d8] sm:$0xff]  }
0x11c8   : > { %24346 = vst [vmem:[#allocation77_spill] sm:$0xff] %v21969_v13  ;;  %24347 = vst [vmem:[#allocation78_spill] sm:$0xff] %v21975_v53 }
0x11ca   : > { %14151 = vmatpush3.bf16.msra.mxu0 %v21957_v60  ;;  %14167 = vmatpush3.bf16.msra.mxu1 %v21963_v61  ;;  %v21981_v60 = vld [vmem:[%s22652_s9 + $0x230] sm:$0xff]   ;;  %v21987_v61 = vld [vmem:[%s22652_s9 + $0x298] sm:$0xff]  }
0x11cb   : > { %14152 = vmatprep.subr.bf16.mxu0 %v21969_v13  ;;  %14168 = vmatprep.subr.bf16.mxu1 %v21975_v53  ;;  %24348 = vst [vmem:[#allocation79_spill] sm:$0xff] %v21981_v60  ;;  %24349 = vst [vmem:[#allocation2_spill] sm:$0xff] %v21987_v61  ;;  %v21993_v13 = vld [vmem:[%s22652_s9 + $0x278] sm:$0xff]   ;;  %v21999_v53 = vld [vmem:[%s22652_s9 + $0x2e0] sm:$0xff]  }
0x11cc   : > { %24350 = vst [vmem:[#allocation20_spill] sm:$0xff] %v21993_v13  ;;  %24351 = vst [vmem:[#allocation75_spill] sm:$0xff] %v21999_v53 }
0x11ce   : > { %14153 = vmatpush3.bf16.msra.mxu0 %v21981_v60  ;;  %14169 = vmatpush3.bf16.msra.mxu1 %v21987_v61  ;;  %v22005_v60 = vld [vmem:[%s22652_s9 + $0x238] sm:$0xff]   ;;  %v22011_v61 = vld [vmem:[%s22652_s9 + $0x2a0] sm:$0xff]  }
0x11cf   : > { %14154 = vmatprep.subr.bf16.mxu0 %v21993_v13  ;;  %14170 = vmatprep.subr.bf16.mxu1 %v21999_v53  ;;  %24352 = vst [vmem:[#allocation47_spill] sm:$0xff] %v22005_v60  ;;  %24353 = vst [vmem:[#allocation48_spill] sm:$0xff] %v22011_v61  ;;  %v10678_v13 = vpack.c.bf16 %v21892_v44, %v21892_v44  ;;  %v22019_v53 = vld [vmem:[%s22652_s9 + $0x2e8] sm:$0xff]   ;;  %v22033_v44 = vld [vmem:[%s22652_s9 + $0x2f0] sm:$0xff]  }
0x11d0   : > { %24354 = vst [vmem:[#allocation76_spill] sm:$0xff] %v22019_v53  ;;  %24356 = vst [vmem:[#allocation94_spill] sm:$0xff] %v22033_v44 }
0x11d2   : > { %14155 = vmatpush3.bf16.msra.mxu0 %v22005_v60  ;;  %14171 = vmatpush3.bf16.msra.mxu1 %v22011_v61  ;;  %v22026_v60 = vld [vmem:[%s22652_s9 + $0x2a8] sm:$0xff]  }
0x11d3   : > { %14172 = vmatprep.subr.bf16.mxu1 %v22019_v53  ;;  %10939 = vmatprep.subr.bf16.mxu0 %v21036_v31  ;;  %24355 = vst [vmem:[#allocation88_spill] sm:$0xff] %v22026_v60  ;;  %v22041_v31 = vld [vmem:[%s22652_s9 + $0x2b0] sm:$0xff]  }
0x11d4   : > { %24357 = vst [vmem:[#allocation96_spill] sm:$0xff] %v22041_v31 }
0x11d5   : > { %10875 = vmatmul.mubr.bf16.vlgmr.msra.gmra.mrb[24].mxu0 %v10678_v13  ;;  %v24360_v13 = vld [vmem:[#allocation21_spill] sm:$0xff] }
0x11d6   : > { %14173 = vmatpush3.bf16.msra.mxu1 %v22026_v60  ;;  %10940 = vmatpush1.bf16.msra.mxu0 %v21043_v41  ;;  %v22048_v41 = vld [vmem:[%s22652_s9 + $0x2f8] sm:$0xff]  }
0x11d7   : > { %14174 = vmatprep.subr.bf16.mxu1 %v22033_v44  ;;  %10941 = vmatprep.subr.bf16.mxu0 %v21050_v62  ;;  %24358 = vst [vmem:[#allocation87_spill] sm:$0xff] %v22048_v41  ;;  %v22055_v62 = vld [vmem:[%s22652_s9 + $0x2b8] sm:$0xff]  }
0x11d8   : > { %10971 = vmatprep.mubr.bf16.mxu0 %v24161_v30  ;;  %24359 = vst [vmem:[#allocation90_spill] sm:$0xff] %v22055_v62  ;;  %v24394_v44 = vld [vmem:[#allocation45_spill] sm:$0xff] }
0x11da   : > { %14175 = vmatpush3.bf16.msra.mxu1 %v22041_v31  ;;  %10942 = vmatpush1.bf16.msra.mxu0 %v21058_v26  ;;  %v10680_v26 = vpack.c.bf16 %v21909_v2, %v21909_v2  ;;  %v24363_v31 = vld [vmem:[#allocation19_spill] sm:$0xff] }
0x11db   : > { %14176 = vmatprep.subr.bf16.mxu1 %v22048_v41  ;;  %10943 = vmatprep.subr.bf16.mxu0 %v21065_v17  ;;  %v24361_v17 = vld [vmem:[#allocation80_spill] sm:$0xff]  ;;  %v24362_v41 = vld [vmem:[#allocation82_spill] sm:$0xff]  ;;  %v24368_v2 = vld [vmem:[#allocation11_spill] sm:$0xff] }
0x11de   : > { %14177 = vmatpush3.bf16.msra.mxu1 %v22055_v62  ;;  %10944 = vmatpush1.bf16.msra.mxu0 %v21072_v9  ;;  %v24364_v62 = vld [vmem:[#allocation6_spill] sm:$0xff]  ;;  %v24365_v9 = vld [vmem:[#allocation7_spill] sm:$0xff] }
0x11df   : > { %10980 = vmatprep.subr.bf16.mxu1 %v21080_v29  ;;  %11021 = vmatprep.subr.bf16.mxu0 %v21086_v56  ;;  %v24366_v29 = vld [vmem:[#allocation9_spill] sm:$0xff]  ;;  %v24367_v56 = vld [vmem:[#allocation10_spill] sm:$0xff] }
0x11e1   : > { %10915 = vmatmul.mubr.bf16.vlgmr.msra.gmra.mrb[36].mxu1 %v10680_v26  ;;  %12710 = vmatmul.mubr.msk.bf16.vlgmr.msra.gmra.mrb[28].mxu0 %vm1806_vm6, %v24360_v13  ;;  %v24369_v26 = vld [vmem:[#allocation12_spill] sm:$0xff] }
0x11e2   : > { %10981 = vmatpush1.bf16.msra.mxu1 %v24361_v17  ;;  %11022 = vmatpush1.bf16.msra.mxu0 %v24362_v41  ;;  %v24370_v17 = vld [vmem:[#allocation14_spill] sm:$0xff]  ;;  %v24371_v41 = vld [vmem:[#allocation23_spill] sm:$0xff] }
0x11e3   : > { %10982 = vmatprep.subr.bf16.mxu1 %v24363_v31  ;;  %11023 = vmatprep.subr.bf16.mxu0 %v24364_v62  ;;  %v24372_v31 = vld [vmem:[#allocation22_spill] sm:$0xff]  ;;  %v24373_v62 = vld [vmem:[#allocation25_spill] sm:$0xff] }
0x11e4   : > { %11012 = vmatprep.mubr.bf16.mxu1 %v24161_v30  ;;  %11053 = vmatprep.mubr.bf16.mxu0 %v24161_v30 }
0x11e6   : > { %10983 = vmatpush1.bf16.msra.mxu1 %v24365_v9  ;;  %11024 = vmatpush1.bf16.msra.mxu0 %v24366_v29  ;;  %v24374_v9 = vld [vmem:[#allocation24_spill] sm:$0xff]  ;;  %v24375_v29 = vld [vmem:[#allocation27_spill] sm:$0xff] }
0x11e7   : > { %10984 = vmatprep.subr.bf16.mxu1 %v24367_v56  ;;  %11025 = vmatprep.subr.bf16.mxu0 %v24368_v2  ;;  %v24376_v56 = vld [vmem:[#allocation26_spill] sm:$0xff]  ;;  %v24377_v2 = vld [vmem:[#allocation29_spill] sm:$0xff] }
0x11ea   : > { %10985 = vmatpush1.bf16.msra.mxu1 %v24369_v26  ;;  %11026 = vmatpush1.bf16.msra.mxu0 %v24370_v17  ;;  %v24378_v26 = vld [vmem:[#allocation28_spill] sm:$0xff]  ;;  %v24379_v17 = vld [vmem:[#allocation31_spill] sm:$0xff] }
0x11eb   : > { %11062 = vmatprep.subr.bf16.mxu1 %v24371_v41  ;;  %11103 = vmatprep.subr.bf16.mxu0 %v24372_v31  ;;  %v24380_v41 = vld [vmem:[#allocation30_spill] sm:$0xff]  ;;  %v24381_v31 = vld [vmem:[#allocation33_spill] sm:$0xff] }
0x11ed   : > { %12711 = vmatmul.mubr.msk.bf16.vlgmr.msra.gmra.mrb[40].mxu1 %vm1806_vm6, %v24360_v13  ;;  %12712 = vmatmul.mubr.msk.bf16.vlgmr.msra.gmra.mrb[32].mxu0 %vm1806_vm6, %v24360_v13 }
0x11ee   : > { %11063 = vmatpush1.bf16.msra.mxu1 %v24373_v62  ;;  %11104 = vmatpush1.bf16.msra.mxu0 %v24374_v9  ;;  %v24382_v62 = vld [vmem:[#allocation32_spill] sm:$0xff]  ;;  %v24383_v9 = vld [vmem:[#allocation35_spill] sm:$0xff] }
0x11ef   : > { %11064 = vmatprep.subr.bf16.mxu1 %v24375_v29  ;;  %11105 = vmatprep.subr.bf16.mxu0 %v24376_v56  ;;  %v24384_v29 = vld [vmem:[#allocation34_spill] sm:$0xff]  ;;  %v24385_v56 = vld [vmem:[#allocation37_spill] sm:$0xff] }
0x11f0   : > { %11094 = vmatprep.mubr.bf16.mxu1 %v24161_v30  ;;  %11135 = vmatprep.mubr.bf16.mxu0 %v24161_v30 }
0x11f2   : > { %11065 = vmatpush1.bf16.msra.mxu1 %v24377_v2  ;;  %11106 = vmatpush1.bf16.msra.mxu0 %v24378_v26  ;;  %v24386_v2 = vld [vmem:[#allocation36_spill] sm:$0xff]  ;;  %v24387_v26 = vld [vmem:[#allocation38_spill] sm:$0xff] }
0x11f3   : > { %11066 = vmatprep.subr.bf16.mxu1 %v24379_v17  ;;  %11107 = vmatprep.subr.bf16.mxu0 %v24380_v41  ;;  %v24388_v17 = vld [vmem:[#allocation39_spill] sm:$0xff]  ;;  %v24389_v41 = vld [vmem:[#allocation40_spill] sm:$0xff] }
0x11f6   : > { %11067 = vmatpush1.bf16.msra.mxu1 %v24381_v31  ;;  %11108 = vmatpush1.bf16.msra.mxu0 %v24382_v62  ;;  %v24390_v31 = vld [vmem:[#allocation41_spill] sm:$0xff]  ;;  %v24391_v62 = vld [vmem:[#allocation42_spill] sm:$0xff] }
0x11f7   : > { %11144 = vmatprep.subr.bf16.mxu1 %v24383_v9  ;;  %14184 = vmatprep.subr.bf16.mxu0 %v24384_v29  ;;  %v24392_v9 = vld [vmem:[#allocation43_spill] sm:$0xff]  ;;  %v24393_v29 = vld [vmem:[#allocation44_spill] sm:$0xff] }
0x11f9   : > { %12713 = vmatmul.mubr.msk.bf16.vlgmr.msra.gmra.mrb[44].mxu1 %vm1806_vm6, %v24360_v13  ;;  %12714 = vmatmul.mubr.msk.bf16.vlgmr.msra.gmra.mrb[36].mxu0 %vm1806_vm6, %v24360_v13 }
0x11fa   : > { %11145 = vmatpush1.bf16.msra.mxu1 %v24385_v56  ;;  %11176 = vmatprep.mubr.bf16.mxu1 %v24161_v30  ;;  %v24395_v56 = vld [vmem:[#allocation3_spill] sm:$0xff]  ;;  %v24396_v30 = vld [vmem:[#allocation4_spill] sm:$0xff] }
0x11fb   : > { %11146 = vmatprep.subr.bf16.mxu1 %v24386_v2  ;;  %14185 = vmatpush3.bf16.msra.mxu0 %v24387_v26  ;;  %v24397_v2 = vld [vmem:[#allocation50_spill] sm:$0xff]  ;;  %v24398_v26 = vld [vmem:[#allocation51_spill] sm:$0xff] }
0x11fc   : > { %14186 = vmatprep.subr.bf16.mxu0 %v24388_v17  ;;  %v24399_v17 = vld [vmem:[#allocation52_spill] sm:$0xff] }
0x11fe   : > { %11147 = vmatpush1.bf16.msra.mxu1 %v24389_v41  ;;  %v24400_v41 = vld [vmem:[#allocation5_spill] sm:$0xff] }
0x11ff   : > { %11148 = vmatprep.subr.bf16.mxu1 %v24390_v31  ;;  %14187 = vmatpush3.bf16.msra.mxu0 %v24391_v62  ;;  %v24401_v31 = vld [vmem:[#allocation46_spill] sm:$0xff]  ;;  %v24402_v62 = vld [vmem:[#allocation53_spill] sm:$0xff] }
0x1200   : > { %14188 = vmatprep.subr.bf16.mxu0 %v24392_v9  ;;  %v24404_v9 = vld [vmem:[#allocation55_spill] sm:$0xff] }
0x1202   : > { %11149 = vmatpush1.bf16.msra.mxu1 %v24393_v29  ;;  %v24406_v29 = vld [vmem:[#allocation57_spill] sm:$0xff] }
0x1203   : > { %14189 = vmatpush3.bf16.msra.mxu0 %v24394_v44  ;;  %14206 = vmatprep.subr.bf16.mxu1 %v24395_v56  ;;  %v24403_v44 = vld [vmem:[#allocation54_spill] sm:$0xff]  ;;  %v24408_v56 = vld [vmem:[#allocation59_spill] sm:$0xff] }
0x1204   : > { %14190 = vmatprep.subr.bf16.mxu0 %v24396_v30  ;;  %v24405_v30 = vld [vmem:[#allocation56_spill] sm:$0xff] }
0x1205   : > { %12715 = vmatmul.mubr.msk.bf16.vlgmr.msra.gmra.mrb[48].mxu1 %vm1806_vm6, %v24360_v13  ;;  %v24407_v13 = vld [vmem:[#allocation58_spill] sm:$0xff] }
0x1206   : > { %14207 = vmatpush3.bf16.msra.mxu1 %v24397_v2  ;;  %v24409_v2 = vld [vmem:[#allocation60_spill] sm:$0xff] }
0x1207   : > { %14191 = vmatpush3.bf16.msra.mxu0 %v24398_v26  ;;  %14208 = vmatprep.subr.bf16.mxu1 %v24399_v17  ;;  %v24410_v26 = vld [vmem:[#allocation61_spill] sm:$0xff]  ;;  %v24411_v17 = vld [vmem:[#allocation62_spill] sm:$0xff] }
0x1208   : > { %14192 = vmatprep.subr.bf16.mxu0 %v24400_v41  ;;  %v24412_v41 = vld [vmem:[#allocation63_spill] sm:$0xff] }
0x120a   : > { %14209 = vmatpush3.bf16.msra.mxu1 %v24401_v31  ;;  %v24413_v31 = vld [vmem:[#allocation64_spill] sm:$0xff] }
0x120b   : > { %14193 = vmatpush3.bf16.msra.mxu0 %v24402_v62  ;;  %14210 = vmatprep.subr.bf16.mxu1 %v24403_v44  ;;  %v24414_v62 = vld [vmem:[#allocation65_spill] sm:$0xff]  ;;  %v24415_v44 = vld [vmem:[#allocation66_spill] sm:$0xff] }
0x120c   : > { %14194 = vmatprep.subr.bf16.mxu0 %v24404_v9  ;;  %v24416_v9 = vld [vmem:[#allocation67_spill] sm:$0xff] }
0x120e   : > { %14211 = vmatpush3.bf16.msra.mxu1 %v24405_v30  ;;  %v24417_v30 = vld [vmem:[#allocation68_spill] sm:$0xff] }
0x120f   : > { %14195 = vmatpush3.bf16.msra.mxu0 %v24406_v29  ;;  %14212 = vmatprep.subr.bf16.mxu1 %v24407_v13  ;;  %v24418_v29 = vld [vmem:[#allocation69_spill] sm:$0xff]  ;;  %v24419_v13 = vld [vmem:[#allocation70_spill] sm:$0xff] }
0x1210   : > { %14196 = vmatprep.subr.bf16.mxu0 %v24408_v56  ;;  %v24420_v56 = vld [vmem:[#allocation71_spill] sm:$0xff] }
0x1212   : > { %14213 = vmatpush3.bf16.msra.mxu1 %v24409_v2  ;;  %v24421_v2 = vld [vmem:[#allocation72_spill] sm:$0xff] }
0x1213   : > { %14197 = vmatpush3.bf16.msra.mxu0 %v24410_v26  ;;  %14214 = vmatprep.subr.bf16.mxu1 %v24411_v17  ;;  %v24422_v26 = vld [vmem:[#allocation73_spill] sm:$0xff] }
0x1214   : > { %14198 = vmatprep.subr.bf16.mxu0 %v24412_v41 }
0x1216   : > { %14215 = vmatpush3.bf16.msra.mxu1 %v24413_v31 }
0x1217   : > { %14199 = vmatpush3.bf16.msra.mxu0 %v24414_v62  ;;  %14216 = vmatprep.subr.bf16.mxu1 %v24415_v44 }
0x1218   : > { %14228 = vmatprep.subr.bf16.mxu0 %v24416_v9 }
0x121a   : > { %14217 = vmatpush3.bf16.msra.mxu1 %v24417_v30 }
0x121b   : > { %14218 = vmatprep.subr.bf16.mxu1 %v24418_v29 }
0x121e   : > { %14219 = vmatpush3.bf16.msra.mxu1 %v24419_v13 }
0x121f   : > { %14220 = vmatprep.subr.bf16.mxu1 %v24420_v56 }
0x1222   : > { %14221 = vmatpush3.bf16.msra.mxu1 %v24421_v2 }
0x1223   : > { %14250 = vmatprep.subr.bf16.mxu1 %v24422_v26 }
0x1268   : > { %v14068_v17 = vpop.f32.mrb[16].mxu0 }
0x1269   : > { %v14069_v41 = vpop.f32.mrb[17].mxu0 }
0x126a   : > { %v14070_v31 = vadd.f32 %v14069_v41, %v14068_v17  ;;  %v14071_v62 = vpop.f32.mrb[18].mxu0 }
0x126b   : > { %v14072_v60 = vpop.f32.mrb[19].mxu0 }
0x1274   : > { %v14090_v44 = vpop.f32.mrb[28].mxu1 }
0x1275   : > { %v14091_v53 = vpop.f32.mrb[29].mxu1 }
0x1276   : > { %v14092_v9 = vadd.f32 %v14091_v53, %v14090_v44  ;;  %v14093_v61 = vpop.f32.mrb[30].mxu1 }
0x1277   : > { %v14094_v30 = vpop.f32.mrb[31].mxu1 }
0x1278   : > { %v10757_v20 = vadd.f32 %v14092_v9, %v14070_v31 }
0x1288   : > { %v14112_v29 = vpop.f32.mrb[20].mxu0 }
0x1289   : > { %v14113_v6 = vpop.f32.mrb[21].mxu0 }
0x128a   : > { %v14114_v13 = vadd.f32 %v14113_v6, %v14112_v29  ;;  %v14115_v28 = vpop.f32.mrb[22].mxu0 }
0x128b   : > { %v14116_v56 = vpop.f32.mrb[23].mxu0 }
0x128c   : > { %v10797_v19 = vadd.f32 %v14114_v13, %v10757_v20 }
0x1294   : > { %v14134_v2 = vpop.f32.mrb[32].mxu1 }
0x1295   : > { %v14135_v47 = vpop.f32.mrb[33].mxu1 }
0x1296   : > { %v14136_v26 = vadd.f32 %v14135_v47, %v14134_v2  ;;  %v14137_v54 = vpop.f32.mrb[34].mxu1 }
0x1297   : > { %v14138_v37 = vpop.f32.mrb[35].mxu1 }
0x1298   : > { %v10837_v17 = vadd.f32 %v14136_v26, %v10797_v19 }
0x12a8   : > { %v14156_v41 = vpop.f32.mrb[24].mxu0 }
0x12a9   : > { %v14157_v60 = vpop.f32.mrb[25].mxu0 }
0x12aa   : > { %v14158_v62 = vadd.f32 %v14157_v60, %v14156_v41  ;;  %v14159_v7 = vpop.f32.mrb[26].mxu0 }
0x12ab   : > { %v14160_v53 = vpop.f32.mrb[27].mxu0 }
0x12ac   : > { %v10877_v61 = vadd.f32 %v14158_v62, %v10837_v17 }
0x12b4   : > { %v14178_v44 = vpop.f32.mrb[36].mxu1  ;;  %v10973_v31 = vpop.f32.mrb[28].mxu0 }
0x12b5   : > { %v11185_v9 = vmul.f32 %v10973_v31, %v23530_v18  ;;  %v14179_v6 = vpop.f32.mrb[37].mxu1  ;;  %v10975_v28 = vpop.f32.mrb[29].mxu0 }
0x12b6   : > { %v14180_v30 = vadd.f32 %v14179_v6, %v14178_v44  ;;  %v11186_v20 = vmul.f32 %v10975_v28, %v23531_v10  ;;  %v14181_v29 = vpop.f32.mrb[38].mxu1  ;;  %v10977_v47 = vpop.f32.mrb[30].mxu0 }
0x12b7   : > { %v14182_v54 = vpop.f32.mrb[39].mxu1  ;;  %v10978_v37 = vpop.f32.mrb[31].mxu0  ;;  %v11197_v56 = vpack.c.bf16 %v11185_v9, %v11185_v9  ;;  %v24423_v47 = vld [vmem:[#allocation95_spill] sm:$0xff] }
0x12b8   : > { %v10917_v19 = vadd.f32 %v14180_v30, %v10877_v61  ;;  %v11198_v13 = vpack.c.bf16 %v11186_v20, %v11186_v20  ;;  %v24426_v54 = vld [vmem:[#allocation86_spill] sm:$0xff] }
0x12ba   : > { %v12732_v2 = vpack.c.bf16 %v10917_v19, %v10917_v19  ;;  %11241 = vmatprep.mubr.bf16.mxu0 %v11198_v13  ;;  %v24427_v19 = vld [vmem:[#allocation91_spill] sm:$0xff]  ;;  %v24428_v13 = vld [vmem:[#allocation92_spill] sm:$0xff] }
0x12bb   : > { %11242 = vmatmul.mubr.bf16.vlgmr.msra.gmra.mrb[40].mxu0 %v11197_v56 }
0x12bc   : > { %14229 = vmatpush3.bf16.msra.mxu0 %v21487_v12  ;;  %10926 = vrot.lane.b32.xlu1 %v12732_v2, %s15911_s11 }
0x12bd   : > { %14230 = vmatprep.subr.bf16.mxu0 %v21493_v40 }
0x12c0   : > { %14231 = vmatpush3.bf16.msra.mxu0 %v21499_v46  ;;  %v11014_v7 = vpop.f32.mrb[40].mxu1  ;;  %v11055_v26 = vpop.f32.mrb[32].mxu0 }
0x12c1   : > { %v11187_v17 = vmul.f32 %v11014_v7, %v23535_v23  ;;  %v11189_v41 = vmul.f32 %v11055_v26, %v23536_v25  ;;  %v11016_v60 = vpop.f32.mrb[41].mxu1  ;;  %v11057_v62 = vpop.f32.mrb[33].mxu0  ;;  %14232 = vmatprep.subr.bf16.mxu0 %v21509_v63  ;;  %v24438_v26 = vld [vmem:[#allocation89_spill] sm:$0xff] }
0x12c2   : > { %v11188_v53 = vmul.f32 %v11016_v60, %v17806_v51  ;;  %v11190_v12 = vmul.f32 %v11057_v62, %v18070_v59  ;;  %v11018_v61 = vpop.f32.mrb[42].mxu1  ;;  %v11059_v44 = vpop.f32.mrb[34].mxu0  ;;  %v24441_v60 = vld [vmem:[#allocation15_spill] sm:$0xff]  ;;  %v24442_v62 = vld [vmem:[#allocation77_spill] sm:$0xff] }
0x12c3   : > { %v11019_v31 = vpop.f32.mrb[43].mxu1  ;;  %v11060_v40 = vpop.f32.mrb[35].mxu0  ;;  %v11199_v6 = vpack.c.bf16 %v11187_v17, %v11187_v17  ;;  %v11201_v37 = vpack.c.bf16 %v11189_v41, %v11189_v41  ;;  %v24439_v17 = vld [vmem:[#allocation97_spill] sm:$0xff]  ;;  %v24440_v41 = vld [vmem:[#allocation98_spill] sm:$0xff]  ;;  %v24446_v44 = vld [vmem:[#allocation20_spill] sm:$0xff] }
0x12c4   : > { %v11200_v9 = vpack.c.bf16 %v11188_v53, %v11188_v53  ;;  %v11202_v46 = vpack.c.bf16 %v11190_v12, %v11190_v12  ;;  %14233 = vmatpush3.bf16.msra.mxu0 %v21517_v32  ;;  %v24443_v53 = vld [vmem:[#allocation78_spill] sm:$0xff]  ;;  %v24444_v12 = vld [vmem:[#allocation79_spill] sm:$0xff] }
0x12c5   : > { %14234 = vmatprep.subr.bf16.mxu0 %v21523_v38  ;;  %v24445_v61 = vld [vmem:[#allocation2_spill] sm:$0xff]  ;;  %v24447_v31 = vld [vmem:[#allocation75_spill] sm:$0xff] }
0x12c6   : > { %11281 = vmatprep.mubr.bf16.mxu1 %v11200_v9  ;;  %11321 = vmatprep.mubr.bf16.mxu0 %v11202_v46  ;;  %v24448_v40 = vld [vmem:[#allocation47_spill] sm:$0xff]  ;;  %v24449_v9 = vld [vmem:[#allocation48_spill] sm:$0xff] }
0x12c7   : > { %11282 = vmatmul.mubr.bf16.vlgmr.msra.gmra.mrb[52].mxu1 %v11199_v6  ;;  %v24450_v6 = vld [vmem:[#allocation76_spill] sm:$0xff] }
0x12c8   : > { %14235 = vmatpush3.bf16.msra.mxu0 %v21529_v0  ;;  %14251 = vmatpush3.bf16.msra.mxu1 %v21535_v11 }
0x12c9   : > { %14236 = vmatprep.subr.bf16.mxu0 %v21541_v14  ;;  %14252 = vmatprep.subr.bf16.mxu1 %v21547_v33 }
0x12cc   : > { %14237 = vmatpush3.bf16.msra.mxu0 %v21553_v15  ;;  %14253 = vmatpush3.bf16.msra.mxu1 %v24318_v21  ;;  %v11096_v63 = vpop.f32.mrb[44].mxu1  ;;  %v11137_v32 = vpop.f32.mrb[36].mxu0 }
0x12cd   : > { %v11191_v28 = vmul.f32 %v11096_v63, %v24319_v45  ;;  %v22163_v38 = vmul.f32 %v11137_v32, %v24320_v58  ;;  %v11098_v30 = vpop.f32.mrb[45].mxu1  ;;  %v11139_v20 = vpop.f32.mrb[37].mxu0  ;;  %14238 = vmatprep.subr.bf16.mxu0 %v24321_v52  ;;  %14254 = vmatprep.subr.bf16.mxu1 %v24322_v22  ;;  %v24424_v52 = vld [vmem:[#allocation99_spill] sm:$0xff]  ;;  %v24425_v22 = vld [vmem:[#allocation100_spill] sm:$0xff] }
0x12ce   : > { %v11192_v0 = vmul.f32 %v11098_v30, %v18074_v49  ;;  %v11194_v11 = vmul.f32 %v11139_v20, %v18078_v3  ;;  %v11100_v14 = vpop.f32.mrb[46].mxu1  ;;  %v11141_v33 = vpop.f32.mrb[38].mxu0  ;;  %v15788_v63 = vld [vmem:[%s22651_s8 + $0x4] ss:$48 sps:$4 sm:$0xff]   ;;  %v24453_v20 = vmov 0  }
0x12cf   : > { %v11101_v15 = vpop.f32.mrb[47].mxu1  ;;  %v11142_v21 = vpop.f32.mrb[39].mxu0  ;;  %v11205_v46 = vpack.c.bf16 %v22163_v38, %v22163_v38  ;;  %v24451_v32 = vld [vmem:[#allocation88_spill] sm:$0xff]  ;;  %v24452_v30 = vld [vmem:[#allocation94_spill] sm:$0xff]  ;;  %v24455_v14 = vld [vmem:[#allocation87_spill] sm:$0xff] }
0x12d0   : > { %v11204_v29 = vpack.c.bf16 %v11192_v0, %v11192_v0  ;;  %14239 = vmatpush3.bf16.msra.mxu0 %v21585_v5  ;;  %14255 = vmatpush3.bf16.msra.mxu1 %v21591_v16  ;;  %v11206_v2 = vpack.c.bf16 %v11194_v11, %v11194_v11  ;;  %v15790_v38 = vld [vmem:[%s22651_s8 + $0x64] ss:$48 sps:$4 sm:$0xff]   ;;  %v15791_v11 = vld [vmem:[%s22651_s8 + $0x60] ss:$48 sps:$4 sm:$0xff]  }
0x12d1   : > { %14240 = vmatprep.subr.bf16.mxu0 %v24323_v43  ;;  %14256 = vmatprep.subr.bf16.mxu1 %v24423_v47  ;;  %v24454_v0 = vld [vmem:[#allocation96_spill] sm:$0xff]  ;;  %v24456_v15 = vld [vmem:[#allocation90_spill] sm:$0xff]  ;;  %v15794_v47 = vld [vmem:[%s22651_s8 + $0xc] ss:$48 sps:$4 sm:$0xff]  }
0x12d2   : > { %11361 = vmatprep.mubr.bf16.mxu1 %v11204_v29  ;;  %v15792_v33 = vld [vmem:[%s22651_s8 + $0xc4] ss:$48 sps:$4 sm:$0xff]   ;;  %v15793_v21 = vld [vmem:[%s22651_s8 + $0xc0] ss:$48 sps:$4 sm:$0xff]  }
0x12d4   : > { %14241 = vmatpush3.bf16.msra.mxu0 %v24325_v4  ;;  %14257 = vmatpush3.bf16.msra.mxu1 %v24424_v52  ;;  %v15795_v52 = vld [vmem:[%s22651_s8 + $0x14] ss:$48 sps:$4 sm:$0xff]  }
0x12d5   : > { %14242 = vmatprep.subr.bf16.mxu0 %v24425_v22  ;;  %14258 = vmatprep.subr.bf16.mxu1 %v24426_v54  ;;  %v24457_v22 = vld [vmem:[#allocation16_spill] sm:$0xff]  ;;  %v15796_v54 = vld [vmem:[%s22651_s8 + $0x8] ss:$48 sps:$4 sm:$0xff]  }
0x12d8   : > { %14243 = vmatpush3.bf16.msra.mxu0 %v24329_v8  ;;  %14259 = vmatpush3.bf16.msra.mxu1 %v24330_v27  ;;  %v11178_v5 = vpop.f32.mrb[48].mxu1  ;;  %v24429_v8 = vld [vmem:[#allocation104_spill] sm:$0xff]  ;;  %v24430_v27 = vld [vmem:[#allocation105_spill] sm:$0xff] }
0x12d9   : > { %v22180_v16 = vmul.f32 %v11178_v5, %v24331_v24  ;;  %v11180_v43 = vpop.f32.mrb[49].mxu1  ;;  %14260 = vmatprep.subr.bf16.mxu1 %v24427_v19  ;;  %14272 = vmatprep.subr.bf16.mxu0 %v24428_v13  ;;  %v15797_v5 = vld [vmem:[%s22651_s8 + $0x10] ss:$48 sps:$4 sm:$0xff]   ;;  %v15802_v13 = vld [vmem:[%s22651_s8 + $0xcc] ss:$48 sps:$4 sm:$0xff]  }
0x12da   : > { %v11196_v4 = vmul.f32 %v11180_v43, %v18083_v1  ;;  %v11182_v56 = vpop.f32.mrb[50].mxu1  ;;  %v15800_v43 = vld [vmem:[%s22651_s8 + $0x68] ss:$48 sps:$4 sm:$0xff]   ;;  %v15801_v19 = vld [vmem:[%s22651_s8 + $0x70] ss:$48 sps:$4 sm:$0xff]  }
0x12db   : > { %11322 = vmatmul.mubr.bf16.vlgmr.msra.gmra.mrb[44].mxu0 %v11201_v37  ;;  %v11183_v7 = vpop.f32.mrb[51].mxu1  ;;  %v11207_v29 = vpack.c.bf16 %v22180_v16, %v22180_v16  ;;  %v15798_v37 = vld [vmem:[%s22651_s8 + $0x6c] ss:$48 sps:$4 sm:$0xff]   ;;  %v15799_v16 = vld [vmem:[%s22651_s8 + $0x74] ss:$48 sps:$4 sm:$0xff]  }
0x12dc   : > { %14261 = vmatpush3.bf16.msra.mxu1 %v21663_v35  ;;  %14273 = vmatpush3.bf16.msra.mxu0 %v21669_v50  ;;  %v11203_v35 = vpack.c.bf16 %v11191_v28, %v11191_v28  ;;  %v24431_v50 = vld [vmem:[#allocation106_spill] sm:$0xff]  ;;  %v15804_v56 = vld [vmem:[%s22651_s8 + $0xc8] ss:$48 sps:$4 sm:$0xff]   ;;  %v15806_v7 = vld [vmem:[%s22651_s8 + $0x1c] ss:$48 sps:$4 sm:$0xff]  }
0x12dd   : > { %11401 = vmatprep.mubr.bf16.mxu0 %v11206_v2  ;;  %14262 = vmatprep.subr.bf16.mxu1 %v21675_v42  ;;  %v11208_v42 = vpack.c.bf16 %v11196_v4, %v11196_v4  ;;  %v15789_v28 = vld [vmem:[%s22651_s8] ss:$48 sps:$4 sm:$0xff]   ;;  %v15803_v4 = vld [vmem:[%s22651_s8 + $0xd4] ss:$48 sps:$4 sm:$0xff]  }
0x12de   : > { %14274 = vmatprep.subr.bf16.mxu0 %v24333_v57  ;;  %v24432_v57 = vld [vmem:[#allocation17_spill] sm:$0xff]  ;;  %v15805_v2 = vld [vmem:[%s22651_s8 + $0xd0] ss:$48 sps:$4 sm:$0xff]  }
0x12e0   : > { %14263 = vmatpush3.bf16.msra.mxu1 %v24334_v55  ;;  %14275 = vmatpush3.bf16.msra.mxu0 %v24335_v36  ;;  %v24433_v55 = vld [vmem:[#allocation18_spill] sm:$0xff]  ;;  %v24434_v36 = vld [vmem:[#allocation81_spill] sm:$0xff] }
0x12e1   : > { %14264 = vmatprep.subr.bf16.mxu1 %v24336_v34  ;;  %14276 = vmatprep.subr.bf16.mxu0 %v24337_v48  ;;  %v24435_v34 = vld [vmem:[#allocation83_spill] sm:$0xff]  ;;  %v24436_v48 = vld [vmem:[#allocation84_spill] sm:$0xff] }
0x12e4   : > { %14265 = vmatpush3.bf16.msra.mxu1 %v24338_v39  ;;  %14277 = vmatpush3.bf16.msra.mxu0 %v24429_v8  ;;  %v24437_v39 = vld [vmem:[#allocation85_spill] sm:$0xff]  ;;  %v15807_v8 = vld [vmem:[%s22651_s8 + $0x24] ss:$48 sps:$4 sm:$0xff]  }
0x12e5   : > { %14278 = vmatprep.subr.bf16.mxu0 %v24430_v27  ;;  %14294 = vmatprep.subr.bf16.mxu1 %v24431_v50  ;;  %v15809_v27 = vld [vmem:[%s22651_s8 + $0x20] ss:$48 sps:$4 sm:$0xff]   ;;  %v15810_v50 = vld [vmem:[%s22651_s8 + $0x7c] ss:$48 sps:$4 sm:$0xff]  }
0x12e7   : > { %11362 = vmatmul.mubr.bf16.vlgmr.msra.gmra.mrb[56].mxu1 %v11203_v35  ;;  %v15808_v35 = vld [vmem:[%s22651_s8 + $0x18] ss:$48 sps:$4 sm:$0xff]  }
0x12e8   : > { %14279 = vmatpush3.bf16.msra.mxu0 %v24432_v57  ;;  %14295 = vmatpush3.bf16.msra.mxu1 %v24433_v55  ;;  %v15812_v57 = vld [vmem:[%s22651_s8 + $0x78] ss:$48 sps:$4 sm:$0xff]   ;;  %v15813_v55 = vld [vmem:[%s22651_s8 + $0x80] ss:$48 sps:$4 sm:$0xff]  }
0x12e9   : > { %11441 = vmatprep.mubr.bf16.mxu1 %v11208_v42  ;;  %14280 = vmatprep.subr.bf16.mxu0 %v24434_v36  ;;  %v15811_v42 = vld [vmem:[%s22651_s8 + $0x84] ss:$48 sps:$4 sm:$0xff]   ;;  %v15814_v36 = vld [vmem:[%s22651_s8 + $0xdc] ss:$48 sps:$4 sm:$0xff]  }
0x12ea   : > { %14296 = vmatprep.subr.bf16.mxu1 %v24435_v34  ;;  %v15815_v34 = vld [vmem:[%s22651_s8 + $0xe4] ss:$48 sps:$4 sm:$0xff]  }
0x12ec   : > { %14281 = vmatpush3.bf16.msra.mxu0 %v24436_v48  ;;  %14297 = vmatpush3.bf16.msra.mxu1 %v24437_v39 }
0x12ed   : > { %14282 = vmatprep.subr.bf16.mxu0 %v24438_v26  ;;  %14298 = vmatprep.subr.bf16.mxu1 %v24439_v17 }
0x12f0   : > { %14283 = vmatpush3.bf16.msra.mxu0 %v24440_v41  ;;  %14299 = vmatpush3.bf16.msra.mxu1 %v24441_v60 }
0x12f1   : > { %14284 = vmatprep.subr.bf16.mxu0 %v24442_v62  ;;  %14300 = vmatprep.subr.bf16.mxu1 %v24443_v53 }
0x12f4   : > { %14285 = vmatpush3.bf16.msra.mxu0 %v24444_v12  ;;  %14301 = vmatpush3.bf16.msra.mxu1 %v24445_v61 }
0x12f5   : > { %14286 = vmatprep.subr.bf16.mxu0 %v24446_v44  ;;  %14302 = vmatprep.subr.bf16.mxu1 %v24447_v31 }
0x12f8   : > { %14287 = vmatpush3.bf16.msra.mxu0 %v24448_v40  ;;  %14303 = vmatpush3.bf16.msra.mxu1 %v24449_v9 }
0x12f9   : > { %14304 = vmatprep.subr.bf16.mxu1 %v24450_v6  ;;  %11462 = vmatprep.subr.bf16.mxu0 %v15788_v63  ;;  %v15817_v63 = vld [vmem:[%s22651_s8 + $0xe0] ss:$48 sps:$4 sm:$0xff]  }
0x12fb   : > { %11402 = vmatmul.mubr.bf16.vlgmr.msra.gmra.mrb[48].mxu0 %v11205_v46  ;;  %v15816_v46 = vld [vmem:[%s22651_s8 + $0xd8] ss:$48 sps:$4 sm:$0xff]  }
0x12fc   : > { %14305 = vmatpush3.bf16.msra.mxu1 %v24451_v32  ;;  %11463 = vmatpush1.bf16.msra.mxu0 %v15789_v28  ;;  %v15818_v28 = vld [vmem:[%s22651_s8 + $0x2c] ss:$48 sps:$4 sm:$0xff]  }
0x12fd   : > { %14306 = vmatprep.subr.bf16.mxu1 %v24452_v30  ;;  %11464 = vmatprep.subr.bf16.mxu0 %v15790_v38  ;;  %v15819_v38 = vld [vmem:[%s22652_s9 + $0x40] sm:$0xff]  }
0x12fe   : > { %11494 = vmatprep.mubr.bf16.mxu0 %v24453_v20 }
0x1300   : > { %14307 = vmatpush3.bf16.msra.mxu1 %v24454_v0  ;;  %11465 = vmatpush1.bf16.msra.mxu0 %v15791_v11  ;;  %v15820_v11 = vld [vmem:[%s22651_s8 + $0x28] ss:$48 sps:$4 sm:$0xff]  }
0x1301   : > { %14308 = vmatprep.subr.bf16.mxu1 %v24455_v14  ;;  %11466 = vmatprep.subr.bf16.mxu0 %v15792_v33  ;;  %v15821_v33 = vld [vmem:[%s22651_s8 + $0x8c] ss:$48 sps:$4 sm:$0xff]  }
0x1304   : > { %14309 = vmatpush3.bf16.msra.mxu1 %v24456_v15  ;;  %11467 = vmatpush1.bf16.msra.mxu0 %v15793_v21  ;;  %v15822_v21 = vld [vmem:[%s22652_s9] sm:$0xff]  }
0x1305   : > { %11503 = vmatprep.subr.bf16.mxu1 %v15794_v47  ;;  %11544 = vmatprep.subr.bf16.mxu0 %v15795_v52  ;;  %v15824_v47 = vld [vmem:[%s22651_s8 + $0x88] ss:$48 sps:$4 sm:$0xff]  }
0x1306   : > { %v15826_v52 = vld [vmem:[%s22652_s9 + $0x8] sm:$0xff]  }
0x1307   : > { %11442 = vmatmul.mubr.bf16.vlgmr.msra.gmra.mrb[60].mxu1 %v11207_v29  ;;  %12717 = vmatmul.mubr.msk.bf16.vlgmr.msra.gmra.mrb[52].mxu0 %vm1806_vm6, %v24457_v22  ;;  %v15823_v29 = vld [vmem:[%s22652_s9 + $0x48] sm:$0xff]  }
0x1308   : > { %11504 = vmatpush1.bf16.msra.mxu1 %v15796_v54  ;;  %11545 = vmatpush1.bf16.msra.mxu0 %v15797_v5  ;;  %v15827_v54 = vld [vmem:[%s22652_s9 + $0x50] sm:$0xff]   ;;  %v15828_v5 = vld [vmem:[%s22651_s8 + $0xe8] ss:$48 sps:$4 sm:$0xff]  }
0x1309   : > { %11505 = vmatprep.subr.bf16.mxu1 %v15798_v37  ;;  %11546 = vmatprep.subr.bf16.mxu0 %v15799_v16  ;;  %v15829_v37 = vld [vmem:[%s22652_s9 + $0x10] sm:$0xff]   ;;  %v15830_v16 = vld [vmem:[%s22652_s9 + $0xc0] sm:$0xff]  }
0x130a   : > { %11535 = vmatprep.mubr.bf16.mxu1 %v24453_v20  ;;  %11576 = vmatprep.mubr.bf16.mxu0 %v24453_v20 }
0x130c   : > { %11506 = vmatpush1.bf16.msra.mxu1 %v15800_v43  ;;  %11547 = vmatpush1.bf16.msra.mxu0 %v15801_v19  ;;  %v15831_v43 = vld [vmem:[%s22652_s9 + $0x58] sm:$0xff]   ;;  %v15832_v19 = vld [vmem:[%s22652_s9 + $0x80] sm:$0xff]  }
0x130d   : > { %11507 = vmatprep.subr.bf16.mxu1 %v15802_v13  ;;  %11548 = vmatprep.subr.bf16.mxu0 %v15803_v4  ;;  %v15833_v13 = vld [vmem:[%s22652_s9 + $0x18] sm:$0xff]   ;;  %v15834_v4 = vld [vmem:[%s22652_s9 + $0xc8] sm:$0xff]  }
0x1310   : > { %11508 = vmatpush1.bf16.msra.mxu1 %v15804_v56  ;;  %11549 = vmatpush1.bf16.msra.mxu0 %v15805_v2  ;;  %v15836_v2 = vld [vmem:[%s22652_s9 + $0x88] sm:$0xff]  }
0x1311   : > { %11585 = vmatprep.subr.bf16.mxu1 %v15806_v7  ;;  %11626 = vmatprep.subr.bf16.mxu0 %v15807_v8  ;;  %v15837_v7 = vld [vmem:[%s22652_s9 + $0x20] sm:$0xff]   ;;  %v15838_v8 = vld [vmem:[%s22652_s9 + $0xd0] sm:$0xff]  }
0x1313   : > { %12718 = vmatmul.mubr.msk.bf16.vlgmr.msra.gmra.mrb[64].mxu1 %vm1806_vm6, %v24457_v22  ;;  %12719 = vmatmul.mubr.msk.bf16.vlgmr.msra.gmra.mrb[56].mxu0 %vm1806_vm6, %v24457_v22 }
0x1314   : > { %11586 = vmatpush1.bf16.msra.mxu1 %v15808_v35  ;;  %11627 = vmatpush1.bf16.msra.mxu0 %v15809_v27  ;;  %v15839_v35 = vld [vmem:[%s22652_s9 + $0x68] sm:$0xff]   ;;  %v15840_v27 = vld [vmem:[%s22652_s9 + $0x90] sm:$0xff]  }
0x1315   : > { %11587 = vmatprep.subr.bf16.mxu1 %v15810_v50  ;;  %11628 = vmatprep.subr.bf16.mxu0 %v15811_v42  ;;  %v15841_v50 = vld [vmem:[%s22652_s9 + $0x28] sm:$0xff]   ;;  %v15842_v42 = vld [vmem:[%s22652_s9 + $0xd8] sm:$0xff]  }
0x1316   : > { %11617 = vmatprep.mubr.bf16.mxu1 %v24453_v20  ;;  %11658 = vmatprep.mubr.bf16.mxu0 %v24453_v20 }
0x1318   : > { %11588 = vmatpush1.bf16.msra.mxu1 %v15812_v57  ;;  %11629 = vmatpush1.bf16.msra.mxu0 %v15813_v55  ;;  %v15843_v57 = vld [vmem:[%s22652_s9 + $0x70] sm:$0xff]   ;;  %v15844_v55 = vld [vmem:[%s22652_s9 + $0x98] sm:$0xff]  }
0x1319   : > { %11589 = vmatprep.subr.bf16.mxu1 %v15814_v36  ;;  %11630 = vmatprep.subr.bf16.mxu0 %v15815_v34  ;;  %v15845_v36 = vld [vmem:[%s22652_s9 + $0x30] sm:$0xff]   ;;  %v15846_v34 = vld [vmem:[%s22652_s9 + $0xe0] sm:$0xff]  }
0x131c   : > { %11590 = vmatpush1.bf16.msra.mxu1 %v15816_v46  ;;  %11631 = vmatpush1.bf16.msra.mxu0 %v15817_v63  ;;  %v15847_v46 = vld [vmem:[%s22652_s9 + $0x78] sm:$0xff]   ;;  %v15848_v63 = vld [vmem:[%s22652_s9 + $0xa0] sm:$0xff]  }
0x131d   : > { %11667 = vmatprep.subr.bf16.mxu1 %v15818_v28  ;;  %14316 = vmatprep.subr.bf16.mxu0 %v15819_v38  ;;  %v15849_v28 = vld [vmem:[%s22652_s9 + $0x38] sm:$0xff]   ;;  %v15850_v38 = vld [vmem:[%s22652_s9 + $0xe8] sm:$0xff]  }
0x131f   : > { %12720 = vmatmul.mubr.msk.bf16.vlgmr.msra.gmra.mrb[68].mxu1 %vm1806_vm6, %v24457_v22  ;;  %12721 = vmatmul.mubr.msk.bf16.vlgmr.msra.gmra.mrb[60].mxu0 %vm1806_vm6, %v24457_v22 }
0x1320   : > { %11668 = vmatpush1.bf16.msra.mxu1 %v15820_v11  ;;  %11699 = vmatprep.mubr.bf16.mxu1 %v24453_v20  ;;  %v15825_v20 = vld [vmem:[%s22651_s8 + $0xec] ss:$48 sps:$4 sm:$0xff]   ;;  %v15851_v11 = vld [vmem:[%s22652_s9 + $0x140] sm:$0xff]  }
0x1321   : > { %11669 = vmatprep.subr.bf16.mxu1 %v15821_v33  ;;  %14317 = vmatpush3.bf16.msra.mxu0 %v15822_v21  ;;  %v15852_v33 = vld [vmem:[%s22652_s9 + $0xa8] sm:$0xff]   ;;  %v15853_v21 = vld [vmem:[%s22652_s9 + $0xf0] sm:$0xff]  }
0x1322   : > { %14318 = vmatprep.subr.bf16.mxu0 %v15823_v29  ;;  %v15854_v29 = vld [vmem:[%s22652_s9 + $0xb0] sm:$0xff]  }
0x1324   : > { %11670 = vmatpush1.bf16.msra.mxu1 %v15824_v47  ;;  %v15855_v47 = vld [vmem:[%s22652_s9 + $0xf8] sm:$0xff]  }
0x1325   : > { %11671 = vmatprep.subr.bf16.mxu1 %v15825_v20  ;;  %14319 = vmatpush3.bf16.msra.mxu0 %v15826_v52  ;;  %v15856_v20 = vld [vmem:[%s22652_s9 + $0xb8] sm:$0xff]   ;;  %v15857_v52 = vld [vmem:[%s22652_s9 + $0x1c0] sm:$0xff]  }
0x1326   : > { %14320 = vmatprep.subr.bf16.mxu0 %v15827_v54 }
0x1328   : > { %11672 = vmatpush1.bf16.msra.mxu1 %v15828_v5 }
0x1329   : > { %14321 = vmatpush3.bf16.msra.mxu0 %v15829_v37  ;;  %14338 = vmatprep.subr.bf16.mxu1 %v15830_v16 }
0x132a   : > { %14322 = vmatprep.subr.bf16.mxu0 %v15831_v43 }
0x132b   : > { %12722 = vmatmul.mubr.msk.bf16.vlgmr.msra.gmra.mrb[72].mxu1 %vm1806_vm6, %v24457_v22  ;;  %v15835_v22 = vld [vmem:[%s22652_s9 + $0x60] sm:$0xff]  }
0x132c   : > { %14339 = vmatpush3.bf16.msra.mxu1 %v15832_v19 }
0x132d   : > { %14323 = vmatpush3.bf16.msra.mxu0 %v15833_v13  ;;  %14340 = vmatprep.subr.bf16.mxu1 %v15834_v4 }
0x132e   : > { %v10927_v56 = vpop.permute.xlu1 %10926  ;;  %14324 = vmatprep.subr.bf16.mxu0 %v15835_v22 }
0x132f   : > { %10929 = vst.msk [vmem:[%s18578_s24 + $0x8] sm:$0xf] %vm6745_vm0, %v10927_v56 }
0x1330   : > { %14341 = vmatpush3.bf16.msra.mxu1 %v15836_v2 }
0x1331   : > { %14325 = vmatpush3.bf16.msra.mxu0 %v15837_v7  ;;  %14342 = vmatprep.subr.bf16.mxu1 %v15838_v8 }
0x1332   : > { %14326 = vmatprep.subr.bf16.mxu0 %v15839_v35 }
0x1334   : > { %14343 = vmatpush3.bf16.msra.mxu1 %v15840_v27 }
0x1335   : > { %14327 = vmatpush3.bf16.msra.mxu0 %v15841_v50  ;;  %14344 = vmatprep.subr.bf16.mxu1 %v15842_v42 }
0x1336   : > { %14328 = vmatprep.subr.bf16.mxu0 %v15843_v57 }
0x1338   : > { %14345 = vmatpush3.bf16.msra.mxu1 %v15844_v55 }
0x1339   : > { %14329 = vmatpush3.bf16.msra.mxu0 %v15845_v36  ;;  %14346 = vmatprep.subr.bf16.mxu1 %v15846_v34 }
0x133a   : > { %14330 = vmatprep.subr.bf16.mxu0 %v15847_v46 }
0x133c   : > { %14347 = vmatpush3.bf16.msra.mxu1 %v15848_v63 }
0x133d   : > { %14331 = vmatpush3.bf16.msra.mxu0 %v15849_v28  ;;  %14348 = vmatprep.subr.bf16.mxu1 %v15850_v38 }
0x133e   : > { %14360 = vmatprep.subr.bf16.mxu0 %v15851_v11 }
0x1340   : > { %14349 = vmatpush3.bf16.msra.mxu1 %v15852_v33 }
0x1341   : > { %14350 = vmatprep.subr.bf16.mxu1 %v15853_v21 }
0x1344   : > { %14351 = vmatpush3.bf16.msra.mxu1 %v15854_v29 }
0x1345   : > { %14352 = vmatprep.subr.bf16.mxu1 %v15855_v47 }
0x1348   : > { %14353 = vmatpush3.bf16.msra.mxu1 %v15856_v20 }
0x1349   : > { %14382 = vmatprep.subr.bf16.mxu1 %v15857_v52 }
0x138e   : > { %v14200_v54 = vpop.f32.mrb[40].mxu0 }
0x138f   : > { %v14201_v5 = vpop.f32.mrb[41].mxu0 }
0x1390   : > { %v14202_v37 = vadd.f32 %v14201_v5, %v14200_v54  ;;  %v14203_v16 = vpop.f32.mrb[42].mxu0 }
0x1391   : > { %v14204_v43 = vpop.f32.mrb[43].mxu0 }
0x139a   : > { %v14222_v19 = vpop.f32.mrb[52].mxu1 }
0x139b   : > { %v14223_v13 = vpop.f32.mrb[53].mxu1 }
0x139c   : > { %v14224_v4 = vadd.f32 %v14223_v13, %v14222_v19  ;;  %v14225_v56 = vpop.f32.mrb[54].mxu1 }
0x139d   : > { %v14226_v22 = vpop.f32.mrb[55].mxu1 }
0x139e   : > { %v11284_v2 = vadd.f32 %v14224_v4, %v14202_v37 }
0x13ae   : > { %v14244_v7 = vpop.f32.mrb[44].mxu0 }
0x13af   : > { %v14245_v8 = vpop.f32.mrb[45].mxu0 }
0x13b0   : > { %v14246_v35 = vadd.f32 %v14245_v8, %v14244_v7  ;;  %v14247_v27 = vpop.f32.mrb[46].mxu0  ;;  %v15858_v8 = vld [vmem:[%s22652_s9 + $0x100] sm:$0xff]  }
0x13b1   : > { %v14248_v50 = vpop.f32.mrb[47].mxu0  ;;  %v15860_v27 = vld [vmem:[%s22652_s9 + $0x108] sm:$0xff]  }
0x13b2   : > { %v11324_v42 = vadd.f32 %v14246_v35, %v11284_v2 }
0x13ba   : > { %v14266_v57 = vpop.f32.mrb[56].mxu1 }
0x13bb   : > { %v14267_v55 = vpop.f32.mrb[57].mxu1 }
0x13bc   : > { %v14268_v36 = vadd.f32 %v14267_v55, %v14266_v57  ;;  %v14269_v34 = vpop.f32.mrb[58].mxu1 }
0x13bd   : > { %v14270_v46 = vpop.f32.mrb[59].mxu1 }
0x13be   : > { %v11364_v63 = vadd.f32 %v14268_v36, %v11324_v42  ;;  %v15861_v46 = vld [vmem:[%s22652_s9 + $0x150] sm:$0xff]  }
0x13ce   : > { %v14288_v28 = vpop.f32.mrb[48].mxu0 }
0x13cf   : > { %v14289_v38 = vpop.f32.mrb[49].mxu0 }
0x13d0   : > { %v14290_v11 = vadd.f32 %v14289_v38, %v14288_v28  ;;  %v14291_v33 = vpop.f32.mrb[50].mxu0 }
0x13d1   : > { %v14292_v21 = vpop.f32.mrb[51].mxu0 }
0x13d2   : > { %v11404_v29 = vadd.f32 %v14290_v11, %v11364_v63 }
0x13da   : > { %v14310_v47 = vpop.f32.mrb[60].mxu1  ;;  %v11496_v20 = vpop.f32.mrb[52].mxu0 }
0x13db   : > { %v11708_v52 = vmul.f32 %v11496_v20, %v23530_v18  ;;  %v14311_v54 = vpop.f32.mrb[61].mxu1  ;;  %v11498_v5 = vpop.f32.mrb[53].mxu0  ;;  %v15859_v18 = vld [vmem:[%s22652_s9 + $0x148] sm:$0xff]   ;;  %v15863_v20 = vld [vmem:[%s22652_s9 + $0x158] sm:$0xff]  }
0x13dc   : > { %v14312_v37 = vadd.f32 %v14311_v54, %v14310_v47  ;;  %v11709_v16 = vmul.f32 %v11498_v5, %v23531_v10  ;;  %v14313_v43 = vpop.f32.mrb[62].mxu1  ;;  %v11500_v19 = vpop.f32.mrb[54].mxu0  ;;  %v24458_v10 = vld [vmem:[#allocation74_spill] sm:$0xff]  ;;  %v15867_v54 = vld [vmem:[%s22652_s9 + $0x1c8] sm:$0xff]  }
0x13dd   : > { %v14314_v13 = vpop.f32.mrb[63].mxu1  ;;  %v11501_v4 = vpop.f32.mrb[55].mxu0  ;;  %v11720_v2 = vpack.c.bf16 %v11708_v52, %v11708_v52  ;;  %v12731_v35 = vpack.c.bf16 %v24458_v10, %v24458_v10  ;;  %v15866_v52 = vld [vmem:[%s22652_s9 + $0x160] sm:$0xff]  }
0x13de   : > { %v11444_v56 = vadd.f32 %v14312_v37, %v11404_v29  ;;  %v11721_v22 = vpack.c.bf16 %v11709_v16, %v11709_v16  ;;  %v15868_v5 = vld [vmem:[%s22652_s9 + $0x120] sm:$0xff]   ;;  %v15869_v37 = vld [vmem:[%s22652_s9 + $0x188] sm:$0xff]  }
0x13e0   : > { %v12733_v7 = vpack.c.bf16 %v11444_v56, %v11444_v56  ;;  %11764 = vmatprep.mubr.bf16.mxu0 %v11721_v22  ;;  %v15870_v22 = vld [vmem:[%s22652_s9 + $0x168] sm:$0xff]  }
0x13e1   : > { %11765 = vmatmul.mubr.bf16.vlgmr.msra.gmra.mrb[64].mxu0 %v11720_v2  ;;  %v15871_v2 = vld [vmem:[%s22652_s9 + $0x1d0] sm:$0xff]  }
0x13e2   : > { %14361 = vmatpush3.bf16.msra.mxu0 %v15858_v8  ;;  %11453 = vrot.lane.b32.xlu0 %v12733_v7, %s15915_s25 }
0x13e3   : > { %14362 = vmatprep.subr.bf16.mxu0 %v15859_v18 }
0x13e6   : > { %14363 = vmatpush3.bf16.msra.mxu0 %v15860_v27  ;;  %v11537_v50 = vpop.f32.mrb[64].mxu1  ;;  %v11578_v42 = vpop.f32.mrb[56].mxu0  ;;  %9887 = vrot.lane.b32.xlu0 %v12731_v35, %s15917_s16  ;;  %v15872_v27 = vld [vmem:[%s22652_s9 + $0x128] sm:$0xff]  }
0x13e7   : > { %v11710_v57 = vmul.f32 %v11537_v50, %v23535_v23  ;;  %v22472_v55 = vmul.f32 %v11578_v42, %v23536_v25  ;;  %v11539_v36 = vpop.f32.mrb[65].mxu1  ;;  %v11580_v34 = vpop.f32.mrb[57].mxu0  ;;  %14364 = vmatprep.subr.bf16.mxu0 %v15861_v46  ;;  %v15862_v25 = vld [vmem:[%s22652_s9 + $0x110] sm:$0xff]   ;;  %v15880_v46 = vld [vmem:[%s22652_s9 + $0x138] sm:$0xff]  }
0x13e8   : > { %v11711_v63 = vmul.f32 %v11539_v36, %v17806_v51  ;;  %v11713_v28 = vmul.f32 %v11580_v34, %v18070_v59  ;;  %v11541_v38 = vpop.f32.mrb[66].mxu1  ;;  %v11582_v11 = vpop.f32.mrb[58].mxu0  ;;  %v15864_v51 = vld [vmem:[%s22652_s9 + $0x118] sm:$0xff]   ;;  %v15865_v59 = vld [vmem:[%s22652_s9 + $0x180] sm:$0xff]   ;;  %v15873_v50 = vld [vmem:[%s22652_s9 + $0x190] sm:$0xff]  }
0x13e9   : > { %v11542_v33 = vpop.f32.mrb[67].mxu1  ;;  %v11583_v21 = vpop.f32.mrb[59].mxu0  ;;  %v11722_v47 = vpack.c.bf16 %v11710_v57, %v11710_v57  ;;  %v15876_v42 = vld [vmem:[%s22652_s9 + $0x130] sm:$0xff]   ;;  %v15877_v57 = vld [vmem:[%s22652_s9 + $0x198] sm:$0xff]   ;;  %v15879_v34 = vld [vmem:[%s22652_s9 + $0x1e0] sm:$0xff]   ;;  %v11724_v38 = vpack.c.bf16 %v22472_v55, %v22472_v55 }
0x13ea   : > { %v11723_v29 = vpack.c.bf16 %v11711_v63, %v11711_v63  ;;  %v11725_v23 = vpack.c.bf16 %v11713_v28, %v11713_v28  ;;  %14365 = vmatpush3.bf16.msra.mxu0 %v15862_v25  ;;  %v15878_v36 = vld [vmem:[%s22652_s9 + $0x178] sm:$0xff]   ;;  %v15881_v63 = vld [vmem:[%s22652_s9 + $0x1a0] sm:$0xff]   ;;  %v15882_v21 = vld [vmem:[%s22652_s9 + $0x1e8] sm:$0xff]  }
0x13eb   : > { %14366 = vmatprep.subr.bf16.mxu0 %v15863_v20  ;;  %v15885_v20 = vld [vmem:[%s22652_s9 + $0x200] sm:$0xff]  }
0x13ec   : > { %11804 = vmatprep.mubr.bf16.mxu1 %v11723_v29  ;;  %11844 = vmatprep.mubr.bf16.mxu0 %v11725_v23  ;;  %v15883_v29 = vld [vmem:[%s22652_s9 + $0x240] sm:$0xff]  }
0x13ed   : > { %11805 = vmatmul.mubr.bf16.vlgmr.msra.gmra.mrb[76].mxu1 %v11722_v47 }
0x13ee   : > { %14367 = vmatpush3.bf16.msra.mxu0 %v15864_v51  ;;  %14383 = vmatpush3.bf16.msra.mxu1 %v15865_v59  ;;  %v15886_v51 = vld [vmem:[%s22652_s9 + $0x1f0] sm:$0xff]  }
0x13ef   : > { %14368 = vmatprep.subr.bf16.mxu0 %v15866_v52  ;;  %14384 = vmatprep.subr.bf16.mxu1 %v15867_v54  ;;  %v15888_v59 = vld [vmem:[%s22652_s9 + $0x1b0] sm:$0xff]   ;;  %v15889_v52 = vld [vmem:[%s22652_s9 + $0x208] sm:$0xff]   ;;  %v15890_v54 = vld [vmem:[%s22652_s9 + $0x1f8] sm:$0xff]  }
0x13f2   : > { %14369 = vmatpush3.bf16.msra.mxu0 %v15868_v5  ;;  %14385 = vmatpush3.bf16.msra.mxu1 %v15869_v37  ;;  %v11619_v16 = vpop.f32.mrb[68].mxu1  ;;  %v11660_v43 = vpop.f32.mrb[60].mxu0  ;;  %v15891_v5 = vld [vmem:[%s22652_s9 + $0x250] sm:$0xff]   ;;  %v15892_v37 = vld [vmem:[%s22652_s9 + $0x1b8] sm:$0xff]  }
0x13f3   : > { %v22504_v19 = vmul.f32 %v11619_v16, %v24319_v45  ;;  %v22507_v13 = vmul.f32 %v11660_v43, %v24320_v58  ;;  %v11621_v4 = vpop.f32.mrb[69].mxu1  ;;  %v11662_v56 = vpop.f32.mrb[61].mxu0  ;;  %14370 = vmatprep.subr.bf16.mxu0 %v15870_v22  ;;  %14386 = vmatprep.subr.bf16.mxu1 %v15871_v2  ;;  %v15893_v16 = vld [vmem:[%s22652_s9 + $0x210] sm:$0xff]   ;;  %v15896_v2 = vld [vmem:[%s22652_s9 + $0x218] sm:$0xff]  }
0x13f4   : > { %v11715_v7 = vmul.f32 %v11621_v4, %v18074_v49  ;;  %v11717_v45 = vmul.f32 %v11662_v56, %v18078_v3  ;;  %v11623_v8 = vpop.f32.mrb[70].mxu1  ;;  %v11664_v18 = vpop.f32.mrb[62].mxu0  ;;  %v15874_v49 = vld [vmem:[%s22652_s9 + $0x170] sm:$0xff]   ;;  %v15875_v3 = vld [vmem:[%s22652_s9 + $0x1d8] sm:$0xff]   ;;  %v15895_v56 = vld [vmem:[%s22652_s9 + $0x2c0] sm:$0xff]  }
0x13f5   : > { %v11624_v58 = vpop.f32.mrb[71].mxu1  ;;  %v11665_v10 = vpop.f32.mrb[63].mxu0  ;;  %v11726_v43 = vpack.c.bf16 %v22504_v19, %v22504_v19  ;;  %v15894_v4 = vld [vmem:[%s22652_s9 + $0x258] sm:$0xff]   ;;  %v15897_v19 = vld [vmem:[%s22652_s9 + $0x280] sm:$0xff]  }
0x13f6   : > { %v11727_v35 = vpack.c.bf16 %v11715_v7, %v11715_v7  ;;  %14371 = vmatpush3.bf16.msra.mxu0 %v15872_v27  ;;  %14387 = vmatpush3.bf16.msra.mxu1 %v15873_v50  ;;  %v11729_v47 = vpack.c.bf16 %v11717_v45, %v11717_v45  ;;  %v15898_v7 = vld [vmem:[%s22652_s9 + $0x260] sm:$0xff]   ;;  %v15899_v45 = vld [vmem:[%s22652_s9 + $0x2c8] sm:$0xff]  }
0x13f7   : > { %14372 = vmatprep.subr.bf16.mxu0 %v15874_v49  ;;  %14388 = vmatprep.subr.bf16.mxu1 %v15875_v3 }
0x13f8   : > { %11884 = vmatprep.mubr.bf16.mxu1 %v11727_v35 }
0x13fa   : > { %14373 = vmatpush3.bf16.msra.mxu0 %v15876_v42  ;;  %14389 = vmatpush3.bf16.msra.mxu1 %v15877_v57 }
0x13fb   : > { %14374 = vmatprep.subr.bf16.mxu0 %v15878_v36  ;;  %14390 = vmatprep.subr.bf16.mxu1 %v15879_v34 }
0x13fe   : > { %14375 = vmatpush3.bf16.msra.mxu0 %v15880_v46  ;;  %14391 = vmatpush3.bf16.msra.mxu1 %v15881_v63  ;;  %v11701_v28 = vpop.f32.mrb[72].mxu1 }
0x13ff   : > { %v22550_v11 = vmul.f32 %v11701_v28, %v24331_v24  ;;  %v11703_v33 = vpop.f32.mrb[73].mxu1  ;;  %14392 = vmatprep.subr.bf16.mxu1 %v15882_v21  ;;  %14404 = vmatprep.subr.bf16.mxu0 %v15883_v29  ;;  %v15884_v24 = vld [vmem:[%s22652_s9 + $0x1a8] sm:$0xff]  }
0x1400   : > { %v11719_v23 = vmul.f32 %v11703_v33, %v18083_v1  ;;  %v11705_v25 = vpop.f32.mrb[74].mxu1  ;;  %v15887_v1 = vld [vmem:[%s22652_s9 + $0x248] sm:$0xff]  }
0x1401   : > { %11845 = vmatmul.mubr.bf16.vlgmr.msra.gmra.mrb[68].mxu0 %v11724_v38  ;;  %v11706_v55 = vpop.f32.mrb[75].mxu1 }
0x1402   : > { %14393 = vmatpush3.bf16.msra.mxu1 %v15884_v24  ;;  %14405 = vmatpush3.bf16.msra.mxu0 %v15885_v20  ;;  %v11731_v22 = vpack.c.bf16 %v11719_v23, %v11719_v23 }
0x1403   : > { %11924 = vmatprep.mubr.bf16.mxu0 %v11729_v47  ;;  %14394 = vmatprep.subr.bf16.mxu1 %v15886_v51 }
0x1404   : > { %14406 = vmatprep.subr.bf16.mxu0 %v15887_v1 }
0x1406   : > { %14395 = vmatpush3.bf16.msra.mxu1 %v15888_v59  ;;  %14407 = vmatpush3.bf16.msra.mxu0 %v15889_v52 }
0x1407   : > { %14396 = vmatprep.subr.bf16.mxu1 %v15890_v54  ;;  %14408 = vmatprep.subr.bf16.mxu0 %v15891_v5 }
0x140a   : > { %14397 = vmatpush3.bf16.msra.mxu1 %v15892_v37  ;;  %14409 = vmatpush3.bf16.msra.mxu0 %v15893_v16 }
0x140b   : > { %14410 = vmatprep.subr.bf16.mxu0 %v15894_v4  ;;  %14426 = vmatprep.subr.bf16.mxu1 %v15895_v56 }
0x140d   : > { %11885 = vmatmul.mubr.bf16.vlgmr.msra.gmra.mrb[80].mxu1 %v11726_v43 }
0x140e   : > { %14411 = vmatpush3.bf16.msra.mxu0 %v15896_v2  ;;  %14427 = vmatpush3.bf16.msra.mxu1 %v15897_v19 }
0x140f   : > { %11964 = vmatprep.mubr.bf16.mxu1 %v11731_v22  ;;  %14412 = vmatprep.subr.bf16.mxu0 %v15898_v7 }
0x1410   : > { %14428 = vmatprep.subr.bf16.mxu1 %v15899_v45 }
0x1412   : > { %14413 = vmatpush3.bf16.msra.mxu0 %v24436_v48  ;;  %14429 = vmatpush3.bf16.msra.mxu1 %v24437_v39  ;;  %v11728_v48 = vpack.c.bf16 %v22507_v13, %v22507_v13  ;;  %v11730_v39 = vpack.c.bf16 %v22550_v11, %v22550_v11 }
0x1413   : > { %14414 = vmatprep.subr.bf16.mxu0 %v24438_v26  ;;  %14430 = vmatprep.subr.bf16.mxu1 %v24439_v17 }
0x1416   : > { %14415 = vmatpush3.bf16.msra.mxu0 %v24440_v41  ;;  %14431 = vmatpush3.bf16.msra.mxu1 %v24441_v60 }
0x1417   : > { %14416 = vmatprep.subr.bf16.mxu0 %v24442_v62  ;;  %14432 = vmatprep.subr.bf16.mxu1 %v24443_v53 }
0x141a   : > { %14417 = vmatpush3.bf16.msra.mxu0 %v24444_v12  ;;  %14433 = vmatpush3.bf16.msra.mxu1 %v24445_v61 }
0x141b   : > { %14418 = vmatprep.subr.bf16.mxu0 %v24446_v44  ;;  %14434 = vmatprep.subr.bf16.mxu1 %v24447_v31 }
0x141e   : > { %14419 = vmatpush3.bf16.msra.mxu0 %v24448_v40  ;;  %14435 = vmatpush3.bf16.msra.mxu1 %v24449_v9 }
0x141f   : > { %14436 = vmatprep.subr.bf16.mxu1 %v24450_v6 }
0x1421   : > { %11925 = vmatmul.mubr.bf16.vlgmr.msra.gmra.mrb[72].mxu0 %v11728_v48 }
0x1422   : > { %14437 = vmatpush3.bf16.msra.mxu1 %v24451_v32 }
0x1423   : > { %14438 = vmatprep.subr.bf16.mxu1 %v24452_v30 }
0x1426   : > { %14439 = vmatpush3.bf16.msra.mxu1 %v24454_v0 }
0x1427   : > { %14440 = vmatprep.subr.bf16.mxu1 %v24455_v14 }
0x142a   : > { %14441 = vmatpush3.bf16.msra.mxu1 %v24456_v15 }
0x142d   : > { %11965 = vmatmul.mubr.bf16.vlgmr.msra.gmra.mrb[84].mxu1 %v11730_v39 }
0x1454   : > { %v11454_v26 = vpop.permute.xlu0 %11453 }
0x1455   : > { %11456 = vst.msk [vmem:[%s18578_s24 + $0x8] sm:$0xf] %vm7274_vm1, %v11454_v26 }
0x1458   : > { %v9888_v17 = vpop.permute.xlu0 %9887 }
0x1459   : > { %9890 = vst.msk [vmem:[%s18578_s24 + $0x4] sm:$0xf] %vm7798_vm2, %v9888_v17 }
0x14b4   : > { %v14332_v41 = vpop.f32.mrb[64].mxu0 }
0x14b5   : > { %v14333_v60 = vpop.f32.mrb[65].mxu0 }
0x14b6   : > { %v14334_v62 = vadd.f32 %v14333_v60, %v14332_v41  ;;  %v14335_v53 = vpop.f32.mrb[66].mxu0 }
0x14b7   : > { %v14336_v12 = vpop.f32.mrb[67].mxu0 }
0x14c0   : > { %v14354_v61 = vpop.f32.mrb[76].mxu1 }
0x14c1   : > { %v14355_v44 = vpop.f32.mrb[77].mxu1 }
0x14c2   : > { %v14356_v31 = vadd.f32 %v14355_v44, %v14354_v61  ;;  %v14357_v40 = vpop.f32.mrb[78].mxu1 }
0x14c3   : > { %v14358_v9 = vpop.f32.mrb[79].mxu1 }
0x14c4   : > { %v11807_v6 = vadd.f32 %v14356_v31, %v14334_v62 }
0x14d4   : > { %v14376_v32 = vpop.f32.mrb[68].mxu0 }
0x14d5   : > { %v14377_v30 = vpop.f32.mrb[69].mxu0 }
0x14d6   : > { %v14378_v0 = vadd.f32 %v14377_v30, %v14376_v32  ;;  %v14379_v14 = vpop.f32.mrb[70].mxu0 }
0x14d7   : > { %v14380_v15 = vpop.f32.mrb[71].mxu0 }
0x14d8   : > { %v11847_v13 = vadd.f32 %v14378_v0, %v11807_v6 }
0x14e0   : > { %v14398_v8 = vpop.f32.mrb[80].mxu1 }
0x14e1   : > { %v14399_v18 = vpop.f32.mrb[81].mxu1 }
0x14e2   : > { %v14400_v58 = vadd.f32 %v14399_v18, %v14398_v8  ;;  %v14401_v10 = vpop.f32.mrb[82].mxu1 }
0x14e3   : > { %v14402_v35 = vpop.f32.mrb[83].mxu1 }
0x14e4   : > { %v11887_v27 = vadd.f32 %v14400_v58, %v11847_v13 }
0x14f4   : > { %v14420_v50 = vpop.f32.mrb[72].mxu0 }
0x14f5   : > { %v14421_v49 = vpop.f32.mrb[73].mxu0 }
0x14f6   : > { %v14422_v3 = vadd.f32 %v14421_v49, %v14420_v50  ;;  %v14423_v42 = vpop.f32.mrb[74].mxu0 }
0x14f7   : > { %v14424_v57 = vpop.f32.mrb[75].mxu0 }
0x14f8   : > { %v11927_v36 = vadd.f32 %v14422_v3, %v11887_v27 }
0x1500   : > { %v14442_v34 = vpop.f32.mrb[84].mxu1 }
0x1501   : > { %v14443_v46 = vpop.f32.mrb[85].mxu1 }
0x1502   : > { %v14444_v63 = vadd.f32 %v14443_v46, %v14442_v34  ;;  %v14445_v28 = vpop.f32.mrb[86].mxu1 }
0x1503   : > { %v14446_v38 = vpop.f32.mrb[87].mxu1 }
0x1504   : > { %v11967_v11 = vadd.f32 %v14444_v63, %v11927_v36 }
0x1506   : > { %v12734_v33 = vpack.c.bf16 %v11967_v11, %v11967_v11 }
0x1508   : > { %11976 = vrot.lane.b32.xlu1 %v12734_v33, %s15917_s16 }
0x157a   : > { %v11977_v21 = vpop.permute.xlu1 %11976 }
0x157b   : > { %11979 = vst.msk [vmem:[%s18578_s24 + $0x8] sm:$0xf] %vm7798_vm2, %v11977_v21 }
0x157c PF: > { %s20_s13 = sadd.s32 1, %s15906_s13  }
0x157d   : > { %p17_p4 = scmp.ge.s32.totalorder %s20_s13, 4  }
0x157f   :  { %19 = sbr.rel (!%p17_p4) target bundleno = 1 (0x1), region = 90 }

// kernel: auwgcn_forward.3
= control target key start
LH: loop header
LB: loop body
LE: loop exit
PB: predicated region body
PF: predicated region fallthrough
CT: control target
= control target key end

     0   :  { %s2506_s21 = smov 0   ;;  %s2508_s22 = smov 0   ;;  %s2938_s0 = inlined_call_operand.vmem [shape: bf16[48,384], index: 0, kind: input, shape index: {}]   ;;  %s2939_s1 = inlined_call_operand.vmem [shape: bf16[384,128], index: 1, kind: input, shape index: {}]   ;;  %s2940_s2 = inlined_call_operand.vmem [shape: f32[3,128], index: 2, kind: input, shape index: {}]   ;;  %s2941_s3 = inlined_call_operand.vmem [shape: bf16[3,128,128], index: 3, kind: input, shape index: {}]   ;;  %s2942_s4 = inlined_call_operand.vmem [shape: bf16[3,128,128], index: 4, kind: input, shape index: {}]   ;;  %s2943_s5 = inlined_call_operand.vmem [shape: bf16[3,128,128], index: 5, kind: input, shape index: {}]   ;;  %s2944_s6 = inlined_call_operand.vmem [shape: f32[2,8,128], index: 6, kind: output, shape index: {}]  }
   0x1   :  { %s2510_s23 = smov 0  }
   0x2 LB: > { %s28_s24 = sadd.s32 1, %s2462_s22  ;;  %p1779_p0 = scmp.ge.s32.totalorder %s2466_s23, 1  ;;  %s2466_s23 = sphi %s2510_s23, %s16_s23   ;;  %s2462_s22 = sphi %s2508_s22, %s2946_s22   ;;  %s2458_s21 = sphi %s2506_s21, %s2945_s21  }
   0x3   : > { %p30_p1 = scmp.ge.s32.totalorder %s28_s24, 2  ;;  %p192_p2 = scmp.lt.s32.totalorder %s2466_s23, 3 }
   0x5   : > { %s2948_s24 = smov (%p30_p1, %s28_s24), 0  ;;  %p193_p3 = pnand %p1779_p0, %p192_p2 }
   0x6   : > { %p217_p4 = scmp.lt.s32.totalorder (!%p193_p3), %s2458_s21, 1  ;;  %s225_s25 = smul.u32 (!%p193_p3), 24, %s2458_s21 }
   0x7   : > { %196 = sbr.rel (%p193_p3) target bundleno = 1104 (0x450), region = 40 }
   0x8   : > { %s228_s26 = sshra.s32 (!%p193_p3), %s225_s25, 3 }
   0x9   : > { %s1984_s28 = smul.u32 (!%p193_p3), 12, %s228_s26 }
   0xb   : > { %s232_s10 = scalar_lea.vmem (!%p193_p3), %s2938_s0, %s1984_s28 }
   0xc   : > { %v270_v0 = vld [vmem:[%s232_s10] sm:$0xff] (!%p193_p3)  ;;  %v272_v1 = vld [vmem:[%s232_s10 + $0x8] sm:$0xff] (!%p193_p3)  ;;  %v274_v2 = vld [vmem:[%s232_s10 + $0x10] sm:$0xff] (!%p193_p3) }
   0xd   : > { %271 = vst [vmem:[#allocation2] sm:$0xff] (!%p193_p3), %v270_v0  ;;  %273 = vst [vmem:[#allocation2 + $0x8] sm:$0xff] (!%p193_p3), %v272_v1  ;;  %v276_v3 = vld [vmem:[%s232_s10 + $0x18] sm:$0xff] (!%p193_p3)  ;;  %v1782_v4 = vld [vmem:[%s232_s10 + $0x20] sm:$0xf] (!%p193_p3) }
   0xe   : > { %s2950_s21 = smov (!%p217_p4, %s2458_s21), 1  ;;  %275 = vst [vmem:[#allocation2 + $0x10] sm:$0xff] %v274_v2  ;;  %277 = vst [vmem:[#allocation2 + $0x18] sm:$0xff] %v276_v3 }
   0xf   : > { %s1780_s27 = sshll.u32 %s2950_s21, 3  ;;  %288 = vst [vmem:[#allocation2 + $0x20] sm:$0xf] %v1782_v4 }
  0x10   : > { %s2527_s7 = scalar_lea.vmem %s2944_s6, %s1780_s27 }
  0x11   : > { %292 = vsyncadd [#allocation3], 576 }
  0x12   : > { %2454 = dma.done.wait [#allocation3], 576 }
  0x13   : > { %2455 = vsyncadd [#allocation3], 4294966720  ;;  %v2339_v5 = vld [vmem:[%s2939_s1 + $0x40] sm:$0xff]   ;;  %v2341_v7 = vld [vmem:[%s2939_s1 + $0x48] sm:$0xff]   ;;  %v2468_v38 = vmov 0.0   ;;  %vm2469_vm0 = vmmov 0   ;;  %v376_v0 = vlaneseq }
  0x14   : > { %v2340_v6 = vld [vmem:[%s2939_s1] sm:$0xff]   ;;  %1985 = vmatprep.subr.bf16.mxu1 %v2339_v5  ;;  %v2342_v8 = vld [vmem:[%s2939_s1 + $0x8] sm:$0xff]   ;;  %v2343_v9 = vld [vmem:[%s2939_s1 + $0x50] sm:$0xff]   ;;  %2124 = vmatprep.subr.bf16.mxu0 %v2468_v38  ;;  %vm690_vm1 = vcmask 1045504   ;;  %vm784_vm2 = vsmask.f32 6400 }
  0x15   : > { %1986 = vmatpush3.bf16.msra.mxu1 %v2340_v6  ;;  %v2344_v10 = vld [vmem:[%s2939_s1 + $0x10] sm:$0xff]   ;;  %v2345_v11 = vld [vmem:[%s2939_s1 + $0x58] sm:$0xff]   ;;  %v2347_v13 = vld [vmem:[%s2939_s1 + $0x60] sm:$0xff]   ;;  %2140 = vmatprep.mubr.msk.bf16.mxu0 %vm2469_vm0, %v2468_v38  ;;  %v2674_v1 = vshrl.u32 %v376_v0, 7  ;;  %vm909_vm3 = vsmask.f32 5376 }
  0x16   : > { %1987 = vmatprep.subr.bf16.mxu1 %v2341_v7  ;;  %v2346_v12 = vld [vmem:[%s2939_s1 + $0x18] sm:$0xff]   ;;  %v2348_v14 = vld [vmem:[%s2939_s1 + $0x20] sm:$0xff]   ;;  %v2349_v15 = vld [vmem:[%s2939_s1 + $0x68] sm:$0xff]   ;;  %vm1020_vm4 = vcmask 1043456   ;;  %vm1363_vm5 = vcmask 1041408  }
  0x17   : > { %v2357_v16 = vld [vmem:[#allocation2 + $0x4] ss:$12 sps:$4 sm:$0xff]   ;;  %v2350_v17 = vld [vmem:[%s2939_s1 + $0x28] sm:$0xff]   ;;  %v2353_v20 = vld [vmem:[%s2939_s1 + $0x78] sm:$0xff]   ;;  %v378_v2 = vsub.s32 0, %v2674_v1 }
  0x18   : > { %583 = vmatprep.mubr.bf16.mxu1 %v2357_v16  ;;  %v2351_v18 = vld [vmem:[%s2939_s1 + $0x70] sm:$0xff]   ;;  %v2354_v21 = vld [vmem:[%s2939_s1 + $0x38] sm:$0xff]   ;;  %v2358_v22 = vld [vmem:[%s2939_s1 + $0x80] sm:$0xff]  }
  0x19   : > { %1988 = vmatpush3.bf16.msra.mxu1 %v2342_v8  ;;  %v2352_v19 = vld [vmem:[%s2939_s1 + $0x30] sm:$0xff]   ;;  %v326_v23 = vld [vmem:[#allocation2 + $0x18] sm:$0xff]  ;;  %v2355_v24 = vld [vmem:[#allocation2] ss:$12 sps:$4 sm:$0xff]  }
  0x1a   : > { %1989 = vmatprep.subr.bf16.mxu1 %v2343_v9  ;;  %v2359_v25 = vld [vmem:[%s2939_s1 + $0x88] sm:$0xff]   ;;  %v1787_v26 = vcombine.high %v326_v23, %v326_v23  ;;  %v2360_v27 = vld [vmem:[%s2939_s1 + $0x90] sm:$0xff]   ;;  %v2361_v29 = vld [vmem:[%s2939_s1 + $0x98] sm:$0xff]   ;;  %v1786_v30 = vcombine.low %v326_v23, %v326_v23 }
  0x1b   : > { %v2368_v28 = vld [vmem:[#allocation2 + $0x8] ss:$12 sps:$4 sm:$0xff]   ;;  %v2362_v31 = vld [vmem:[%s2939_s1 + $0xa0] sm:$0xff]   ;;  %v2367_v34 = vld [vmem:[%s2939_s1 + $0xb8] sm:$0xff]  }
  0x1c   : > { %v2364_v32 = vld [vmem:[%s2939_s1 + $0xa8] sm:$0xff]   ;;  %v2366_v33 = vld [vmem:[%s2939_s1 + $0xb0] sm:$0xff]   ;;  %v2369_v35 = vld [vmem:[#allocation2 + $0x20] ss:$0 sps:$4 sm:$0xff]  }
  0x1d   : > { %1990 = vmatpush3.bf16.msra.mxu1 %v2344_v10  ;;  %v2370_v36 = vld [vmem:[%s2941_s3 + $0x40] sm:$0xff]   ;;  %v2371_v39 = vld [vmem:[%s2941_s3 + $0x48] sm:$0xff]   ;;  %v2373_v40 = vld [vmem:[%s2941_s3 + $0x50] sm:$0xff]  }
  0x1e   : > { %1991 = vmatprep.subr.bf16.mxu1 %v2345_v11  ;;  %v2372_v37 = vld [vmem:[%s2941_s3] sm:$0xff]   ;;  %2125 = vmatpush3.bf16.msra.mxu0 %v2370_v36  ;;  %v2374_v41 = vld [vmem:[%s2941_s3 + $0x8] sm:$0xff]   ;;  %v2376_v42 = vld [vmem:[%s2941_s3 + $0x10] sm:$0xff]  }
  0x1f   : > { %2126 = vmatprep.subr.bf16.mxu0 %v2468_v38  ;;  %v2375_v43 = vld [vmem:[%s2941_s3 + $0x58] sm:$0xff]   ;;  %v2377_v45 = vld [vmem:[%s2941_s3 + $0x60] sm:$0xff]   ;;  %v2379_v46 = vld [vmem:[%s2941_s3 + $0x68] sm:$0xff]  }
  0x20   : > { %v2378_v44 = vld [vmem:[%s2941_s3 + $0x18] sm:$0xff]   ;;  %v2380_v47 = vld [vmem:[%s2941_s3 + $0x20] sm:$0xff]   ;;  %v2381_v48 = vld [vmem:[%s2941_s3 + $0x70] sm:$0xff]  }
  0x21   : > { %1992 = vmatpush3.bf16.msra.mxu1 %v2346_v12  ;;  %v2382_v49 = vld [vmem:[%s2941_s3 + $0x28] sm:$0xff]   ;;  %v2383_v50 = vld [vmem:[%s2941_s3 + $0x78] sm:$0xff]   ;;  %v2384_v51 = vld [vmem:[%s2941_s3 + $0x30] sm:$0xff]  }
  0x22   : > { %1993 = vmatprep.subr.bf16.mxu1 %v2347_v13  ;;  %2127 = vmatpush3.bf16.msra.mxu0 %v2371_v39  ;;  %v2386_v52 = vld [vmem:[%s2941_s3 + $0x38] sm:$0xff]   ;;  %v2680_v3 = vld [vmem:[%s2940_s2] sm:$0x7]  ;;  %v2406_v0 = vld [vmem:[%s2942_s4 + $0x30] sm:$0xff]  }
  0x23   : > { %2128 = vmatprep.subr.bf16.mxu0 %v2468_v38  ;;  %v379_v4 = vrot.slane %v2680_v3, %v378_v2  ;;  %v2407_v2 = vld [vmem:[%s2942_s4 + $0x70] sm:$0xff]  }
  0x25   : > { %1994 = vmatpush3.bf16.msra.mxu1 %v2348_v14 }
  0x26   : > { %1995 = vmatprep.subr.bf16.mxu1 %v2349_v15  ;;  %2129 = vmatpush3.bf16.msra.mxu0 %v2373_v40 }
  0x27   : > { %2130 = vmatprep.subr.bf16.mxu0 %v2468_v38 }
  0x29   : > { %1996 = vmatpush3.bf16.msra.mxu1 %v2350_v17 }
  0x2a   : > { %1997 = vmatprep.subr.bf16.mxu1 %v2351_v18  ;;  %2131 = vmatpush3.bf16.msra.mxu0 %v2375_v43  ;;  %v2387_v43 = vld [vmem:[%s2941_s3 + $0x88] sm:$0xff]  }
  0x2b   : > { %2132 = vmatprep.subr.bf16.mxu0 %v2468_v38 }
  0x2d   : > { %1998 = vmatpush3.bf16.msra.mxu1 %v2352_v19 }
  0x2e   : > { %1999 = vmatprep.subr.bf16.mxu1 %v2353_v20  ;;  %2133 = vmatpush3.bf16.msra.mxu0 %v2377_v45 }
  0x2f   : > { %2134 = vmatprep.subr.bf16.mxu0 %v2468_v38 }
  0x31   : > { %2000 = vmatpush3.bf16.msra.mxu1 %v2354_v21 }
  0x32   : > { %2104 = vmatprep.subr.bf16.mxu1 %v2358_v22  ;;  %2135 = vmatpush3.bf16.msra.mxu0 %v2379_v46  ;;  %v2388_v46 = vld [vmem:[%s2941_s3 + $0x90] sm:$0xff]  }
  0x33   : > { %2136 = vmatprep.subr.bf16.mxu0 %v2468_v38 }
  0x34   : > { %584 = vmatmul.mubr.bf16.vlgmr.msra.gmra.mrb[0].mxu1 %v2355_v24 }
  0x35   : > { %2105 = vmatpush3.bf16.msra.mxu1 %v2358_v22  ;;  %591 = vmatprep.mubr.bf16.mxu1 %v1787_v26 }
  0x36   : > { %2106 = vmatprep.subr.bf16.mxu1 %v2359_v25  ;;  %2137 = vmatpush3.bf16.msra.mxu0 %v2381_v48  ;;  %v2390_v48 = vld [vmem:[%s2941_s3 + $0xa0] sm:$0xff]  }
  0x37   : > { %2138 = vmatprep.subr.bf16.mxu0 %v2468_v38 }
  0x39   : > { %2107 = vmatpush3.bf16.msra.mxu1 %v2359_v25 }
  0x3a   : > { %2108 = vmatprep.subr.bf16.mxu1 %v2360_v27  ;;  %2139 = vmatpush3.bf16.msra.mxu0 %v2383_v50  ;;  %v2392_v50 = vld [vmem:[%s2941_s3 + $0xb0] sm:$0xff]  }
  0x3b   : > { %2164 = vmatprep.subr.bf16.mxu0 %v2468_v38 }
  0x3c   : > { %592 = vmatmul.mubr.bf16.gmra.mrb[4].mxu1 %v1786_v30 }
  0x3d   : > { %2109 = vmatpush3.bf16.msra.mxu1 %v2360_v27  ;;  %2120 = vmatprep.mubr.bf16.mxu1 %v2368_v28 }
  0x3e   : > { %2110 = vmatprep.subr.bf16.mxu1 %v2361_v29 }
  0x41   : > { %2111 = vmatpush3.bf16.msra.mxu1 %v2361_v29 }
  0x42   : > { %2112 = vmatprep.subr.bf16.mxu1 %v2362_v31 }
  0x45   : > { %2113 = vmatpush3.bf16.msra.mxu1 %v2362_v31 }
  0x46   : > { %2114 = vmatprep.subr.bf16.mxu1 %v2364_v32 }
  0x49   : > { %2115 = vmatpush3.bf16.msra.mxu1 %v2364_v32  ;;  %v2385_v32 = vld [vmem:[%s2941_s3 + $0x80] sm:$0xff]  }
  0x4a   : > { %2116 = vmatprep.subr.bf16.mxu1 %v2366_v33 }
  0x4d   : > { %2117 = vmatpush3.bf16.msra.mxu1 %v2366_v33 }
  0x4e   : > { %2118 = vmatprep.subr.bf16.mxu1 %v2367_v34 }
  0x51   : > { %2119 = vmatpush3.bf16.msra.mxu1 %v2367_v34 }
  0x52   : > { %2144 = vmatprep.subr.bf16.mxu1 %v2468_v38 }
  0x54   : > { %2121 = vmatmul.mubr.bf16.vlgmr.msra.gmra.mrb[8].mxu1 %v2369_v35 }
  0x55   : > { %2145 = vmatpush3.bf16.msra.mxu1 %v2372_v37  ;;  %2160 = vmatprep.mubr.msk.bf16.mxu1 %vm2469_vm0, %v2468_v38 }
  0x56   : > { %2146 = vmatprep.subr.bf16.mxu1 %v2468_v38 }
  0x59   : > { %2147 = vmatpush3.bf16.msra.mxu1 %v2374_v41 }
  0x5a   : > { %2148 = vmatprep.subr.bf16.mxu1 %v2468_v38 }
  0x5d   : > { %2149 = vmatpush3.bf16.msra.mxu1 %v2376_v42 }
  0x5e   : > { %2150 = vmatprep.subr.bf16.mxu1 %v2468_v38 }
  0x61   : > { %2151 = vmatpush3.bf16.msra.mxu1 %v2378_v44 }
  0x62   : > { %2152 = vmatprep.subr.bf16.mxu1 %v2468_v38 }
  0x65   : > { %2153 = vmatpush3.bf16.msra.mxu1 %v2380_v47  ;;  %v2389_v47 = vld [vmem:[%s2941_s3 + $0x98] sm:$0xff]  }
  0x66   : > { %2154 = vmatprep.subr.bf16.mxu1 %v2468_v38 }
  0x69   : > { %2155 = vmatpush3.bf16.msra.mxu1 %v2382_v49  ;;  %v2391_v49 = vld [vmem:[%s2941_s3 + $0xa8] sm:$0xff]  }
  0x6a   : > { %2156 = vmatprep.subr.bf16.mxu1 %v2468_v38 }
  0x6d   : > { %2157 = vmatpush3.bf16.msra.mxu1 %v2384_v51  ;;  %v2393_v51 = vld [vmem:[%s2941_s3 + $0xb8] sm:$0xff]  }
  0x6e   : > { %2158 = vmatprep.subr.bf16.mxu1 %v2468_v38 }
  0x71   : > { %2159 = vmatpush3.bf16.msra.mxu1 %v2386_v52  ;;  %v2394_v52 = vld [vmem:[%s2942_s4] sm:$0xff]  }
  0x72   : > { %2184 = vmatprep.subr.bf16.mxu1 %v2468_v38 }
 0x107   : > { %v2001_v53 = vpop.f32.mrb[0].mxu1 }
 0x108   : > { %v2002_v54 = vpop.f32.mrb[1].mxu1 }
 0x109   : > { %v2003_v55 = vadd.f32 %v2002_v54, %v2001_v53  ;;  %v2004_v56 = vpop.f32.mrb[2].mxu1  ;;  %v2395_v53 = vld [vmem:[%s2942_s4 + $0x40] sm:$0xff]   ;;  %v2396_v54 = vld [vmem:[%s2942_s4 + $0x8] sm:$0xff]  }
 0x10a   : > { %v2005_v57 = vpop.f32.mrb[3].mxu1 }
 0x10b   : > { %v2006_v58 = vadd.f32 %v2005_v57, %v2004_v56  ;;  %v586_v7 = vadd.f32 %v2003_v55, %v379_v4  ;;  %v2397_v55 = vld [vmem:[%s2942_s4 + $0x48] sm:$0xff]   ;;  %v2398_v56 = vld [vmem:[%s2942_s4 + $0x10] sm:$0xff]  }
 0x10c   : > { %v2399_v57 = vld [vmem:[%s2942_s4 + $0x50] sm:$0xff]  }
 0x10d   : > { %v589_v12 = vadd.f32 %v2006_v58, %v379_v4  ;;  %v2400_v58 = vld [vmem:[%s2942_s4 + $0x18] sm:$0xff]  }
 0x10f   : > { %v2007_v59 = vpop.f32.mrb[4].mxu1 }
 0x110   : > { %v2008_v60 = vpop.f32.mrb[5].mxu1 }
 0x111   : > { %v2009_v61 = vadd.f32 %v2008_v60, %v2007_v59  ;;  %v2010_v62 = vpop.f32.mrb[6].mxu1  ;;  %v2401_v59 = vld [vmem:[%s2942_s4 + $0x58] sm:$0xff]   ;;  %v2402_v60 = vld [vmem:[%s2942_s4 + $0x20] sm:$0xff]  }
 0x112   : > { %v2011_v63 = vpop.f32.mrb[7].mxu1  ;;  %v2404_v62 = vld [vmem:[%s2942_s4 + $0x28] sm:$0xff]  }
 0x113   : > { %v594_v5 = vadd.f32 %v2009_v61, %v379_v4  ;;  %v2403_v61 = vld [vmem:[%s2942_s4 + $0x60] sm:$0xff]   ;;  %v2405_v63 = vld [vmem:[%s2942_s4 + $0x68] sm:$0xff]   ;;  %v2408_v4 = vld [vmem:[%s2942_s4 + $0x38] sm:$0xff]  }
 0x127   : > { %v2122_v6 = vpop.f32.mrb[8].mxu1 }
 0x128   : > { %v642_v8 = vadd.f32 %v2122_v6, %v594_v5  ;;  %v633_v9 = vpop.f32.mrb[9].mxu1  ;;  %v2409_v5 = vld [vmem:[%s2942_s4 + $0x78] sm:$0xff]  }
 0x129   : > { %v634_v10 = vadd.f32 %v633_v9, %v586_v7  ;;  %v2123_v11 = vpop.f32.mrb[10].mxu1 }
 0x12a   : > { %v649_v13 = vmax.f32 %v642_v8, 0.0  ;;  %v636_v14 = vpop.f32.mrb[11].mxu1 }
 0x12b   : > { %v647_v15 = vmax.f32 %v634_v10, 0.0  ;;  %v637_v16 = vadd.f32 %v636_v14, %v589_v12 }
 0x12c   : > { %v652_v17 = vmul.f32 0.0, %v649_v13 }
 0x12d   : > { %v650_v18 = vmul.f32 0.0, %v647_v15  ;;  %v648_v19 = vmax.f32 %v637_v16, 0.0  ;;  %v1011_v16 = vsub.s32 1, %v2674_v1 }
 0x12e   : > { %v654_v20 = vpack.c.bf16 %v652_v17, %v652_v17 }
 0x12f   : > { %v653_v21 = vpack.c.bf16 %v648_v19, %v650_v18  ;;  %v1012_v17 = vrot.slane %v2680_v3, %v1011_v16 }
 0x130   : > { %v794_v22 = vshrl.u32 %v654_v20, 16  ;;  %v797_v23 = vshll.u32 %v654_v20, 16  ;;  %v692_v24 = vrot.slane %v654_v20, 2 }
 0x131   : > { %v786_v25 = vshrl.u32 %v653_v21, 16  ;;  %v789_v26 = vshll.u32 %v653_v21, 16  ;;  %v691_v27 = vrot.slane %v653_v21, 2  ;;  %v1021_v21 = vrot.slane %v2468_v38, 4 }
 0x132   : > { %v796_v28 = vrot.slane %v794_v22, 1  ;;  %v799_v29 = vrot.slane %v797_v23, 2  ;;  %v913_v30 = vrot.slane %v794_v22, 2  ;;  %v914_v31 = vrot.slane %v797_v23, 3 }
 0x133   : > { %v788_v33 = vrot.slane %v786_v25, 1  ;;  %v791_v34 = vrot.slane %v789_v26, 2  ;;  %v910_v35 = vrot.slane %v786_v25, 2  ;;  %v911_v36 = vrot.slane %v789_v26, 3 }
 0x134   : > { %v693_v37 = vsel %vm690_vm1, %v691_v27, %v692_v24  ;;  %v800_v39 = vor.u32 %v799_v29, %v796_v28  ;;  %v915_v40 = vor.u32 %v914_v31, %v913_v30  ;;  %v2470_v22 = vmov 1.0  }
 0x135   : > { %2141 = vmatmul.mubr.bf16.vlgmr.msra.gmra.mrb[0].mxu0 %v693_v37  ;;  %v792_v41 = vor.u32 %v791_v34, %v788_v33  ;;  %v912_v42 = vor.u32 %v911_v36, %v910_v35  ;;  %v1022_v23 = vrot.slane %v2470_v22, 4  ;;  %v2410_v36 = vld [vmem:[%s2942_s4 + $0x80] sm:$0xff]  }
 0x136   : > { %2165 = vmatpush3.bf16.msra.mxu0 %v2385_v32  ;;  %2180 = vmatprep.mubr.msk.bf16.mxu0 %vm2469_vm0, %v2468_v38 }
 0x137   : > { %2166 = vmatprep.subr.bf16.mxu0 %v2468_v38  ;;  %v801_v44 = vsel %vm784_vm2, %v792_v41, %v800_v39  ;;  %v916_v45 = vsel %vm909_vm3, %v912_v42, %v915_v40  ;;  %v1023_v30 = vsel %vm1020_vm4, %v1021_v21, %v1022_v23  ;;  %v1025_v31 = vsel %vm1020_vm4, %v1022_v23, %v1021_v21  ;;  %v2411_v39 = vld [vmem:[%s2942_s4 + $0x88] sm:$0xff]   ;;  %v2412_v40 = vld [vmem:[%s2942_s4 + $0x90] sm:$0xff]   ;;  %v2413_v41 = vld [vmem:[%s2942_s4 + $0x98] sm:$0xff]  }
 0x138   : > { %2161 = vmatmul.mubr.bf16.vlgmr.msra.gmra.mrb[12].mxu1 %v801_v44  ;;  %v2414_v42 = vld [vmem:[%s2942_s4 + $0xa0] sm:$0xff]   ;;  %v2416_v44 = vld [vmem:[%s2942_s4 + $0xb0] sm:$0xff]  }
 0x139   : > { %2200 = vmatprep.mubr.msk.bf16.mxu1 %vm2469_vm0, %v2468_v38  ;;  %2185 = vmatpush3.bf16.msra.mxu1 %v2395_v53  ;;  %v2424_v53 = vld [vmem:[%s2943_s5 + $0x70] sm:$0xff]  }
 0x13a   : > { %2167 = vmatpush3.bf16.msra.mxu0 %v2387_v43  ;;  %2186 = vmatprep.subr.bf16.mxu1 %v2468_v38  ;;  %v2415_v43 = vld [vmem:[%s2942_s4 + $0xa8] sm:$0xff]   ;;  %v2428_v23 = vld [vmem:[%s2943_s5 + $0x10] sm:$0xff]  }
 0x13b   : > { %2168 = vmatprep.subr.bf16.mxu0 %v2468_v38 }
 0x13d   : > { %2187 = vmatpush3.bf16.msra.mxu1 %v2397_v55 }
 0x13e   : > { %2169 = vmatpush3.bf16.msra.mxu0 %v2388_v46  ;;  %2188 = vmatprep.subr.bf16.mxu1 %v2468_v38 }
 0x13f   : > { %2170 = vmatprep.subr.bf16.mxu0 %v2468_v38 }
 0x141   : > { %2189 = vmatpush3.bf16.msra.mxu1 %v2399_v57 }
 0x142   : > { %2171 = vmatpush3.bf16.msra.mxu0 %v2389_v47  ;;  %2190 = vmatprep.subr.bf16.mxu1 %v2468_v38  ;;  %v2418_v47 = vld [vmem:[%s2943_s5 + $0x40] sm:$0xff]  }
 0x143   : > { %2172 = vmatprep.subr.bf16.mxu0 %v2468_v38 }
 0x145   : > { %2191 = vmatpush3.bf16.msra.mxu1 %v2401_v59 }
 0x146   : > { %2173 = vmatpush3.bf16.msra.mxu0 %v2390_v48  ;;  %2192 = vmatprep.subr.bf16.mxu1 %v2468_v38  ;;  %v2419_v48 = vld [vmem:[%s2943_s5 + $0x48] sm:$0xff]  }
 0x147   : > { %2174 = vmatprep.subr.bf16.mxu0 %v2468_v38 }
 0x149   : > { %2193 = vmatpush3.bf16.msra.mxu1 %v2403_v61 }
 0x14a   : > { %2175 = vmatpush3.bf16.msra.mxu0 %v2391_v49  ;;  %2194 = vmatprep.subr.bf16.mxu1 %v2468_v38  ;;  %v2420_v49 = vld [vmem:[%s2943_s5 + $0x50] sm:$0xff]  }
 0x14b   : > { %2176 = vmatprep.subr.bf16.mxu0 %v2468_v38 }
 0x14d   : > { %2195 = vmatpush3.bf16.msra.mxu1 %v2405_v63 }
 0x14e   : > { %2177 = vmatpush3.bf16.msra.mxu0 %v2392_v50  ;;  %2196 = vmatprep.subr.bf16.mxu1 %v2468_v38  ;;  %v2421_v50 = vld [vmem:[%s2943_s5 + $0x58] sm:$0xff]  }
 0x14f   : > { %2178 = vmatprep.subr.bf16.mxu0 %v2468_v38 }
 0x151   : > { %2197 = vmatpush3.bf16.msra.mxu1 %v2407_v2  ;;  %v1357_v2 = vsub.s32 2, %v2674_v1 }
 0x152   : > { %2179 = vmatpush3.bf16.msra.mxu0 %v2393_v51  ;;  %2198 = vmatprep.subr.bf16.mxu1 %v2468_v38  ;;  %v2422_v51 = vld [vmem:[%s2943_s5 + $0x60] sm:$0xff]  }
 0x153   : > { %2204 = vmatprep.subr.bf16.mxu0 %v2468_v38 }
 0x155   : > { %2181 = vmatmul.mubr.bf16.vlgmr.msra.gmra.mrb[4].mxu0 %v916_v45  ;;  %2199 = vmatpush3.bf16.msra.mxu1 %v2409_v5  ;;  %v2417_v45 = vld [vmem:[%s2942_s4 + $0xb8] sm:$0xff]  }
 0x156   : > { %2220 = vmatprep.mubr.msk.bf16.mxu0 %vm2469_vm0, %v2468_v38  ;;  %2205 = vmatpush3.bf16.msra.mxu0 %v2394_v52  ;;  %v2423_v52 = vld [vmem:[%s2943_s5 + $0x68] sm:$0xff]  }
 0x157   : > { %2206 = vmatprep.subr.bf16.mxu0 %v2468_v38  ;;  %2224 = vmatprep.subr.bf16.mxu1 %v2468_v38 }
 0x15a   : > { %2207 = vmatpush3.bf16.msra.mxu0 %v2396_v54  ;;  %v2425_v54 = vld [vmem:[%s2943_s5 + $0x78] sm:$0xff]  }
 0x15b   : > { %2208 = vmatprep.subr.bf16.mxu0 %v2468_v38 }
 0x15e   : > { %2209 = vmatpush3.bf16.msra.mxu0 %v2398_v56 }
 0x15f   : > { %2210 = vmatprep.subr.bf16.mxu0 %v2468_v38 }
 0x162   : > { %2211 = vmatpush3.bf16.msra.mxu0 %v2400_v58 }
 0x163   : > { %2212 = vmatprep.subr.bf16.mxu0 %v2468_v38 }
 0x166   : > { %2213 = vmatpush3.bf16.msra.mxu0 %v2402_v60 }
 0x167   : > { %2214 = vmatprep.subr.bf16.mxu0 %v2468_v38 }
 0x16a   : > { %2215 = vmatpush3.bf16.msra.mxu0 %v2404_v62 }
 0x16b   : > { %2216 = vmatprep.subr.bf16.mxu0 %v2468_v38 }
 0x16e   : > { %2217 = vmatpush3.bf16.msra.mxu0 %v2406_v0 }
 0x16f   : > { %2218 = vmatprep.subr.bf16.mxu0 %v2468_v38 }
 0x172   : > { %2219 = vmatpush3.bf16.msra.mxu0 %v2408_v4  ;;  %v1358_v4 = vrot.slane %v2680_v3, %v1357_v2 }
 0x173   : > { %2244 = vmatprep.subr.bf16.mxu0 %v2468_v38 }
 0x208   : > { %v777_v6 = vpop.f32.mrb[0].mxu0 }
 0x209   : > { %v2142_v7 = vpop.f32.mrb[1].mxu0 }
 0x20a   : > { %v780_v8 = vpop.f32.mrb[2].mxu0 }
 0x20b   : > { %v2143_v9 = vpop.f32.mrb[3].mxu0  ;;  %v885_v10 = vpop.f32.mrb[12].mxu1 }
 0x20c   : > { %v886_v11 = vadd.f32 %v885_v10, %v777_v6  ;;  %v2162_v12 = vpop.f32.mrb[13].mxu1  ;;  %v1365_v9 = vrot.slane %v2470_v22, 6  ;;  %v2427_v22 = vld [vmem:[%s2943_s5 + $0x8] sm:$0xff]  }
 0x20d   : > { %v888_v13 = vpop.f32.mrb[14].mxu1 }
 0x20e   : > { %v889_v14 = vadd.f32 %v888_v13, %v780_v8  ;;  %v2163_v15 = vpop.f32.mrb[15].mxu1  ;;  %v1364_v8 = vrot.slane %v2468_v38, 6 }
 0x210   : > { %v1366_v16 = vsel %vm1363_vm5, %v1364_v8, %v1365_v9 }
 0x228   : > { %v1000_v18 = vpop.f32.mrb[4].mxu0 }
 0x229   : > { %v1007_v19 = vadd.f32 %v1000_v18, %v886_v11  ;;  %v2182_v20 = vpop.f32.mrb[5].mxu0 }
 0x22a   : > { %v1003_v24 = vpop.f32.mrb[6].mxu0  ;;  %v2426_v20 = vld [vmem:[%s2943_s5] sm:$0xff]  }
 0x22b   : > { %v1013_v25 = vadd.f32 %v1012_v17, %v1007_v19  ;;  %v1008_v26 = vadd.f32 %v1003_v24, %v889_v14  ;;  %v2183_v27 = vpop.f32.mrb[7].mxu0  ;;  %v2429_v24 = vld [vmem:[%s2943_s5 + $0x18] sm:$0xff]  }
 0x22c   : > { %v2432_v27 = vld [vmem:[%s2943_s5 + $0x30] sm:$0xff]  }
 0x22d   : > { %v1015_v28 = vmax.f32 %v1013_v25, 0.0  ;;  %v1014_v29 = vadd.f32 %v1012_v17, %v1008_v26  ;;  %v1368_v17 = vsel %vm1363_vm5, %v1365_v9, %v1364_v8  ;;  %v2430_v25 = vld [vmem:[%s2943_s5 + $0x20] sm:$0xff]   ;;  %v2431_v26 = vld [vmem:[%s2943_s5 + $0x28] sm:$0xff]  }
 0x22f   : > { %v1016_v32 = vmax.f32 %v1014_v29, 0.0  ;;  %v1028_v33 = vmul.f32 %v1023_v30, %v1015_v28  ;;  %v2433_v28 = vld [vmem:[%s2943_s5 + $0x38] sm:$0xff]   ;;  %v2434_v29 = vld [vmem:[%s2943_s5 + $0x80] sm:$0xff]   ;;  %v2435_v30 = vld [vmem:[%s2943_s5 + $0x88] sm:$0xff]  }
 0x231   : > { %v1029_v34 = vmul.f32 %v1025_v31, %v1016_v32  ;;  %v2436_v31 = vld [vmem:[%s2943_s5 + $0x90] sm:$0xff]   ;;  %v2437_v32 = vld [vmem:[%s2943_s5 + $0x98] sm:$0xff]  }
 0x233   : > { %v1030_v35 = vpack.c.bf16 %v1029_v34, %v1028_v33  ;;  %v2438_v33 = vld [vmem:[%s2943_s5 + $0xa0] sm:$0xff]   ;;  %v2439_v34 = vld [vmem:[%s2943_s5 + $0xa8] sm:$0xff]  }
 0x235   : > { %2221 = vmatmul.mubr.bf16.vlgmr.msra.gmra.mrb[8].mxu0 %v1030_v35  ;;  %v1065_v37 = vrot.slane %v1030_v35, 1  ;;  %v1262_v46 = vrot.slane %v1030_v35, 2  ;;  %v2440_v35 = vld [vmem:[%s2943_s5 + $0xb0] sm:$0xff]  }
 0x236   : > { %2260 = vmatprep.mubr.msk.bf16.mxu0 %vm2469_vm0, %v2468_v38  ;;  %2245 = vmatpush3.bf16.msra.mxu0 %v2418_v47 }
 0x237   : > { %2201 = vmatmul.mubr.bf16.vlgmr.msra.gmra.mrb[16].mxu1 %v1065_v37  ;;  %2246 = vmatprep.subr.bf16.mxu0 %v2468_v38 }
 0x238   : > { %2225 = vmatpush3.bf16.msra.mxu1 %v2410_v36  ;;  %2240 = vmatprep.mubr.msk.bf16.mxu1 %vm2469_vm0, %v2468_v38  ;;  %v2441_v36 = vld [vmem:[%s2943_s5 + $0xb8] sm:$0xff]  }
 0x239   : > { %2226 = vmatprep.subr.bf16.mxu1 %v2468_v38 }
 0x23a   : > { %2247 = vmatpush3.bf16.msra.mxu0 %v2419_v48 }
 0x23b   : > { %2248 = vmatprep.subr.bf16.mxu0 %v2468_v38 }
 0x23c   : > { %2227 = vmatpush3.bf16.msra.mxu1 %v2411_v39 }
 0x23d   : > { %2228 = vmatprep.subr.bf16.mxu1 %v2468_v38 }
 0x23e   : > { %2249 = vmatpush3.bf16.msra.mxu0 %v2420_v49 }
 0x23f   : > { %2250 = vmatprep.subr.bf16.mxu0 %v2468_v38 }
 0x240   : > { %2229 = vmatpush3.bf16.msra.mxu1 %v2412_v40 }
 0x241   : > { %2230 = vmatprep.subr.bf16.mxu1 %v2468_v38 }
 0x242   : > { %2251 = vmatpush3.bf16.msra.mxu0 %v2421_v50 }
 0x243   : > { %2252 = vmatprep.subr.bf16.mxu0 %v2468_v38 }
 0x244   : > { %2231 = vmatpush3.bf16.msra.mxu1 %v2413_v41 }
 0x245   : > { %2232 = vmatprep.subr.bf16.mxu1 %v2468_v38 }
 0x246   : > { %2253 = vmatpush3.bf16.msra.mxu0 %v2422_v51 }
 0x247   : > { %2254 = vmatprep.subr.bf16.mxu0 %v2468_v38 }
 0x248   : > { %2233 = vmatpush3.bf16.msra.mxu1 %v2414_v42 }
 0x249   : > { %2234 = vmatprep.subr.bf16.mxu1 %v2468_v38 }
 0x24a   : > { %2255 = vmatpush3.bf16.msra.mxu0 %v2423_v52 }
 0x24b   : > { %2256 = vmatprep.subr.bf16.mxu0 %v2468_v38 }
 0x24c   : > { %2235 = vmatpush3.bf16.msra.mxu1 %v2415_v43 }
 0x24d   : > { %2236 = vmatprep.subr.bf16.mxu1 %v2468_v38 }
 0x24e   : > { %2257 = vmatpush3.bf16.msra.mxu0 %v2424_v53 }
 0x24f   : > { %2258 = vmatprep.subr.bf16.mxu0 %v2468_v38 }
 0x250   : > { %2237 = vmatpush3.bf16.msra.mxu1 %v2416_v44 }
 0x251   : > { %2238 = vmatprep.subr.bf16.mxu1 %v2468_v38 }
 0x252   : > { %2259 = vmatpush3.bf16.msra.mxu0 %v2425_v54 }
 0x253   : > { %2264 = vmatprep.subr.bf16.mxu0 %v2468_v38 }
 0x254   : > { %2239 = vmatpush3.bf16.msra.mxu1 %v2417_v45 }
 0x257   : > { %2241 = vmatmul.mubr.bf16.vlgmr.msra.gmra.mrb[20].mxu1 %v1262_v46 }
 0x308   : > { %v1238_v55 = vpop.f32.mrb[8].mxu0 }
 0x309   : > { %v2222_v56 = vpop.f32.mrb[9].mxu0 }
 0x30a   : > { %v1149_v57 = vpop.f32.mrb[16].mxu1  ;;  %v1241_v58 = vpop.f32.mrb[10].mxu0 }
 0x30b   : > { %v1239_v59 = vadd.f32 %v1238_v55, %v1149_v57  ;;  %v2202_v60 = vpop.f32.mrb[17].mxu1  ;;  %v2223_v61 = vpop.f32.mrb[11].mxu0 }
 0x30c   : > { %v1152_v62 = vpop.f32.mrb[18].mxu1 }
 0x30d   : > { %v1242_v63 = vadd.f32 %v1241_v58, %v1152_v62  ;;  %v2203_v0 = vpop.f32.mrb[19].mxu1 }
 0x32a   : > { %v1346_v5 = vpop.f32.mrb[20].mxu1 }
 0x32b   : > { %v1353_v6 = vadd.f32 %v1346_v5, %v1239_v59  ;;  %v2242_v7 = vpop.f32.mrb[21].mxu1 }
 0x32c   : > { %v1349_v10 = vpop.f32.mrb[22].mxu1 }
 0x32d   : > { %v1359_v11 = vadd.f32 %v1358_v4, %v1353_v6  ;;  %v1354_v12 = vadd.f32 %v1349_v10, %v1242_v63  ;;  %v2243_v13 = vpop.f32.mrb[23].mxu1 }
 0x32f   : > { %v1361_v14 = vmax.f32 %v1359_v11, 0.0  ;;  %v1360_v15 = vadd.f32 %v1358_v4, %v1354_v12 }
 0x331   : > { %v1362_v18 = vmax.f32 %v1360_v15, 0.0  ;;  %v1371_v1 = vmul.f32 %v1366_v16, %v1361_v14 }
 0x333   : > { %v1372_v19 = vmul.f32 %v1368_v17, %v1362_v18 }
 0x335   : > { %v1373_v3 = vpack.c.bf16 %v1372_v19, %v1371_v1 }
 0x337   : > { %v1408_v21 = vrot.slane %v1373_v3, 1  ;;  %v1603_v37 = vrot.slane %v1373_v3, 2 }
 0x339   : > { %2261 = vmatmul.mubr.bf16.vlgmr.msra.gmra.mrb[12].mxu0 %v1408_v21 }
 0x33a   : > { %2265 = vmatpush3.bf16.msra.mxu0 %v2426_v20  ;;  %2280 = vmatprep.mubr.msk.bf16.mxu0 %vm2469_vm0, %v2468_v38 }
 0x33b   : > { %2266 = vmatprep.subr.bf16.mxu0 %v2468_v38 }
 0x33e   : > { %2267 = vmatpush3.bf16.msra.mxu0 %v2427_v22 }
 0x33f   : > { %2268 = vmatprep.subr.bf16.mxu0 %v2468_v38 }
 0x342   : > { %2269 = vmatpush3.bf16.msra.mxu0 %v2428_v23 }
 0x343   : > { %2270 = vmatprep.subr.bf16.mxu0 %v2468_v38 }
 0x346   : > { %2271 = vmatpush3.bf16.msra.mxu0 %v2429_v24 }
 0x347   : > { %2272 = vmatprep.subr.bf16.mxu0 %v2468_v38 }
 0x34a   : > { %2273 = vmatpush3.bf16.msra.mxu0 %v2430_v25 }
 0x34b   : > { %2274 = vmatprep.subr.bf16.mxu0 %v2468_v38 }
 0x34e   : > { %2275 = vmatpush3.bf16.msra.mxu0 %v2431_v26 }
 0x34f   : > { %2276 = vmatprep.subr.bf16.mxu0 %v2468_v38 }
 0x352   : > { %2277 = vmatpush3.bf16.msra.mxu0 %v2432_v27 }
 0x353   : > { %2278 = vmatprep.subr.bf16.mxu0 %v2468_v38 }
 0x356   : > { %2279 = vmatpush3.bf16.msra.mxu0 %v2433_v28 }
 0x357   : > { %2284 = vmatprep.subr.bf16.mxu0 %v2468_v38 }
 0x359   : > { %2281 = vmatmul.mubr.bf16.vlgmr.msra.gmra.mrb[12].mxu0 %v1373_v3 }
 0x35a   : > { %2285 = vmatpush3.bf16.msra.mxu0 %v2434_v29  ;;  %2300 = vmatprep.mubr.msk.bf16.mxu0 %vm2469_vm0, %v2468_v38 }
 0x35b   : > { %2286 = vmatprep.subr.bf16.mxu0 %v2468_v38 }
 0x35e   : > { %2287 = vmatpush3.bf16.msra.mxu0 %v2435_v30 }
 0x35f   : > { %2288 = vmatprep.subr.bf16.mxu0 %v2468_v38 }
 0x362   : > { %2289 = vmatpush3.bf16.msra.mxu0 %v2436_v31 }
 0x363   : > { %2290 = vmatprep.subr.bf16.mxu0 %v2468_v38 }
 0x366   : > { %2291 = vmatpush3.bf16.msra.mxu0 %v2437_v32 }
 0x367   : > { %2292 = vmatprep.subr.bf16.mxu0 %v2468_v38 }
 0x36a   : > { %2293 = vmatpush3.bf16.msra.mxu0 %v2438_v33 }
 0x36b   : > { %2294 = vmatprep.subr.bf16.mxu0 %v2468_v38 }
 0x36e   : > { %2295 = vmatpush3.bf16.msra.mxu0 %v2439_v34 }
 0x36f   : > { %2296 = vmatprep.subr.bf16.mxu0 %v2468_v38 }
 0x372   : > { %2297 = vmatpush3.bf16.msra.mxu0 %v2440_v35 }
 0x373   : > { %2298 = vmatprep.subr.bf16.mxu0 %v2468_v38 }
 0x376   : > { %2299 = vmatpush3.bf16.msra.mxu0 %v2441_v36 }
 0x379   : > { %2301 = vmatmul.mubr.bf16.vlgmr.msra.gmra.mrb[12].mxu0 %v1603_v37 }
 0x44c   : > { %v1687_v39 = vpop.f32.mrb[12].mxu0 }
 0x44d   : > { %1694 = vst [vmem:[%s2527_s7] sm:$0xff] %v1687_v39  ;;  %v2302_v40 = vpop.f32.mrb[13].mxu0 }
 0x44e   : > { %v1690_v41 = vpop.f32.mrb[14].mxu0 }
 0x44f   : > { %v2303_v42 = vpop.f32.mrb[15].mxu0 }
 0x450 PF: > { %s16_s23 = sadd.s32 1, %s2466_s23   ;;  %s2945_s21 = smov %s2462_s22 }
 0x451   : > { %p13_p5 = scmp.ge.s32.totalorder %s16_s23, 4   ;;  %s2946_s22 = smov %s2948_s24 }
 0x453   :  { %15 = sbr.rel (!%p13_p5) target bundleno = 2 (0x2), region = 125 }
 0x45a   :  { %1720 = vsyncmov [#allocation3] }
 0x45d   :  { %s1721_s28 = vpop.sfrf %1720 }
 0x45e   :  { %p1983_p6 = scmp.ne.s32.totalorder %s1721_s28, 0 }
 0x460   :  { %1725 = shalt.err (%p1983_p6)  }

</bundles_post_ra>
